<compile_context>
chip_gen: v7x
topology: tpu7x:2x2x1
jax: 0.10.0
libtpu: 0.0.40
codegen_flags: <defaults>
</compile_context>

<pallas_src>
import jax
import jax.numpy as jnp
from jax import lax
from jax.experimental import pallas as pl
from jax.experimental.pallas import tpu as pltpu


# -----------------------------------------------------------------------------
# Fused kernel: n_layers bidirectional GRUs (DenseNet-style concat) + head.
# -----------------------------------------------------------------------------
def make_fused_kernel(T, B, D0, H, n_layers, num_classes):
    G = 6 * H                      # gate lanes: [r_f r_b | z_f z_b | n_f n_b]
    TWOH = 2 * H
    layer_nblocks = [1 + j for j in range(n_layers)]    # merged feature blocks
    head_nblocks = 1 + n_layers

    def kernel(*refs):
        it = iter(refs)
        x0_ref = next(it)                       # (T*B, D0) f32, time-major rows
        mask_ref = next(it)                     # (1, 6H): 1.0 on fwd-direction lanes
        layer_params = []
        for j in range(n_layers):
            wih_refs = [next(it) for _ in range(layer_nblocks[j])]   # bf16
            layer_params.append((wih_refs, next(it), next(it), next(it)))
        scale_refs = [next(it) for _ in range(head_nblocks)]
        shift_refs = [next(it) for _ in range(head_nblocks)]
        wt_refs = [next(it) for _ in range(head_nblocks)]
        bias_ref = next(it)
        out_ref = next(it)
        seq_scr = [next(it) for _ in range(n_layers - 1)]   # (T*B, 2H) per layer
        gi_scr = next(it)                                   # (T*B, 6H), reused

        is_fwd = mask_ref[...] > 0.5            # (1, 6H) gate-lane direction mask
        is_fwd_h = is_fwd[:, :TWOH]             # (1, 2H) hidden-lane direction mask

        feat_refs = [x0_ref]                    # dense feature blocks, torch order
        layer_means = []                        # per-layer (B, 2H) time-means

        for j in range(n_layers):
            wih_refs, whh_ref, gibias_ref, bhhn_ref = layer_params[j]
            need_seq = (j + 1 < n_layers)
            seq = seq_scr[j] if need_seq else None

            # ---- hoisted input projection (bf16 operands, f32 accumulate);
            #      b_ih (+ b_hh for r/z) pre-merged into gibias. Off the
            #      serial recurrence chain.
            gi = jnp.zeros((T * B, G), jnp.float32) + gibias_ref[...]
            for fr, wr in zip(feat_refs, wih_refs):
                gi = gi + jnp.dot(fr[...].astype(jnp.bfloat16), wr[...],
                                  preferred_element_type=jnp.float32)

            # ---- pre-compose per-step gate inputs: fwd lanes take time s,
            #      bwd lanes take time T-1-s, so the recurrence loop issues
            #      one (B, 6H) load per step and no per-step select.
            for s in range(T):
                g_f = gi[s * B:(s + 1) * B, :]
                g_b = gi[(T - 1 - s) * B:(T - s) * B, :]
                gi_scr[s * B:(s + 1) * B, :] = jnp.where(is_fwd, g_f, g_b)

            bhhn = bhhn_ref[...]                # (1, 6H): b_hh for the n gate only
            h = jnp.zeros((B, TWOH), jnp.float32)          # [h_fwd | h_bwd]
            acc = jnp.zeros((B, TWOH), jnp.float32)

            # ---- fully unrolled recurrence (fwd processes t=s, bwd t=T-1-s)
            for s in range(T):
                pre = gi_scr[s * B:(s + 1) * B, :]
                gh = jnp.dot(h.astype(jnp.bfloat16), whh_ref[...],
                             preferred_element_type=jnp.float32) + bhhn
                rz = jax.nn.sigmoid(pre[:, :2 * TWOH] + gh[:, :2 * TWOH])
                r = rz[:, :TWOH]
                z = rz[:, TWOH:]
                n = jnp.tanh(pre[:, 2 * TWOH:] + r * gh[:, 2 * TWOH:])
                h = (1.0 - z) * n + z * h
                acc = acc + h
                if need_seq:
                    # one lane-dense unmasked (8, 128) store per step
                    seq[s * B:(s + 1) * B, :] = h

            layer_means.append(acc * (1.0 / T))            # AdaptiveAvgPool fold

            if need_seq:
                # time-align the bwd lane-half once per layer (pairwise swap),
                # off the recurrence critical path.
                seq_val = seq[...]
                for s in range(T // 2):
                    a = seq_val[s * B:(s + 1) * B, :]
                    b = seq_val[(T - 1 - s) * B:(T - s) * B, :]
                    seq[s * B:(s + 1) * B, :] = jnp.where(is_fwd_h, a, b)
                    seq[(T - 1 - s) * B:(T - s) * B, :] = jnp.where(is_fwd_h, b, a)
                feat_refs = feat_refs + [seq]

        # ---- regression head: AvgPool(time-mean) + BatchNorm1d(eval) + ReLU
        #      + Dropout(identity, eval) + Linear, split per feature block so
        #      the concatenated (B, T, C) tensor is never formed.
        x0_mean = jnp.zeros((B, D0), jnp.float32)
        for s in range(T):
            x0_mean = x0_mean + x0_ref[s * B:(s + 1) * B, :]
        x0_mean = x0_mean * (1.0 / T)

        feats = [x0_mean] + layer_means
        out = jnp.zeros((B, num_classes), jnp.float32) + bias_ref[...]
        for f, sc, sh, wt in zip(feats, scale_refs, shift_refs, wt_refs):
            xn = jnp.maximum(f * sc[...] + sh[...], 0.0)         # BN(eval) + ReLU
            out = out + jnp.dot(xn, wt[...], preferred_element_type=jnp.float32)
        out_ref[...] = out

    return kernel


# -----------------------------------------------------------------------------
# Wrapper
# -----------------------------------------------------------------------------
def forward(x, kp):
    """x: (B, input_size, T)  ->  (B, num_classes)."""
    B, D0, T = x.shape
    H, L, NC = kp["H"], kp["n_layers"], kp["num_classes"]

    # zero-pad batch to a sublane multiple so every per-step slice is a full
    # (8, 128) tile; slice the result back afterwards.
    B_pad = max(8, ((B + 7) // 8) * 8)
    xt = jnp.transpose(x, (2, 0, 1)).astype(jnp.float32)        # (T, B, D0)
    if B_pad != B:
        xt = jnp.pad(xt, ((0, 0), (0, B_pad - B), (0, 0)))
    x0 = xt.reshape(T * B_pad, D0)                              # time-major rows

    inputs = [x0, kp["fwd_mask"]]
    for layer in kp["layers"]:
        inputs += list(layer["wih_blocks"])
        inputs += [layer["whh"], layer["gibias"], layer["bhhn"]]
    head = kp["head"]
    inputs += list(head["scales"]) + list(head["shifts"]) + list(head["wts"])
    inputs.append(head["bias"])

    vmem = pl.BlockSpec(memory_space=pltpu.MemorySpace.VMEM)
    scratch = ([pltpu.VMEM((T * B_pad, 2 * H), jnp.float32) for _ in range(L - 1)]
               + [pltpu.VMEM((T * B_pad, 6 * H), jnp.float32)])

    # advisory cost estimate for XLA's scheduler
    flops = 0
    for j in range(L):
        d_in = D0 + j * 2 * H
        flops += 2 * (T * B_pad) * d_in * (6 * H)       # hoisted projections
        flops += 2 * T * B_pad * (2 * H) * (6 * H)      # recurrent matmuls
    flops += 2 * B_pad * (D0 + L * 2 * H) * NC          # head
    transcendentals = L * T * B_pad * (6 * H)
    bytes_accessed = sum(int(a.size) * a.dtype.itemsize for a in inputs) \
        + B_pad * NC * 4

    out = pl.pallas_call(
        make_fused_kernel(T, B_pad, D0, H, L, NC),
        out_shape=jax.ShapeDtypeStruct((B_pad, NC), jnp.float32),
        in_specs=[vmem] * len(inputs),
        out_specs=vmem,
        scratch_shapes=scratch,
        compiler_params=pltpu.CompilerParams(vmem_limit_bytes=32 * 1024 * 1024),
        cost_estimate=pl.CostEstimate(flops=int(flops),
                                      transcendentals=int(transcendentals),
                                      bytes_accessed=int(bytes_accessed)),
    )(*inputs)
    return out[:B]


# -----------------------------------------------------------------------------
# Repack torch-layout parameters into the fused-kernel layout (done once).
# -----------------------------------------------------------------------------
def prepare_params(torch_params, input_size, hidden, n_layers, num_classes):
    H, G = hidden, 6 * hidden

    def interleave_mat(mf, mb):                 # (3H, D) x2 -> (D, 6H)
        cols = []
        for g in range(3):
            cols.append(mf[g * H:(g + 1) * H, :].T)
            cols.append(mb[g * H:(g + 1) * H, :].T)
        return jnp.concatenate(cols, axis=1)

    def interleave_vec(vf, vb):                 # (3H,) x2 -> (1, 6H)
        parts = []
        for g in range(3):
            parts.append(vf[g * H:(g + 1) * H])
            parts.append(vb[g * H:(g + 1) * H])
        return jnp.concatenate(parts).reshape(1, G)

    col = jnp.arange(G)
    n_lanes = (col >= 4 * H).reshape(1, G)                      # n-gate lanes
    fwd_mask = ((col % (2 * H)) < H).astype(jnp.float32).reshape(1, G)

    layers = []
    for j, tl in enumerate(torch_params["layers"]):
        wih_f, whh_f, bih_f, bhh_f = tl["fwd"]
        wih_b, whh_b, bih_b, bhh_b = tl["bwd"]
        # merged fwd|bwd (2H-wide) feature blocks to match the combined scratch
        block_dims = [input_size] + [2 * H] * j
        wih_comb = interleave_mat(wih_f, wih_b)                 # (D_in_j, 6H)
        wih_blocks, off = [], 0
        for d in block_dims:
            wih_blocks.append(wih_comb[off:off + d, :].astype(jnp.bfloat16))
            off += d
        whh = jnp.zeros((2 * H, G), jnp.float32)                # block-diagonal
        for g in range(3):
            whh = whh.at[0:H, 2 * g * H:2 * g * H + H].set(
                whh_f[g * H:(g + 1) * H, :].T)
            whh = whh.at[H:2 * H, 2 * g * H + H:2 * (g + 1) * H].set(
                whh_b[g * H:(g + 1) * H, :].T)
        bih_i = interleave_vec(bih_f, bih_b)
        bhh_i = interleave_vec(bhh_f, bhh_b)
        layers.append({
            "wih_blocks": tuple(wih_blocks),
            "whh": whh.astype(jnp.bfloat16),
            "gibias": bih_i + jnp.where(n_lanes, 0.0, bhh_i),   # b_ih (+b_hh for r,z)
            "bhhn": jnp.where(n_lanes, bhh_i, 0.0),             # b_hh_n only
        })

    th = torch_params["head"]
    eps = 1e-5
    scale = th["gamma"] / jnp.sqrt(th["running_var"] + eps)     # BN folded
    shift = th["beta"] - th["running_mean"] * scale
    wt = th["w"].T                                              # (C, NC) pre-transposed
    head_dims = [input_size] + [2 * H] * n_layers
    scales, shifts, wts, off = [], [], [], 0
    for d in head_dims:
        scales.append(scale[:, off:off + d])
        shifts.append(shift[:, off:off + d])
        wts.append(wt[off:off + d, :])
        off += d
    head = {"scales": tuple(scales), "shifts": tuple(shifts),
            "wts": tuple(wts), "bias": th["b"]}

    return {"layers": layers, "head": head, "fwd_mask": fwd_mask,
            "H": H, "n_layers": n_layers, "num_classes": num_classes}


# -----------------------------------------------------------------------------
# Deterministic synthetic parameters in PyTorch layout (mirrors __init__ +
# _initialize_weights: uniform(-1/sqrt(H),1/sqrt(H)), orthogonal W_hh,
# zeroed first third of b_ih).
# -----------------------------------------------------------------------------
def _orthogonal(key, shape):
    a = jax.random.normal(key, shape, dtype=jnp.float32)
    q, r = jnp.linalg.qr(a)
    return q * jnp.sign(jnp.diagonal(r))[None, :]


def init_torch_params(key, input_size=2, hidden=64, n_layers=3, num_classes=2):
    params = {"layers": []}
    d_in = input_size
    s = 1.0 / (hidden ** 0.5)
    k = key
    for _ in range(n_layers):
        layer = {}
        for d in ("fwd", "bwd"):
            k, k1, k2, k3, k4 = jax.random.split(k, 5)
            wih = jax.random.uniform(k1, (3 * hidden, d_in), jnp.float32, -s, s)
            whh = _orthogonal(k2, (3 * hidden, hidden))
            bih = jax.random.uniform(k3, (3 * hidden,), jnp.float32, -s, s)
            bih = bih.at[:hidden].set(0.0)          # zero reset-gate b_ih
            bhh = jax.random.uniform(k4, (3 * hidden,), jnp.float32, -s, s)
            layer[d] = (wih, whh, bih, bhh)
        params["layers"].append(layer)
        d_in += 2 * hidden
    C = d_in
    k, kw, kb = jax.random.split(k, 3)
    sl = 1.0 / (C ** 0.5)
    params["head"] = {
        "gamma": jnp.ones((1, C), jnp.float32),
        "beta": jnp.zeros((1, C), jnp.float32),
        "running_mean": jnp.zeros((1, C), jnp.float32),
        "running_var": jnp.ones((1, C), jnp.float32),
        "w": jax.random.uniform(kw, (num_classes, C), jnp.float32, -sl, sl),
        "b": jax.random.uniform(kb, (num_classes,), jnp.float32,
                                -sl, sl).reshape(1, -1),
    }
    return params


def quantize_weights_like_kernel(torch_params):
    """Round-trip GRU matrix weights through bf16 so the f32 reference uses the
    same effective weights the kernel stores in VMEM (bf16 storage is a
    deliberate perf choice; biases and the head stay f32)."""
    q = lambda w: w.astype(jnp.bfloat16).astype(jnp.float32)
    layers = []
    for layer in torch_params["layers"]:
        nl = {}
        for d in ("fwd", "bwd"):
            wih, whh, bih, bhh = layer[d]
            nl[d] = (q(wih), q(whh), bih, bhh)
        layers.append(nl)
    return {"layers": layers, "head": torch_params["head"]}


# -----------------------------------------------------------------------------
# Pure-JAX reference (torch semantics) for a numerical self-check.
# -----------------------------------------------------------------------------
def reference_forward(x, torch_params, hidden):
    H = hidden
    enc = jnp.transpose(x, (0, 2, 1)).astype(jnp.float32)       # (B, T, D)

    def gru_dir(seq, wih, whh, bih, bhh):
        B = seq.shape[0]

        def cell(h, x_t):
            gi = x_t @ wih.T + bih
            gh = h @ whh.T + bhh
            r = jax.nn.sigmoid(gi[:, 0:H] + gh[:, 0:H])
            z = jax.nn.sigmoid(gi[:, H:2 * H] + gh[:, H:2 * H])
            n = jnp.tanh(gi[:, 2 * H:3 * H] + r * gh[:, 2 * H:3 * H])
            h = (1.0 - z) * n + z * h
            return h, h

        h0 = jnp.zeros((B, H), jnp.float32)
        _, out = lax.scan(cell, h0, jnp.swapaxes(seq, 0, 1))
        return jnp.swapaxes(out, 0, 1)                          # (B, T, H)

    for layer in torch_params["layers"]:
        out_f = gru_dir(enc, *layer["fwd"])
        out_b = jnp.flip(gru_dir(jnp.flip(enc, axis=1), *layer["bwd"]), axis=1)
        enc = jnp.concatenate([enc, out_f, out_b], axis=-1)
    th = torch_params["head"]
    feats = jnp.mean(enc, axis=1)
    xn = (feats - th["running_mean"]) / jnp.sqrt(th["running_var"] + 1e-5)
    xn = xn * th["gamma"] + th["beta"]
    xn = jnp.maximum(xn, 0.0)
    return xn @ th["w"].T + th["b"]


# -----------------------------------------------------------------------------
if __name__ == "__main__":
    B, INPUT_SIZE, T = 2, 2, 8
    HIDDEN, N_LAYERS, NUM_CLASSES = 64, 3, 2

    key = jax.random.PRNGKey(0)
    k_params, k_x = jax.random.split(key)
    torch_params = init_torch_params(k_params, INPUT_SIZE, HIDDEN, N_LAYERS,
                                     NUM_CLASSES)
    kparams = prepare_params(torch_params, INPUT_SIZE, HIDDEN, N_LAYERS,
                             NUM_CLASSES)
    x = jax.random.normal(k_x, (B, INPUT_SIZE, T), dtype=jnp.float32)

    out = forward(x, kparams)
    out = jax.block_until_ready(out)
    assert out.shape == (B, NUM_CLASSES), out.shape
    assert bool(jnp.all(jnp.isfinite(out)))

    # Reference with bf16-rounded weights (same effective weights as the
    # kernel); remaining delta comes only from bf16 activation casts.
    with jax.default_matmul_precision("float32"):
        ref = jax.block_until_ready(
            reference_forward(x, quantize_weights_like_kernel(torch_params),
                              HIDDEN))
    max_err = float(jnp.max(jnp.abs(out - ref)))
    assert max_err < 5e-2, f"kernel/reference mismatch: max_err={max_err}"
    print("KERNEL_OK")
</pallas_src>

<mosaic_0001>
module attributes {stable_mosaic.version = 11 : i64} {
  func.func @kernel(%arg0: memref<64x2xf32, #tpu.memory_space<vmem>>, %arg1: memref<1x384xf32, #tpu.memory_space<vmem>>, %arg2: memref<2x384xbf16, #tpu.memory_space<vmem>>, %arg3: memref<128x384xbf16, #tpu.memory_space<vmem>>, %arg4: memref<1x384xf32, #tpu.memory_space<vmem>>, %arg5: memref<1x384xf32, #tpu.memory_space<vmem>>, %arg6: memref<2x384xbf16, #tpu.memory_space<vmem>>, %arg7: memref<128x384xbf16, #tpu.memory_space<vmem>>, %arg8: memref<128x384xbf16, #tpu.memory_space<vmem>>, %arg9: memref<1x384xf32, #tpu.memory_space<vmem>>, %arg10: memref<1x384xf32, #tpu.memory_space<vmem>>, %arg11: memref<2x384xbf16, #tpu.memory_space<vmem>>, %arg12: memref<128x384xbf16, #tpu.memory_space<vmem>>, %arg13: memref<128x384xbf16, #tpu.memory_space<vmem>>, %arg14: memref<128x384xbf16, #tpu.memory_space<vmem>>, %arg15: memref<1x384xf32, #tpu.memory_space<vmem>>, %arg16: memref<1x384xf32, #tpu.memory_space<vmem>>, %arg17: memref<1x2xf32, #tpu.memory_space<vmem>>, %arg18: memref<1x128xf32, #tpu.memory_space<vmem>>, %arg19: memref<1x128xf32, #tpu.memory_space<vmem>>, %arg20: memref<1x128xf32, #tpu.memory_space<vmem>>, %arg21: memref<1x2xf32, #tpu.memory_space<vmem>>, %arg22: memref<1x128xf32, #tpu.memory_space<vmem>>, %arg23: memref<1x128xf32, #tpu.memory_space<vmem>>, %arg24: memref<1x128xf32, #tpu.memory_space<vmem>>, %arg25: memref<2x2xf32, #tpu.memory_space<vmem>>, %arg26: memref<128x2xf32, #tpu.memory_space<vmem>>, %arg27: memref<128x2xf32, #tpu.memory_space<vmem>>, %arg28: memref<128x2xf32, #tpu.memory_space<vmem>>, %arg29: memref<1x2xf32, #tpu.memory_space<vmem>>, %arg30: memref<8x2xf32, #tpu.memory_space<vmem>>, %arg31: memref<64x128xf32, #tpu.memory_space<vmem>>, %arg32: memref<64x128xf32, #tpu.memory_space<vmem>>, %arg33: memref<64x384xf32, #tpu.memory_space<vmem>>) attributes {dimension_semantics = [], scalar_prefetch = 0 : i64, scratch_operands = 3 : i64, tpu.core_type = #tpu.core_type<tc>} {
    %c0 = arith.constant 0 : index
    %c0_0 = arith.constant 0 : index
    %0 = vector.load %arg1[%c0, %c0_0] : memref<1x384xf32, #tpu.memory_space<vmem>>, vector<1x384xf32>
    %cst = arith.constant 5.000000e-01 : f32
    %1 = vector.broadcast %cst : f32 to vector<1x384xf32>
    %2 = arith.cmpf ogt, %0, %1 : vector<1x384xf32>
    %3 = vector.extract_strided_slice %2 {offsets = [0, 0], sizes = [1, 128], strides = [1, 1]} : vector<1x384xi1> to vector<1x128xi1>
    %cst_1 = arith.constant 0.000000e+00 : f32
    %4 = vector.broadcast %cst_1 : f32 to vector<64x384xf32>
    %c0_2 = arith.constant 0 : index
    %c0_3 = arith.constant 0 : index
    %5 = vector.load %arg4[%c0_2, %c0_3] : memref<1x384xf32, #tpu.memory_space<vmem>>, vector<1x384xf32>
    %6 = vector.broadcast %5 : vector<1x384xf32> to vector<64x384xf32>
    %7 = arith.addf %4, %6 : vector<64x384xf32>
    %c0_4 = arith.constant 0 : index
    %c0_5 = arith.constant 0 : index
    %8 = vector.load %arg0[%c0_4, %c0_5] : memref<64x2xf32, #tpu.memory_space<vmem>>, vector<64x2xf32>
    %9 = arith.truncf %8 : vector<64x2xf32> to vector<64x2xbf16>
    %c0_6 = arith.constant 0 : index
    %c0_7 = arith.constant 0 : index
    %10 = vector.load %arg2[%c0_6, %c0_7] : memref<2x384xbf16, #tpu.memory_space<vmem>>, vector<2x384xbf16>
    %cst_8 = arith.constant dense<0.000000e+00> : vector<64x384xf32>
    %11 = tpu.matmul %9, %10, %cst_8 {dimension_numbers = #tpu.dot_dimension_numbers<[1], [0], [0], [1], [0, 0, 1, 1], [], []>} : vector<64x2xbf16>, vector<2x384xbf16>, vector<64x384xf32> -> vector<64x384xf32>
    %12 = arith.addf %7, %11 : vector<64x384xf32>
    %13 = vector.extract_strided_slice %12 {offsets = [0, 0], sizes = [8, 384], strides = [1, 1]} : vector<64x384xf32> to vector<8x384xf32>
    %14 = vector.extract_strided_slice %12 {offsets = [56, 0], sizes = [8, 384], strides = [1, 1]} : vector<64x384xf32> to vector<8x384xf32>
    %15 = vector.shape_cast %2 : vector<1x384xi1> to vector<1x384xi1>
    %16 = vector.broadcast %15 : vector<1x384xi1> to vector<8x384xi1>
    %17 = arith.select %16, %13, %14 : vector<8x384xi1>, vector<8x384xf32>
    %c0_9 = arith.constant 0 : index
    %c0_10 = arith.constant 0 : index
    %18 = vector.load %arg33[%c0_9, %c0_10] : memref<64x384xf32, #tpu.memory_space<vmem>>, vector<8x384xf32>
    tpu.vector_store %arg33[%c0_9, %c0_10], %17 {strides = array<i32>} : memref<64x384xf32, #tpu.memory_space<vmem>>, vector<8x384xf32>,
    %19 = vector.extract_strided_slice %12 {offsets = [8, 0], sizes = [8, 384], strides = [1, 1]} : vector<64x384xf32> to vector<8x384xf32>
    %20 = vector.extract_strided_slice %12 {offsets = [48, 0], sizes = [8, 384], strides = [1, 1]} : vector<64x384xf32> to vector<8x384xf32>
    %21 = vector.shape_cast %2 : vector<1x384xi1> to vector<1x384xi1>
    %22 = vector.broadcast %21 : vector<1x384xi1> to vector<8x384xi1>
    %23 = arith.select %22, %19, %20 : vector<8x384xi1>, vector<8x384xf32>
    %c8 = arith.constant 8 : index
    %c0_11 = arith.constant 0 : index
    %24 = vector.load %arg33[%c8, %c0_11] : memref<64x384xf32, #tpu.memory_space<vmem>>, vector<8x384xf32>
    tpu.vector_store %arg33[%c8, %c0_11], %23 {strides = array<i32>} : memref<64x384xf32, #tpu.memory_space<vmem>>, vector<8x384xf32>,
    %25 = vector.extract_strided_slice %12 {offsets = [16, 0], sizes = [8, 384], strides = [1, 1]} : vector<64x384xf32> to vector<8x384xf32>
    %26 = vector.extract_strided_slice %12 {offsets = [40, 0], sizes = [8, 384], strides = [1, 1]} : vector<64x384xf32> to vector<8x384xf32>
    %27 = vector.shape_cast %2 : vector<1x384xi1> to vector<1x384xi1>
    %28 = vector.broadcast %27 : vector<1x384xi1> to vector<8x384xi1>
    %29 = arith.select %28, %25, %26 : vector<8x384xi1>, vector<8x384xf32>
    %c16 = arith.constant 16 : index
    %c0_12 = arith.constant 0 : index
    %30 = vector.load %arg33[%c16, %c0_12] : memref<64x384xf32, #tpu.memory_space<vmem>>, vector<8x384xf32>
    tpu.vector_store %arg33[%c16, %c0_12], %29 {strides = array<i32>} : memref<64x384xf32, #tpu.memory_space<vmem>>, vector<8x384xf32>,
    %31 = vector.extract_strided_slice %12 {offsets = [24, 0], sizes = [8, 384], strides = [1, 1]} : vector<64x384xf32> to vector<8x384xf32>
    %32 = vector.extract_strided_slice %12 {offsets = [32, 0], sizes = [8, 384], strides = [1, 1]} : vector<64x384xf32> to vector<8x384xf32>
    %33 = vector.shape_cast %2 : vector<1x384xi1> to vector<1x384xi1>
    %34 = vector.broadcast %33 : vector<1x384xi1> to vector<8x384xi1>
    %35 = arith.select %34, %31, %32 : vector<8x384xi1>, vector<8x384xf32>
    %c24 = arith.constant 24 : index
    %c0_13 = arith.constant 0 : index
    %36 = vector.load %arg33[%c24, %c0_13] : memref<64x384xf32, #tpu.memory_space<vmem>>, vector<8x384xf32>
    tpu.vector_store %arg33[%c24, %c0_13], %35 {strides = array<i32>} : memref<64x384xf32, #tpu.memory_space<vmem>>, vector<8x384xf32>,
    %37 = vector.extract_strided_slice %12 {offsets = [32, 0], sizes = [8, 384], strides = [1, 1]} : vector<64x384xf32> to vector<8x384xf32>
    %38 = vector.extract_strided_slice %12 {offsets = [24, 0], sizes = [8, 384], strides = [1, 1]} : vector<64x384xf32> to vector<8x384xf32>
    %39 = vector.shape_cast %2 : vector<1x384xi1> to vector<1x384xi1>
    %40 = vector.broadcast %39 : vector<1x384xi1> to vector<8x384xi1>
    %41 = arith.select %40, %37, %38 : vector<8x384xi1>, vector<8x384xf32>
    %c32 = arith.constant 32 : index
    %c0_14 = arith.constant 0 : index
    %42 = vector.load %arg33[%c32, %c0_14] : memref<64x384xf32, #tpu.memory_space<vmem>>, vector<8x384xf32>
    tpu.vector_store %arg33[%c32, %c0_14], %41 {strides = array<i32>} : memref<64x384xf32, #tpu.memory_space<vmem>>, vector<8x384xf32>,
    %43 = vector.extract_strided_slice %12 {offsets = [40, 0], sizes = [8, 384], strides = [1, 1]} : vector<64x384xf32> to vector<8x384xf32>
    %44 = vector.extract_strided_slice %12 {offsets = [16, 0], sizes = [8, 384], strides = [1, 1]} : vector<64x384xf32> to vector<8x384xf32>
    %45 = vector.shape_cast %2 : vector<1x384xi1> to vector<1x384xi1>
    %46 = vector.broadcast %45 : vector<1x384xi1> to vector<8x384xi1>
    %47 = arith.select %46, %43, %44 : vector<8x384xi1>, vector<8x384xf32>
    %c40 = arith.constant 40 : index
    %c0_15 = arith.constant 0 : index
    %48 = vector.load %arg33[%c40, %c0_15] : memref<64x384xf32, #tpu.memory_space<vmem>>, vector<8x384xf32>
    tpu.vector_store %arg33[%c40, %c0_15], %47 {strides = array<i32>} : memref<64x384xf32, #tpu.memory_space<vmem>>, vector<8x384xf32>,
    %49 = vector.extract_strided_slice %12 {offsets = [48, 0], sizes = [8, 384], strides = [1, 1]} : vector<64x384xf32> to vector<8x384xf32>
    %50 = vector.extract_strided_slice %12 {offsets = [8, 0], sizes = [8, 384], strides = [1, 1]} : vector<64x384xf32> to vector<8x384xf32>
    %51 = vector.shape_cast %2 : vector<1x384xi1> to vector<1x384xi1>
    %52 = vector.broadcast %51 : vector<1x384xi1> to vector<8x384xi1>
    %53 = arith.select %52, %49, %50 : vector<8x384xi1>, vector<8x384xf32>
    %c48 = arith.constant 48 : index
    %c0_16 = arith.constant 0 : index
    %54 = vector.load %arg33[%c48, %c0_16] : memref<64x384xf32, #tpu.memory_space<vmem>>, vector<8x384xf32>
    tpu.vector_store %arg33[%c48, %c0_16], %53 {strides = array<i32>} : memref<64x384xf32, #tpu.memory_space<vmem>>, vector<8x384xf32>,
    %55 = vector.extract_strided_slice %12 {offsets = [56, 0], sizes = [8, 384], strides = [1, 1]} : vector<64x384xf32> to vector<8x384xf32>
    %56 = vector.extract_strided_slice %12 {offsets = [0, 0], sizes = [8, 384], strides = [1, 1]} : vector<64x384xf32> to vector<8x384xf32>
    %57 = vector.shape_cast %2 : vector<1x384xi1> to vector<1x384xi1>
    %58 = vector.broadcast %57 : vector<1x384xi1> to vector<8x384xi1>
    %59 = arith.select %58, %55, %56 : vector<8x384xi1>, vector<8x384xf32>
    %c56 = arith.constant 56 : index
    %c0_17 = arith.constant 0 : index
    %60 = vector.load %arg33[%c56, %c0_17] : memref<64x384xf32, #tpu.memory_space<vmem>>, vector<8x384xf32>
    tpu.vector_store %arg33[%c56, %c0_17], %59 {strides = array<i32>} : memref<64x384xf32, #tpu.memory_space<vmem>>, vector<8x384xf32>,
    %c0_18 = arith.constant 0 : index
    %c0_19 = arith.constant 0 : index
    %61 = vector.load %arg5[%c0_18, %c0_19] : memref<1x384xf32, #tpu.memory_space<vmem>>, vector<1x384xf32>
    %cst_20 = arith.constant 0.000000e+00 : f32
    %62 = vector.broadcast %cst_20 : f32 to vector<8x128xf32>
    %cst_21 = arith.constant 0.000000e+00 : f32
    %63 = vector.broadcast %cst_21 : f32 to vector<8x128xf32>
    %c0_22 = arith.constant 0 : index
    %c0_23 = arith.constant 0 : index
    %64 = vector.load %arg33[%c0_22, %c0_23] : memref<64x384xf32, #tpu.memory_space<vmem>>, vector<8x384xf32>
    %65 = arith.truncf %62 : vector<8x128xf32> to vector<8x128xbf16>
    %c0_24 = arith.constant 0 : index
    %c0_25 = arith.constant 0 : index
    %66 = vector.load %arg3[%c0_24, %c0_25] : memref<128x384xbf16, #tpu.memory_space<vmem>>, vector<128x384xbf16>
    %cst_26 = arith.constant dense<0.000000e+00> : vector<8x384xf32>
    %67 = tpu.matmul %65, %66, %cst_26 {dimension_numbers = #tpu.dot_dimension_numbers<[1], [0], [0], [1], [0, 0, 1, 1], [], []>} : vector<8x128xbf16>, vector<128x384xbf16>, vector<8x384xf32> -> vector<8x384xf32>
    %68 = vector.broadcast %61 : vector<1x384xf32> to vector<8x384xf32>
    %69 = arith.addf %67, %68 : vector<8x384xf32>
    %70 = vector.extract_strided_slice %64 {offsets = [0, 0], sizes = [8, 256], strides = [1, 1]} : vector<8x384xf32> to vector<8x256xf32>
    %71 = vector.extract_strided_slice %69 {offsets = [0, 0], sizes = [8, 256], strides = [1, 1]} : vector<8x384xf32> to vector<8x256xf32>
    %72 = arith.addf %70, %71 : vector<8x256xf32>
    %73 = arith.negf %72 : vector<8x256xf32>
    %74 = math.exp %73 : vector<8x256xf32>
    %cst_27 = arith.constant 1.000000e+00 : f32
    %75 = vector.broadcast %cst_27 : f32 to vector<8x256xf32>
    %76 = arith.addf %75, %74 : vector<8x256xf32>
    %77 = arith.divf %75, %76 : vector<8x256xf32>
    %78 = vector.extract_strided_slice %77 {offsets = [0, 0], sizes = [8, 128], strides = [1, 1]} : vector<8x256xf32> to vector<8x128xf32>
    %79 = vector.extract_strided_slice %77 {offsets = [0, 128], sizes = [8, 128], strides = [1, 1]} : vector<8x256xf32> to vector<8x128xf32>
    %80 = vector.extract_strided_slice %64 {offsets = [0, 256], sizes = [8, 128], strides = [1, 1]} : vector<8x384xf32> to vector<8x128xf32>
    %81 = vector.extract_strided_slice %69 {offsets = [0, 256], sizes = [8, 128], strides = [1, 1]} : vector<8x384xf32> to vector<8x128xf32>
    %82 = arith.mulf %78, %81 : vector<8x128xf32>
    %83 = arith.addf %80, %82 : vector<8x128xf32>
    %84 = math.tanh %83 : vector<8x128xf32>
    %cst_28 = arith.constant 1.000000e+00 : f32
    %85 = vector.broadcast %cst_28 : f32 to vector<8x128xf32>
    %86 = arith.subf %85, %79 : vector<8x128xf32>
    %87 = arith.mulf %86, %84 : vector<8x128xf32>
    %88 = arith.mulf %79, %62 : vector<8x128xf32>
    %89 = arith.addf %87, %88 : vector<8x128xf32>
    %90 = arith.addf %63, %89 : vector<8x128xf32>
    %c0_29 = arith.constant 0 : index
    %c0_30 = arith.constant 0 : index
    %91 = vector.load %arg31[%c0_29, %c0_30] : memref<64x128xf32, #tpu.memory_space<vmem>>, vector<8x128xf32>
    tpu.vector_store %arg31[%c0_29, %c0_30], %89 {strides = array<i32>} : memref<64x128xf32, #tpu.memory_space<vmem>>, vector<8x128xf32>,
    %c8_31 = arith.constant 8 : index
    %c0_32 = arith.constant 0 : index
    %92 = vector.load %arg33[%c8_31, %c0_32] : memref<64x384xf32, #tpu.memory_space<vmem>>, vector<8x384xf32>
    %93 = arith.truncf %89 : vector<8x128xf32> to vector<8x128xbf16>
    %c0_33 = arith.constant 0 : index
    %c0_34 = arith.constant 0 : index
    %94 = vector.load %arg3[%c0_33, %c0_34] : memref<128x384xbf16, #tpu.memory_space<vmem>>, vector<128x384xbf16>
    %cst_35 = arith.constant dense<0.000000e+00> : vector<8x384xf32>
    %95 = tpu.matmul %93, %94, %cst_35 {dimension_numbers = #tpu.dot_dimension_numbers<[1], [0], [0], [1], [0, 0, 1, 1], [], []>} : vector<8x128xbf16>, vector<128x384xbf16>, vector<8x384xf32> -> vector<8x384xf32>
    %96 = vector.broadcast %61 : vector<1x384xf32> to vector<8x384xf32>
    %97 = arith.addf %95, %96 : vector<8x384xf32>
    %98 = vector.extract_strided_slice %92 {offsets = [0, 0], sizes = [8, 256], strides = [1, 1]} : vector<8x384xf32> to vector<8x256xf32>
    %99 = vector.extract_strided_slice %97 {offsets = [0, 0], sizes = [8, 256], strides = [1, 1]} : vector<8x384xf32> to vector<8x256xf32>
    %100 = arith.addf %98, %99 : vector<8x256xf32>
    %101 = arith.negf %100 : vector<8x256xf32>
    %102 = math.exp %101 : vector<8x256xf32>
    %cst_36 = arith.constant 1.000000e+00 : f32
    %103 = vector.broadcast %cst_36 : f32 to vector<8x256xf32>
    %104 = arith.addf %103, %102 : vector<8x256xf32>
    %105 = arith.divf %103, %104 : vector<8x256xf32>
    %106 = vector.extract_strided_slice %105 {offsets = [0, 0], sizes = [8, 128], strides = [1, 1]} : vector<8x256xf32> to vector<8x128xf32>
    %107 = vector.extract_strided_slice %105 {offsets = [0, 128], sizes = [8, 128], strides = [1, 1]} : vector<8x256xf32> to vector<8x128xf32>
    %108 = vector.extract_strided_slice %92 {offsets = [0, 256], sizes = [8, 128], strides = [1, 1]} : vector<8x384xf32> to vector<8x128xf32>
    %109 = vector.extract_strided_slice %97 {offsets = [0, 256], sizes = [8, 128], strides = [1, 1]} : vector<8x384xf32> to vector<8x128xf32>
    %110 = arith.mulf %106, %109 : vector<8x128xf32>
    %111 = arith.addf %108, %110 : vector<8x128xf32>
    %112 = math.tanh %111 : vector<8x128xf32>
    %cst_37 = arith.constant 1.000000e+00 : f32
    %113 = vector.broadcast %cst_37 : f32 to vector<8x128xf32>
    %114 = arith.subf %113, %107 : vector<8x128xf32>
    %115 = arith.mulf %114, %112 : vector<8x128xf32>
    %116 = arith.mulf %107, %89 : vector<8x128xf32>
    %117 = arith.addf %115, %116 : vector<8x128xf32>
    %118 = arith.addf %90, %117 : vector<8x128xf32>
    %c8_38 = arith.constant 8 : index
    %c0_39 = arith.constant 0 : index
    %119 = vector.load %arg31[%c8_38, %c0_39] : memref<64x128xf32, #tpu.memory_space<vmem>>, vector<8x128xf32>
    tpu.vector_store %arg31[%c8_38, %c0_39], %117 {strides = array<i32>} : memref<64x128xf32, #tpu.memory_space<vmem>>, vector<8x128xf32>,
    %c16_40 = arith.constant 16 : index
    %c0_41 = arith.constant 0 : index
    %120 = vector.load %arg33[%c16_40, %c0_41] : memref<64x384xf32, #tpu.memory_space<vmem>>, vector<8x384xf32>
    %121 = arith.truncf %117 : vector<8x128xf32> to vector<8x128xbf16>
    %c0_42 = arith.constant 0 : index
    %c0_43 = arith.constant 0 : index
    %122 = vector.load %arg3[%c0_42, %c0_43] : memref<128x384xbf16, #tpu.memory_space<vmem>>, vector<128x384xbf16>
    %cst_44 = arith.constant dense<0.000000e+00> : vector<8x384xf32>
    %123 = tpu.matmul %121, %122, %cst_44 {dimension_numbers = #tpu.dot_dimension_numbers<[1], [0], [0], [1], [0, 0, 1, 1], [], []>} : vector<8x128xbf16>, vector<128x384xbf16>, vector<8x384xf32> -> vector<8x384xf32>
    %124 = vector.broadcast %61 : vector<1x384xf32> to vector<8x384xf32>
    %125 = arith.addf %123, %124 : vector<8x384xf32>
    %126 = vector.extract_strided_slice %120 {offsets = [0, 0], sizes = [8, 256], strides = [1, 1]} : vector<8x384xf32> to vector<8x256xf32>
    %127 = vector.extract_strided_slice %125 {offsets = [0, 0], sizes = [8, 256], strides = [1, 1]} : vector<8x384xf32> to vector<8x256xf32>
    %128 = arith.addf %126, %127 : vector<8x256xf32>
    %129 = arith.negf %128 : vector<8x256xf32>
    %130 = math.exp %129 : vector<8x256xf32>
    %cst_45 = arith.constant 1.000000e+00 : f32
    %131 = vector.broadcast %cst_45 : f32 to vector<8x256xf32>
    %132 = arith.addf %131, %130 : vector<8x256xf32>
    %133 = arith.divf %131, %132 : vector<8x256xf32>
    %134 = vector.extract_strided_slice %133 {offsets = [0, 0], sizes = [8, 128], strides = [1, 1]} : vector<8x256xf32> to vector<8x128xf32>
    %135 = vector.extract_strided_slice %133 {offsets = [0, 128], sizes = [8, 128], strides = [1, 1]} : vector<8x256xf32> to vector<8x128xf32>
    %136 = vector.extract_strided_slice %120 {offsets = [0, 256], sizes = [8, 128], strides = [1, 1]} : vector<8x384xf32> to vector<8x128xf32>
    %137 = vector.extract_strided_slice %125 {offsets = [0, 256], sizes = [8, 128], strides = [1, 1]} : vector<8x384xf32> to vector<8x128xf32>
    %138 = arith.mulf %134, %137 : vector<8x128xf32>
    %139 = arith.addf %136, %138 : vector<8x128xf32>
    %140 = math.tanh %139 : vector<8x128xf32>
    %cst_46 = arith.constant 1.000000e+00 : f32
    %141 = vector.broadcast %cst_46 : f32 to vector<8x128xf32>
    %142 = arith.subf %141, %135 : vector<8x128xf32>
    %143 = arith.mulf %142, %140 : vector<8x128xf32>
    %144 = arith.mulf %135, %117 : vector<8x128xf32>
    %145 = arith.addf %143, %144 : vector<8x128xf32>
    %146 = arith.addf %118, %145 : vector<8x128xf32>
    %c16_47 = arith.constant 16 : index
    %c0_48 = arith.constant 0 : index
    %147 = vector.load %arg31[%c16_47, %c0_48] : memref<64x128xf32, #tpu.memory_space<vmem>>, vector<8x128xf32>
    tpu.vector_store %arg31[%c16_47, %c0_48], %145 {strides = array<i32>} : memref<64x128xf32, #tpu.memory_space<vmem>>, vector<8x128xf32>,
    %c24_49 = arith.constant 24 : index
    %c0_50 = arith.constant 0 : index
    %148 = vector.load %arg33[%c24_49, %c0_50] : memref<64x384xf32, #tpu.memory_space<vmem>>, vector<8x384xf32>
    %149 = arith.truncf %145 : vector<8x128xf32> to vector<8x128xbf16>
    %c0_51 = arith.constant 0 : index
    %c0_52 = arith.constant 0 : index
    %150 = vector.load %arg3[%c0_51, %c0_52] : memref<128x384xbf16, #tpu.memory_space<vmem>>, vector<128x384xbf16>
    %cst_53 = arith.constant dense<0.000000e+00> : vector<8x384xf32>
    %151 = tpu.matmul %149, %150, %cst_53 {dimension_numbers = #tpu.dot_dimension_numbers<[1], [0], [0], [1], [0, 0, 1, 1], [], []>} : vector<8x128xbf16>, vector<128x384xbf16>, vector<8x384xf32> -> vector<8x384xf32>
    %152 = vector.broadcast %61 : vector<1x384xf32> to vector<8x384xf32>
    %153 = arith.addf %151, %152 : vector<8x384xf32>
    %154 = vector.extract_strided_slice %148 {offsets = [0, 0], sizes = [8, 256], strides = [1, 1]} : vector<8x384xf32> to vector<8x256xf32>
    %155 = vector.extract_strided_slice %153 {offsets = [0, 0], sizes = [8, 256], strides = [1, 1]} : vector<8x384xf32> to vector<8x256xf32>
    %156 = arith.addf %154, %155 : vector<8x256xf32>
    %157 = arith.negf %156 : vector<8x256xf32>
    %158 = math.exp %157 : vector<8x256xf32>
    %cst_54 = arith.constant 1.000000e+00 : f32
    %159 = vector.broadcast %cst_54 : f32 to vector<8x256xf32>
    %160 = arith.addf %159, %158 : vector<8x256xf32>
    %161 = arith.divf %159, %160 : vector<8x256xf32>
    %162 = vector.extract_strided_slice %161 {offsets = [0, 0], sizes = [8, 128], strides = [1, 1]} : vector<8x256xf32> to vector<8x128xf32>
    %163 = vector.extract_strided_slice %161 {offsets = [0, 128], sizes = [8, 128], strides = [1, 1]} : vector<8x256xf32> to vector<8x128xf32>
    %164 = vector.extract_strided_slice %148 {offsets = [0, 256], sizes = [8, 128], strides = [1, 1]} : vector<8x384xf32> to vector<8x128xf32>
    %165 = vector.extract_strided_slice %153 {offsets = [0, 256], sizes = [8, 128], strides = [1, 1]} : vector<8x384xf32> to vector<8x128xf32>
    %166 = arith.mulf %162, %165 : vector<8x128xf32>
    %167 = arith.addf %164, %166 : vector<8x128xf32>
    %168 = math.tanh %167 : vector<8x128xf32>
    %cst_55 = arith.constant 1.000000e+00 : f32
    %169 = vector.broadcast %cst_55 : f32 to vector<8x128xf32>
    %170 = arith.subf %169, %163 : vector<8x128xf32>
    %171 = arith.mulf %170, %168 : vector<8x128xf32>
    %172 = arith.mulf %163, %145 : vector<8x128xf32>
    %173 = arith.addf %171, %172 : vector<8x128xf32>
    %174 = arith.addf %146, %173 : vector<8x128xf32>
    %c24_56 = arith.constant 24 : index
    %c0_57 = arith.constant 0 : index
    %175 = vector.load %arg31[%c24_56, %c0_57] : memref<64x128xf32, #tpu.memory_space<vmem>>, vector<8x128xf32>
    tpu.vector_store %arg31[%c24_56, %c0_57], %173 {strides = array<i32>} : memref<64x128xf32, #tpu.memory_space<vmem>>, vector<8x128xf32>,
    %c32_58 = arith.constant 32 : index
    %c0_59 = arith.constant 0 : index
    %176 = vector.load %arg33[%c32_58, %c0_59] : memref<64x384xf32, #tpu.memory_space<vmem>>, vector<8x384xf32>
    %177 = arith.truncf %173 : vector<8x128xf32> to vector<8x128xbf16>
    %c0_60 = arith.constant 0 : index
    %c0_61 = arith.constant 0 : index
    %178 = vector.load %arg3[%c0_60, %c0_61] : memref<128x384xbf16, #tpu.memory_space<vmem>>, vector<128x384xbf16>
    %cst_62 = arith.constant dense<0.000000e+00> : vector<8x384xf32>
    %179 = tpu.matmul %177, %178, %cst_62 {dimension_numbers = #tpu.dot_dimension_numbers<[1], [0], [0], [1], [0, 0, 1, 1], [], []>} : vector<8x128xbf16>, vector<128x384xbf16>, vector<8x384xf32> -> vector<8x384xf32>
    %180 = vector.broadcast %61 : vector<1x384xf32> to vector<8x384xf32>
    %181 = arith.addf %179, %180 : vector<8x384xf32>
    %182 = vector.extract_strided_slice %176 {offsets = [0, 0], sizes = [8, 256], strides = [1, 1]} : vector<8x384xf32> to vector<8x256xf32>
    %183 = vector.extract_strided_slice %181 {offsets = [0, 0], sizes = [8, 256], strides = [1, 1]} : vector<8x384xf32> to vector<8x256xf32>
    %184 = arith.addf %182, %183 : vector<8x256xf32>
    %185 = arith.negf %184 : vector<8x256xf32>
    %186 = math.exp %185 : vector<8x256xf32>
    %cst_63 = arith.constant 1.000000e+00 : f32
    %187 = vector.broadcast %cst_63 : f32 to vector<8x256xf32>
    %188 = arith.addf %187, %186 : vector<8x256xf32>
    %189 = arith.divf %187, %188 : vector<8x256xf32>
    %190 = vector.extract_strided_slice %189 {offsets = [0, 0], sizes = [8, 128], strides = [1, 1]} : vector<8x256xf32> to vector<8x128xf32>
    %191 = vector.extract_strided_slice %189 {offsets = [0, 128], sizes = [8, 128], strides = [1, 1]} : vector<8x256xf32> to vector<8x128xf32>
    %192 = vector.extract_strided_slice %176 {offsets = [0, 256], sizes = [8, 128], strides = [1, 1]} : vector<8x384xf32> to vector<8x128xf32>
    %193 = vector.extract_strided_slice %181 {offsets = [0, 256], sizes = [8, 128], strides = [1, 1]} : vector<8x384xf32> to vector<8x128xf32>
    %194 = arith.mulf %190, %193 : vector<8x128xf32>
    %195 = arith.addf %192, %194 : vector<8x128xf32>
    %196 = math.tanh %195 : vector<8x128xf32>
    %cst_64 = arith.constant 1.000000e+00 : f32
    %197 = vector.broadcast %cst_64 : f32 to vector<8x128xf32>
    %198 = arith.subf %197, %191 : vector<8x128xf32>
    %199 = arith.mulf %198, %196 : vector<8x128xf32>
    %200 = arith.mulf %191, %173 : vector<8x128xf32>
    %201 = arith.addf %199, %200 : vector<8x128xf32>
    %202 = arith.addf %174, %201 : vector<8x128xf32>
    %c32_65 = arith.constant 32 : index
    %c0_66 = arith.constant 0 : index
    %203 = vector.load %arg31[%c32_65, %c0_66] : memref<64x128xf32, #tpu.memory_space<vmem>>, vector<8x128xf32>
    tpu.vector_store %arg31[%c32_65, %c0_66], %201 {strides = array<i32>} : memref<64x128xf32, #tpu.memory_space<vmem>>, vector<8x128xf32>,
    %c40_67 = arith.constant 40 : index
    %c0_68 = arith.constant 0 : index
    %204 = vector.load %arg33[%c40_67, %c0_68] : memref<64x384xf32, #tpu.memory_space<vmem>>, vector<8x384xf32>
    %205 = arith.truncf %201 : vector<8x128xf32> to vector<8x128xbf16>
    %c0_69 = arith.constant 0 : index
    %c0_70 = arith.constant 0 : index
    %206 = vector.load %arg3[%c0_69, %c0_70] : memref<128x384xbf16, #tpu.memory_space<vmem>>, vector<128x384xbf16>
    %cst_71 = arith.constant dense<0.000000e+00> : vector<8x384xf32>
    %207 = tpu.matmul %205, %206, %cst_71 {dimension_numbers = #tpu.dot_dimension_numbers<[1], [0], [0], [1], [0, 0, 1, 1], [], []>} : vector<8x128xbf16>, vector<128x384xbf16>, vector<8x384xf32> -> vector<8x384xf32>
    %208 = vector.broadcast %61 : vector<1x384xf32> to vector<8x384xf32>
    %209 = arith.addf %207, %208 : vector<8x384xf32>
    %210 = vector.extract_strided_slice %204 {offsets = [0, 0], sizes = [8, 256], strides = [1, 1]} : vector<8x384xf32> to vector<8x256xf32>
    %211 = vector.extract_strided_slice %209 {offsets = [0, 0], sizes = [8, 256], strides = [1, 1]} : vector<8x384xf32> to vector<8x256xf32>
    %212 = arith.addf %210, %211 : vector<8x256xf32>
    %213 = arith.negf %212 : vector<8x256xf32>
    %214 = math.exp %213 : vector<8x256xf32>
    %cst_72 = arith.constant 1.000000e+00 : f32
    %215 = vector.broadcast %cst_72 : f32 to vector<8x256xf32>
    %216 = arith.addf %215, %214 : vector<8x256xf32>
    %217 = arith.divf %215, %216 : vector<8x256xf32>
    %218 = vector.extract_strided_slice %217 {offsets = [0, 0], sizes = [8, 128], strides = [1, 1]} : vector<8x256xf32> to vector<8x128xf32>
    %219 = vector.extract_strided_slice %217 {offsets = [0, 128], sizes = [8, 128], strides = [1, 1]} : vector<8x256xf32> to vector<8x128xf32>
    %220 = vector.extract_strided_slice %204 {offsets = [0, 256], sizes = [8, 128], strides = [1, 1]} : vector<8x384xf32> to vector<8x128xf32>
    %221 = vector.extract_strided_slice %209 {offsets = [0, 256], sizes = [8, 128], strides = [1, 1]} : vector<8x384xf32> to vector<8x128xf32>
    %222 = arith.mulf %218, %221 : vector<8x128xf32>
    %223 = arith.addf %220, %222 : vector<8x128xf32>
    %224 = math.tanh %223 : vector<8x128xf32>
    %cst_73 = arith.constant 1.000000e+00 : f32
    %225 = vector.broadcast %cst_73 : f32 to vector<8x128xf32>
    %226 = arith.subf %225, %219 : vector<8x128xf32>
    %227 = arith.mulf %226, %224 : vector<8x128xf32>
    %228 = arith.mulf %219, %201 : vector<8x128xf32>
    %229 = arith.addf %227, %228 : vector<8x128xf32>
    %230 = arith.addf %202, %229 : vector<8x128xf32>
    %c40_74 = arith.constant 40 : index
    %c0_75 = arith.constant 0 : index
    %231 = vector.load %arg31[%c40_74, %c0_75] : memref<64x128xf32, #tpu.memory_space<vmem>>, vector<8x128xf32>
    tpu.vector_store %arg31[%c40_74, %c0_75], %229 {strides = array<i32>} : memref<64x128xf32, #tpu.memory_space<vmem>>, vector<8x128xf32>,
    %c48_76 = arith.constant 48 : index
    %c0_77 = arith.constant 0 : index
    %232 = vector.load %arg33[%c48_76, %c0_77] : memref<64x384xf32, #tpu.memory_space<vmem>>, vector<8x384xf32>
    %233 = arith.truncf %229 : vector<8x128xf32> to vector<8x128xbf16>
    %c0_78 = arith.constant 0 : index
    %c0_79 = arith.constant 0 : index
    %234 = vector.load %arg3[%c0_78, %c0_79] : memref<128x384xbf16, #tpu.memory_space<vmem>>, vector<128x384xbf16>
    %cst_80 = arith.constant dense<0.000000e+00> : vector<8x384xf32>
    %235 = tpu.matmul %233, %234, %cst_80 {dimension_numbers = #tpu.dot_dimension_numbers<[1], [0], [0], [1], [0, 0, 1, 1], [], []>} : vector<8x128xbf16>, vector<128x384xbf16>, vector<8x384xf32> -> vector<8x384xf32>
    %236 = vector.broadcast %61 : vector<1x384xf32> to vector<8x384xf32>
    %237 = arith.addf %235, %236 : vector<8x384xf32>
    %238 = vector.extract_strided_slice %232 {offsets = [0, 0], sizes = [8, 256], strides = [1, 1]} : vector<8x384xf32> to vector<8x256xf32>
    %239 = vector.extract_strided_slice %237 {offsets = [0, 0], sizes = [8, 256], strides = [1, 1]} : vector<8x384xf32> to vector<8x256xf32>
    %240 = arith.addf %238, %239 : vector<8x256xf32>
    %241 = arith.negf %240 : vector<8x256xf32>
    %242 = math.exp %241 : vector<8x256xf32>
    %cst_81 = arith.constant 1.000000e+00 : f32
    %243 = vector.broadcast %cst_81 : f32 to vector<8x256xf32>
    %244 = arith.addf %243, %242 : vector<8x256xf32>
    %245 = arith.divf %243, %244 : vector<8x256xf32>
    %246 = vector.extract_strided_slice %245 {offsets = [0, 0], sizes = [8, 128], strides = [1, 1]} : vector<8x256xf32> to vector<8x128xf32>
    %247 = vector.extract_strided_slice %245 {offsets = [0, 128], sizes = [8, 128], strides = [1, 1]} : vector<8x256xf32> to vector<8x128xf32>
    %248 = vector.extract_strided_slice %232 {offsets = [0, 256], sizes = [8, 128], strides = [1, 1]} : vector<8x384xf32> to vector<8x128xf32>
    %249 = vector.extract_strided_slice %237 {offsets = [0, 256], sizes = [8, 128], strides = [1, 1]} : vector<8x384xf32> to vector<8x128xf32>
    %250 = arith.mulf %246, %249 : vector<8x128xf32>
    %251 = arith.addf %248, %250 : vector<8x128xf32>
    %252 = math.tanh %251 : vector<8x128xf32>
    %cst_82 = arith.constant 1.000000e+00 : f32
    %253 = vector.broadcast %cst_82 : f32 to vector<8x128xf32>
    %254 = arith.subf %253, %247 : vector<8x128xf32>
    %255 = arith.mulf %254, %252 : vector<8x128xf32>
    %256 = arith.mulf %247, %229 : vector<8x128xf32>
    %257 = arith.addf %255, %256 : vector<8x128xf32>
    %258 = arith.addf %230, %257 : vector<8x128xf32>
    %c48_83 = arith.constant 48 : index
    %c0_84 = arith.constant 0 : index
    %259 = vector.load %arg31[%c48_83, %c0_84] : memref<64x128xf32, #tpu.memory_space<vmem>>, vector<8x128xf32>
    tpu.vector_store %arg31[%c48_83, %c0_84], %257 {strides = array<i32>} : memref<64x128xf32, #tpu.memory_space<vmem>>, vector<8x128xf32>,
    %c56_85 = arith.constant 56 : index
    %c0_86 = arith.constant 0 : index
    %260 = vector.load %arg33[%c56_85, %c0_86] : memref<64x384xf32, #tpu.memory_space<vmem>>, vector<8x384xf32>
    %261 = arith.truncf %257 : vector<8x128xf32> to vector<8x128xbf16>
    %c0_87 = arith.constant 0 : index
    %c0_88 = arith.constant 0 : index
    %262 = vector.load %arg3[%c0_87, %c0_88] : memref<128x384xbf16, #tpu.memory_space<vmem>>, vector<128x384xbf16>
    %cst_89 = arith.constant dense<0.000000e+00> : vector<8x384xf32>
    %263 = tpu.matmul %261, %262, %cst_89 {dimension_numbers = #tpu.dot_dimension_numbers<[1], [0], [0], [1], [0, 0, 1, 1], [], []>} : vector<8x128xbf16>, vector<128x384xbf16>, vector<8x384xf32> -> vector<8x384xf32>
    %264 = vector.broadcast %61 : vector<1x384xf32> to vector<8x384xf32>
    %265 = arith.addf %263, %264 : vector<8x384xf32>
    %266 = vector.extract_strided_slice %260 {offsets = [0, 0], sizes = [8, 256], strides = [1, 1]} : vector<8x384xf32> to vector<8x256xf32>
    %267 = vector.extract_strided_slice %265 {offsets = [0, 0], sizes = [8, 256], strides = [1, 1]} : vector<8x384xf32> to vector<8x256xf32>
    %268 = arith.addf %266, %267 : vector<8x256xf32>
    %269 = arith.negf %268 : vector<8x256xf32>
    %270 = math.exp %269 : vector<8x256xf32>
    %cst_90 = arith.constant 1.000000e+00 : f32
    %271 = vector.broadcast %cst_90 : f32 to vector<8x256xf32>
    %272 = arith.addf %271, %270 : vector<8x256xf32>
    %273 = arith.divf %271, %272 : vector<8x256xf32>
    %274 = vector.extract_strided_slice %273 {offsets = [0, 0], sizes = [8, 128], strides = [1, 1]} : vector<8x256xf32> to vector<8x128xf32>
    %275 = vector.extract_strided_slice %273 {offsets = [0, 128], sizes = [8, 128], strides = [1, 1]} : vector<8x256xf32> to vector<8x128xf32>
    %276 = vector.extract_strided_slice %260 {offsets = [0, 256], sizes = [8, 128], strides = [1, 1]} : vector<8x384xf32> to vector<8x128xf32>
    %277 = vector.extract_strided_slice %265 {offsets = [0, 256], sizes = [8, 128], strides = [1, 1]} : vector<8x384xf32> to vector<8x128xf32>
    %278 = arith.mulf %274, %277 : vector<8x128xf32>
    %279 = arith.addf %276, %278 : vector<8x128xf32>
    %280 = math.tanh %279 : vector<8x128xf32>
    %cst_91 = arith.constant 1.000000e+00 : f32
    %281 = vector.broadcast %cst_91 : f32 to vector<8x128xf32>
    %282 = arith.subf %281, %275 : vector<8x128xf32>
    %283 = arith.mulf %282, %280 : vector<8x128xf32>
    %284 = arith.mulf %275, %257 : vector<8x128xf32>
    %285 = arith.addf %283, %284 : vector<8x128xf32>
    %286 = arith.addf %258, %285 : vector<8x128xf32>
    %c56_92 = arith.constant 56 : index
    %c0_93 = arith.constant 0 : index
    %287 = vector.load %arg31[%c56_92, %c0_93] : memref<64x128xf32, #tpu.memory_space<vmem>>, vector<8x128xf32>
    tpu.vector_store %arg31[%c56_92, %c0_93], %285 {strides = array<i32>} : memref<64x128xf32, #tpu.memory_space<vmem>>, vector<8x128xf32>,
    %cst_94 = arith.constant 1.250000e-01 : f32
    %288 = vector.broadcast %cst_94 : f32 to vector<8x128xf32>
    %289 = arith.mulf %286, %288 : vector<8x128xf32>
    %c0_95 = arith.constant 0 : index
    %c0_96 = arith.constant 0 : index
    %290 = vector.load %arg31[%c0_95, %c0_96] : memref<64x128xf32, #tpu.memory_space<vmem>>, vector<64x128xf32>
    %291 = vector.extract_strided_slice %290 {offsets = [0, 0], sizes = [8, 128], strides = [1, 1]} : vector<64x128xf32> to vector<8x128xf32>
    %292 = vector.extract_strided_slice %290 {offsets = [56, 0], sizes = [8, 128], strides = [1, 1]} : vector<64x128xf32> to vector<8x128xf32>
    %293 = vector.shape_cast %3 : vector<1x128xi1> to vector<1x128xi1>
    %294 = vector.broadcast %293 : vector<1x128xi1> to vector<8x128xi1>
    %295 = arith.select %294, %291, %292 : vector<8x128xi1>, vector<8x128xf32>
    %c0_97 = arith.constant 0 : index
    %c0_98 = arith.constant 0 : index
    %296 = vector.load %arg31[%c0_97, %c0_98] : memref<64x128xf32, #tpu.memory_space<vmem>>, vector<8x128xf32>
    tpu.vector_store %arg31[%c0_97, %c0_98], %295 {strides = array<i32>} : memref<64x128xf32, #tpu.memory_space<vmem>>, vector<8x128xf32>,
    %297 = vector.shape_cast %3 : vector<1x128xi1> to vector<1x128xi1>
    %298 = vector.broadcast %297 : vector<1x128xi1> to vector<8x128xi1>
    %299 = arith.select %298, %292, %291 : vector<8x128xi1>, vector<8x128xf32>
    %c56_99 = arith.constant 56 : index
    %c0_100 = arith.constant 0 : index
    %300 = vector.load %arg31[%c56_99, %c0_100] : memref<64x128xf32, #tpu.memory_space<vmem>>, vector<8x128xf32>
    tpu.vector_store %arg31[%c56_99, %c0_100], %299 {strides = array<i32>} : memref<64x128xf32, #tpu.memory_space<vmem>>, vector<8x128xf32>,
    %301 = vector.extract_strided_slice %290 {offsets = [8, 0], sizes = [8, 128], strides = [1, 1]} : vector<64x128xf32> to vector<8x128xf32>
    %302 = vector.extract_strided_slice %290 {offsets = [48, 0], sizes = [8, 128], strides = [1, 1]} : vector<64x128xf32> to vector<8x128xf32>
    %303 = vector.shape_cast %3 : vector<1x128xi1> to vector<1x128xi1>
    %304 = vector.broadcast %303 : vector<1x128xi1> to vector<8x128xi1>
    %305 = arith.select %304, %301, %302 : vector<8x128xi1>, vector<8x128xf32>
    %c8_101 = arith.constant 8 : index
    %c0_102 = arith.constant 0 : index
    %306 = vector.load %arg31[%c8_101, %c0_102] : memref<64x128xf32, #tpu.memory_space<vmem>>, vector<8x128xf32>
    tpu.vector_store %arg31[%c8_101, %c0_102], %305 {strides = array<i32>} : memref<64x128xf32, #tpu.memory_space<vmem>>, vector<8x128xf32>,
    %307 = vector.shape_cast %3 : vector<1x128xi1> to vector<1x128xi1>
    %308 = vector.broadcast %307 : vector<1x128xi1> to vector<8x128xi1>
    %309 = arith.select %308, %302, %301 : vector<8x128xi1>, vector<8x128xf32>
    %c48_103 = arith.constant 48 : index
    %c0_104 = arith.constant 0 : index
    %310 = vector.load %arg31[%c48_103, %c0_104] : memref<64x128xf32, #tpu.memory_space<vmem>>, vector<8x128xf32>
    tpu.vector_store %arg31[%c48_103, %c0_104], %309 {strides = array<i32>} : memref<64x128xf32, #tpu.memory_space<vmem>>, vector<8x128xf32>,
    %311 = vector.extract_strided_slice %290 {offsets = [16, 0], sizes = [8, 128], strides = [1, 1]} : vector<64x128xf32> to vector<8x128xf32>
    %312 = vector.extract_strided_slice %290 {offsets = [40, 0], sizes = [8, 128], strides = [1, 1]} : vector<64x128xf32> to vector<8x128xf32>
    %313 = vector.shape_cast %3 : vector<1x128xi1> to vector<1x128xi1>
    %314 = vector.broadcast %313 : vector<1x128xi1> to vector<8x128xi1>
    %315 = arith.select %314, %311, %312 : vector<8x128xi1>, vector<8x128xf32>
    %c16_105 = arith.constant 16 : index
    %c0_106 = arith.constant 0 : index
    %316 = vector.load %arg31[%c16_105, %c0_106] : memref<64x128xf32, #tpu.memory_space<vmem>>, vector<8x128xf32>
    tpu.vector_store %arg31[%c16_105, %c0_106], %315 {strides = array<i32>} : memref<64x128xf32, #tpu.memory_space<vmem>>, vector<8x128xf32>,
    %317 = vector.shape_cast %3 : vector<1x128xi1> to vector<1x128xi1>
    %318 = vector.broadcast %317 : vector<1x128xi1> to vector<8x128xi1>
    %319 = arith.select %318, %312, %311 : vector<8x128xi1>, vector<8x128xf32>
    %c40_107 = arith.constant 40 : index
    %c0_108 = arith.constant 0 : index
    %320 = vector.load %arg31[%c40_107, %c0_108] : memref<64x128xf32, #tpu.memory_space<vmem>>, vector<8x128xf32>
    tpu.vector_store %arg31[%c40_107, %c0_108], %319 {strides = array<i32>} : memref<64x128xf32, #tpu.memory_space<vmem>>, vector<8x128xf32>,
    %321 = vector.extract_strided_slice %290 {offsets = [24, 0], sizes = [8, 128], strides = [1, 1]} : vector<64x128xf32> to vector<8x128xf32>
    %322 = vector.extract_strided_slice %290 {offsets = [32, 0], sizes = [8, 128], strides = [1, 1]} : vector<64x128xf32> to vector<8x128xf32>
    %323 = vector.shape_cast %3 : vector<1x128xi1> to vector<1x128xi1>
    %324 = vector.broadcast %323 : vector<1x128xi1> to vector<8x128xi1>
    %325 = arith.select %324, %321, %322 : vector<8x128xi1>, vector<8x128xf32>
    %c24_109 = arith.constant 24 : index
    %c0_110 = arith.constant 0 : index
    %326 = vector.load %arg31[%c24_109, %c0_110] : memref<64x128xf32, #tpu.memory_space<vmem>>, vector<8x128xf32>
    tpu.vector_store %arg31[%c24_109, %c0_110], %325 {strides = array<i32>} : memref<64x128xf32, #tpu.memory_space<vmem>>, vector<8x128xf32>,
    %327 = vector.shape_cast %3 : vector<1x128xi1> to vector<1x128xi1>
    %328 = vector.broadcast %327 : vector<1x128xi1> to vector<8x128xi1>
    %329 = arith.select %328, %322, %321 : vector<8x128xi1>, vector<8x128xf32>
    %c32_111 = arith.constant 32 : index
    %c0_112 = arith.constant 0 : index
    %330 = vector.load %arg31[%c32_111, %c0_112] : memref<64x128xf32, #tpu.memory_space<vmem>>, vector<8x128xf32>
    tpu.vector_store %arg31[%c32_111, %c0_112], %329 {strides = array<i32>} : memref<64x128xf32, #tpu.memory_space<vmem>>, vector<8x128xf32>,
    %cst_113 = arith.constant 0.000000e+00 : f32
    %331 = vector.broadcast %cst_113 : f32 to vector<64x384xf32>
    %c0_114 = arith.constant 0 : index
    %c0_115 = arith.constant 0 : index
    %332 = vector.load %arg9[%c0_114, %c0_115] : memref<1x384xf32, #tpu.memory_space<vmem>>, vector<1x384xf32>
    %333 = vector.broadcast %332 : vector<1x384xf32> to vector<64x384xf32>
    %334 = arith.addf %331, %333 : vector<64x384xf32>
    %c0_116 = arith.constant 0 : index
    %c0_117 = arith.constant 0 : index
    %335 = vector.load %arg0[%c0_116, %c0_117] : memref<64x2xf32, #tpu.memory_space<vmem>>, vector<64x2xf32>
    %336 = arith.truncf %335 : vector<64x2xf32> to vector<64x2xbf16>
    %c0_118 = arith.constant 0 : index
    %c0_119 = arith.constant 0 : index
    %337 = vector.load %arg6[%c0_118, %c0_119] : memref<2x384xbf16, #tpu.memory_space<vmem>>, vector<2x384xbf16>
    %cst_120 = arith.constant dense<0.000000e+00> : vector<64x384xf32>
    %338 = tpu.matmul %336, %337, %cst_120 {dimension_numbers = #tpu.dot_dimension_numbers<[1], [0], [0], [1], [0, 0, 1, 1], [], []>} : vector<64x2xbf16>, vector<2x384xbf16>, vector<64x384xf32> -> vector<64x384xf32>
    %339 = arith.addf %334, %338 : vector<64x384xf32>
    %c0_121 = arith.constant 0 : index
    %c0_122 = arith.constant 0 : index
    %340 = vector.load %arg31[%c0_121, %c0_122] : memref<64x128xf32, #tpu.memory_space<vmem>>, vector<64x128xf32>
    %341 = arith.truncf %340 : vector<64x128xf32> to vector<64x128xbf16>
    %c0_123 = arith.constant 0 : index
    %c0_124 = arith.constant 0 : index
    %342 = vector.load %arg7[%c0_123, %c0_124] : memref<128x384xbf16, #tpu.memory_space<vmem>>, vector<128x384xbf16>
    %cst_125 = arith.constant dense<0.000000e+00> : vector<64x384xf32>
    %343 = tpu.matmul %341, %342, %cst_125 {dimension_numbers = #tpu.dot_dimension_numbers<[1], [0], [0], [1], [0, 0, 1, 1], [], []>} : vector<64x128xbf16>, vector<128x384xbf16>, vector<64x384xf32> -> vector<64x384xf32>
    %344 = arith.addf %339, %343 : vector<64x384xf32>
    %345 = vector.extract_strided_slice %344 {offsets = [0, 0], sizes = [8, 384], strides = [1, 1]} : vector<64x384xf32> to vector<8x384xf32>
    %346 = vector.extract_strided_slice %344 {offsets = [56, 0], sizes = [8, 384], strides = [1, 1]} : vector<64x384xf32> to vector<8x384xf32>
    %347 = vector.shape_cast %2 : vector<1x384xi1> to vector<1x384xi1>
    %348 = vector.broadcast %347 : vector<1x384xi1> to vector<8x384xi1>
    %349 = arith.select %348, %345, %346 : vector<8x384xi1>, vector<8x384xf32>
    %c0_126 = arith.constant 0 : index
    %c0_127 = arith.constant 0 : index
    %350 = vector.load %arg33[%c0_126, %c0_127] : memref<64x384xf32, #tpu.memory_space<vmem>>, vector<8x384xf32>
    tpu.vector_store %arg33[%c0_126, %c0_127], %349 {strides = array<i32>} : memref<64x384xf32, #tpu.memory_space<vmem>>, vector<8x384xf32>,
    %351 = vector.extract_strided_slice %344 {offsets = [8, 0], sizes = [8, 384], strides = [1, 1]} : vector<64x384xf32> to vector<8x384xf32>
    %352 = vector.extract_strided_slice %344 {offsets = [48, 0], sizes = [8, 384], strides = [1, 1]} : vector<64x384xf32> to vector<8x384xf32>
    %353 = vector.shape_cast %2 : vector<1x384xi1> to vector<1x384xi1>
    %354 = vector.broadcast %353 : vector<1x384xi1> to vector<8x384xi1>
    %355 = arith.select %354, %351, %352 : vector<8x384xi1>, vector<8x384xf32>
    %c8_128 = arith.constant 8 : index
    %c0_129 = arith.constant 0 : index
    %356 = vector.load %arg33[%c8_128, %c0_129] : memref<64x384xf32, #tpu.memory_space<vmem>>, vector<8x384xf32>
    tpu.vector_store %arg33[%c8_128, %c0_129], %355 {strides = array<i32>} : memref<64x384xf32, #tpu.memory_space<vmem>>, vector<8x384xf32>,
    %357 = vector.extract_strided_slice %344 {offsets = [16, 0], sizes = [8, 384], strides = [1, 1]} : vector<64x384xf32> to vector<8x384xf32>
    %358 = vector.extract_strided_slice %344 {offsets = [40, 0], sizes = [8, 384], strides = [1, 1]} : vector<64x384xf32> to vector<8x384xf32>
    %359 = vector.shape_cast %2 : vector<1x384xi1> to vector<1x384xi1>
    %360 = vector.broadcast %359 : vector<1x384xi1> to vector<8x384xi1>
    %361 = arith.select %360, %357, %358 : vector<8x384xi1>, vector<8x384xf32>
    %c16_130 = arith.constant 16 : index
    %c0_131 = arith.constant 0 : index
    %362 = vector.load %arg33[%c16_130, %c0_131] : memref<64x384xf32, #tpu.memory_space<vmem>>, vector<8x384xf32>
    tpu.vector_store %arg33[%c16_130, %c0_131], %361 {strides = array<i32>} : memref<64x384xf32, #tpu.memory_space<vmem>>, vector<8x384xf32>,
    %363 = vector.extract_strided_slice %344 {offsets = [24, 0], sizes = [8, 384], strides = [1, 1]} : vector<64x384xf32> to vector<8x384xf32>
    %364 = vector.extract_strided_slice %344 {offsets = [32, 0], sizes = [8, 384], strides = [1, 1]} : vector<64x384xf32> to vector<8x384xf32>
    %365 = vector.shape_cast %2 : vector<1x384xi1> to vector<1x384xi1>
    %366 = vector.broadcast %365 : vector<1x384xi1> to vector<8x384xi1>
    %367 = arith.select %366, %363, %364 : vector<8x384xi1>, vector<8x384xf32>
    %c24_132 = arith.constant 24 : index
    %c0_133 = arith.constant 0 : index
    %368 = vector.load %arg33[%c24_132, %c0_133] : memref<64x384xf32, #tpu.memory_space<vmem>>, vector<8x384xf32>
    tpu.vector_store %arg33[%c24_132, %c0_133], %367 {strides = array<i32>} : memref<64x384xf32, #tpu.memory_space<vmem>>, vector<8x384xf32>,
    %369 = vector.extract_strided_slice %344 {offsets = [32, 0], sizes = [8, 384], strides = [1, 1]} : vector<64x384xf32> to vector<8x384xf32>
    %370 = vector.extract_strided_slice %344 {offsets = [24, 0], sizes = [8, 384], strides = [1, 1]} : vector<64x384xf32> to vector<8x384xf32>
    %371 = vector.shape_cast %2 : vector<1x384xi1> to vector<1x384xi1>
    %372 = vector.broadcast %371 : vector<1x384xi1> to vector<8x384xi1>
    %373 = arith.select %372, %369, %370 : vector<8x384xi1>, vector<8x384xf32>
    %c32_134 = arith.constant 32 : index
    %c0_135 = arith.constant 0 : index
    %374 = vector.load %arg33[%c32_134, %c0_135] : memref<64x384xf32, #tpu.memory_space<vmem>>, vector<8x384xf32>
    tpu.vector_store %arg33[%c32_134, %c0_135], %373 {strides = array<i32>} : memref<64x384xf32, #tpu.memory_space<vmem>>, vector<8x384xf32>,
    %375 = vector.extract_strided_slice %344 {offsets = [40, 0], sizes = [8, 384], strides = [1, 1]} : vector<64x384xf32> to vector<8x384xf32>
    %376 = vector.extract_strided_slice %344 {offsets = [16, 0], sizes = [8, 384], strides = [1, 1]} : vector<64x384xf32> to vector<8x384xf32>
    %377 = vector.shape_cast %2 : vector<1x384xi1> to vector<1x384xi1>
    %378 = vector.broadcast %377 : vector<1x384xi1> to vector<8x384xi1>
    %379 = arith.select %378, %375, %376 : vector<8x384xi1>, vector<8x384xf32>
    %c40_136 = arith.constant 40 : index
    %c0_137 = arith.constant 0 : index
    %380 = vector.load %arg33[%c40_136, %c0_137] : memref<64x384xf32, #tpu.memory_space<vmem>>, vector<8x384xf32>
    tpu.vector_store %arg33[%c40_136, %c0_137], %379 {strides = array<i32>} : memref<64x384xf32, #tpu.memory_space<vmem>>, vector<8x384xf32>,
    %381 = vector.extract_strided_slice %344 {offsets = [48, 0], sizes = [8, 384], strides = [1, 1]} : vector<64x384xf32> to vector<8x384xf32>
    %382 = vector.extract_strided_slice %344 {offsets = [8, 0], sizes = [8, 384], strides = [1, 1]} : vector<64x384xf32> to vector<8x384xf32>
    %383 = vector.shape_cast %2 : vector<1x384xi1> to vector<1x384xi1>
    %384 = vector.broadcast %383 : vector<1x384xi1> to vector<8x384xi1>
    %385 = arith.select %384, %381, %382 : vector<8x384xi1>, vector<8x384xf32>
    %c48_138 = arith.constant 48 : index
    %c0_139 = arith.constant 0 : index
    %386 = vector.load %arg33[%c48_138, %c0_139] : memref<64x384xf32, #tpu.memory_space<vmem>>, vector<8x384xf32>
    tpu.vector_store %arg33[%c48_138, %c0_139], %385 {strides = array<i32>} : memref<64x384xf32, #tpu.memory_space<vmem>>, vector<8x384xf32>,
    %387 = vector.extract_strided_slice %344 {offsets = [56, 0], sizes = [8, 384], strides = [1, 1]} : vector<64x384xf32> to vector<8x384xf32>
    %388 = vector.extract_strided_slice %344 {offsets = [0, 0], sizes = [8, 384], strides = [1, 1]} : vector<64x384xf32> to vector<8x384xf32>
    %389 = vector.shape_cast %2 : vector<1x384xi1> to vector<1x384xi1>
    %390 = vector.broadcast %389 : vector<1x384xi1> to vector<8x384xi1>
    %391 = arith.select %390, %387, %388 : vector<8x384xi1>, vector<8x384xf32>
    %c56_140 = arith.constant 56 : index
    %c0_141 = arith.constant 0 : index
    %392 = vector.load %arg33[%c56_140, %c0_141] : memref<64x384xf32, #tpu.memory_space<vmem>>, vector<8x384xf32>
    tpu.vector_store %arg33[%c56_140, %c0_141], %391 {strides = array<i32>} : memref<64x384xf32, #tpu.memory_space<vmem>>, vector<8x384xf32>,
    %c0_142 = arith.constant 0 : index
    %c0_143 = arith.constant 0 : index
    %393 = vector.load %arg10[%c0_142, %c0_143] : memref<1x384xf32, #tpu.memory_space<vmem>>, vector<1x384xf32>
    %cst_144 = arith.constant 0.000000e+00 : f32
    %394 = vector.broadcast %cst_144 : f32 to vector<8x128xf32>
    %cst_145 = arith.constant 0.000000e+00 : f32
    %395 = vector.broadcast %cst_145 : f32 to vector<8x128xf32>
    %c0_146 = arith.constant 0 : index
    %c0_147 = arith.constant 0 : index
    %396 = vector.load %arg33[%c0_146, %c0_147] : memref<64x384xf32, #tpu.memory_space<vmem>>, vector<8x384xf32>
    %397 = arith.truncf %394 : vector<8x128xf32> to vector<8x128xbf16>
    %c0_148 = arith.constant 0 : index
    %c0_149 = arith.constant 0 : index
    %398 = vector.load %arg8[%c0_148, %c0_149] : memref<128x384xbf16, #tpu.memory_space<vmem>>, vector<128x384xbf16>
    %cst_150 = arith.constant dense<0.000000e+00> : vector<8x384xf32>
    %399 = tpu.matmul %397, %398, %cst_150 {dimension_numbers = #tpu.dot_dimension_numbers<[1], [0], [0], [1], [0, 0, 1, 1], [], []>} : vector<8x128xbf16>, vector<128x384xbf16>, vector<8x384xf32> -> vector<8x384xf32>
    %400 = vector.broadcast %393 : vector<1x384xf32> to vector<8x384xf32>
    %401 = arith.addf %399, %400 : vector<8x384xf32>
    %402 = vector.extract_strided_slice %396 {offsets = [0, 0], sizes = [8, 256], strides = [1, 1]} : vector<8x384xf32> to vector<8x256xf32>
    %403 = vector.extract_strided_slice %401 {offsets = [0, 0], sizes = [8, 256], strides = [1, 1]} : vector<8x384xf32> to vector<8x256xf32>
    %404 = arith.addf %402, %403 : vector<8x256xf32>
    %405 = arith.negf %404 : vector<8x256xf32>
    %406 = math.exp %405 : vector<8x256xf32>
    %cst_151 = arith.constant 1.000000e+00 : f32
    %407 = vector.broadcast %cst_151 : f32 to vector<8x256xf32>
    %408 = arith.addf %407, %406 : vector<8x256xf32>
    %409 = arith.divf %407, %408 : vector<8x256xf32>
    %410 = vector.extract_strided_slice %409 {offsets = [0, 0], sizes = [8, 128], strides = [1, 1]} : vector<8x256xf32> to vector<8x128xf32>
    %411 = vector.extract_strided_slice %409 {offsets = [0, 128], sizes = [8, 128], strides = [1, 1]} : vector<8x256xf32> to vector<8x128xf32>
    %412 = vector.extract_strided_slice %396 {offsets = [0, 256], sizes = [8, 128], strides = [1, 1]} : vector<8x384xf32> to vector<8x128xf32>
    %413 = vector.extract_strided_slice %401 {offsets = [0, 256], sizes = [8, 128], strides = [1, 1]} : vector<8x384xf32> to vector<8x128xf32>
    %414 = arith.mulf %410, %413 : vector<8x128xf32>
    %415 = arith.addf %412, %414 : vector<8x128xf32>
    %416 = math.tanh %415 : vector<8x128xf32>
    %cst_152 = arith.constant 1.000000e+00 : f32
    %417 = vector.broadcast %cst_152 : f32 to vector<8x128xf32>
    %418 = arith.subf %417, %411 : vector<8x128xf32>
    %419 = arith.mulf %418, %416 : vector<8x128xf32>
    %420 = arith.mulf %411, %394 : vector<8x128xf32>
    %421 = arith.addf %419, %420 : vector<8x128xf32>
    %422 = arith.addf %395, %421 : vector<8x128xf32>
    %c0_153 = arith.constant 0 : index
    %c0_154 = arith.constant 0 : index
    %423 = vector.load %arg32[%c0_153, %c0_154] : memref<64x128xf32, #tpu.memory_space<vmem>>, vector<8x128xf32>
    tpu.vector_store %arg32[%c0_153, %c0_154], %421 {strides = array<i32>} : memref<64x128xf32, #tpu.memory_space<vmem>>, vector<8x128xf32>,
    %c8_155 = arith.constant 8 : index
    %c0_156 = arith.constant 0 : index
    %424 = vector.load %arg33[%c8_155, %c0_156] : memref<64x384xf32, #tpu.memory_space<vmem>>, vector<8x384xf32>
    %425 = arith.truncf %421 : vector<8x128xf32> to vector<8x128xbf16>
    %c0_157 = arith.constant 0 : index
    %c0_158 = arith.constant 0 : index
    %426 = vector.load %arg8[%c0_157, %c0_158] : memref<128x384xbf16, #tpu.memory_space<vmem>>, vector<128x384xbf16>
    %cst_159 = arith.constant dense<0.000000e+00> : vector<8x384xf32>
    %427 = tpu.matmul %425, %426, %cst_159 {dimension_numbers = #tpu.dot_dimension_numbers<[1], [0], [0], [1], [0, 0, 1, 1], [], []>} : vector<8x128xbf16>, vector<128x384xbf16>, vector<8x384xf32> -> vector<8x384xf32>
    %428 = vector.broadcast %393 : vector<1x384xf32> to vector<8x384xf32>
    %429 = arith.addf %427, %428 : vector<8x384xf32>
    %430 = vector.extract_strided_slice %424 {offsets = [0, 0], sizes = [8, 256], strides = [1, 1]} : vector<8x384xf32> to vector<8x256xf32>
    %431 = vector.extract_strided_slice %429 {offsets = [0, 0], sizes = [8, 256], strides = [1, 1]} : vector<8x384xf32> to vector<8x256xf32>
    %432 = arith.addf %430, %431 : vector<8x256xf32>
    %433 = arith.negf %432 : vector<8x256xf32>
    %434 = math.exp %433 : vector<8x256xf32>
    %cst_160 = arith.constant 1.000000e+00 : f32
    %435 = vector.broadcast %cst_160 : f32 to vector<8x256xf32>
    %436 = arith.addf %435, %434 : vector<8x256xf32>
    %437 = arith.divf %435, %436 : vector<8x256xf32>
    %438 = vector.extract_strided_slice %437 {offsets = [0, 0], sizes = [8, 128], strides = [1, 1]} : vector<8x256xf32> to vector<8x128xf32>
    %439 = vector.extract_strided_slice %437 {offsets = [0, 128], sizes = [8, 128], strides = [1, 1]} : vector<8x256xf32> to vector<8x128xf32>
    %440 = vector.extract_strided_slice %424 {offsets = [0, 256], sizes = [8, 128], strides = [1, 1]} : vector<8x384xf32> to vector<8x128xf32>
    %441 = vector.extract_strided_slice %429 {offsets = [0, 256], sizes = [8, 128], strides = [1, 1]} : vector<8x384xf32> to vector<8x128xf32>
    %442 = arith.mulf %438, %441 : vector<8x128xf32>
    %443 = arith.addf %440, %442 : vector<8x128xf32>
    %444 = math.tanh %443 : vector<8x128xf32>
    %cst_161 = arith.constant 1.000000e+00 : f32
    %445 = vector.broadcast %cst_161 : f32 to vector<8x128xf32>
    %446 = arith.subf %445, %439 : vector<8x128xf32>
    %447 = arith.mulf %446, %444 : vector<8x128xf32>
    %448 = arith.mulf %439, %421 : vector<8x128xf32>
    %449 = arith.addf %447, %448 : vector<8x128xf32>
    %450 = arith.addf %422, %449 : vector<8x128xf32>
    %c8_162 = arith.constant 8 : index
    %c0_163 = arith.constant 0 : index
    %451 = vector.load %arg32[%c8_162, %c0_163] : memref<64x128xf32, #tpu.memory_space<vmem>>, vector<8x128xf32>
    tpu.vector_store %arg32[%c8_162, %c0_163], %449 {strides = array<i32>} : memref<64x128xf32, #tpu.memory_space<vmem>>, vector<8x128xf32>,
    %c16_164 = arith.constant 16 : index
    %c0_165 = arith.constant 0 : index
    %452 = vector.load %arg33[%c16_164, %c0_165] : memref<64x384xf32, #tpu.memory_space<vmem>>, vector<8x384xf32>
    %453 = arith.truncf %449 : vector<8x128xf32> to vector<8x128xbf16>
    %c0_166 = arith.constant 0 : index
    %c0_167 = arith.constant 0 : index
    %454 = vector.load %arg8[%c0_166, %c0_167] : memref<128x384xbf16, #tpu.memory_space<vmem>>, vector<128x384xbf16>
    %cst_168 = arith.constant dense<0.000000e+00> : vector<8x384xf32>
    %455 = tpu.matmul %453, %454, %cst_168 {dimension_numbers = #tpu.dot_dimension_numbers<[1], [0], [0], [1], [0, 0, 1, 1], [], []>} : vector<8x128xbf16>, vector<128x384xbf16>, vector<8x384xf32> -> vector<8x384xf32>
    %456 = vector.broadcast %393 : vector<1x384xf32> to vector<8x384xf32>
    %457 = arith.addf %455, %456 : vector<8x384xf32>
    %458 = vector.extract_strided_slice %452 {offsets = [0, 0], sizes = [8, 256], strides = [1, 1]} : vector<8x384xf32> to vector<8x256xf32>
    %459 = vector.extract_strided_slice %457 {offsets = [0, 0], sizes = [8, 256], strides = [1, 1]} : vector<8x384xf32> to vector<8x256xf32>
    %460 = arith.addf %458, %459 : vector<8x256xf32>
    %461 = arith.negf %460 : vector<8x256xf32>
    %462 = math.exp %461 : vector<8x256xf32>
    %cst_169 = arith.constant 1.000000e+00 : f32
    %463 = vector.broadcast %cst_169 : f32 to vector<8x256xf32>
    %464 = arith.addf %463, %462 : vector<8x256xf32>
    %465 = arith.divf %463, %464 : vector<8x256xf32>
    %466 = vector.extract_strided_slice %465 {offsets = [0, 0], sizes = [8, 128], strides = [1, 1]} : vector<8x256xf32> to vector<8x128xf32>
    %467 = vector.extract_strided_slice %465 {offsets = [0, 128], sizes = [8, 128], strides = [1, 1]} : vector<8x256xf32> to vector<8x128xf32>
    %468 = vector.extract_strided_slice %452 {offsets = [0, 256], sizes = [8, 128], strides = [1, 1]} : vector<8x384xf32> to vector<8x128xf32>
    %469 = vector.extract_strided_slice %457 {offsets = [0, 256], sizes = [8, 128], strides = [1, 1]} : vector<8x384xf32> to vector<8x128xf32>
    %470 = arith.mulf %466, %469 : vector<8x128xf32>
    %471 = arith.addf %468, %470 : vector<8x128xf32>
    %472 = math.tanh %471 : vector<8x128xf32>
    %cst_170 = arith.constant 1.000000e+00 : f32
    %473 = vector.broadcast %cst_170 : f32 to vector<8x128xf32>
    %474 = arith.subf %473, %467 : vector<8x128xf32>
    %475 = arith.mulf %474, %472 : vector<8x128xf32>
    %476 = arith.mulf %467, %449 : vector<8x128xf32>
    %477 = arith.addf %475, %476 : vector<8x128xf32>
    %478 = arith.addf %450, %477 : vector<8x128xf32>
    %c16_171 = arith.constant 16 : index
    %c0_172 = arith.constant 0 : index
    %479 = vector.load %arg32[%c16_171, %c0_172] : memref<64x128xf32, #tpu.memory_space<vmem>>, vector<8x128xf32>
    tpu.vector_store %arg32[%c16_171, %c0_172], %477 {strides = array<i32>} : memref<64x128xf32, #tpu.memory_space<vmem>>, vector<8x128xf32>,
    %c24_173 = arith.constant 24 : index
    %c0_174 = arith.constant 0 : index
    %480 = vector.load %arg33[%c24_173, %c0_174] : memref<64x384xf32, #tpu.memory_space<vmem>>, vector<8x384xf32>
    %481 = arith.truncf %477 : vector<8x128xf32> to vector<8x128xbf16>
    %c0_175 = arith.constant 0 : index
    %c0_176 = arith.constant 0 : index
    %482 = vector.load %arg8[%c0_175, %c0_176] : memref<128x384xbf16, #tpu.memory_space<vmem>>, vector<128x384xbf16>
    %cst_177 = arith.constant dense<0.000000e+00> : vector<8x384xf32>
    %483 = tpu.matmul %481, %482, %cst_177 {dimension_numbers = #tpu.dot_dimension_numbers<[1], [0], [0], [1], [0, 0, 1, 1], [], []>} : vector<8x128xbf16>, vector<128x384xbf16>, vector<8x384xf32> -> vector<8x384xf32>
    %484 = vector.broadcast %393 : vector<1x384xf32> to vector<8x384xf32>
    %485 = arith.addf %483, %484 : vector<8x384xf32>
    %486 = vector.extract_strided_slice %480 {offsets = [0, 0], sizes = [8, 256], strides = [1, 1]} : vector<8x384xf32> to vector<8x256xf32>
    %487 = vector.extract_strided_slice %485 {offsets = [0, 0], sizes = [8, 256], strides = [1, 1]} : vector<8x384xf32> to vector<8x256xf32>
    %488 = arith.addf %486, %487 : vector<8x256xf32>
    %489 = arith.negf %488 : vector<8x256xf32>
    %490 = math.exp %489 : vector<8x256xf32>
    %cst_178 = arith.constant 1.000000e+00 : f32
    %491 = vector.broadcast %cst_178 : f32 to vector<8x256xf32>
    %492 = arith.addf %491, %490 : vector<8x256xf32>
    %493 = arith.divf %491, %492 : vector<8x256xf32>
    %494 = vector.extract_strided_slice %493 {offsets = [0, 0], sizes = [8, 128], strides = [1, 1]} : vector<8x256xf32> to vector<8x128xf32>
    %495 = vector.extract_strided_slice %493 {offsets = [0, 128], sizes = [8, 128], strides = [1, 1]} : vector<8x256xf32> to vector<8x128xf32>
    %496 = vector.extract_strided_slice %480 {offsets = [0, 256], sizes = [8, 128], strides = [1, 1]} : vector<8x384xf32> to vector<8x128xf32>
    %497 = vector.extract_strided_slice %485 {offsets = [0, 256], sizes = [8, 128], strides = [1, 1]} : vector<8x384xf32> to vector<8x128xf32>
    %498 = arith.mulf %494, %497 : vector<8x128xf32>
    %499 = arith.addf %496, %498 : vector<8x128xf32>
    %500 = math.tanh %499 : vector<8x128xf32>
    %cst_179 = arith.constant 1.000000e+00 : f32
    %501 = vector.broadcast %cst_179 : f32 to vector<8x128xf32>
    %502 = arith.subf %501, %495 : vector<8x128xf32>
    %503 = arith.mulf %502, %500 : vector<8x128xf32>
    %504 = arith.mulf %495, %477 : vector<8x128xf32>
    %505 = arith.addf %503, %504 : vector<8x128xf32>
    %506 = arith.addf %478, %505 : vector<8x128xf32>
    %c24_180 = arith.constant 24 : index
    %c0_181 = arith.constant 0 : index
    %507 = vector.load %arg32[%c24_180, %c0_181] : memref<64x128xf32, #tpu.memory_space<vmem>>, vector<8x128xf32>
    tpu.vector_store %arg32[%c24_180, %c0_181], %505 {strides = array<i32>} : memref<64x128xf32, #tpu.memory_space<vmem>>, vector<8x128xf32>,
    %c32_182 = arith.constant 32 : index
    %c0_183 = arith.constant 0 : index
    %508 = vector.load %arg33[%c32_182, %c0_183] : memref<64x384xf32, #tpu.memory_space<vmem>>, vector<8x384xf32>
    %509 = arith.truncf %505 : vector<8x128xf32> to vector<8x128xbf16>
    %c0_184 = arith.constant 0 : index
    %c0_185 = arith.constant 0 : index
    %510 = vector.load %arg8[%c0_184, %c0_185] : memref<128x384xbf16, #tpu.memory_space<vmem>>, vector<128x384xbf16>
    %cst_186 = arith.constant dense<0.000000e+00> : vector<8x384xf32>
    %511 = tpu.matmul %509, %510, %cst_186 {dimension_numbers = #tpu.dot_dimension_numbers<[1], [0], [0], [1], [0, 0, 1, 1], [], []>} : vector<8x128xbf16>, vector<128x384xbf16>, vector<8x384xf32> -> vector<8x384xf32>
    %512 = vector.broadcast %393 : vector<1x384xf32> to vector<8x384xf32>
    %513 = arith.addf %511, %512 : vector<8x384xf32>
    %514 = vector.extract_strided_slice %508 {offsets = [0, 0], sizes = [8, 256], strides = [1, 1]} : vector<8x384xf32> to vector<8x256xf32>
    %515 = vector.extract_strided_slice %513 {offsets = [0, 0], sizes = [8, 256], strides = [1, 1]} : vector<8x384xf32> to vector<8x256xf32>
    %516 = arith.addf %514, %515 : vector<8x256xf32>
    %517 = arith.negf %516 : vector<8x256xf32>
    %518 = math.exp %517 : vector<8x256xf32>
    %cst_187 = arith.constant 1.000000e+00 : f32
    %519 = vector.broadcast %cst_187 : f32 to vector<8x256xf32>
    %520 = arith.addf %519, %518 : vector<8x256xf32>
    %521 = arith.divf %519, %520 : vector<8x256xf32>
    %522 = vector.extract_strided_slice %521 {offsets = [0, 0], sizes = [8, 128], strides = [1, 1]} : vector<8x256xf32> to vector<8x128xf32>
    %523 = vector.extract_strided_slice %521 {offsets = [0, 128], sizes = [8, 128], strides = [1, 1]} : vector<8x256xf32> to vector<8x128xf32>
    %524 = vector.extract_strided_slice %508 {offsets = [0, 256], sizes = [8, 128], strides = [1, 1]} : vector<8x384xf32> to vector<8x128xf32>
    %525 = vector.extract_strided_slice %513 {offsets = [0, 256], sizes = [8, 128], strides = [1, 1]} : vector<8x384xf32> to vector<8x128xf32>
    %526 = arith.mulf %522, %525 : vector<8x128xf32>
    %527 = arith.addf %524, %526 : vector<8x128xf32>
    %528 = math.tanh %527 : vector<8x128xf32>
    %cst_188 = arith.constant 1.000000e+00 : f32
    %529 = vector.broadcast %cst_188 : f32 to vector<8x128xf32>
    %530 = arith.subf %529, %523 : vector<8x128xf32>
    %531 = arith.mulf %530, %528 : vector<8x128xf32>
    %532 = arith.mulf %523, %505 : vector<8x128xf32>
    %533 = arith.addf %531, %532 : vector<8x128xf32>
    %534 = arith.addf %506, %533 : vector<8x128xf32>
    %c32_189 = arith.constant 32 : index
    %c0_190 = arith.constant 0 : index
    %535 = vector.load %arg32[%c32_189, %c0_190] : memref<64x128xf32, #tpu.memory_space<vmem>>, vector<8x128xf32>
    tpu.vector_store %arg32[%c32_189, %c0_190], %533 {strides = array<i32>} : memref<64x128xf32, #tpu.memory_space<vmem>>, vector<8x128xf32>,
    %c40_191 = arith.constant 40 : index
    %c0_192 = arith.constant 0 : index
    %536 = vector.load %arg33[%c40_191, %c0_192] : memref<64x384xf32, #tpu.memory_space<vmem>>, vector<8x384xf32>
    %537 = arith.truncf %533 : vector<8x128xf32> to vector<8x128xbf16>
    %c0_193 = arith.constant 0 : index
    %c0_194 = arith.constant 0 : index
    %538 = vector.load %arg8[%c0_193, %c0_194] : memref<128x384xbf16, #tpu.memory_space<vmem>>, vector<128x384xbf16>
    %cst_195 = arith.constant dense<0.000000e+00> : vector<8x384xf32>
    %539 = tpu.matmul %537, %538, %cst_195 {dimension_numbers = #tpu.dot_dimension_numbers<[1], [0], [0], [1], [0, 0, 1, 1], [], []>} : vector<8x128xbf16>, vector<128x384xbf16>, vector<8x384xf32> -> vector<8x384xf32>
    %540 = vector.broadcast %393 : vector<1x384xf32> to vector<8x384xf32>
    %541 = arith.addf %539, %540 : vector<8x384xf32>
    %542 = vector.extract_strided_slice %536 {offsets = [0, 0], sizes = [8, 256], strides = [1, 1]} : vector<8x384xf32> to vector<8x256xf32>
    %543 = vector.extract_strided_slice %541 {offsets = [0, 0], sizes = [8, 256], strides = [1, 1]} : vector<8x384xf32> to vector<8x256xf32>
    %544 = arith.addf %542, %543 : vector<8x256xf32>
    %545 = arith.negf %544 : vector<8x256xf32>
    %546 = math.exp %545 : vector<8x256xf32>
    %cst_196 = arith.constant 1.000000e+00 : f32
    %547 = vector.broadcast %cst_196 : f32 to vector<8x256xf32>
    %548 = arith.addf %547, %546 : vector<8x256xf32>
    %549 = arith.divf %547, %548 : vector<8x256xf32>
    %550 = vector.extract_strided_slice %549 {offsets = [0, 0], sizes = [8, 128], strides = [1, 1]} : vector<8x256xf32> to vector<8x128xf32>
    %551 = vector.extract_strided_slice %549 {offsets = [0, 128], sizes = [8, 128], strides = [1, 1]} : vector<8x256xf32> to vector<8x128xf32>
    %552 = vector.extract_strided_slice %536 {offsets = [0, 256], sizes = [8, 128], strides = [1, 1]} : vector<8x384xf32> to vector<8x128xf32>
    %553 = vector.extract_strided_slice %541 {offsets = [0, 256], sizes = [8, 128], strides = [1, 1]} : vector<8x384xf32> to vector<8x128xf32>
    %554 = arith.mulf %550, %553 : vector<8x128xf32>
    %555 = arith.addf %552, %554 : vector<8x128xf32>
    %556 = math.tanh %555 : vector<8x128xf32>
    %cst_197 = arith.constant 1.000000e+00 : f32
    %557 = vector.broadcast %cst_197 : f32 to vector<8x128xf32>
    %558 = arith.subf %557, %551 : vector<8x128xf32>
    %559 = arith.mulf %558, %556 : vector<8x128xf32>
    %560 = arith.mulf %551, %533 : vector<8x128xf32>
    %561 = arith.addf %559, %560 : vector<8x128xf32>
    %562 = arith.addf %534, %561 : vector<8x128xf32>
    %c40_198 = arith.constant 40 : index
    %c0_199 = arith.constant 0 : index
    %563 = vector.load %arg32[%c40_198, %c0_199] : memref<64x128xf32, #tpu.memory_space<vmem>>, vector<8x128xf32>
    tpu.vector_store %arg32[%c40_198, %c0_199], %561 {strides = array<i32>} : memref<64x128xf32, #tpu.memory_space<vmem>>, vector<8x128xf32>,
    %c48_200 = arith.constant 48 : index
    %c0_201 = arith.constant 0 : index
    %564 = vector.load %arg33[%c48_200, %c0_201] : memref<64x384xf32, #tpu.memory_space<vmem>>, vector<8x384xf32>
    %565 = arith.truncf %561 : vector<8x128xf32> to vector<8x128xbf16>
    %c0_202 = arith.constant 0 : index
    %c0_203 = arith.constant 0 : index
    %566 = vector.load %arg8[%c0_202, %c0_203] : memref<128x384xbf16, #tpu.memory_space<vmem>>, vector<128x384xbf16>
    %cst_204 = arith.constant dense<0.000000e+00> : vector<8x384xf32>
    %567 = tpu.matmul %565, %566, %cst_204 {dimension_numbers = #tpu.dot_dimension_numbers<[1], [0], [0], [1], [0, 0, 1, 1], [], []>} : vector<8x128xbf16>, vector<128x384xbf16>, vector<8x384xf32> -> vector<8x384xf32>
    %568 = vector.broadcast %393 : vector<1x384xf32> to vector<8x384xf32>
    %569 = arith.addf %567, %568 : vector<8x384xf32>
    %570 = vector.extract_strided_slice %564 {offsets = [0, 0], sizes = [8, 256], strides = [1, 1]} : vector<8x384xf32> to vector<8x256xf32>
    %571 = vector.extract_strided_slice %569 {offsets = [0, 0], sizes = [8, 256], strides = [1, 1]} : vector<8x384xf32> to vector<8x256xf32>
    %572 = arith.addf %570, %571 : vector<8x256xf32>
    %573 = arith.negf %572 : vector<8x256xf32>
    %574 = math.exp %573 : vector<8x256xf32>
    %cst_205 = arith.constant 1.000000e+00 : f32
    %575 = vector.broadcast %cst_205 : f32 to vector<8x256xf32>
    %576 = arith.addf %575, %574 : vector<8x256xf32>
    %577 = arith.divf %575, %576 : vector<8x256xf32>
    %578 = vector.extract_strided_slice %577 {offsets = [0, 0], sizes = [8, 128], strides = [1, 1]} : vector<8x256xf32> to vector<8x128xf32>
    %579 = vector.extract_strided_slice %577 {offsets = [0, 128], sizes = [8, 128], strides = [1, 1]} : vector<8x256xf32> to vector<8x128xf32>
    %580 = vector.extract_strided_slice %564 {offsets = [0, 256], sizes = [8, 128], strides = [1, 1]} : vector<8x384xf32> to vector<8x128xf32>
    %581 = vector.extract_strided_slice %569 {offsets = [0, 256], sizes = [8, 128], strides = [1, 1]} : vector<8x384xf32> to vector<8x128xf32>
    %582 = arith.mulf %578, %581 : vector<8x128xf32>
    %583 = arith.addf %580, %582 : vector<8x128xf32>
    %584 = math.tanh %583 : vector<8x128xf32>
    %cst_206 = arith.constant 1.000000e+00 : f32
    %585 = vector.broadcast %cst_206 : f32 to vector<8x128xf32>
    %586 = arith.subf %585, %579 : vector<8x128xf32>
    %587 = arith.mulf %586, %584 : vector<8x128xf32>
    %588 = arith.mulf %579, %561 : vector<8x128xf32>
    %589 = arith.addf %587, %588 : vector<8x128xf32>
    %590 = arith.addf %562, %589 : vector<8x128xf32>
    %c48_207 = arith.constant 48 : index
    %c0_208 = arith.constant 0 : index
    %591 = vector.load %arg32[%c48_207, %c0_208] : memref<64x128xf32, #tpu.memory_space<vmem>>, vector<8x128xf32>
    tpu.vector_store %arg32[%c48_207, %c0_208], %589 {strides = array<i32>} : memref<64x128xf32, #tpu.memory_space<vmem>>, vector<8x128xf32>,
    %c56_209 = arith.constant 56 : index
    %c0_210 = arith.constant 0 : index
    %592 = vector.load %arg33[%c56_209, %c0_210] : memref<64x384xf32, #tpu.memory_space<vmem>>, vector<8x384xf32>
    %593 = arith.truncf %589 : vector<8x128xf32> to vector<8x128xbf16>
    %c0_211 = arith.constant 0 : index
    %c0_212 = arith.constant 0 : index
    %594 = vector.load %arg8[%c0_211, %c0_212] : memref<128x384xbf16, #tpu.memory_space<vmem>>, vector<128x384xbf16>
    %cst_213 = arith.constant dense<0.000000e+00> : vector<8x384xf32>
    %595 = tpu.matmul %593, %594, %cst_213 {dimension_numbers = #tpu.dot_dimension_numbers<[1], [0], [0], [1], [0, 0, 1, 1], [], []>} : vector<8x128xbf16>, vector<128x384xbf16>, vector<8x384xf32> -> vector<8x384xf32>
    %596 = vector.broadcast %393 : vector<1x384xf32> to vector<8x384xf32>
    %597 = arith.addf %595, %596 : vector<8x384xf32>
    %598 = vector.extract_strided_slice %592 {offsets = [0, 0], sizes = [8, 256], strides = [1, 1]} : vector<8x384xf32> to vector<8x256xf32>
    %599 = vector.extract_strided_slice %597 {offsets = [0, 0], sizes = [8, 256], strides = [1, 1]} : vector<8x384xf32> to vector<8x256xf32>
    %600 = arith.addf %598, %599 : vector<8x256xf32>
    %601 = arith.negf %600 : vector<8x256xf32>
    %602 = math.exp %601 : vector<8x256xf32>
    %cst_214 = arith.constant 1.000000e+00 : f32
    %603 = vector.broadcast %cst_214 : f32 to vector<8x256xf32>
    %604 = arith.addf %603, %602 : vector<8x256xf32>
    %605 = arith.divf %603, %604 : vector<8x256xf32>
    %606 = vector.extract_strided_slice %605 {offsets = [0, 0], sizes = [8, 128], strides = [1, 1]} : vector<8x256xf32> to vector<8x128xf32>
    %607 = vector.extract_strided_slice %605 {offsets = [0, 128], sizes = [8, 128], strides = [1, 1]} : vector<8x256xf32> to vector<8x128xf32>
    %608 = vector.extract_strided_slice %592 {offsets = [0, 256], sizes = [8, 128], strides = [1, 1]} : vector<8x384xf32> to vector<8x128xf32>
    %609 = vector.extract_strided_slice %597 {offsets = [0, 256], sizes = [8, 128], strides = [1, 1]} : vector<8x384xf32> to vector<8x128xf32>
    %610 = arith.mulf %606, %609 : vector<8x128xf32>
    %611 = arith.addf %608, %610 : vector<8x128xf32>
    %612 = math.tanh %611 : vector<8x128xf32>
    %cst_215 = arith.constant 1.000000e+00 : f32
    %613 = vector.broadcast %cst_215 : f32 to vector<8x128xf32>
    %614 = arith.subf %613, %607 : vector<8x128xf32>
    %615 = arith.mulf %614, %612 : vector<8x128xf32>
    %616 = arith.mulf %607, %589 : vector<8x128xf32>
    %617 = arith.addf %615, %616 : vector<8x128xf32>
    %618 = arith.addf %590, %617 : vector<8x128xf32>
    %c56_216 = arith.constant 56 : index
    %c0_217 = arith.constant 0 : index
    %619 = vector.load %arg32[%c56_216, %c0_217] : memref<64x128xf32, #tpu.memory_space<vmem>>, vector<8x128xf32>
    tpu.vector_store %arg32[%c56_216, %c0_217], %617 {strides = array<i32>} : memref<64x128xf32, #tpu.memory_space<vmem>>, vector<8x128xf32>,
    %cst_218 = arith.constant 1.250000e-01 : f32
    %620 = vector.broadcast %cst_218 : f32 to vector<8x128xf32>
    %621 = arith.mulf %618, %620 : vector<8x128xf32>
    %c0_219 = arith.constant 0 : index
    %c0_220 = arith.constant 0 : index
    %622 = vector.load %arg32[%c0_219, %c0_220] : memref<64x128xf32, #tpu.memory_space<vmem>>, vector<64x128xf32>
    %623 = vector.extract_strided_slice %622 {offsets = [0, 0], sizes = [8, 128], strides = [1, 1]} : vector<64x128xf32> to vector<8x128xf32>
    %624 = vector.extract_strided_slice %622 {offsets = [56, 0], sizes = [8, 128], strides = [1, 1]} : vector<64x128xf32> to vector<8x128xf32>
    %625 = vector.shape_cast %3 : vector<1x128xi1> to vector<1x128xi1>
    %626 = vector.broadcast %625 : vector<1x128xi1> to vector<8x128xi1>
    %627 = arith.select %626, %623, %624 : vector<8x128xi1>, vector<8x128xf32>
    %c0_221 = arith.constant 0 : index
    %c0_222 = arith.constant 0 : index
    %628 = vector.load %arg32[%c0_221, %c0_222] : memref<64x128xf32, #tpu.memory_space<vmem>>, vector<8x128xf32>
    tpu.vector_store %arg32[%c0_221, %c0_222], %627 {strides = array<i32>} : memref<64x128xf32, #tpu.memory_space<vmem>>, vector<8x128xf32>,
    %629 = vector.shape_cast %3 : vector<1x128xi1> to vector<1x128xi1>
    %630 = vector.broadcast %629 : vector<1x128xi1> to vector<8x128xi1>
    %631 = arith.select %630, %624, %623 : vector<8x128xi1>, vector<8x128xf32>
    %c56_223 = arith.constant 56 : index
    %c0_224 = arith.constant 0 : index
    %632 = vector.load %arg32[%c56_223, %c0_224] : memref<64x128xf32, #tpu.memory_space<vmem>>, vector<8x128xf32>
    tpu.vector_store %arg32[%c56_223, %c0_224], %631 {strides = array<i32>} : memref<64x128xf32, #tpu.memory_space<vmem>>, vector<8x128xf32>,
    %633 = vector.extract_strided_slice %622 {offsets = [8, 0], sizes = [8, 128], strides = [1, 1]} : vector<64x128xf32> to vector<8x128xf32>
    %634 = vector.extract_strided_slice %622 {offsets = [48, 0], sizes = [8, 128], strides = [1, 1]} : vector<64x128xf32> to vector<8x128xf32>
    %635 = vector.shape_cast %3 : vector<1x128xi1> to vector<1x128xi1>
    %636 = vector.broadcast %635 : vector<1x128xi1> to vector<8x128xi1>
    %637 = arith.select %636, %633, %634 : vector<8x128xi1>, vector<8x128xf32>
    %c8_225 = arith.constant 8 : index
    %c0_226 = arith.constant 0 : index
    %638 = vector.load %arg32[%c8_225, %c0_226] : memref<64x128xf32, #tpu.memory_space<vmem>>, vector<8x128xf32>
    tpu.vector_store %arg32[%c8_225, %c0_226], %637 {strides = array<i32>} : memref<64x128xf32, #tpu.memory_space<vmem>>, vector<8x128xf32>,
    %639 = vector.shape_cast %3 : vector<1x128xi1> to vector<1x128xi1>
    %640 = vector.broadcast %639 : vector<1x128xi1> to vector<8x128xi1>
    %641 = arith.select %640, %634, %633 : vector<8x128xi1>, vector<8x128xf32>
    %c48_227 = arith.constant 48 : index
    %c0_228 = arith.constant 0 : index
    %642 = vector.load %arg32[%c48_227, %c0_228] : memref<64x128xf32, #tpu.memory_space<vmem>>, vector<8x128xf32>
    tpu.vector_store %arg32[%c48_227, %c0_228], %641 {strides = array<i32>} : memref<64x128xf32, #tpu.memory_space<vmem>>, vector<8x128xf32>,
    %643 = vector.extract_strided_slice %622 {offsets = [16, 0], sizes = [8, 128], strides = [1, 1]} : vector<64x128xf32> to vector<8x128xf32>
    %644 = vector.extract_strided_slice %622 {offsets = [40, 0], sizes = [8, 128], strides = [1, 1]} : vector<64x128xf32> to vector<8x128xf32>
    %645 = vector.shape_cast %3 : vector<1x128xi1> to vector<1x128xi1>
    %646 = vector.broadcast %645 : vector<1x128xi1> to vector<8x128xi1>
    %647 = arith.select %646, %643, %644 : vector<8x128xi1>, vector<8x128xf32>
    %c16_229 = arith.constant 16 : index
    %c0_230 = arith.constant 0 : index
    %648 = vector.load %arg32[%c16_229, %c0_230] : memref<64x128xf32, #tpu.memory_space<vmem>>, vector<8x128xf32>
    tpu.vector_store %arg32[%c16_229, %c0_230], %647 {strides = array<i32>} : memref<64x128xf32, #tpu.memory_space<vmem>>, vector<8x128xf32>,
    %649 = vector.shape_cast %3 : vector<1x128xi1> to vector<1x128xi1>
    %650 = vector.broadcast %649 : vector<1x128xi1> to vector<8x128xi1>
    %651 = arith.select %650, %644, %643 : vector<8x128xi1>, vector<8x128xf32>
    %c40_231 = arith.constant 40 : index
    %c0_232 = arith.constant 0 : index
    %652 = vector.load %arg32[%c40_231, %c0_232] : memref<64x128xf32, #tpu.memory_space<vmem>>, vector<8x128xf32>
    tpu.vector_store %arg32[%c40_231, %c0_232], %651 {strides = array<i32>} : memref<64x128xf32, #tpu.memory_space<vmem>>, vector<8x128xf32>,
    %653 = vector.extract_strided_slice %622 {offsets = [24, 0], sizes = [8, 128], strides = [1, 1]} : vector<64x128xf32> to vector<8x128xf32>
    %654 = vector.extract_strided_slice %622 {offsets = [32, 0], sizes = [8, 128], strides = [1, 1]} : vector<64x128xf32> to vector<8x128xf32>
    %655 = vector.shape_cast %3 : vector<1x128xi1> to vector<1x128xi1>
    %656 = vector.broadcast %655 : vector<1x128xi1> to vector<8x128xi1>
    %657 = arith.select %656, %653, %654 : vector<8x128xi1>, vector<8x128xf32>
    %c24_233 = arith.constant 24 : index
    %c0_234 = arith.constant 0 : index
    %658 = vector.load %arg32[%c24_233, %c0_234] : memref<64x128xf32, #tpu.memory_space<vmem>>, vector<8x128xf32>
    tpu.vector_store %arg32[%c24_233, %c0_234], %657 {strides = array<i32>} : memref<64x128xf32, #tpu.memory_space<vmem>>, vector<8x128xf32>,
    %659 = vector.shape_cast %3 : vector<1x128xi1> to vector<1x128xi1>
    %660 = vector.broadcast %659 : vector<1x128xi1> to vector<8x128xi1>
    %661 = arith.select %660, %654, %653 : vector<8x128xi1>, vector<8x128xf32>
    %c32_235 = arith.constant 32 : index
    %c0_236 = arith.constant 0 : index
    %662 = vector.load %arg32[%c32_235, %c0_236] : memref<64x128xf32, #tpu.memory_space<vmem>>, vector<8x128xf32>
    tpu.vector_store %arg32[%c32_235, %c0_236], %661 {strides = array<i32>} : memref<64x128xf32, #tpu.memory_space<vmem>>, vector<8x128xf32>,
    %cst_237 = arith.constant 0.000000e+00 : f32
    %663 = vector.broadcast %cst_237 : f32 to vector<64x384xf32>
    %c0_238 = arith.constant 0 : index
    %c0_239 = arith.constant 0 : index
    %664 = vector.load %arg15[%c0_238, %c0_239] : memref<1x384xf32, #tpu.memory_space<vmem>>, vector<1x384xf32>
    %665 = vector.broadcast %664 : vector<1x384xf32> to vector<64x384xf32>
    %666 = arith.addf %663, %665 : vector<64x384xf32>
    %c0_240 = arith.constant 0 : index
    %c0_241 = arith.constant 0 : index
    %667 = vector.load %arg0[%c0_240, %c0_241] : memref<64x2xf32, #tpu.memory_space<vmem>>, vector<64x2xf32>
    %668 = arith.truncf %667 : vector<64x2xf32> to vector<64x2xbf16>
    %c0_242 = arith.constant 0 : index
    %c0_243 = arith.constant 0 : index
    %669 = vector.load %arg11[%c0_242, %c0_243] : memref<2x384xbf16, #tpu.memory_space<vmem>>, vector<2x384xbf16>
    %cst_244 = arith.constant dense<0.000000e+00> : vector<64x384xf32>
    %670 = tpu.matmul %668, %669, %cst_244 {dimension_numbers = #tpu.dot_dimension_numbers<[1], [0], [0], [1], [0, 0, 1, 1], [], []>} : vector<64x2xbf16>, vector<2x384xbf16>, vector<64x384xf32> -> vector<64x384xf32>
    %671 = arith.addf %666, %670 : vector<64x384xf32>
    %c0_245 = arith.constant 0 : index
    %c0_246 = arith.constant 0 : index
    %672 = vector.load %arg31[%c0_245, %c0_246] : memref<64x128xf32, #tpu.memory_space<vmem>>, vector<64x128xf32>
    %673 = arith.truncf %672 : vector<64x128xf32> to vector<64x128xbf16>
    %c0_247 = arith.constant 0 : index
    %c0_248 = arith.constant 0 : index
    %674 = vector.load %arg12[%c0_247, %c0_248] : memref<128x384xbf16, #tpu.memory_space<vmem>>, vector<128x384xbf16>
    %cst_249 = arith.constant dense<0.000000e+00> : vector<64x384xf32>
    %675 = tpu.matmul %673, %674, %cst_249 {dimension_numbers = #tpu.dot_dimension_numbers<[1], [0], [0], [1], [0, 0, 1, 1], [], []>} : vector<64x128xbf16>, vector<128x384xbf16>, vector<64x384xf32> -> vector<64x384xf32>
    %676 = arith.addf %671, %675 : vector<64x384xf32>
    %c0_250 = arith.constant 0 : index
    %c0_251 = arith.constant 0 : index
    %677 = vector.load %arg32[%c0_250, %c0_251] : memref<64x128xf32, #tpu.memory_space<vmem>>, vector<64x128xf32>
    %678 = arith.truncf %677 : vector<64x128xf32> to vector<64x128xbf16>
    %c0_252 = arith.constant 0 : index
    %c0_253 = arith.constant 0 : index
    %679 = vector.load %arg13[%c0_252, %c0_253] : memref<128x384xbf16, #tpu.memory_space<vmem>>, vector<128x384xbf16>
    %cst_254 = arith.constant dense<0.000000e+00> : vector<64x384xf32>
    %680 = tpu.matmul %678, %679, %cst_254 {dimension_numbers = #tpu.dot_dimension_numbers<[1], [0], [0], [1], [0, 0, 1, 1], [], []>} : vector<64x128xbf16>, vector<128x384xbf16>, vector<64x384xf32> -> vector<64x384xf32>
    %681 = arith.addf %676, %680 : vector<64x384xf32>
    %682 = vector.extract_strided_slice %681 {offsets = [0, 0], sizes = [8, 384], strides = [1, 1]} : vector<64x384xf32> to vector<8x384xf32>
    %683 = vector.extract_strided_slice %681 {offsets = [56, 0], sizes = [8, 384], strides = [1, 1]} : vector<64x384xf32> to vector<8x384xf32>
    %684 = vector.shape_cast %2 : vector<1x384xi1> to vector<1x384xi1>
    %685 = vector.broadcast %684 : vector<1x384xi1> to vector<8x384xi1>
    %686 = arith.select %685, %682, %683 : vector<8x384xi1>, vector<8x384xf32>
    %c0_255 = arith.constant 0 : index
    %c0_256 = arith.constant 0 : index
    %687 = vector.load %arg33[%c0_255, %c0_256] : memref<64x384xf32, #tpu.memory_space<vmem>>, vector<8x384xf32>
    tpu.vector_store %arg33[%c0_255, %c0_256], %686 {strides = array<i32>} : memref<64x384xf32, #tpu.memory_space<vmem>>, vector<8x384xf32>,
    %688 = vector.extract_strided_slice %681 {offsets = [8, 0], sizes = [8, 384], strides = [1, 1]} : vector<64x384xf32> to vector<8x384xf32>
    %689 = vector.extract_strided_slice %681 {offsets = [48, 0], sizes = [8, 384], strides = [1, 1]} : vector<64x384xf32> to vector<8x384xf32>
    %690 = vector.shape_cast %2 : vector<1x384xi1> to vector<1x384xi1>
    %691 = vector.broadcast %690 : vector<1x384xi1> to vector<8x384xi1>
    %692 = arith.select %691, %688, %689 : vector<8x384xi1>, vector<8x384xf32>
    %c8_257 = arith.constant 8 : index
    %c0_258 = arith.constant 0 : index
    %693 = vector.load %arg33[%c8_257, %c0_258] : memref<64x384xf32, #tpu.memory_space<vmem>>, vector<8x384xf32>
    tpu.vector_store %arg33[%c8_257, %c0_258], %692 {strides = array<i32>} : memref<64x384xf32, #tpu.memory_space<vmem>>, vector<8x384xf32>,
    %694 = vector.extract_strided_slice %681 {offsets = [16, 0], sizes = [8, 384], strides = [1, 1]} : vector<64x384xf32> to vector<8x384xf32>
    %695 = vector.extract_strided_slice %681 {offsets = [40, 0], sizes = [8, 384], strides = [1, 1]} : vector<64x384xf32> to vector<8x384xf32>
    %696 = vector.shape_cast %2 : vector<1x384xi1> to vector<1x384xi1>
    %697 = vector.broadcast %696 : vector<1x384xi1> to vector<8x384xi1>
    %698 = arith.select %697, %694, %695 : vector<8x384xi1>, vector<8x384xf32>
    %c16_259 = arith.constant 16 : index
    %c0_260 = arith.constant 0 : index
    %699 = vector.load %arg33[%c16_259, %c0_260] : memref<64x384xf32, #tpu.memory_space<vmem>>, vector<8x384xf32>
    tpu.vector_store %arg33[%c16_259, %c0_260], %698 {strides = array<i32>} : memref<64x384xf32, #tpu.memory_space<vmem>>, vector<8x384xf32>,
    %700 = vector.extract_strided_slice %681 {offsets = [24, 0], sizes = [8, 384], strides = [1, 1]} : vector<64x384xf32> to vector<8x384xf32>
    %701 = vector.extract_strided_slice %681 {offsets = [32, 0], sizes = [8, 384], strides = [1, 1]} : vector<64x384xf32> to vector<8x384xf32>
    %702 = vector.shape_cast %2 : vector<1x384xi1> to vector<1x384xi1>
    %703 = vector.broadcast %702 : vector<1x384xi1> to vector<8x384xi1>
    %704 = arith.select %703, %700, %701 : vector<8x384xi1>, vector<8x384xf32>
    %c24_261 = arith.constant 24 : index
    %c0_262 = arith.constant 0 : index
    %705 = vector.load %arg33[%c24_261, %c0_262] : memref<64x384xf32, #tpu.memory_space<vmem>>, vector<8x384xf32>
    tpu.vector_store %arg33[%c24_261, %c0_262], %704 {strides = array<i32>} : memref<64x384xf32, #tpu.memory_space<vmem>>, vector<8x384xf32>,
    %706 = vector.extract_strided_slice %681 {offsets = [32, 0], sizes = [8, 384], strides = [1, 1]} : vector<64x384xf32> to vector<8x384xf32>
    %707 = vector.extract_strided_slice %681 {offsets = [24, 0], sizes = [8, 384], strides = [1, 1]} : vector<64x384xf32> to vector<8x384xf32>
    %708 = vector.shape_cast %2 : vector<1x384xi1> to vector<1x384xi1>
    %709 = vector.broadcast %708 : vector<1x384xi1> to vector<8x384xi1>
    %710 = arith.select %709, %706, %707 : vector<8x384xi1>, vector<8x384xf32>
    %c32_263 = arith.constant 32 : index
    %c0_264 = arith.constant 0 : index
    %711 = vector.load %arg33[%c32_263, %c0_264] : memref<64x384xf32, #tpu.memory_space<vmem>>, vector<8x384xf32>
    tpu.vector_store %arg33[%c32_263, %c0_264], %710 {strides = array<i32>} : memref<64x384xf32, #tpu.memory_space<vmem>>, vector<8x384xf32>,
    %712 = vector.extract_strided_slice %681 {offsets = [40, 0], sizes = [8, 384], strides = [1, 1]} : vector<64x384xf32> to vector<8x384xf32>
    %713 = vector.extract_strided_slice %681 {offsets = [16, 0], sizes = [8, 384], strides = [1, 1]} : vector<64x384xf32> to vector<8x384xf32>
    %714 = vector.shape_cast %2 : vector<1x384xi1> to vector<1x384xi1>
    %715 = vector.broadcast %714 : vector<1x384xi1> to vector<8x384xi1>
    %716 = arith.select %715, %712, %713 : vector<8x384xi1>, vector<8x384xf32>
    %c40_265 = arith.constant 40 : index
    %c0_266 = arith.constant 0 : index
    %717 = vector.load %arg33[%c40_265, %c0_266] : memref<64x384xf32, #tpu.memory_space<vmem>>, vector<8x384xf32>
    tpu.vector_store %arg33[%c40_265, %c0_266], %716 {strides = array<i32>} : memref<64x384xf32, #tpu.memory_space<vmem>>, vector<8x384xf32>,
    %718 = vector.extract_strided_slice %681 {offsets = [48, 0], sizes = [8, 384], strides = [1, 1]} : vector<64x384xf32> to vector<8x384xf32>
    %719 = vector.extract_strided_slice %681 {offsets = [8, 0], sizes = [8, 384], strides = [1, 1]} : vector<64x384xf32> to vector<8x384xf32>
    %720 = vector.shape_cast %2 : vector<1x384xi1> to vector<1x384xi1>
    %721 = vector.broadcast %720 : vector<1x384xi1> to vector<8x384xi1>
    %722 = arith.select %721, %718, %719 : vector<8x384xi1>, vector<8x384xf32>
    %c48_267 = arith.constant 48 : index
    %c0_268 = arith.constant 0 : index
    %723 = vector.load %arg33[%c48_267, %c0_268] : memref<64x384xf32, #tpu.memory_space<vmem>>, vector<8x384xf32>
    tpu.vector_store %arg33[%c48_267, %c0_268], %722 {strides = array<i32>} : memref<64x384xf32, #tpu.memory_space<vmem>>, vector<8x384xf32>,
    %724 = vector.extract_strided_slice %681 {offsets = [56, 0], sizes = [8, 384], strides = [1, 1]} : vector<64x384xf32> to vector<8x384xf32>
    %725 = vector.extract_strided_slice %681 {offsets = [0, 0], sizes = [8, 384], strides = [1, 1]} : vector<64x384xf32> to vector<8x384xf32>
    %726 = vector.shape_cast %2 : vector<1x384xi1> to vector<1x384xi1>
    %727 = vector.broadcast %726 : vector<1x384xi1> to vector<8x384xi1>
    %728 = arith.select %727, %724, %725 : vector<8x384xi1>, vector<8x384xf32>
    %c56_269 = arith.constant 56 : index
    %c0_270 = arith.constant 0 : index
    %729 = vector.load %arg33[%c56_269, %c0_270] : memref<64x384xf32, #tpu.memory_space<vmem>>, vector<8x384xf32>
    tpu.vector_store %arg33[%c56_269, %c0_270], %728 {strides = array<i32>} : memref<64x384xf32, #tpu.memory_space<vmem>>, vector<8x384xf32>,
    %c0_271 = arith.constant 0 : index
    %c0_272 = arith.constant 0 : index
    %730 = vector.load %arg16[%c0_271, %c0_272] : memref<1x384xf32, #tpu.memory_space<vmem>>, vector<1x384xf32>
    %cst_273 = arith.constant 0.000000e+00 : f32
    %731 = vector.broadcast %cst_273 : f32 to vector<8x128xf32>
    %cst_274 = arith.constant 0.000000e+00 : f32
    %732 = vector.broadcast %cst_274 : f32 to vector<8x128xf32>
    %c0_275 = arith.constant 0 : index
    %c0_276 = arith.constant 0 : index
    %733 = vector.load %arg33[%c0_275, %c0_276] : memref<64x384xf32, #tpu.memory_space<vmem>>, vector<8x384xf32>
    %734 = arith.truncf %731 : vector<8x128xf32> to vector<8x128xbf16>
    %c0_277 = arith.constant 0 : index
    %c0_278 = arith.constant 0 : index
    %735 = vector.load %arg14[%c0_277, %c0_278] : memref<128x384xbf16, #tpu.memory_space<vmem>>, vector<128x384xbf16>
    %cst_279 = arith.constant dense<0.000000e+00> : vector<8x384xf32>
    %736 = tpu.matmul %734, %735, %cst_279 {dimension_numbers = #tpu.dot_dimension_numbers<[1], [0], [0], [1], [0, 0, 1, 1], [], []>} : vector<8x128xbf16>, vector<128x384xbf16>, vector<8x384xf32> -> vector<8x384xf32>
    %737 = vector.broadcast %730 : vector<1x384xf32> to vector<8x384xf32>
    %738 = arith.addf %736, %737 : vector<8x384xf32>
    %739 = vector.extract_strided_slice %733 {offsets = [0, 0], sizes = [8, 256], strides = [1, 1]} : vector<8x384xf32> to vector<8x256xf32>
    %740 = vector.extract_strided_slice %738 {offsets = [0, 0], sizes = [8, 256], strides = [1, 1]} : vector<8x384xf32> to vector<8x256xf32>
    %741 = arith.addf %739, %740 : vector<8x256xf32>
    %742 = arith.negf %741 : vector<8x256xf32>
    %743 = math.exp %742 : vector<8x256xf32>
    %cst_280 = arith.constant 1.000000e+00 : f32
    %744 = vector.broadcast %cst_280 : f32 to vector<8x256xf32>
    %745 = arith.addf %744, %743 : vector<8x256xf32>
    %746 = arith.divf %744, %745 : vector<8x256xf32>
    %747 = vector.extract_strided_slice %746 {offsets = [0, 0], sizes = [8, 128], strides = [1, 1]} : vector<8x256xf32> to vector<8x128xf32>
    %748 = vector.extract_strided_slice %746 {offsets = [0, 128], sizes = [8, 128], strides = [1, 1]} : vector<8x256xf32> to vector<8x128xf32>
    %749 = vector.extract_strided_slice %733 {offsets = [0, 256], sizes = [8, 128], strides = [1, 1]} : vector<8x384xf32> to vector<8x128xf32>
    %750 = vector.extract_strided_slice %738 {offsets = [0, 256], sizes = [8, 128], strides = [1, 1]} : vector<8x384xf32> to vector<8x128xf32>
    %751 = arith.mulf %747, %750 : vector<8x128xf32>
    %752 = arith.addf %749, %751 : vector<8x128xf32>
    %753 = math.tanh %752 : vector<8x128xf32>
    %cst_281 = arith.constant 1.000000e+00 : f32
    %754 = vector.broadcast %cst_281 : f32 to vector<8x128xf32>
    %755 = arith.subf %754, %748 : vector<8x128xf32>
    %756 = arith.mulf %755, %753 : vector<8x128xf32>
    %757 = arith.mulf %748, %731 : vector<8x128xf32>
    %758 = arith.addf %756, %757 : vector<8x128xf32>
    %759 = arith.addf %732, %758 : vector<8x128xf32>
    %c8_282 = arith.constant 8 : index
    %c0_283 = arith.constant 0 : index
    %760 = vector.load %arg33[%c8_282, %c0_283] : memref<64x384xf32, #tpu.memory_space<vmem>>, vector<8x384xf32>
    %761 = arith.truncf %758 : vector<8x128xf32> to vector<8x128xbf16>
    %c0_284 = arith.constant 0 : index
    %c0_285 = arith.constant 0 : index
    %762 = vector.load %arg14[%c0_284, %c0_285] : memref<128x384xbf16, #tpu.memory_space<vmem>>, vector<128x384xbf16>
    %cst_286 = arith.constant dense<0.000000e+00> : vector<8x384xf32>
    %763 = tpu.matmul %761, %762, %cst_286 {dimension_numbers = #tpu.dot_dimension_numbers<[1], [0], [0], [1], [0, 0, 1, 1], [], []>} : vector<8x128xbf16>, vector<128x384xbf16>, vector<8x384xf32> -> vector<8x384xf32>
    %764 = vector.broadcast %730 : vector<1x384xf32> to vector<8x384xf32>
    %765 = arith.addf %763, %764 : vector<8x384xf32>
    %766 = vector.extract_strided_slice %760 {offsets = [0, 0], sizes = [8, 256], strides = [1, 1]} : vector<8x384xf32> to vector<8x256xf32>
    %767 = vector.extract_strided_slice %765 {offsets = [0, 0], sizes = [8, 256], strides = [1, 1]} : vector<8x384xf32> to vector<8x256xf32>
    %768 = arith.addf %766, %767 : vector<8x256xf32>
    %769 = arith.negf %768 : vector<8x256xf32>
    %770 = math.exp %769 : vector<8x256xf32>
    %cst_287 = arith.constant 1.000000e+00 : f32
    %771 = vector.broadcast %cst_287 : f32 to vector<8x256xf32>
    %772 = arith.addf %771, %770 : vector<8x256xf32>
    %773 = arith.divf %771, %772 : vector<8x256xf32>
    %774 = vector.extract_strided_slice %773 {offsets = [0, 0], sizes = [8, 128], strides = [1, 1]} : vector<8x256xf32> to vector<8x128xf32>
    %775 = vector.extract_strided_slice %773 {offsets = [0, 128], sizes = [8, 128], strides = [1, 1]} : vector<8x256xf32> to vector<8x128xf32>
    %776 = vector.extract_strided_slice %760 {offsets = [0, 256], sizes = [8, 128], strides = [1, 1]} : vector<8x384xf32> to vector<8x128xf32>
    %777 = vector.extract_strided_slice %765 {offsets = [0, 256], sizes = [8, 128], strides = [1, 1]} : vector<8x384xf32> to vector<8x128xf32>
    %778 = arith.mulf %774, %777 : vector<8x128xf32>
    %779 = arith.addf %776, %778 : vector<8x128xf32>
    %780 = math.tanh %779 : vector<8x128xf32>
    %cst_288 = arith.constant 1.000000e+00 : f32
    %781 = vector.broadcast %cst_288 : f32 to vector<8x128xf32>
    %782 = arith.subf %781, %775 : vector<8x128xf32>
    %783 = arith.mulf %782, %780 : vector<8x128xf32>
    %784 = arith.mulf %775, %758 : vector<8x128xf32>
    %785 = arith.addf %783, %784 : vector<8x128xf32>
    %786 = arith.addf %759, %785 : vector<8x128xf32>
    %c16_289 = arith.constant 16 : index
    %c0_290 = arith.constant 0 : index
    %787 = vector.load %arg33[%c16_289, %c0_290] : memref<64x384xf32, #tpu.memory_space<vmem>>, vector<8x384xf32>
    %788 = arith.truncf %785 : vector<8x128xf32> to vector<8x128xbf16>
    %c0_291 = arith.constant 0 : index
    %c0_292 = arith.constant 0 : index
    %789 = vector.load %arg14[%c0_291, %c0_292] : memref<128x384xbf16, #tpu.memory_space<vmem>>, vector<128x384xbf16>
    %cst_293 = arith.constant dense<0.000000e+00> : vector<8x384xf32>
    %790 = tpu.matmul %788, %789, %cst_293 {dimension_numbers = #tpu.dot_dimension_numbers<[1], [0], [0], [1], [0, 0, 1, 1], [], []>} : vector<8x128xbf16>, vector<128x384xbf16>, vector<8x384xf32> -> vector<8x384xf32>
    %791 = vector.broadcast %730 : vector<1x384xf32> to vector<8x384xf32>
    %792 = arith.addf %790, %791 : vector<8x384xf32>
    %793 = vector.extract_strided_slice %787 {offsets = [0, 0], sizes = [8, 256], strides = [1, 1]} : vector<8x384xf32> to vector<8x256xf32>
    %794 = vector.extract_strided_slice %792 {offsets = [0, 0], sizes = [8, 256], strides = [1, 1]} : vector<8x384xf32> to vector<8x256xf32>
    %795 = arith.addf %793, %794 : vector<8x256xf32>
    %796 = arith.negf %795 : vector<8x256xf32>
    %797 = math.exp %796 : vector<8x256xf32>
    %cst_294 = arith.constant 1.000000e+00 : f32
    %798 = vector.broadcast %cst_294 : f32 to vector<8x256xf32>
    %799 = arith.addf %798, %797 : vector<8x256xf32>
    %800 = arith.divf %798, %799 : vector<8x256xf32>
    %801 = vector.extract_strided_slice %800 {offsets = [0, 0], sizes = [8, 128], strides = [1, 1]} : vector<8x256xf32> to vector<8x128xf32>
    %802 = vector.extract_strided_slice %800 {offsets = [0, 128], sizes = [8, 128], strides = [1, 1]} : vector<8x256xf32> to vector<8x128xf32>
    %803 = vector.extract_strided_slice %787 {offsets = [0, 256], sizes = [8, 128], strides = [1, 1]} : vector<8x384xf32> to vector<8x128xf32>
    %804 = vector.extract_strided_slice %792 {offsets = [0, 256], sizes = [8, 128], strides = [1, 1]} : vector<8x384xf32> to vector<8x128xf32>
    %805 = arith.mulf %801, %804 : vector<8x128xf32>
    %806 = arith.addf %803, %805 : vector<8x128xf32>
    %807 = math.tanh %806 : vector<8x128xf32>
    %cst_295 = arith.constant 1.000000e+00 : f32
    %808 = vector.broadcast %cst_295 : f32 to vector<8x128xf32>
    %809 = arith.subf %808, %802 : vector<8x128xf32>
    %810 = arith.mulf %809, %807 : vector<8x128xf32>
    %811 = arith.mulf %802, %785 : vector<8x128xf32>
    %812 = arith.addf %810, %811 : vector<8x128xf32>
    %813 = arith.addf %786, %812 : vector<8x128xf32>
    %c24_296 = arith.constant 24 : index
    %c0_297 = arith.constant 0 : index
    %814 = vector.load %arg33[%c24_296, %c0_297] : memref<64x384xf32, #tpu.memory_space<vmem>>, vector<8x384xf32>
    %815 = arith.truncf %812 : vector<8x128xf32> to vector<8x128xbf16>
    %c0_298 = arith.constant 0 : index
    %c0_299 = arith.constant 0 : index
    %816 = vector.load %arg14[%c0_298, %c0_299] : memref<128x384xbf16, #tpu.memory_space<vmem>>, vector<128x384xbf16>
    %cst_300 = arith.constant dense<0.000000e+00> : vector<8x384xf32>
    %817 = tpu.matmul %815, %816, %cst_300 {dimension_numbers = #tpu.dot_dimension_numbers<[1], [0], [0], [1], [0, 0, 1, 1], [], []>} : vector<8x128xbf16>, vector<128x384xbf16>, vector<8x384xf32> -> vector<8x384xf32>
    %818 = vector.broadcast %730 : vector<1x384xf32> to vector<8x384xf32>
    %819 = arith.addf %817, %818 : vector<8x384xf32>
    %820 = vector.extract_strided_slice %814 {offsets = [0, 0], sizes = [8, 256], strides = [1, 1]} : vector<8x384xf32> to vector<8x256xf32>
    %821 = vector.extract_strided_slice %819 {offsets = [0, 0], sizes = [8, 256], strides = [1, 1]} : vector<8x384xf32> to vector<8x256xf32>
    %822 = arith.addf %820, %821 : vector<8x256xf32>
    %823 = arith.negf %822 : vector<8x256xf32>
    %824 = math.exp %823 : vector<8x256xf32>
    %cst_301 = arith.constant 1.000000e+00 : f32
    %825 = vector.broadcast %cst_301 : f32 to vector<8x256xf32>
    %826 = arith.addf %825, %824 : vector<8x256xf32>
    %827 = arith.divf %825, %826 : vector<8x256xf32>
    %828 = vector.extract_strided_slice %827 {offsets = [0, 0], sizes = [8, 128], strides = [1, 1]} : vector<8x256xf32> to vector<8x128xf32>
    %829 = vector.extract_strided_slice %827 {offsets = [0, 128], sizes = [8, 128], strides = [1, 1]} : vector<8x256xf32> to vector<8x128xf32>
    %830 = vector.extract_strided_slice %814 {offsets = [0, 256], sizes = [8, 128], strides = [1, 1]} : vector<8x384xf32> to vector<8x128xf32>
    %831 = vector.extract_strided_slice %819 {offsets = [0, 256], sizes = [8, 128], strides = [1, 1]} : vector<8x384xf32> to vector<8x128xf32>
    %832 = arith.mulf %828, %831 : vector<8x128xf32>
    %833 = arith.addf %830, %832 : vector<8x128xf32>
    %834 = math.tanh %833 : vector<8x128xf32>
    %cst_302 = arith.constant 1.000000e+00 : f32
    %835 = vector.broadcast %cst_302 : f32 to vector<8x128xf32>
    %836 = arith.subf %835, %829 : vector<8x128xf32>
    %837 = arith.mulf %836, %834 : vector<8x128xf32>
    %838 = arith.mulf %829, %812 : vector<8x128xf32>
    %839 = arith.addf %837, %838 : vector<8x128xf32>
    %840 = arith.addf %813, %839 : vector<8x128xf32>
    %c32_303 = arith.constant 32 : index
    %c0_304 = arith.constant 0 : index
    %841 = vector.load %arg33[%c32_303, %c0_304] : memref<64x384xf32, #tpu.memory_space<vmem>>, vector<8x384xf32>
    %842 = arith.truncf %839 : vector<8x128xf32> to vector<8x128xbf16>
    %c0_305 = arith.constant 0 : index
    %c0_306 = arith.constant 0 : index
    %843 = vector.load %arg14[%c0_305, %c0_306] : memref<128x384xbf16, #tpu.memory_space<vmem>>, vector<128x384xbf16>
    %cst_307 = arith.constant dense<0.000000e+00> : vector<8x384xf32>
    %844 = tpu.matmul %842, %843, %cst_307 {dimension_numbers = #tpu.dot_dimension_numbers<[1], [0], [0], [1], [0, 0, 1, 1], [], []>} : vector<8x128xbf16>, vector<128x384xbf16>, vector<8x384xf32> -> vector<8x384xf32>
    %845 = vector.broadcast %730 : vector<1x384xf32> to vector<8x384xf32>
    %846 = arith.addf %844, %845 : vector<8x384xf32>
    %847 = vector.extract_strided_slice %841 {offsets = [0, 0], sizes = [8, 256], strides = [1, 1]} : vector<8x384xf32> to vector<8x256xf32>
    %848 = vector.extract_strided_slice %846 {offsets = [0, 0], sizes = [8, 256], strides = [1, 1]} : vector<8x384xf32> to vector<8x256xf32>
    %849 = arith.addf %847, %848 : vector<8x256xf32>
    %850 = arith.negf %849 : vector<8x256xf32>
    %851 = math.exp %850 : vector<8x256xf32>
    %cst_308 = arith.constant 1.000000e+00 : f32
    %852 = vector.broadcast %cst_308 : f32 to vector<8x256xf32>
    %853 = arith.addf %852, %851 : vector<8x256xf32>
    %854 = arith.divf %852, %853 : vector<8x256xf32>
    %855 = vector.extract_strided_slice %854 {offsets = [0, 0], sizes = [8, 128], strides = [1, 1]} : vector<8x256xf32> to vector<8x128xf32>
    %856 = vector.extract_strided_slice %854 {offsets = [0, 128], sizes = [8, 128], strides = [1, 1]} : vector<8x256xf32> to vector<8x128xf32>
    %857 = vector.extract_strided_slice %841 {offsets = [0, 256], sizes = [8, 128], strides = [1, 1]} : vector<8x384xf32> to vector<8x128xf32>
    %858 = vector.extract_strided_slice %846 {offsets = [0, 256], sizes = [8, 128], strides = [1, 1]} : vector<8x384xf32> to vector<8x128xf32>
    %859 = arith.mulf %855, %858 : vector<8x128xf32>
    %860 = arith.addf %857, %859 : vector<8x128xf32>
    %861 = math.tanh %860 : vector<8x128xf32>
    %cst_309 = arith.constant 1.000000e+00 : f32
    %862 = vector.broadcast %cst_309 : f32 to vector<8x128xf32>
    %863 = arith.subf %862, %856 : vector<8x128xf32>
    %864 = arith.mulf %863, %861 : vector<8x128xf32>
    %865 = arith.mulf %856, %839 : vector<8x128xf32>
    %866 = arith.addf %864, %865 : vector<8x128xf32>
    %867 = arith.addf %840, %866 : vector<8x128xf32>
    %c40_310 = arith.constant 40 : index
    %c0_311 = arith.constant 0 : index
    %868 = vector.load %arg33[%c40_310, %c0_311] : memref<64x384xf32, #tpu.memory_space<vmem>>, vector<8x384xf32>
    %869 = arith.truncf %866 : vector<8x128xf32> to vector<8x128xbf16>
    %c0_312 = arith.constant 0 : index
    %c0_313 = arith.constant 0 : index
    %870 = vector.load %arg14[%c0_312, %c0_313] : memref<128x384xbf16, #tpu.memory_space<vmem>>, vector<128x384xbf16>
    %cst_314 = arith.constant dense<0.000000e+00> : vector<8x384xf32>
    %871 = tpu.matmul %869, %870, %cst_314 {dimension_numbers = #tpu.dot_dimension_numbers<[1], [0], [0], [1], [0, 0, 1, 1], [], []>} : vector<8x128xbf16>, vector<128x384xbf16>, vector<8x384xf32> -> vector<8x384xf32>
    %872 = vector.broadcast %730 : vector<1x384xf32> to vector<8x384xf32>
    %873 = arith.addf %871, %872 : vector<8x384xf32>
    %874 = vector.extract_strided_slice %868 {offsets = [0, 0], sizes = [8, 256], strides = [1, 1]} : vector<8x384xf32> to vector<8x256xf32>
    %875 = vector.extract_strided_slice %873 {offsets = [0, 0], sizes = [8, 256], strides = [1, 1]} : vector<8x384xf32> to vector<8x256xf32>
    %876 = arith.addf %874, %875 : vector<8x256xf32>
    %877 = arith.negf %876 : vector<8x256xf32>
    %878 = math.exp %877 : vector<8x256xf32>
    %cst_315 = arith.constant 1.000000e+00 : f32
    %879 = vector.broadcast %cst_315 : f32 to vector<8x256xf32>
    %880 = arith.addf %879, %878 : vector<8x256xf32>
    %881 = arith.divf %879, %880 : vector<8x256xf32>
    %882 = vector.extract_strided_slice %881 {offsets = [0, 0], sizes = [8, 128], strides = [1, 1]} : vector<8x256xf32> to vector<8x128xf32>
    %883 = vector.extract_strided_slice %881 {offsets = [0, 128], sizes = [8, 128], strides = [1, 1]} : vector<8x256xf32> to vector<8x128xf32>
    %884 = vector.extract_strided_slice %868 {offsets = [0, 256], sizes = [8, 128], strides = [1, 1]} : vector<8x384xf32> to vector<8x128xf32>
    %885 = vector.extract_strided_slice %873 {offsets = [0, 256], sizes = [8, 128], strides = [1, 1]} : vector<8x384xf32> to vector<8x128xf32>
    %886 = arith.mulf %882, %885 : vector<8x128xf32>
    %887 = arith.addf %884, %886 : vector<8x128xf32>
    %888 = math.tanh %887 : vector<8x128xf32>
    %cst_316 = arith.constant 1.000000e+00 : f32
    %889 = vector.broadcast %cst_316 : f32 to vector<8x128xf32>
    %890 = arith.subf %889, %883 : vector<8x128xf32>
    %891 = arith.mulf %890, %888 : vector<8x128xf32>
    %892 = arith.mulf %883, %866 : vector<8x128xf32>
    %893 = arith.addf %891, %892 : vector<8x128xf32>
    %894 = arith.addf %867, %893 : vector<8x128xf32>
    %c48_317 = arith.constant 48 : index
    %c0_318 = arith.constant 0 : index
    %895 = vector.load %arg33[%c48_317, %c0_318] : memref<64x384xf32, #tpu.memory_space<vmem>>, vector<8x384xf32>
    %896 = arith.truncf %893 : vector<8x128xf32> to vector<8x128xbf16>
    %c0_319 = arith.constant 0 : index
    %c0_320 = arith.constant 0 : index
    %897 = vector.load %arg14[%c0_319, %c0_320] : memref<128x384xbf16, #tpu.memory_space<vmem>>, vector<128x384xbf16>
    %cst_321 = arith.constant dense<0.000000e+00> : vector<8x384xf32>
    %898 = tpu.matmul %896, %897, %cst_321 {dimension_numbers = #tpu.dot_dimension_numbers<[1], [0], [0], [1], [0, 0, 1, 1], [], []>} : vector<8x128xbf16>, vector<128x384xbf16>, vector<8x384xf32> -> vector<8x384xf32>
    %899 = vector.broadcast %730 : vector<1x384xf32> to vector<8x384xf32>
    %900 = arith.addf %898, %899 : vector<8x384xf32>
    %901 = vector.extract_strided_slice %895 {offsets = [0, 0], sizes = [8, 256], strides = [1, 1]} : vector<8x384xf32> to vector<8x256xf32>
    %902 = vector.extract_strided_slice %900 {offsets = [0, 0], sizes = [8, 256], strides = [1, 1]} : vector<8x384xf32> to vector<8x256xf32>
    %903 = arith.addf %901, %902 : vector<8x256xf32>
    %904 = arith.negf %903 : vector<8x256xf32>
    %905 = math.exp %904 : vector<8x256xf32>
    %cst_322 = arith.constant 1.000000e+00 : f32
    %906 = vector.broadcast %cst_322 : f32 to vector<8x256xf32>
    %907 = arith.addf %906, %905 : vector<8x256xf32>
    %908 = arith.divf %906, %907 : vector<8x256xf32>
    %909 = vector.extract_strided_slice %908 {offsets = [0, 0], sizes = [8, 128], strides = [1, 1]} : vector<8x256xf32> to vector<8x128xf32>
    %910 = vector.extract_strided_slice %908 {offsets = [0, 128], sizes = [8, 128], strides = [1, 1]} : vector<8x256xf32> to vector<8x128xf32>
    %911 = vector.extract_strided_slice %895 {offsets = [0, 256], sizes = [8, 128], strides = [1, 1]} : vector<8x384xf32> to vector<8x128xf32>
    %912 = vector.extract_strided_slice %900 {offsets = [0, 256], sizes = [8, 128], strides = [1, 1]} : vector<8x384xf32> to vector<8x128xf32>
    %913 = arith.mulf %909, %912 : vector<8x128xf32>
    %914 = arith.addf %911, %913 : vector<8x128xf32>
    %915 = math.tanh %914 : vector<8x128xf32>
    %cst_323 = arith.constant 1.000000e+00 : f32
    %916 = vector.broadcast %cst_323 : f32 to vector<8x128xf32>
    %917 = arith.subf %916, %910 : vector<8x128xf32>
    %918 = arith.mulf %917, %915 : vector<8x128xf32>
    %919 = arith.mulf %910, %893 : vector<8x128xf32>
    %920 = arith.addf %918, %919 : vector<8x128xf32>
    %921 = arith.addf %894, %920 : vector<8x128xf32>
    %c56_324 = arith.constant 56 : index
    %c0_325 = arith.constant 0 : index
    %922 = vector.load %arg33[%c56_324, %c0_325] : memref<64x384xf32, #tpu.memory_space<vmem>>, vector<8x384xf32>
    %923 = arith.truncf %920 : vector<8x128xf32> to vector<8x128xbf16>
    %c0_326 = arith.constant 0 : index
    %c0_327 = arith.constant 0 : index
    %924 = vector.load %arg14[%c0_326, %c0_327] : memref<128x384xbf16, #tpu.memory_space<vmem>>, vector<128x384xbf16>
    %cst_328 = arith.constant dense<0.000000e+00> : vector<8x384xf32>
    %925 = tpu.matmul %923, %924, %cst_328 {dimension_numbers = #tpu.dot_dimension_numbers<[1], [0], [0], [1], [0, 0, 1, 1], [], []>} : vector<8x128xbf16>, vector<128x384xbf16>, vector<8x384xf32> -> vector<8x384xf32>
    %926 = vector.broadcast %730 : vector<1x384xf32> to vector<8x384xf32>
    %927 = arith.addf %925, %926 : vector<8x384xf32>
    %928 = vector.extract_strided_slice %922 {offsets = [0, 0], sizes = [8, 256], strides = [1, 1]} : vector<8x384xf32> to vector<8x256xf32>
    %929 = vector.extract_strided_slice %927 {offsets = [0, 0], sizes = [8, 256], strides = [1, 1]} : vector<8x384xf32> to vector<8x256xf32>
    %930 = arith.addf %928, %929 : vector<8x256xf32>
    %931 = arith.negf %930 : vector<8x256xf32>
    %932 = math.exp %931 : vector<8x256xf32>
    %cst_329 = arith.constant 1.000000e+00 : f32
    %933 = vector.broadcast %cst_329 : f32 to vector<8x256xf32>
    %934 = arith.addf %933, %932 : vector<8x256xf32>
    %935 = arith.divf %933, %934 : vector<8x256xf32>
    %936 = vector.extract_strided_slice %935 {offsets = [0, 0], sizes = [8, 128], strides = [1, 1]} : vector<8x256xf32> to vector<8x128xf32>
    %937 = vector.extract_strided_slice %935 {offsets = [0, 128], sizes = [8, 128], strides = [1, 1]} : vector<8x256xf32> to vector<8x128xf32>
    %938 = vector.extract_strided_slice %922 {offsets = [0, 256], sizes = [8, 128], strides = [1, 1]} : vector<8x384xf32> to vector<8x128xf32>
    %939 = vector.extract_strided_slice %927 {offsets = [0, 256], sizes = [8, 128], strides = [1, 1]} : vector<8x384xf32> to vector<8x128xf32>
    %940 = arith.mulf %936, %939 : vector<8x128xf32>
    %941 = arith.addf %938, %940 : vector<8x128xf32>
    %942 = math.tanh %941 : vector<8x128xf32>
    %cst_330 = arith.constant 1.000000e+00 : f32
    %943 = vector.broadcast %cst_330 : f32 to vector<8x128xf32>
    %944 = arith.subf %943, %937 : vector<8x128xf32>
    %945 = arith.mulf %944, %942 : vector<8x128xf32>
    %946 = arith.mulf %937, %920 : vector<8x128xf32>
    %947 = arith.addf %945, %946 : vector<8x128xf32>
    %948 = arith.addf %921, %947 : vector<8x128xf32>
    %cst_331 = arith.constant 1.250000e-01 : f32
    %949 = vector.broadcast %cst_331 : f32 to vector<8x128xf32>
    %950 = arith.mulf %948, %949 : vector<8x128xf32>
    %cst_332 = arith.constant 0.000000e+00 : f32
    %951 = vector.broadcast %cst_332 : f32 to vector<8x2xf32>
    %c0_333 = arith.constant 0 : index
    %c0_334 = arith.constant 0 : index
    %952 = vector.load %arg0[%c0_333, %c0_334] : memref<64x2xf32, #tpu.memory_space<vmem>>, vector<8x2xf32>
    %953 = arith.addf %951, %952 : vector<8x2xf32>
    %c8_335 = arith.constant 8 : index
    %c0_336 = arith.constant 0 : index
    %954 = vector.load %arg0[%c8_335, %c0_336] : memref<64x2xf32, #tpu.memory_space<vmem>>, vector<8x2xf32>
    %955 = arith.addf %953, %954 : vector<8x2xf32>
    %c16_337 = arith.constant 16 : index
    %c0_338 = arith.constant 0 : index
    %956 = vector.load %arg0[%c16_337, %c0_338] : memref<64x2xf32, #tpu.memory_space<vmem>>, vector<8x2xf32>
    %957 = arith.addf %955, %956 : vector<8x2xf32>
    %c24_339 = arith.constant 24 : index
    %c0_340 = arith.constant 0 : index
    %958 = vector.load %arg0[%c24_339, %c0_340] : memref<64x2xf32, #tpu.memory_space<vmem>>, vector<8x2xf32>
    %959 = arith.addf %957, %958 : vector<8x2xf32>
    %c32_341 = arith.constant 32 : index
    %c0_342 = arith.constant 0 : index
    %960 = vector.load %arg0[%c32_341, %c0_342] : memref<64x2xf32, #tpu.memory_space<vmem>>, vector<8x2xf32>
    %961 = arith.addf %959, %960 : vector<8x2xf32>
    %c40_343 = arith.constant 40 : index
    %c0_344 = arith.constant 0 : index
    %962 = vector.load %arg0[%c40_343, %c0_344] : memref<64x2xf32, #tpu.memory_space<vmem>>, vector<8x2xf32>
    %963 = arith.addf %961, %962 : vector<8x2xf32>
    %c48_345 = arith.constant 48 : index
    %c0_346 = arith.constant 0 : index
    %964 = vector.load %arg0[%c48_345, %c0_346] : memref<64x2xf32, #tpu.memory_space<vmem>>, vector<8x2xf32>
    %965 = arith.addf %963, %964 : vector<8x2xf32>
    %c56_347 = arith.constant 56 : index
    %c0_348 = arith.constant 0 : index
    %966 = vector.load %arg0[%c56_347, %c0_348] : memref<64x2xf32, #tpu.memory_space<vmem>>, vector<8x2xf32>
    %967 = arith.addf %965, %966 : vector<8x2xf32>
    %cst_349 = arith.constant 1.250000e-01 : f32
    %968 = vector.broadcast %cst_349 : f32 to vector<8x2xf32>
    %969 = arith.mulf %967, %968 : vector<8x2xf32>
    %cst_350 = arith.constant 0.000000e+00 : f32
    %970 = vector.broadcast %cst_350 : f32 to vector<8x2xf32>
    %c0_351 = arith.constant 0 : index
    %c0_352 = arith.constant 0 : index
    %971 = vector.load %arg29[%c0_351, %c0_352] : memref<1x2xf32, #tpu.memory_space<vmem>>, vector<1x2xf32>
    %972 = vector.broadcast %971 : vector<1x2xf32> to vector<8x2xf32>
    %973 = arith.addf %970, %972 : vector<8x2xf32>
    %c0_353 = arith.constant 0 : index
    %c0_354 = arith.constant 0 : index
    %974 = vector.load %arg17[%c0_353, %c0_354] : memref<1x2xf32, #tpu.memory_space<vmem>>, vector<1x2xf32>
    %975 = vector.broadcast %974 : vector<1x2xf32> to vector<8x2xf32>
    %976 = arith.mulf %969, %975 : vector<8x2xf32>
    %c0_355 = arith.constant 0 : index
    %c0_356 = arith.constant 0 : index
    %977 = vector.load %arg21[%c0_355, %c0_356] : memref<1x2xf32, #tpu.memory_space<vmem>>, vector<1x2xf32>
    %978 = vector.broadcast %977 : vector<1x2xf32> to vector<8x2xf32>
    %979 = arith.addf %976, %978 : vector<8x2xf32>
    %cst_357 = arith.constant 0.000000e+00 : f32
    %980 = vector.broadcast %cst_357 : f32 to vector<8x2xf32>
    %981 = arith.maximumf %979, %980 : vector<8x2xf32>
    %c0_358 = arith.constant 0 : index
    %c0_359 = arith.constant 0 : index
    %982 = vector.load %arg25[%c0_358, %c0_359] : memref<2x2xf32, #tpu.memory_space<vmem>>, vector<2x2xf32>
    %cst_360 = arith.constant dense<0.000000e+00> : vector<8x2xf32>
    %983 = tpu.matmul %981, %982, %cst_360 {dimension_numbers = #tpu.dot_dimension_numbers<[1], [0], [0], [1], [0, 0, 1, 1], [], []>} : vector<8x2xf32>, vector<2x2xf32>, vector<8x2xf32> -> vector<8x2xf32>
    %984 = arith.addf %973, %983 : vector<8x2xf32>
    %c0_361 = arith.constant 0 : index
    %c0_362 = arith.constant 0 : index
    %985 = vector.load %arg18[%c0_361, %c0_362] : memref<1x128xf32, #tpu.memory_space<vmem>>, vector<1x128xf32>
    %986 = vector.broadcast %985 : vector<1x128xf32> to vector<8x128xf32>
    %987 = arith.mulf %289, %986 : vector<8x128xf32>
    %c0_363 = arith.constant 0 : index
    %c0_364 = arith.constant 0 : index
    %988 = vector.load %arg22[%c0_363, %c0_364] : memref<1x128xf32, #tpu.memory_space<vmem>>, vector<1x128xf32>
    %989 = vector.broadcast %988 : vector<1x128xf32> to vector<8x128xf32>
    %990 = arith.addf %987, %989 : vector<8x128xf32>
    %cst_365 = arith.constant 0.000000e+00 : f32
    %991 = vector.broadcast %cst_365 : f32 to vector<8x128xf32>
    %992 = arith.maximumf %990, %991 : vector<8x128xf32>
    %c0_366 = arith.constant 0 : index
    %c0_367 = arith.constant 0 : index
    %993 = vector.load %arg26[%c0_366, %c0_367] : memref<128x2xf32, #tpu.memory_space<vmem>>, vector<128x2xf32>
    %cst_368 = arith.constant dense<0.000000e+00> : vector<8x2xf32>
    %994 = tpu.matmul %992, %993, %cst_368 {dimension_numbers = #tpu.dot_dimension_numbers<[1], [0], [0], [1], [0, 0, 1, 1], [], []>} : vector<8x128xf32>, vector<128x2xf32>, vector<8x2xf32> -> vector<8x2xf32>
    %995 = arith.addf %984, %994 : vector<8x2xf32>
    %c0_369 = arith.constant 0 : index
    %c0_370 = arith.constant 0 : index
    %996 = vector.load %arg19[%c0_369, %c0_370] : memref<1x128xf32, #tpu.memory_space<vmem>>, vector<1x128xf32>
    %997 = vector.broadcast %996 : vector<1x128xf32> to vector<8x128xf32>
    %998 = arith.mulf %621, %997 : vector<8x128xf32>
    %c0_371 = arith.constant 0 : index
    %c0_372 = arith.constant 0 : index
    %999 = vector.load %arg23[%c0_371, %c0_372] : memref<1x128xf32, #tpu.memory_space<vmem>>, vector<1x128xf32>
    %1000 = vector.broadcast %999 : vector<1x128xf32> to vector<8x128xf32>
    %1001 = arith.addf %998, %1000 : vector<8x128xf32>
    %cst_373 = arith.constant 0.000000e+00 : f32
    %1002 = vector.broadcast %cst_373 : f32 to vector<8x128xf32>
    %1003 = arith.maximumf %1001, %1002 : vector<8x128xf32>
    %c0_374 = arith.constant 0 : index
    %c0_375 = arith.constant 0 : index
    %1004 = vector.load %arg27[%c0_374, %c0_375] : memref<128x2xf32, #tpu.memory_space<vmem>>, vector<128x2xf32>
    %cst_376 = arith.constant dense<0.000000e+00> : vector<8x2xf32>
    %1005 = tpu.matmul %1003, %1004, %cst_376 {dimension_numbers = #tpu.dot_dimension_numbers<[1], [0], [0], [1], [0, 0, 1, 1], [], []>} : vector<8x128xf32>, vector<128x2xf32>, vector<8x2xf32> -> vector<8x2xf32>
    %1006 = arith.addf %995, %1005 : vector<8x2xf32>
    %c0_377 = arith.constant 0 : index
    %c0_378 = arith.constant 0 : index
    %1007 = vector.load %arg20[%c0_377, %c0_378] : memref<1x128xf32, #tpu.memory_space<vmem>>, vector<1x128xf32>
    %1008 = vector.broadcast %1007 : vector<1x128xf32> to vector<8x128xf32>
    %1009 = arith.mulf %950, %1008 : vector<8x128xf32>
    %c0_379 = arith.constant 0 : index
    %c0_380 = arith.constant 0 : index
    %1010 = vector.load %arg24[%c0_379, %c0_380] : memref<1x128xf32, #tpu.memory_space<vmem>>, vector<1x128xf32>
    %1011 = vector.broadcast %1010 : vector<1x128xf32> to vector<8x128xf32>
    %1012 = arith.addf %1009, %1011 : vector<8x128xf32>
    %cst_381 = arith.constant 0.000000e+00 : f32
    %1013 = vector.broadcast %cst_381 : f32 to vector<8x128xf32>
    %1014 = arith.maximumf %1012, %1013 : vector<8x128xf32>
    %c0_382 = arith.constant 0 : index
    %c0_383 = arith.constant 0 : index
    %1015 = vector.load %arg28[%c0_382, %c0_383] : memref<128x2xf32, #tpu.memory_space<vmem>>, vector<128x2xf32>
    %cst_384 = arith.constant dense<0.000000e+00> : vector<8x2xf32>
    %1016 = tpu.matmul %1014, %1015, %cst_384 {dimension_numbers = #tpu.dot_dimension_numbers<[1], [0], [0], [1], [0, 0, 1, 1], [], []>} : vector<8x128xf32>, vector<128x2xf32>, vector<8x2xf32> -> vector<8x2xf32>
    %1017 = arith.addf %1006, %1016 : vector<8x2xf32>
    %c0_385 = arith.constant 0 : index
    %c0_386 = arith.constant 0 : index
    %1018 = vector.load %arg30[%c0_385, %c0_386] : memref<8x2xf32, #tpu.memory_space<vmem>>, vector<8x2xf32>
    tpu.vector_store %arg30[%c0_385, %c0_386], %1017 {strides = array<i32>} : memref<8x2xf32, #tpu.memory_space<vmem>>, vector<8x2xf32>,
    return
  }
}

</mosaic_0001>

<bundles_post_ra>
// kernel: tpu_custom_call.1
= control target key start
LH: loop header
LB: loop body
LE: loop exit
PB: predicated region body
PF: predicated region fallthrough
CT: control target
= control target key end

     0   :  { %s10491_s6 = smov 1   ;;  %s10492_s10 = smov 2   ;;  %s13086_s0 = inlined_call_operand.smem [shape: u32[31], index: -1, kind: input, shape index: {}] }
   0x1   :  { %s10540_s5 = sld [smem:[%s13086_s0]]   ;;  %s10493_s14 = smov 3  }
   0x2   :  { %s10545_s9 = sld [smem:[%s13086_s0 + %s10491_s6]]   ;;  %s10494_s18 = smov 4  }
   0x3   :  { %s10550_s13 = sld [smem:[%s13086_s0 + %s10492_s10]]   ;;  %s10495_s22 = smov 5  }
   0x4   :  { %s10555_s17 = sld [smem:[%s13086_s0 + %s10493_s14]]   ;;  %s10496_s26 = smov 6  }
   0x5   :  { %s10560_s21 = sld [smem:[%s13086_s0 + %s10494_s18]]   ;;  %s10497_s30 = smov 7  }
   0x6   :  { %s10565_s25 = sld [smem:[%s13086_s0 + %s10495_s22]]   ;;  %s10498_s4 = smov 8  }
   0x7   :  { %s10570_s29 = sld [smem:[%s13086_s0 + %s10496_s26]]   ;;  %s10499_s10 = smov 9  }
   0x8   :  { %s10575_s3 = sld [smem:[%s13086_s0 + %s10497_s30]]   ;;  %s10500_s15 = smov 10  }
   0x9   :  { %s10580_s8 = sld [smem:[%s13086_s0 + %s10498_s4]]   ;;  %s10501_s20 = smov 11  }
   0xa   :  { %s10585_s14 = sld [smem:[%s13086_s0 + %s10499_s10]]   ;;  %s10502_s26 = smov 12  }
   0xb   :  { %s10590_s19 = sld [smem:[%s13086_s0 + %s10500_s15]]   ;;  %s10503_s1 = smov 13  }
   0xc   :  { %s10595_s24 = sld [smem:[%s13086_s0 + %s10501_s20]]   ;;  %s10504_s7 = smov 14  }
   0xd   :  { %s10600_s30 = sld [smem:[%s13086_s0 + %s10502_s26]]   ;;  %s10505_s15 = smov 15  }
   0xe   :  { %s10605_s6 = sld [smem:[%s13086_s0 + %s10503_s1]]   ;;  %s10506_s22 = smov 16  }
   0xf   :  { %s10610_s12 = sld [smem:[%s13086_s0 + %s10504_s7]]   ;;  %s10507_s28 = smov 17  }
  0x10   :  { %s10615_s20 = sld [smem:[%s13086_s0 + %s10505_s15]]   ;;  %s10508_s7 = smov 18  }
  0x11   :  { %s10620_s27 = sld [smem:[%s13086_s0 + %s10506_s22]]   ;;  %s10509_s15 = smov 19  }
  0x12   :  { %13167 = sst [smem:[#allocation15_spill]] %s10595_s24  ;;  %s10510_s22 = smov 20  }
  0x13   :  { %s10625_s4 = sld [smem:[%s13086_s0 + %s10507_s28]]   ;;  %s10511_s28 = smov 21  }
  0x14   :  { %s10630_s24 = sld [smem:[%s13086_s0 + %s10508_s7]]   ;;  %s10512_s7 = smov 22  }
  0x16   :  { %13168 = sst [smem:[#allocation16_spill]] %s10615_s20 }
  0x17   :  { %13169 = sst [smem:[#allocation17_spill]] %s10620_s27 }
  0x18   :  { %s10635_s20 = sld [smem:[%s13086_s0 + %s10509_s15]]   ;;  %s10513_s15 = smov 23  }
  0x19   :  { %13170 = sst [smem:[#allocation18_spill]] %s10625_s4 }
  0x1a   :  { %13171 = sst [smem:[#allocation19_spill]] %s10630_s24 }
  0x1b   :  { %s10640_s27 = sld [smem:[%s13086_s0 + %s10510_s22]]   ;;  %s10514_s22 = smov 24  }
  0x1c   :  { %s10645_s4 = sld [smem:[%s13086_s0 + %s10511_s28]]   ;;  %s10515_s28 = smov 25  }
  0x1d   :  { %s10650_s24 = sld [smem:[%s13086_s0 + %s10512_s7]]   ;;  %s10516_s7 = smov 26  }
  0x1e   :  { %13172 = sst [smem:[#allocation20_spill]] %s10635_s20 }
  0x1f   :  { %s10655_s20 = sld [smem:[%s13086_s0 + %s10513_s15]]   ;;  %s10517_s15 = smov 27  }
  0x21   :  { %13173 = sst [smem:[#allocation21_spill]] %s10640_s27 }
  0x22   :  { %13174 = sst [smem:[#allocation22_spill]] %s10645_s4 }
  0x23   :  { %13175 = sst [smem:[#allocation23_spill]] %s10650_s24 }
  0x24   :  { %s10660_s27 = sld [smem:[%s13086_s0 + %s10514_s22]]   ;;  %s10518_s22 = smov 28  }
  0x25   :  { %13176 = sst [smem:[#allocation24_spill]] %s10655_s20 }
  0x26   :  { %s10665_s4 = sld [smem:[%s13086_s0 + %s10515_s28]]   ;;  %s10519_s28 = smov 29  }
  0x27   :  { %s10670_s24 = sld [smem:[%s13086_s0 + %s10516_s7]]   ;;  %s10520_s7 = smov 30  }
  0x28   :  { %s10675_s20 = sld [smem:[%s13086_s0 + %s10517_s15]]  }
  0x2a   :  { %13177 = sst [smem:[#allocation25_spill]] %s10660_s27 }
  0x2b   :  { %s10680_s27 = sld [smem:[%s13086_s0 + %s10518_s22]]  }
  0x2c   :  { %13178 = sst [smem:[#allocation26_spill]] %s10665_s4 }
  0x2d   :  { %13179 = sst [smem:[#allocation27_spill]] %s10670_s24 }
  0x2e   :  { %s10685_s4 = sld [smem:[%s13086_s0 + %s10519_s28]]  }
  0x2f   :  { %s10690_s24 = sld [smem:[%s13086_s0 + %s10520_s7]]  }
  0x30   :  { %66 = vsyncpa [#allocation6], 0 }
  0x31   :  { %67 = vsyncpa [#allocation8], 0 }
  0x32   :  { %68 = vsyncpa [#allocation11], 0  ;;  %s10521_s15 = smov [#allocation7]   ;;  %s10522_s18 = smov [#allocation5]  }
  0x33   :  { %s108_s16 = sshll.u32 %s10521_s15, 4  ;;  %s90_s22 = sshll.u32 %s10522_s18, 4  ;;  %s109_s16 = int_to_ptr.vmem [resolvable:$true] %s108_s16  ;;  %s10692_s22 = int_to_ptr.vmem [resolvable:$true] %s90_s22 }
  0x34   :  { %s10397_s23 = scalar_lea.hbm %s10600_s30, 3072 }
  0x35   :  { %p10398_p0 = scmp.ne.s32.totalorder %s10600_s30, %s10397_s23  ;;  %p10401_p1 = scmp.lt.u32.totalorder %s10397_s23, %s10600_s30 }
  0x37   :  { %p10403_p2 = pnand %p10401_p1, %p10398_p0 }
  0x39   :  { %10406 = shalt.err (!%p10403_p2)
}
  0x3a   :  { %s10407_s0 = scalar_lea.vmem %s109_s16, 3072  ;;  %p10412_p4 = scmp.lt.s32.totalorder %s109_s16, %s109_s16 }
  0x3b   :  { %p10408_p3 = scmp.ne.s32.totalorder %s109_s16, %s10407_s0  ;;  %p10413_p5 = scmp.lt.s32.totalorder %s10407_s0, %s10407_s0 }
  0x3d   :  { %p10414_p6 = por %p10413_p5, %p10412_p4 }
  0x3f   :  { %p10415_p7 = pnand %p10414_p6, %p10408_p3 }
  0x41   :  { %10418 = shalt.err (!%p10415_p7)
}
  0x42   :  { %s10523_s26 = smov 192   ;;  %s10524_s28 = smov 12  }
  0x43   :  { %114 = dma.hbm_to_vmem [thread:$0]  %s10600_s30, 3072, %s109_s16, [#allocation8], %s10523_s26, %s10523_s26, %s10524_s28  }
  0x44   :  { %s10419_s1 = scalar_lea.hbm %s10580_s8, 3072 }
  0x45   :  { %p10420_p8 = scmp.ne.s32.totalorder %s10580_s8, %s10419_s1  ;;  %p10423_p9 = scmp.lt.u32.totalorder %s10419_s1, %s10580_s8 }
  0x47   :  { %p10425_p10 = pnand %p10423_p9, %p10420_p8 }
  0x49   :  { %10428 = shalt.err (!%p10425_p10)
}
  0x4a   :  { %s10429_s2 = scalar_lea.vmem %s10692_s22, 3072  ;;  %p10434_p12 = scmp.lt.s32.totalorder %s10692_s22, %s10692_s22 }
  0x4b   :  { %p10430_p11 = scmp.ne.s32.totalorder %s10692_s22, %s10429_s2  ;;  %p10435_p13 = scmp.lt.s32.totalorder %s10429_s2, %s10429_s2 }
  0x4d   :  { %p10436_p0 = por %p10435_p13, %p10434_p12 }
  0x4f   :  { %p10437_p1 = pnand %p10436_p0, %p10430_p11 }
  0x51   :  { %10440 = shalt.err (!%p10437_p1)
}
  0x52   :  { %96 = dma.hbm_to_vmem [thread:$0]  %s10580_s8, 3072, %s10692_s22, [#allocation6], %s10523_s26, %s10523_s26, %s10524_s28  }
  0x53   :  { %s10525_s30 = smov [#allocation9]   ;;  %s10526_s10 = smov [#allocation10]  }
  0x54   :  { %s120_s7 = sshll.u32 %s10525_s30, 4  ;;  %s132_s11 = sshll.u32 %s10526_s10, 4  ;;  %s121_s7 = int_to_ptr.vmem [resolvable:$true] %s120_s7  ;;  %s10713_s11 = int_to_ptr.vmem [resolvable:$true] %s132_s11 }
  0x55   :  { %s10441_s15 = scalar_lea.hbm %s10605_s6, 3072 }
  0x56   :  { %p10442_p2 = scmp.ne.s32.totalorder %s10605_s6, %s10441_s15  ;;  %p10445_p3 = scmp.lt.u32.totalorder %s10441_s15, %s10605_s6 }
  0x58   :  { %p10447_p4 = pnand %p10445_p3, %p10442_p2 }
  0x5a   :  { %10450 = shalt.err (!%p10447_p4)
}
  0x5b   :  { %s10451_s16 = scalar_lea.vmem %s121_s7, 3072  ;;  %p10456_p6 = scmp.lt.s32.totalorder %s121_s7, %s121_s7 }
  0x5c   :  { %p10452_p5 = scmp.ne.s32.totalorder %s121_s7, %s10451_s16  ;;  %p10457_p7 = scmp.lt.s32.totalorder %s10451_s16, %s10451_s16 }
  0x5e   :  { %p10458_p8 = por %p10457_p7, %p10456_p6 }
  0x60   :  { %p10459_p9 = pnand %p10458_p8, %p10452_p5 }
  0x62   :  { %10462 = shalt.err (!%p10459_p9)
}
  0x63   :  { %126 = dma.hbm_to_vmem [thread:$0]  %s10605_s6, 3072, %s121_s7, [#allocation8], %s10523_s26, %s10523_s26, %s10524_s28  }
  0x64   :  { %s10463_s8 = scalar_lea.hbm %s10610_s12, 3072 }
  0x65   :  { %p10464_p10 = scmp.ne.s32.totalorder %s10610_s12, %s10463_s8  ;;  %p10467_p11 = scmp.lt.u32.totalorder %s10463_s8, %s10610_s12 }
  0x67   :  { %p10469_p12 = pnand %p10467_p11, %p10464_p10 }
  0x69   :  { %10472 = shalt.err (!%p10469_p12)
}
  0x6a   :  { %s10473_s18 = scalar_lea.vmem %s10713_s11, 3072  ;;  %p10478_p0 = scmp.lt.s32.totalorder %s10713_s11, %s10713_s11 }
  0x6b   :  { %p10474_p13 = scmp.ne.s32.totalorder %s10713_s11, %s10473_s18  ;;  %p10479_p1 = scmp.lt.s32.totalorder %s10473_s18, %s10473_s18 }
  0x6d   :  { %p10480_p2 = por %p10479_p1, %p10478_p0 }
  0x6f   :  { %p10481_p3 = pnand %p10480_p2, %p10474_p13 }
  0x71   :  { %10484 = shalt.err (!%p10481_p3)
}
  0x72   :  { %138 = dma.hbm_to_vmem [thread:$0]  %s10610_s12, 3072, %s10713_s11, [#allocation11], %s10523_s26, %s10523_s26, %s10524_s28  }
  0x73   :  { %10485 = dma.done.wait [#allocation6], 3072  }
  0x74   :  { %10486 = vsyncadd [#allocation6], 4294964224 }
  0x75   :  { %10487 = dma.done.wait [#allocation8], 6144  }
  0x76   :  { %10488 = vsyncadd [#allocation8], 4294961152 }
  0x77   :  { %10489 = dma.done.wait [#allocation11], 3072  }
  0x78   :  { %10490 = vsyncadd [#allocation11], 4294964224  ;;  %v186_v0 = vlaneseq  ;;  %v10527_v1 = vmov 1966171168   ;;  %v13088_v3 = vmov 0   ;;  %vm254_vm0 = vcmask 1040384  }
  0x79   :  { %v227_v2 = vunpack.c.l.s4 %v10527_v1  ;;  %296 = vmatprep.mubr.bf16.mxu0 %v13088_v3  ;;  %v7942_v7 = vld.sshfl [vmem:[%s10550_s13] sm:$0x13 pattern:$0x75316420]  ;;  %v205_v11 = vld [vmem:[%s10540_s5 + $0x8] sm:$0xff]  ;;  %vm241_vm1 = vcmask 15360  }
  0x7a   :  { %v10735_v4 = vshrl.u32 %v186_v0, 7  ;;  %v225_v8 = vcombine.high %v7942_v7, %v7942_v7  ;;  %v204_v10 = vld [vmem:[%s10540_s5] sm:$0xff]  ;;  %v206_v14 = vld [vmem:[%s10540_s5 + $0x10] sm:$0xff]  ;;  %v207_v15 = vld [vmem:[%s10540_s5 + $0x18] sm:$0xff]  ;;  %v13090_v43 = vmov 0.0   ;;  %vm10530_vm2 = vmmov 0  }
  0x7b   :  { %v228_v5 = vunpack.c.0.s8 %v227_v2  ;;  %v212_v12 = vpack.c.bf16 %v205_v11, %v204_v10  ;;  %v10750_v18 = vld [vmem:[%s10555_s17 + $0x4] ss:$12 sps:$4 sm:$0xff]   ;;  %v209_v20 = vld [vmem:[%s10540_s5 + $0x28] sm:$0xff]  ;;  %v213_v22 = vpack.c.bf16 %v207_v15, %v206_v14  ;;  %v211_v28 = vld [vmem:[%s10540_s5 + $0x38] sm:$0xff]  ;;  %s13276_s13 = sld [smem:[#allocation16_spill]]  ;;  %vm7517_vm7 = vcmask 1041408  }
  0x7c   :  { %v208_v19 = vld [vmem:[%s10540_s5 + $0x20] sm:$0xff]  ;;  %v9770_v25 = vld [vmem:[%s10555_s17 + $0x1c] ss:$12 sps:$4 sm:$0xff]   ;;  %v210_v27 = vld [vmem:[%s10540_s5 + $0x30] sm:$0xff]  ;;  %v10829_v59 = vsub.s32 2, %v10735_v4  ;;  %v10832_v60 = vsub.s32 0, %v10735_v4 }
  0x7d   :  { %v10738_v6 = vsub.s32 %v228_v5, %v10735_v4  ;;  %8833 = vmatprep.mubr.msk.bf16.mxu1 %vm241_vm1, %v212_v12  ;;  %v9765_v23 = vld [vmem:[%s10555_s17] ss:$12 sps:$4 sm:$0xff]   ;;  %v214_v24 = vpack.c.bf16 %v209_v20, %v208_v19  ;;  %v9768_v26 = vld [vmem:[%s10555_s17 + $0x18] ss:$12 sps:$4 sm:$0xff]   ;;  %v215_v30 = vpack.c.bf16 %v211_v28, %v210_v27  ;;  %v9771_v31 = vld [vmem:[%s10555_s17 + $0x30] ss:$12 sps:$4 sm:$0xff]  }
  0x7e   :  { %v9773_v29 = vld [vmem:[%s10555_s17 + $0x34] ss:$12 sps:$4 sm:$0xff]   ;;  %v9776_v32 = vld [vmem:[%s10555_s17 + $0x4c] ss:$12 sps:$4 sm:$0xff]   ;;  %v9779_v34 = vld [vmem:[%s10555_s17 + $0x64] ss:$12 sps:$4 sm:$0xff]  }
  0x7f   :  { %13180 = vst [vmem:[#allocation28_spill] sm:$0xff] %v10738_v6  ;;  %v232_v9 = vrot.slane %v7942_v7, %v10738_v6  ;;  %v239_v13 = vrot.slane %v225_v8, %v10738_v6  ;;  %v9774_v33 = vld [vmem:[%s10555_s17 + $0x48] ss:$12 sps:$4 sm:$0xff]   ;;  %v9777_v35 = vld [vmem:[%s10555_s17 + $0x60] ss:$12 sps:$4 sm:$0xff]   ;;  %13181 = vst [vmem:[#allocation29_spill] sm:$0xff] %v10829_v59 }
  0x80   :  { %v9782_v36 = vld [vmem:[%s10555_s17 + $0x7c] ss:$12 sps:$4 sm:$0xff]   ;;  %v9780_v37 = vld [vmem:[%s10555_s17 + $0x78] ss:$12 sps:$4 sm:$0xff]   ;;  %v9785_v38 = vld [vmem:[%s10555_s17 + $0x94] ss:$12 sps:$4 sm:$0xff]  }
  0x81   :  { %v240_v16 = vcombine.high %v232_v9, %v232_v9  ;;  %v256_v17 = vsel %vm254_vm0, %v232_v9, 0  ;;  %7943 = vmatprep.subr.msk.bf16.mxu0 %vm254_vm0, %v239_v13  ;;  %v9783_v39 = vld [vmem:[%s10555_s17 + $0x90] ss:$12 sps:$4 sm:$0xff]   ;;  %v9788_v40 = vld [vmem:[%s10555_s17 + $0xac] ss:$12 sps:$4 sm:$0xff]   ;;  %13182 = vst [vmem:[#allocation30_spill] sm:$0xff] %v10832_v60 }
  0x82   :  { %265 = vmatpush1.bf16.msra.mxu0 %v256_v17  ;;  %v9786_v41 = vld [vmem:[%s10555_s17 + $0xa8] ss:$12 sps:$4 sm:$0xff]   ;;  %v9790_v44 = vld [vmem:[%s10555_s17 + $0x20] ss:$12 sps:$4 sm:$0xff]   ;;  %v9791_v45 = vld [vmem:[%s10555_s17 + $0x38] ss:$12 sps:$4 sm:$0xff]  }
  0x83   :  { %9721 = vmatprep.subr.msk.bf16.mxu1 %vm254_vm0, %v240_v16  ;;  %v262_v21 = vsel %vm254_vm0, %v240_v16, 0  ;;  %938 = vmatprep.subr.bf16.mxu0 %v10750_v18  ;;  %v9789_v42 = vld [vmem:[%s10555_s17 + $0x8] ss:$12 sps:$4 sm:$0xff]   ;;  %v9792_v46 = vld [vmem:[%s10555_s17 + $0x50] ss:$12 sps:$4 sm:$0xff]   ;;  %v10837_v63 = vsub.s32 1, %v10735_v4 }
  0x84   :  { %8832 = vmatpush3.bf16.msra.mxu1 %v262_v21  ;;  %v9793_v47 = vld [vmem:[%s10555_s17 + $0x68] ss:$12 sps:$4 sm:$0xff]   ;;  %v9794_v48 = vld [vmem:[%s10555_s17 + $0x80] ss:$12 sps:$4 sm:$0xff]   ;;  %v9795_v49 = vld [vmem:[%s10555_s17 + $0x98] ss:$12 sps:$4 sm:$0xff]  }
  0x85   :  { %670 = vmatprep.subr.bf16.mxu1 %v10750_v18  ;;  %7944 = vmatmul.mubr.msk.bf16.vlgmr.msra.gmra.mrb[0].mxu0 %vm241_vm1, %v212_v12  ;;  %v9796_v50 = vld [vmem:[%s10555_s17 + $0xb0] ss:$12 sps:$4 sm:$0xff]   ;;  %v9797_v51 = vld [vmem:[%s10555_s17 + $0x8] ss:$12 sps:$4 sm:$0xff]   ;;  %v9798_v52 = vld [vmem:[%s10555_s17 + $0x20] ss:$12 sps:$4 sm:$0xff]  }
  0x86   :  { %306 = vmatprep.mubr.bf16.mxu0 %v13088_v3  ;;  %939 = vmatpush1.bf16.msra.mxu0 %v9765_v23  ;;  %v9799_v53 = vld [vmem:[%s10555_s17 + $0x38] ss:$12 sps:$4 sm:$0xff]   ;;  %v9800_v54 = vld [vmem:[%s10555_s17 + $0x50] ss:$12 sps:$4 sm:$0xff]   ;;  %v9801_v55 = vld [vmem:[%s10555_s17 + $0x68] ss:$12 sps:$4 sm:$0xff]  }
  0x87   :  { %8834 = vmatmul.mubr.msk.bf16.vlgmr.msra.gmra.mrb[0].mxu1 %vm241_vm1, %v213_v22  ;;  %940 = vmatprep.subr.bf16.mxu0 %v9770_v25  ;;  %v9802_v56 = vld [vmem:[%s10555_s17 + $0x80] ss:$12 sps:$4 sm:$0xff]   ;;  %v9803_v57 = vld [vmem:[%s10555_s17 + $0x98] ss:$12 sps:$4 sm:$0xff]   ;;  %v9804_v58 = vld [vmem:[%s10555_s17 + $0xb0] ss:$12 sps:$4 sm:$0xff]  }
  0x88   :  { %671 = vmatpush1.bf16.msra.mxu1 %v9765_v23  ;;  %8837 = vmatprep.mubr.msk.bf16.mxu1 %vm241_vm1, %v214_v24  ;;  %v184_v61 = vld [vmem:[%s10560_s21] sm:$0x7]  ;;  %13183 = vst [vmem:[#allocation31_spill] sm:$0xff] %v10837_v63  ;;  %s13328_s21 = sld [smem:[#allocation27_spill]]  ;;  %s13353_s6 = sld [smem:[#allocation18_spill]] }
  0x89   :  { %672 = vmatprep.subr.bf16.mxu1 %v9770_v25  ;;  %v182_v62 = vld [vmem:[%s10545_s9] sm:$0x7]  ;;  %v197_v0 = vrot.slane %v184_v61, %v10829_v59  ;;  %v10841_v1 = vrot.slane %v184_v61, %v10832_v60  ;;  %v10846_v5 = vrot.slane %v184_v61, %v10837_v63  ;;  %s13259_s9 = sld [smem:[#allocation15_spill]]  ;;  %s13354_s12 = sld [smem:[#allocation22_spill]] }
  0x8a   :  { %941 = vmatpush1.bf16.msra.mxu0 %v9768_v26  ;;  %vm183_vm3 = vcmp.gt.f32.partialorder %v182_v62, 0.5 }
  0x8b   :  { %942 = vmatprep.subr.bf16.mxu0 %v9773_v29  ;;  %v426_v9 = vsel %vm183_vm3, 1, %v13088_v3 }
  0x8c   :  { %673 = vmatpush1.bf16.msra.mxu1 %v9768_v26 }
  0x8d   :  { %674 = vmatprep.subr.bf16.mxu1 %v9773_v29  ;;  %7945 = vmatmul.mubr.msk.bf16.gmra.mrb[4].mxu0 %vm241_vm1, %v213_v22  ;;  %v430_v29 = vrot.slane %v426_v9, %v10832_v60 }
  0x8e   :  { %316 = vmatprep.mubr.bf16.mxu0 %v13088_v3  ;;  %943 = vmatpush1.bf16.msra.mxu0 %v9771_v31 }
  0x8f   :  { %8838 = vmatmul.mubr.msk.bf16.gmra.mrb[4].mxu1 %vm241_vm1, %v215_v30  ;;  %944 = vmatprep.subr.bf16.mxu0 %v9776_v32  ;;  %vm10924_vm5 = vcmp.eq.s32.totalorder %v430_v29, 1  ;;  %v490_v29 = vld [vmem:[%s10565_s25] sm:$0x7]  ;;  %s13337_s25 = sld [smem:[#allocation19_spill]] }
  0x90   :  { %675 = vmatpush1.bf16.msra.mxu1 %v9771_v31  ;;  %702 = vmatprep.mubr.bf16.mxu1 %v13088_v3 }
  0x91   :  { %676 = vmatprep.subr.bf16.mxu1 %v9776_v32 }
  0x92   :  { %945 = vmatpush1.bf16.msra.mxu0 %v9774_v33 }
  0x93   :  { %946 = vmatprep.subr.bf16.mxu0 %v9779_v34 }
  0x94   :  { %677 = vmatpush1.bf16.msra.mxu1 %v9774_v33 }
  0x95   :  { %678 = vmatprep.subr.bf16.mxu1 %v9779_v34  ;;  %7946 = vmatmul.mubr.msk.bf16.gmra.mrb[8].mxu0 %vm241_vm1, %v214_v24 }
  0x96   :  { %326 = vmatprep.mubr.bf16.mxu0 %v13088_v3  ;;  %947 = vmatpush1.bf16.msra.mxu0 %v9777_v35 }
  0x97   :  { %948 = vmatprep.subr.bf16.mxu0 %v9782_v36 }
  0x98   :  { %679 = vmatpush1.bf16.msra.mxu1 %v9777_v35 }
  0x99   :  { %680 = vmatprep.subr.bf16.mxu1 %v9782_v36 }
  0x9a   :  { %949 = vmatpush1.bf16.msra.mxu0 %v9780_v37 }
  0x9b   :  { %950 = vmatprep.subr.bf16.mxu0 %v9785_v38 }
  0x9c   :  { %681 = vmatpush1.bf16.msra.mxu1 %v9780_v37 }
  0x9d   :  { %682 = vmatprep.subr.bf16.mxu1 %v9785_v38  ;;  %7947 = vmatmul.mubr.msk.bf16.gmra.mrb[12].mxu0 %vm241_vm1, %v215_v30 }
  0x9e   :  { %970 = vmatprep.mubr.bf16.mxu0 %v13088_v3  ;;  %951 = vmatpush1.bf16.msra.mxu0 %v9783_v39 }
  0x9f   :  { %952 = vmatprep.subr.bf16.mxu0 %v9788_v40 }
  0xa0   :  { %683 = vmatpush1.bf16.msra.mxu1 %v9783_v39 }
  0xa1   :  { %684 = vmatprep.subr.bf16.mxu1 %v9788_v40  ;;  %v434_v40 = vrot.slane %v426_v9, %v10837_v63 }
  0xa2   :  { %953 = vmatpush1.bf16.msra.mxu0 %v9786_v41 }
  0xa3   :  { %1206 = vmatprep.subr.bf16.mxu0 %v10750_v18  ;;  %v438_v18 = vrot.slane %v426_v9, %v10829_v59  ;;  %vm10928_vm6 = vcmp.eq.s32.totalorder %v434_v40, 1 }
  0xa4   :  { %685 = vmatpush1.bf16.msra.mxu1 %v9786_v41  ;;  %v9807_v41 = vld [vmem:[%s10555_s17 + $0x38] ss:$12 sps:$4 sm:$0xff]  }
  0xa5   :  { %8841 = vmatprep.subr.bf16.mxu1 %v13090_v43  ;;  %vm10864_vm4 = vcmp.eq.s32.totalorder %v438_v18, 1 }
  0xa7   :  { %703 = vmatmul.mubr.bf16.vlgmr.msra.gmra.mrb[8].mxu1 %v13088_v3 }
  0xa8   :  { %8842 = vmatpush3.bf16.msra.mxu1 %v9789_v42  ;;  %8857 = vmatprep.mubr.msk.bf16.mxu1 %vm10530_vm2, %v13090_v43  ;;  %v11038_v42 = vrot.slane %v490_v29, %v10829_v59 }
  0xa9   :  { %8843 = vmatprep.subr.bf16.mxu1 %v13090_v43 }
  0xac   :  { %8844 = vmatpush3.bf16.msra.mxu1 %v9790_v44 }
  0xad   :  { %8845 = vmatprep.subr.bf16.mxu1 %v13090_v43 }
  0xb0   :  { %8846 = vmatpush3.bf16.msra.mxu1 %v9791_v45 }
  0xb1   :  { %8847 = vmatprep.subr.bf16.mxu1 %v13090_v43 }
  0xb4   :  { %8848 = vmatpush3.bf16.msra.mxu1 %v9792_v46 }
  0xb5   :  { %8849 = vmatprep.subr.bf16.mxu1 %v13090_v43 }
  0xb8   :  { %8850 = vmatpush3.bf16.msra.mxu1 %v9793_v47 }
  0xb9   :  { %8851 = vmatprep.subr.bf16.mxu1 %v13090_v43 }
  0xbc   :  { %8852 = vmatpush3.bf16.msra.mxu1 %v9794_v48 }
  0xbd   :  { %8853 = vmatprep.subr.bf16.mxu1 %v13090_v43 }
  0xc0   :  { %8854 = vmatpush3.bf16.msra.mxu1 %v9795_v49 }
  0xc1   :  { %8855 = vmatprep.subr.bf16.mxu1 %v13090_v43 }
  0xc4   :  { %8856 = vmatpush3.bf16.msra.mxu1 %v9796_v50 }
  0xc5   :  { %8861 = vmatprep.subr.bf16.mxu1 %v13090_v43 }
  0xc7   :  { %8858 = vmatmul.mubr.bf16.vlgmr.msra.gmra.mrb[12].mxu1 %v13088_v3 }
  0xc8   :  { %8877 = vmatprep.mubr.msk.bf16.mxu1 %vm10530_vm2, %v13090_v43  ;;  %8862 = vmatpush3.bf16.msra.mxu1 %v9797_v51 }
  0xc9   :  { %8863 = vmatprep.subr.bf16.mxu1 %v13090_v43 }
  0xcc   :  { %8864 = vmatpush3.bf16.msra.mxu1 %v9798_v52 }
  0xcd   :  { %8865 = vmatprep.subr.bf16.mxu1 %v13090_v43 }
  0xd0   :  { %8866 = vmatpush3.bf16.msra.mxu1 %v9799_v53 }
  0xd1   :  { %8867 = vmatprep.subr.bf16.mxu1 %v13090_v43 }
  0xd4   :  { %8868 = vmatpush3.bf16.msra.mxu1 %v9800_v54 }
  0xd5   :  { %8869 = vmatprep.subr.bf16.mxu1 %v13090_v43 }
  0xd8   :  { %8870 = vmatpush3.bf16.msra.mxu1 %v9801_v55 }
  0xd9   :  { %8871 = vmatprep.subr.bf16.mxu1 %v13090_v43 }
  0xdc   :  { %8872 = vmatpush3.bf16.msra.mxu1 %v9802_v56 }
  0xdd   :  { %8873 = vmatprep.subr.bf16.mxu1 %v13090_v43 }
  0xe0   :  { %8874 = vmatpush3.bf16.msra.mxu1 %v9803_v57 }
  0xe1   :  { %8875 = vmatprep.subr.bf16.mxu1 %v13090_v43 }
  0xe4   :  { %8876 = vmatpush3.bf16.msra.mxu1 %v9804_v58  ;;  %v9812_v58 = vld [vmem:[%s10555_s17 + $0xb0] ss:$12 sps:$4 sm:$0xff]  }
  0xe5   :  { %8881 = vmatprep.subr.bf16.mxu1 %v13090_v43 }
 0x158   :  { %v10843_v2 = vpop.f32.mrb[0].mxu0 }
 0x159   :  { %v10848_v8 = vpop.f32.mrb[1].mxu0 }
 0x15a   :  { %v8835_v7 = vpop.f32.mrb[0].mxu1  ;;  %v302_v11 = vpop.f32.mrb[2].mxu0 }
 0x15b   :  { %v10851_v10 = vadd.f32 %v8835_v7, %v197_v0  ;;  %v371_v4 = vpop.f32.mrb[1].mxu1  ;;  %v10854_v13 = vadd.f32 %v302_v11, %v10841_v1  ;;  %v304_v14 = vpop.f32.mrb[3].mxu0 }
 0x15c   :  { %v8836_v12 = vpop.f32.mrb[2].mxu1  ;;  %v10859_v17 = vadd.f32 %v304_v14, %v10846_v5  ;;  %v10877_v30 = vadd.f32 %v371_v4, %v197_v0 }
 0x15d   :  { %v10856_v15 = vadd.f32 %v8836_v12, %v197_v0  ;;  %v374_v16 = vpop.f32.mrb[3].mxu1 }
 0x15e   :  { %v10862_v19 = vadd.f32 %v374_v16, %v197_v0  ;;  %13186 = vst [vmem:[#allocation32_spill] sm:$0xff] %v10877_v30 }
 0x160   :  { %v308_v20 = vpop.f32.mrb[4].mxu0 }
 0x161   :  { %v10869_v23 = vadd.f32 %v308_v20, %v10841_v1  ;;  %v310_v24 = vpop.f32.mrb[5].mxu0 }
 0x162   :  { %v8839_v22 = vpop.f32.mrb[4].mxu1  ;;  %v10874_v27 = vadd.f32 %v310_v24, %v10846_v5  ;;  %v312_v28 = vpop.f32.mrb[6].mxu0  ;;  %v10984_v24 = vadd.f32 %v10843_v2, %v10841_v1 }
 0x163   :  { %v10871_v25 = vadd.f32 %v8839_v22, %v197_v0  ;;  %v387_v26 = vpop.f32.mrb[5].mxu1  ;;  %v10882_v33 = vadd.f32 %v312_v28, %v10841_v1  ;;  %v314_v34 = vpop.f32.mrb[7].mxu0 }
 0x164   :  { %v10879_v31 = vadd.f32 %v387_v26, %v197_v0  ;;  %v8840_v32 = vpop.f32.mrb[6].mxu1  ;;  %v10895_v39 = vadd.f32 %v314_v34, %v10846_v5 }
 0x165   :  { %v10892_v37 = vadd.f32 %v8840_v32, %v197_v0  ;;  %v390_v38 = vpop.f32.mrb[7].mxu1 }
 0x166   :  { %v10906_v44 = vadd.f32 %v390_v38, %v197_v0  ;;  %v11000_v38 = vadd.f32 %v10848_v8, %v10846_v5  ;;  %v11022_v8 = vrot.slane %v490_v29, %v10832_v60  ;;  %v9808_v0 = vld [vmem:[%s10555_s17 + $0x50] ss:$12 sps:$4 sm:$0xff]  }
 0x167   :  { %13187 = vst [vmem:[#allocation33_spill] sm:$0xff] %v10892_v37  ;;  %v444_v45 = vsel %vm10864_vm4, %v10877_v30, %v10892_v37 }
 0x168   :  { %v318_v50 = vpop.f32.mrb[8].mxu0 }
 0x169   :  { %v10933_v52 = vadd.f32 %v318_v50, %v10841_v1  ;;  %v320_v53 = vpop.f32.mrb[9].mxu0 }
 0x16a   :  { %v10936_v54 = vadd.f32 %v320_v53, %v10846_v5  ;;  %v322_v55 = vpop.f32.mrb[10].mxu0 }
 0x16b   :  { %v10939_v56 = vadd.f32 %v322_v55, %v10841_v1  ;;  %v324_v57 = vpop.f32.mrb[11].mxu0 }
 0x16c   :  { %v10950_v62 = vadd.f32 %v324_v57, %v10846_v5  ;;  %v11033_v57 = vrot.slane %v490_v29, %v10837_v63 }
 0x170   :  { %v328_v14 = vpop.f32.mrb[12].mxu0 }
 0x171   :  { %v10977_v16 = vadd.f32 %v328_v14, %v10841_v1  ;;  %v330_v18 = vpop.f32.mrb[13].mxu0 }
 0x172   :  { %v10980_v20 = vadd.f32 %v330_v18, %v10846_v5  ;;  %v332_v22 = vpop.f32.mrb[14].mxu0 }
 0x173   :  { %v10987_v26 = vadd.f32 %v332_v22, %v10841_v1  ;;  %v334_v28 = vpop.f32.mrb[15].mxu0  ;;  %v448_v32 = vsel %vm10924_vm5, %v10854_v13, %v10977_v16 }
 0x174   :  { %v11003_v2 = vadd.f32 %v334_v28, %v10846_v5  ;;  %v449_v1 = vsel %vm10928_vm6, %v10859_v17, %v10980_v20 }
 0x175   :  { %v442_v50 = vsel %vm10924_vm5, %v10984_v24, %v10987_v26 }
 0x176   :  { %v443_v53 = vsel %vm10928_vm6, %v11000_v38, %v11003_v2 }
 0x17a   :  { %v704_v14 = vpop.f32.mrb[8].mxu1 }
 0x17b   :  { %v705_v18 = vadd.f32 %v704_v14, %v11022_v8  ;;  %v706_v22 = vpop.f32.mrb[9].mxu1 }
 0x17c   :  { %v707_v28 = vadd.f32 %v706_v22, %v11033_v57  ;;  %v708_v46 = vpop.f32.mrb[10].mxu1 }
 0x17d   :  { %v751_v5 = vadd.f32 %v705_v18, %v442_v50  ;;  %v709_v36 = vpop.f32.mrb[11].mxu1  ;;  %v11066_v18 = vld [vmem:[%s10555_s17 + $0x34] ss:$12 sps:$4 sm:$0xff]  }
 0x17e   :  { %v752_v40 = vadd.f32 %v707_v28, %v443_v53  ;;  %v11070_v28 = vld [vmem:[%s10555_s17 + $0x30] ss:$12 sps:$4 sm:$0xff]  }
 0x17f   :  { %v7976_v34 = vmul.f32 -1.442695, %v751_v5 }
 0x180   :  { %v7977_v48 = vmul.f32 -1.442695, %v752_v40 }
 0x181   :  { %10117 = vpow2.f32 %v7976_v34 }
 0x182   :  { %10119 = vpow2.f32 %v7977_v48 }
 0x18b   :  { %v10118_v12 = vpop.eup %10117 }
 0x18c   :  { %v759_v4 = vadd.f32 1.0, %v10118_v12  ;;  %v10120_v55 = vpop.eup %10119 }
 0x18d   :  { %v760_v7 = vadd.f32 1.0, %v10120_v55  ;;  %v11062_v55 = vld [vmem:[%s10555_s17 + $0x18] ss:$12 sps:$4 sm:$0xff]  }
 0x18e   :  { %10121 = vrcp.f32 %v759_v4 }
 0x18f   :  { %10123 = vrcp.f32 %v760_v7  ;;  %v11051_v7 = vld [vmem:[%s10555_s17] ss:$12 sps:$4 sm:$0xff]  }
 0x198   :  { %v10122_v46 = vpop.eup %10121 }
 0x199   :  { %v10124_v4 = vpop.eup %10123 }
 0x19a   :  { %v745_v14 = vpop.f32.mrb[12].mxu1  ;;  %v768_v12 = vsub.f32 1.0, %v10124_v4  ;;  %v770_v40 = vmul.f32 0.0, %v10124_v4  ;;  %v11102_v4 = vld [vmem:[%s10555_s17 + $0x90] ss:$12 sps:$4 sm:$0xff]  }
 0x19b   :  { %v746_v61 = vadd.f32 %v745_v14, %v11038_v42  ;;  %v8859_v22 = vpop.f32.mrb[13].mxu1  ;;  %v11074_v14 = vld [vmem:[%s10555_s17 + $0x4c] ss:$12 sps:$4 sm:$0xff]  }
 0x19c   :  { %v748_v36 = vpop.f32.mrb[14].mxu1  ;;  %v11078_v22 = vld [vmem:[%s10555_s17 + $0x48] ss:$12 sps:$4 sm:$0xff]  }
 0x19d   :  { %v765_v50 = vmul.f32 %v10122_v46, %v746_v61  ;;  %v8860_v34 = vpop.f32.mrb[15].mxu1  ;;  %v11082_v46 = vld [vmem:[%s10555_s17 + $0x64] ss:$12 sps:$4 sm:$0xff]   ;;  %v11086_v36 = vld [vmem:[%s10555_s17 + $0x60] ss:$12 sps:$4 sm:$0xff]  }
 0x19e   :  { %v11094_v34 = vld [vmem:[%s10555_s17 + $0x78] ss:$12 sps:$4 sm:$0xff]  }
 0x19f   :  { %v766_v48 = vadd.f32 %v765_v50, %v444_v45  ;;  %v11056_v45 = vld [vmem:[%s10555_s17 + $0x1c] ss:$12 sps:$4 sm:$0xff]  }
 0x1a0   :  { %v11090_v50 = vld [vmem:[%s10555_s17 + $0x7c] ss:$12 sps:$4 sm:$0xff]  }
 0x1a1   :  { %10125 = vtanh.f32 %v766_v48  ;;  %v11098_v48 = vld [vmem:[%s10555_s17 + $0x94] ss:$12 sps:$4 sm:$0xff]  }
 0x1ab   :  { %v10126_v29 = vpop.eup %10125 }
 0x1ac   :  { %v769_v5 = vmul.f32 %v10126_v29, %v768_v12  ;;  %v11106_v12 = vld [vmem:[%s10555_s17 + $0xac] ss:$12 sps:$4 sm:$0xff]   ;;  %v11110_v29 = vld [vmem:[%s10555_s17 + $0xa8] ss:$12 sps:$4 sm:$0xff]  }
 0x1ae   :  { %v11046_v53 = vadd.f32 %v770_v40, %v769_v5  ;;  %v10372_v40 = vld [vmem:[%s10555_s17 + $0x4] ss:$12 sps:$4 sm:$0xff]   ;;  %v9805_v5 = vld [vmem:[%s10555_s17 + $0x8] ss:$12 sps:$4 sm:$0xff]  }
 0x1b0   :  { %13192 = vst [vmem:[#allocation34_spill] sm:$0xff] %v11046_v53  ;;  %v777_v61 = vpack.c.bf16 %v11046_v53, %v11046_v53 }
 0x1b2   :  { %971 = vmatmul.mubr.bf16.vlgmr.msra.gmra.mrb[16].mxu0 %v777_v61  ;;  %8878 = vmatmul.mubr.bf16.vlgmr.msra.gmra.mrb[16].mxu1 %v777_v61  ;;  %v9806_v61 = vld [vmem:[%s10555_s17 + $0x20] ss:$12 sps:$4 sm:$0xff]  }
 0x1b3   :  { %1207 = vmatpush1.bf16.msra.mxu0 %v11051_v7  ;;  %1238 = vmatprep.mubr.bf16.mxu0 %v13088_v3 }
 0x1b4   :  { %1208 = vmatprep.subr.bf16.mxu0 %v11056_v45  ;;  %8897 = vmatprep.mubr.msk.bf16.mxu1 %vm10530_vm2, %v13090_v43 }
 0x1b5   :  { %8882 = vmatpush3.bf16.msra.mxu1 %v9805_v5  ;;  %v9810_v5 = vld [vmem:[%s10555_s17 + $0x80] ss:$12 sps:$4 sm:$0xff]  }
 0x1b6   :  { %8883 = vmatprep.subr.bf16.mxu1 %v13090_v43 }
 0x1b7   :  { %1209 = vmatpush1.bf16.msra.mxu0 %v11062_v55 }
 0x1b8   :  { %1210 = vmatprep.subr.bf16.mxu0 %v11066_v18 }
 0x1b9   :  { %8884 = vmatpush3.bf16.msra.mxu1 %v9806_v61  ;;  %v9811_v61 = vld [vmem:[%s10555_s17 + $0x98] ss:$12 sps:$4 sm:$0xff]  }
 0x1ba   :  { %8885 = vmatprep.subr.bf16.mxu1 %v13090_v43 }
 0x1bb   :  { %1211 = vmatpush1.bf16.msra.mxu0 %v11070_v28 }
 0x1bc   :  { %1212 = vmatprep.subr.bf16.mxu0 %v11074_v14 }
 0x1bd   :  { %8886 = vmatpush3.bf16.msra.mxu1 %v9807_v41 }
 0x1be   :  { %8887 = vmatprep.subr.bf16.mxu1 %v13090_v43 }
 0x1bf   :  { %1213 = vmatpush1.bf16.msra.mxu0 %v11078_v22 }
 0x1c0   :  { %1214 = vmatprep.subr.bf16.mxu0 %v11082_v46 }
 0x1c1   :  { %8888 = vmatpush3.bf16.msra.mxu1 %v9808_v0 }
 0x1c2   :  { %8889 = vmatprep.subr.bf16.mxu1 %v13090_v43 }
 0x1c3   :  { %1215 = vmatpush1.bf16.msra.mxu0 %v11086_v36 }
 0x1c4   :  { %1216 = vmatprep.subr.bf16.mxu0 %v11090_v50 }
 0x1c7   :  { %1217 = vmatpush1.bf16.msra.mxu0 %v11094_v34 }
 0x1c8   :  { %1218 = vmatprep.subr.bf16.mxu0 %v11098_v48 }
 0x1cb   :  { %1219 = vmatpush1.bf16.msra.mxu0 %v11102_v4 }
 0x1cc   :  { %1220 = vmatprep.subr.bf16.mxu0 %v11106_v12 }
 0x1cf   :  { %1221 = vmatpush1.bf16.msra.mxu0 %v11110_v29 }
 0x1d0   :  { %1474 = vmatprep.subr.bf16.mxu0 %v10372_v40  ;;  %v9809_v40 = vld [vmem:[%s10555_s17 + $0x68] ss:$12 sps:$4 sm:$0xff]  }
 0x1d1   :  { %8890 = vmatpush3.bf16.msra.mxu1 %v9809_v40 }
 0x1d2   :  { %8891 = vmatprep.subr.bf16.mxu1 %v13090_v43 }
 0x1d5   :  { %8892 = vmatpush3.bf16.msra.mxu1 %v9810_v5 }
 0x1d6   :  { %8893 = vmatprep.subr.bf16.mxu1 %v13090_v43 }
 0x1d9   :  { %8894 = vmatpush3.bf16.msra.mxu1 %v9811_v61 }
 0x1da   :  { %8895 = vmatprep.subr.bf16.mxu1 %v13090_v43 }
 0x1dd   :  { %8896 = vmatpush3.bf16.msra.mxu1 %v9812_v58 }
 0x1de   :  { %8901 = vmatprep.subr.bf16.mxu1 %v13090_v43 }
 0x285   :  { %v972_v41 = vpop.f32.mrb[16].mxu0  ;;  %v1013_v0 = vpop.f32.mrb[16].mxu1 }
 0x286   :  { %v973_v47 = vadd.f32 %v972_v41, %v11022_v8  ;;  %v974_v11 = vpop.f32.mrb[17].mxu0  ;;  %v8879_v40 = vpop.f32.mrb[17].mxu1  ;;  %v1014_v60 = vadd.f32 %v1013_v0, %v11038_v42 }
 0x287   :  { %v975_v9 = vadd.f32 %v974_v11, %v11033_v57  ;;  %v976_v3 = vpop.f32.mrb[18].mxu0  ;;  %v1016_v5 = vpop.f32.mrb[18].mxu1 }
 0x288   :  { %v1019_v61 = vadd.f32 %v973_v47, %v448_v32  ;;  %v977_v35 = vpop.f32.mrb[19].mxu0  ;;  %v8880_v58 = vpop.f32.mrb[19].mxu1  ;;  %v13193_v32 = vsel %vm10864_vm4, %v10862_v19, %v10871_v25 }
 0x289   :  { %v1020_v41 = vadd.f32 %v975_v9, %v449_v1 }
 0x28a   :  { %v8002_v43 = vmul.f32 -1.442695, %v1019_v61 }
 0x28b   :  { %v8003_v40 = vmul.f32 -1.442695, %v1020_v41 }
 0x28c   :  { %10127 = vpow2.f32 %v8002_v43 }
 0x28d   :  { %10129 = vpow2.f32 %v8003_v40 }
 0x296   :  { %v10128_v3 = vpop.eup %10127 }
 0x297   :  { %v1027_v11 = vadd.f32 1.0, %v10128_v3  ;;  %v10130_v5 = vpop.eup %10129 }
 0x298   :  { %v1028_v63 = vadd.f32 1.0, %v10130_v5 }
 0x299   :  { %10131 = vrcp.f32 %v1027_v11  ;;  %v13197_v11 = vsel %vm10924_vm5, %v10869_v23, %v10939_v56 }
 0x29a   :  { %10133 = vrcp.f32 %v1028_v63  ;;  %v13196_v63 = vmov 0.0  }
 0x2a3   :  { %v10132_v47 = vpop.eup %10131 }
 0x2a4   :  { %v1033_v35 = vmul.f32 %v10132_v47, %v1014_v60  ;;  %v10134_v43 = vpop.eup %10133  ;;  %v13195_v60 = vmov 0  }
 0x2a5   :  { %v1036_v1 = vsub.f32 1.0, %v10134_v43  ;;  %v1038_v41 = vmul.f32 %v10134_v43, %v11046_v53 }
 0x2a6   :  { %v1034_v9 = vadd.f32 %v1033_v35, %v13193_v32  ;;  %v13198_v32 = vsel %vm10928_vm6, %v10874_v27, %v10950_v62 }
 0x2a8   :  { %10135 = vtanh.f32 %v1034_v9 }
 0x2b2   :  { %v10136_v61 = vpop.eup %10135 }
 0x2b3   :  { %v1037_v58 = vmul.f32 %v10136_v61, %v1036_v1 }
 0x2b5   :  { %v11149_v40 = vadd.f32 %v1038_v41, %v1037_v58 }
 0x2b7   :  { %13194 = vst [vmem:[#allocation35_spill] sm:$0xff] %v11149_v40  ;;  %v1045_v0 = vpack.c.bf16 %v11149_v40, %v11149_v40 }
 0x2b9   :  { %1239 = vmatmul.mubr.bf16.vlgmr.msra.gmra.mrb[20].mxu0 %v1045_v0  ;;  %8898 = vmatmul.mubr.bf16.vlgmr.msra.gmra.mrb[20].mxu1 %v1045_v0 }
 0x2ba   :  { %1475 = vmatpush1.bf16.msra.mxu0 %v11051_v7  ;;  %1506 = vmatprep.mubr.bf16.mxu0 %v13195_v60  ;;  %v9813_v7 = vld [vmem:[%s10555_s17 + $0x8] ss:$12 sps:$4 sm:$0xff]  }
 0x2bb   :  { %1476 = vmatprep.subr.bf16.mxu0 %v11056_v45  ;;  %8917 = vmatprep.mubr.msk.bf16.mxu1 %vm10530_vm2, %v13196_v63  ;;  %v9814_v45 = vld [vmem:[%s10555_s17 + $0x20] ss:$12 sps:$4 sm:$0xff]  }
 0x2bc   :  { %8902 = vmatpush3.bf16.msra.mxu1 %v9813_v7 }
 0x2bd   :  { %8903 = vmatprep.subr.bf16.mxu1 %v13196_v63 }
 0x2be   :  { %1477 = vmatpush1.bf16.msra.mxu0 %v11062_v55  ;;  %v9815_v55 = vld [vmem:[%s10555_s17 + $0x38] ss:$12 sps:$4 sm:$0xff]  }
 0x2bf   :  { %1478 = vmatprep.subr.bf16.mxu0 %v11066_v18  ;;  %v9816_v18 = vld [vmem:[%s10555_s17 + $0x50] ss:$12 sps:$4 sm:$0xff]  }
 0x2c0   :  { %8904 = vmatpush3.bf16.msra.mxu1 %v9814_v45 }
 0x2c1   :  { %8905 = vmatprep.subr.bf16.mxu1 %v13196_v63 }
 0x2c2   :  { %1479 = vmatpush1.bf16.msra.mxu0 %v11070_v28  ;;  %v9817_v28 = vld [vmem:[%s10555_s17 + $0x68] ss:$12 sps:$4 sm:$0xff]  }
 0x2c3   :  { %1480 = vmatprep.subr.bf16.mxu0 %v11074_v14  ;;  %v9818_v14 = vld [vmem:[%s10555_s17 + $0x80] ss:$12 sps:$4 sm:$0xff]  }
 0x2c4   :  { %8906 = vmatpush3.bf16.msra.mxu1 %v9815_v55 }
 0x2c5   :  { %8907 = vmatprep.subr.bf16.mxu1 %v13196_v63 }
 0x2c6   :  { %1481 = vmatpush1.bf16.msra.mxu0 %v11078_v22  ;;  %v9819_v22 = vld [vmem:[%s10555_s17 + $0x98] ss:$12 sps:$4 sm:$0xff]  }
 0x2c7   :  { %1482 = vmatprep.subr.bf16.mxu0 %v11082_v46  ;;  %v9820_v46 = vld [vmem:[%s10555_s17 + $0xb0] ss:$12 sps:$4 sm:$0xff]  }
 0x2c8   :  { %8908 = vmatpush3.bf16.msra.mxu1 %v9816_v18  ;;  %v13199_v18 = vsel %vm10864_vm4, %v10851_v10, %v10906_v44 }
 0x2c9   :  { %8909 = vmatprep.subr.bf16.mxu1 %v13196_v63 }
 0x2ca   :  { %1483 = vmatpush1.bf16.msra.mxu0 %v11086_v36 }
 0x2cb   :  { %1484 = vmatprep.subr.bf16.mxu0 %v11090_v50 }
 0x2cc   :  { %8910 = vmatpush3.bf16.msra.mxu1 %v9817_v28 }
 0x2cd   :  { %8911 = vmatprep.subr.bf16.mxu1 %v13196_v63 }
 0x2ce   :  { %1485 = vmatpush1.bf16.msra.mxu0 %v11094_v34 }
 0x2cf   :  { %1486 = vmatprep.subr.bf16.mxu0 %v11098_v48 }
 0x2d0   :  { %8912 = vmatpush3.bf16.msra.mxu1 %v9818_v14 }
 0x2d1   :  { %8913 = vmatprep.subr.bf16.mxu1 %v13196_v63 }
 0x2d2   :  { %1487 = vmatpush1.bf16.msra.mxu0 %v11102_v4 }
 0x2d3   :  { %1488 = vmatprep.subr.bf16.mxu0 %v11106_v12 }
 0x2d4   :  { %8914 = vmatpush3.bf16.msra.mxu1 %v9819_v22 }
 0x2d5   :  { %8915 = vmatprep.subr.bf16.mxu1 %v13196_v63 }
 0x2d6   :  { %1489 = vmatpush1.bf16.msra.mxu0 %v11110_v29 }
 0x2d8   :  { %8916 = vmatpush3.bf16.msra.mxu1 %v9820_v46 }
 0x2d9   :  { %8921 = vmatprep.subr.bf16.mxu1 %v13196_v63 }
 0x38c   :  { %v1240_v36 = vpop.f32.mrb[20].mxu0  ;;  %v1281_v50 = vpop.f32.mrb[20].mxu1 }
 0x38d   :  { %v1241_v34 = vadd.f32 %v1240_v36, %v11022_v8  ;;  %v1242_v48 = vpop.f32.mrb[21].mxu0  ;;  %v8899_v4 = vpop.f32.mrb[21].mxu1  ;;  %v1282_v7 = vadd.f32 %v1281_v50, %v11038_v42 }
 0x38e   :  { %v1243_v12 = vadd.f32 %v1242_v48, %v11033_v57  ;;  %v1244_v29 = vpop.f32.mrb[22].mxu0  ;;  %v1284_v3 = vpop.f32.mrb[22].mxu1  ;;  %v11214_v4 = vld [vmem:[%s10555_s17 + $0x4] ss:$12 sps:$4 sm:$0xff]  }
 0x38f   :  { %v1287_v5 = vadd.f32 %v1241_v34, %v13197_v11  ;;  %v1245_v47 = vpop.f32.mrb[23].mxu0  ;;  %v8900_v35 = vpop.f32.mrb[23].mxu1  ;;  %v9824_v29 = vld [vmem:[%s10555_s17 + $0x8] ss:$12 sps:$4 sm:$0xff]   ;;  %1742 = vmatprep.subr.bf16.mxu0 %v11214_v4  ;;  %v11227_v11 = vld [vmem:[%s10555_s17 + $0x18] ss:$12 sps:$4 sm:$0xff]  }
 0x390   :  { %v1288_v9 = vadd.f32 %v1243_v12, %v13198_v32  ;;  %v11217_v12 = vld [vmem:[%s10555_s17] ss:$12 sps:$4 sm:$0xff]   ;;  %v11223_v3 = vld [vmem:[%s10555_s17 + $0x1c] ss:$12 sps:$4 sm:$0xff]   ;;  %v9832_v32 = vld [vmem:[%s10555_s17 + $0x38] ss:$12 sps:$4 sm:$0xff]  }
 0x391   :  { %v8028_v43 = vmul.f32 -1.442695, %v1287_v5  ;;  %v9828_v5 = vld [vmem:[%s10555_s17 + $0x20] ss:$12 sps:$4 sm:$0xff]   ;;  %v11237_v35 = vld [vmem:[%s10555_s17 + $0x30] ss:$12 sps:$4 sm:$0xff]  }
 0x392   :  { %v8029_v1 = vmul.f32 -1.442695, %v1288_v9  ;;  %v11233_v47 = vld [vmem:[%s10555_s17 + $0x34] ss:$12 sps:$4 sm:$0xff]   ;;  %v11243_v9 = vld [vmem:[%s10555_s17 + $0x4c] ss:$12 sps:$4 sm:$0xff]  }
 0x393   :  { %10137 = vpow2.f32 %v8028_v43  ;;  %v11247_v43 = vld [vmem:[%s10555_s17 + $0x48] ss:$12 sps:$4 sm:$0xff]  }
 0x394   :  { %10139 = vpow2.f32 %v8029_v1  ;;  %v9836_v1 = vld [vmem:[%s10555_s17 + $0x50] ss:$12 sps:$4 sm:$0xff]  }
 0x39d   :  { %v10138_v61 = vpop.eup %10137 }
 0x39e   :  { %v1295_v58 = vadd.f32 1.0, %v10138_v61  ;;  %v10140_v41 = vpop.eup %10139  ;;  %v11253_v61 = vld [vmem:[%s10555_s17 + $0x64] ss:$12 sps:$4 sm:$0xff]  }
 0x39f   :  { %v1296_v0 = vadd.f32 1.0, %v10140_v41  ;;  %v9840_v41 = vld [vmem:[%s10555_s17 + $0x68] ss:$12 sps:$4 sm:$0xff]  }
 0x3a0   :  { %10141 = vrcp.f32 %v1295_v58  ;;  %v11257_v58 = vld [vmem:[%s10555_s17 + $0x60] ss:$12 sps:$4 sm:$0xff]  }
 0x3a1   :  { %10143 = vrcp.f32 %v1296_v0  ;;  %v11263_v0 = vld [vmem:[%s10555_s17 + $0x7c] ss:$12 sps:$4 sm:$0xff]  }
 0x3aa   :  { %v10142_v45 = vpop.eup %10141 }
 0x3ab   :  { %v1301_v55 = vmul.f32 %v10142_v45, %v1282_v7  ;;  %v10144_v14 = vpop.eup %10143  ;;  %v11267_v7 = vld [vmem:[%s10555_s17 + $0x78] ss:$12 sps:$4 sm:$0xff]   ;;  %v9844_v45 = vld [vmem:[%s10555_s17 + $0x80] ss:$12 sps:$4 sm:$0xff]  }
 0x3ac   :  { %v1304_v22 = vsub.f32 1.0, %v10144_v14  ;;  %v1306_v50 = vmul.f32 %v10144_v14, %v11149_v40  ;;  %v11283_v14 = vld [vmem:[%s10555_s17 + $0xac] ss:$12 sps:$4 sm:$0xff]   ;;  %v13202_v40 = vsel %vm10928_vm6, %v10895_v39, %v10936_v54 }
 0x3ad   :  { %v1302_v28 = vadd.f32 %v1301_v55, %v13199_v18  ;;  %v11273_v55 = vld [vmem:[%s10555_s17 + $0x94] ss:$12 sps:$4 sm:$0xff]   ;;  %v11277_v18 = vld [vmem:[%s10555_s17 + $0x90] ss:$12 sps:$4 sm:$0xff]  }
 0x3af   :  { %10145 = vtanh.f32 %v1302_v28  ;;  %v9848_v28 = vld [vmem:[%s10555_s17 + $0x98] ss:$12 sps:$4 sm:$0xff]  }
 0x3b9   :  { %v10146_v46 = vpop.eup %10145 }
 0x3ba   :  { %v1305_v36 = vmul.f32 %v10146_v46, %v1304_v22  ;;  %v11287_v22 = vld [vmem:[%s10555_s17 + $0xa8] ss:$12 sps:$4 sm:$0xff]   ;;  %v9852_v46 = vld [vmem:[%s10555_s17 + $0xb0] ss:$12 sps:$4 sm:$0xff]  }
 0x3bc   :  { %v11206_v34 = vadd.f32 %v1306_v50, %v1305_v36 }
 0x3be   :  { %13200 = vst [vmem:[#allocation36_spill] sm:$0xff] %v11206_v34  ;;  %v1313_v48 = vpack.c.bf16 %v11206_v34, %v11206_v34 }
 0x3c0   :  { %1507 = vmatmul.mubr.bf16.vlgmr.msra.gmra.mrb[24].mxu0 %v1313_v48  ;;  %8918 = vmatmul.mubr.bf16.vlgmr.msra.gmra.mrb[24].mxu1 %v1313_v48 }
 0x3c1   :  { %1774 = vmatprep.mubr.bf16.mxu0 %v13195_v60  ;;  %8937 = vmatprep.mubr.msk.bf16.mxu1 %vm10530_vm2, %v13196_v63 }
 0x3c2   :  { %1743 = vmatpush1.bf16.msra.mxu0 %v11217_v12  ;;  %8922 = vmatpush3.bf16.msra.mxu1 %v9824_v29 }
 0x3c3   :  { %8923 = vmatprep.subr.bf16.mxu1 %v13196_v63  ;;  %1744 = vmatprep.subr.bf16.mxu0 %v11223_v3 }
 0x3c6   :  { %1745 = vmatpush1.bf16.msra.mxu0 %v11227_v11  ;;  %8924 = vmatpush3.bf16.msra.mxu1 %v9828_v5 }
 0x3c7   :  { %8925 = vmatprep.subr.bf16.mxu1 %v13196_v63  ;;  %1746 = vmatprep.subr.bf16.mxu0 %v11233_v47 }
 0x3ca   :  { %1747 = vmatpush1.bf16.msra.mxu0 %v11237_v35  ;;  %8926 = vmatpush3.bf16.msra.mxu1 %v9832_v32 }
 0x3cb   :  { %8927 = vmatprep.subr.bf16.mxu1 %v13196_v63  ;;  %1748 = vmatprep.subr.bf16.mxu0 %v11243_v9 }
 0x3ce   :  { %1749 = vmatpush1.bf16.msra.mxu0 %v11247_v43  ;;  %8928 = vmatpush3.bf16.msra.mxu1 %v9836_v1 }
 0x3cf   :  { %8929 = vmatprep.subr.bf16.mxu1 %v13196_v63  ;;  %1750 = vmatprep.subr.bf16.mxu0 %v11253_v61 }
 0x3d2   :  { %1751 = vmatpush1.bf16.msra.mxu0 %v11257_v58  ;;  %8930 = vmatpush3.bf16.msra.mxu1 %v9840_v41 }
 0x3d3   :  { %8931 = vmatprep.subr.bf16.mxu1 %v13196_v63  ;;  %1752 = vmatprep.subr.bf16.mxu0 %v11263_v0 }
 0x3d6   :  { %1753 = vmatpush1.bf16.msra.mxu0 %v11267_v7  ;;  %8932 = vmatpush3.bf16.msra.mxu1 %v9844_v45  ;;  %v13201_v45 = vsel %vm10924_vm5, %v10882_v33, %v10933_v52 }
 0x3d7   :  { %8933 = vmatprep.subr.bf16.mxu1 %v13196_v63  ;;  %1754 = vmatprep.subr.bf16.mxu0 %v11273_v55 }
 0x3da   :  { %1755 = vmatpush1.bf16.msra.mxu0 %v11277_v18  ;;  %8934 = vmatpush3.bf16.msra.mxu1 %v9848_v28 }
 0x3db   :  { %8935 = vmatprep.subr.bf16.mxu1 %v13196_v63  ;;  %1756 = vmatprep.subr.bf16.mxu0 %v11283_v14 }
 0x3de   :  { %1757 = vmatpush1.bf16.msra.mxu0 %v11287_v22  ;;  %8936 = vmatpush3.bf16.msra.mxu1 %v9852_v46 }
 0x3df   :  { %2010 = vmatprep.subr.bf16.mxu0 %v11214_v4  ;;  %8941 = vmatprep.subr.bf16.mxu1 %v13196_v63 }
 0x493   :  { %v1508_v36 = vpop.f32.mrb[24].mxu0  ;;  %v1549_v50 = vpop.f32.mrb[24].mxu1 }
 0x494   :  { %v1509_v48 = vadd.f32 %v1508_v36, %v11022_v8  ;;  %v1510_v29 = vpop.f32.mrb[25].mxu0  ;;  %v8919_v5 = vpop.f32.mrb[25].mxu1  ;;  %v1550_v37 = vadd.f32 %v1549_v50, %v11038_v42 }
 0x495   :  { %v1511_v32 = vadd.f32 %v1510_v29, %v11033_v57  ;;  %v1512_v1 = vpop.f32.mrb[26].mxu0  ;;  %v1552_v41 = vpop.f32.mrb[26].mxu1 }
 0x496   :  { %v1555_v28 = vadd.f32 %v1509_v48, %v13201_v45  ;;  %v1513_v46 = vpop.f32.mrb[27].mxu0  ;;  %v8920_v59 = vpop.f32.mrb[27].mxu1 }
 0x497   :  { %v1556_v36 = vadd.f32 %v1511_v32, %v13202_v40  ;;  %v13203_v59 = vsel %vm10864_vm4, %v10856_v15, %v10879_v31 }
 0x498   :  { %v8054_v53 = vmul.f32 -1.442695, %v1555_v28 }
 0x499   :  { %v8055_v5 = vmul.f32 -1.442695, %v1556_v36 }
 0x49a   :  { %10147 = vpow2.f32 %v8054_v53 }
 0x49b   :  { %10149 = vpow2.f32 %v8055_v5 }
 0x4a4   :  { %v10148_v29 = vpop.eup %10147 }
 0x4a5   :  { %v1563_v1 = vadd.f32 1.0, %v10148_v29  ;;  %v10150_v41 = vpop.eup %10149  ;;  %v9855_v29 = vld [vmem:[%s10555_s17 + $0x38] ss:$12 sps:$4 sm:$0xff]  }
 0x4a6   :  { %v1564_v30 = vadd.f32 1.0, %v10150_v41  ;;  %v9857_v41 = vld [vmem:[%s10555_s17 + $0x68] ss:$12 sps:$4 sm:$0xff]  }
 0x4a7   :  { %10151 = vrcp.f32 %v1563_v1  ;;  %v9856_v1 = vld [vmem:[%s10555_s17 + $0x50] ss:$12 sps:$4 sm:$0xff]  }
 0x4a8   :  { %10153 = vrcp.f32 %v1564_v30  ;;  %v9853_v30 = vld [vmem:[%s10555_s17 + $0x8] ss:$12 sps:$4 sm:$0xff]  }
 0x4b1   :  { %v10152_v48 = vpop.eup %10151 }
 0x4b2   :  { %v1569_v45 = vmul.f32 %v10152_v48, %v1550_v37  ;;  %v10154_v53 = vpop.eup %10153  ;;  %v9854_v37 = vld [vmem:[%s10555_s17 + $0x20] ss:$12 sps:$4 sm:$0xff]  }
 0x4b3   :  { %v1572_v32 = vsub.f32 1.0, %v10154_v53  ;;  %v1574_v36 = vmul.f32 %v10154_v53, %v11206_v34  ;;  %v9858_v48 = vld [vmem:[%s10555_s17 + $0x80] ss:$12 sps:$4 sm:$0xff]  }
 0x4b4   :  { %v1570_v40 = vadd.f32 %v1569_v45, %v13203_v59  ;;  %v9859_v45 = vld [vmem:[%s10555_s17 + $0x98] ss:$12 sps:$4 sm:$0xff]   ;;  %v9860_v59 = vld [vmem:[%s10555_s17 + $0xb0] ss:$12 sps:$4 sm:$0xff]  }
 0x4b6   :  { %10155 = vtanh.f32 %v1570_v40 }
 0x4c0   :  { %v10156_v28 = vpop.eup %10155 }
 0x4c1   :  { %v1573_v46 = vmul.f32 %v10156_v28, %v1572_v32 }
 0x4c3   :  { %v11313_v5 = vadd.f32 %v1574_v36, %v1573_v46 }
 0x4c5   :  { %13204 = vst [vmem:[#allocation37_spill] sm:$0xff] %v11313_v5  ;;  %v1581_v50 = vpack.c.bf16 %v11313_v5, %v11313_v5 }
 0x4c7   :  { %1775 = vmatmul.mubr.bf16.vlgmr.msra.gmra.mrb[28].mxu0 %v1581_v50  ;;  %8938 = vmatmul.mubr.bf16.vlgmr.msra.gmra.mrb[28].mxu1 %v1581_v50 }
 0x4c8   :  { %2011 = vmatpush1.bf16.msra.mxu0 %v11217_v12  ;;  %2042 = vmatprep.mubr.bf16.mxu0 %v13195_v60 }
 0x4c9   :  { %2012 = vmatprep.subr.bf16.mxu0 %v11223_v3  ;;  %8957 = vmatprep.mubr.msk.bf16.mxu1 %vm10530_vm2, %v13196_v63 }
 0x4ca   :  { %8942 = vmatpush3.bf16.msra.mxu1 %v9853_v30 }
 0x4cb   :  { %8943 = vmatprep.subr.bf16.mxu1 %v13196_v63 }
 0x4cc   :  { %2013 = vmatpush1.bf16.msra.mxu0 %v11227_v11 }
 0x4cd   :  { %2014 = vmatprep.subr.bf16.mxu0 %v11233_v47 }
 0x4ce   :  { %8944 = vmatpush3.bf16.msra.mxu1 %v9854_v37  ;;  %v13205_v37 = vsel %vm10924_vm5, %v10933_v52, %v10882_v33 }
 0x4cf   :  { %8945 = vmatprep.subr.bf16.mxu1 %v13196_v63 }
 0x4d0   :  { %2015 = vmatpush1.bf16.msra.mxu0 %v11237_v35 }
 0x4d1   :  { %2016 = vmatprep.subr.bf16.mxu0 %v11243_v9 }
 0x4d2   :  { %8946 = vmatpush3.bf16.msra.mxu1 %v9855_v29 }
 0x4d3   :  { %8947 = vmatprep.subr.bf16.mxu1 %v13196_v63 }
 0x4d4   :  { %2017 = vmatpush1.bf16.msra.mxu0 %v11247_v43 }
 0x4d5   :  { %2018 = vmatprep.subr.bf16.mxu0 %v11253_v61 }
 0x4d6   :  { %8948 = vmatpush3.bf16.msra.mxu1 %v9856_v1 }
 0x4d7   :  { %8949 = vmatprep.subr.bf16.mxu1 %v13196_v63 }
 0x4d8   :  { %2019 = vmatpush1.bf16.msra.mxu0 %v11257_v58 }
 0x4d9   :  { %2020 = vmatprep.subr.bf16.mxu0 %v11263_v0 }
 0x4da   :  { %8950 = vmatpush3.bf16.msra.mxu1 %v9857_v41 }
 0x4db   :  { %8951 = vmatprep.subr.bf16.mxu1 %v13196_v63 }
 0x4dc   :  { %2021 = vmatpush1.bf16.msra.mxu0 %v11267_v7 }
 0x4dd   :  { %2022 = vmatprep.subr.bf16.mxu0 %v11273_v55 }
 0x4de   :  { %8952 = vmatpush3.bf16.msra.mxu1 %v9858_v48  ;;  %v13206_v48 = vsel %vm10928_vm6, %v10936_v54, %v10895_v39  ;;  %v13207_v39 = vsel %vm10864_vm4, %v10879_v31, %v10856_v15  ;;  %v9861_v15 = vld [vmem:[%s10555_s17 + $0x8] ss:$12 sps:$4 sm:$0xff]   ;;  %v9862_v31 = vld [vmem:[%s10555_s17 + $0x20] ss:$12 sps:$4 sm:$0xff]  }
 0x4df   :  { %8953 = vmatprep.subr.bf16.mxu1 %v13196_v63 }
 0x4e0   :  { %2023 = vmatpush1.bf16.msra.mxu0 %v11277_v18 }
 0x4e1   :  { %2024 = vmatprep.subr.bf16.mxu0 %v11283_v14 }
 0x4e2   :  { %8954 = vmatpush3.bf16.msra.mxu1 %v9859_v45 }
 0x4e3   :  { %8955 = vmatprep.subr.bf16.mxu1 %v13196_v63 }
 0x4e4   :  { %2025 = vmatpush1.bf16.msra.mxu0 %v11287_v22 }
 0x4e5   :  { %2278 = vmatprep.subr.bf16.mxu0 %v11214_v4 }
 0x4e6   :  { %8956 = vmatpush3.bf16.msra.mxu1 %v9860_v59 }
 0x4e7   :  { %8961 = vmatprep.subr.bf16.mxu1 %v13196_v63 }
 0x59a   :  { %v1776_v40 = vpop.f32.mrb[28].mxu0  ;;  %v1817_v53 = vpop.f32.mrb[28].mxu1 }
 0x59b   :  { %v1777_v32 = vadd.f32 %v1776_v40, %v11022_v8  ;;  %v1778_v28 = vpop.f32.mrb[29].mxu0  ;;  %v8939_v46 = vpop.f32.mrb[29].mxu1  ;;  %v1818_v33 = vadd.f32 %v1817_v53, %v11038_v42 }
 0x59c   :  { %v1779_v36 = vadd.f32 %v1778_v28, %v11033_v57  ;;  %v1780_v50 = vpop.f32.mrb[30].mxu0  ;;  %v1820_v30 = vpop.f32.mrb[30].mxu1 }
 0x59d   :  { %v1823_v29 = vadd.f32 %v1777_v32, %v13205_v37  ;;  %v1781_v1 = vpop.f32.mrb[31].mxu0  ;;  %v8940_v41 = vpop.f32.mrb[31].mxu1 }
 0x59e   :  { %v1824_v45 = vadd.f32 %v1779_v36, %v13206_v48 }
 0x59f   :  { %v8080_v59 = vmul.f32 -1.442695, %v1823_v29 }
 0x5a0   :  { %v8081_v40 = vmul.f32 -1.442695, %v1824_v45  ;;  %v9863_v45 = vld [vmem:[%s10555_s17 + $0x38] ss:$12 sps:$4 sm:$0xff]  }
 0x5a1   :  { %10157 = vpow2.f32 %v8080_v59  ;;  %v9864_v59 = vld [vmem:[%s10555_s17 + $0x50] ss:$12 sps:$4 sm:$0xff]  }
 0x5a2   :  { %10159 = vpow2.f32 %v8081_v40  ;;  %v9866_v40 = vld [vmem:[%s10555_s17 + $0x80] ss:$12 sps:$4 sm:$0xff]  }
 0x5ab   :  { %v10158_v28 = vpop.eup %10157 }
 0x5ac   :  { %v1831_v46 = vadd.f32 1.0, %v10158_v28  ;;  %v10160_v50 = vpop.eup %10159  ;;  %v9867_v28 = vld [vmem:[%s10555_s17 + $0x98] ss:$12 sps:$4 sm:$0xff]  }
 0x5ad   :  { %v1832_v30 = vadd.f32 1.0, %v10160_v50 }
 0x5ae   :  { %10161 = vrcp.f32 %v1831_v46  ;;  %v9868_v46 = vld [vmem:[%s10555_s17 + $0xb0] ss:$12 sps:$4 sm:$0xff]  }
 0x5af   :  { %10163 = vrcp.f32 %v1832_v30 }
 0x5b8   :  { %v10162_v52 = vpop.eup %10161 }
 0x5b9   :  { %v1837_v32 = vmul.f32 %v10162_v52, %v1818_v33  ;;  %v10164_v36 = vpop.eup %10163 }
 0x5ba   :  { %v1840_v37 = vsub.f32 1.0, %v10164_v36  ;;  %v1842_v41 = vmul.f32 %v10164_v36, %v11313_v5 }
 0x5bb   :  { %v1838_v54 = vadd.f32 %v1837_v32, %v13207_v39 }
 0x5bd   :  { %10165 = vtanh.f32 %v1838_v54 }
 0x5c7   :  { %v10166_v29 = vpop.eup %10165 }
 0x5c8   :  { %v1841_v1 = vmul.f32 %v10166_v29, %v1840_v37  ;;  %v13209_v37 = vsel %vm10924_vm5, %v10939_v56, %v10869_v23 }
 0x5ca   :  { %v11371_v48 = vadd.f32 %v1842_v41, %v1841_v1 }
 0x5cc   :  { %13208 = vst [vmem:[#allocation38_spill] sm:$0xff] %v11371_v48  ;;  %v1849_v53 = vpack.c.bf16 %v11371_v48, %v11371_v48 }
 0x5ce   :  { %2043 = vmatmul.mubr.bf16.vlgmr.msra.gmra.mrb[32].mxu0 %v1849_v53  ;;  %8958 = vmatmul.mubr.bf16.vlgmr.msra.gmra.mrb[32].mxu1 %v1849_v53  ;;  %v13210_v53 = vsel %vm10928_vm6, %v10950_v62, %v10874_v27  ;;  %v13211_v27 = vsel %vm10864_vm4, %v10906_v44, %v10851_v10  ;;  %v9869_v10 = vld [vmem:[%s10555_s17 + $0x8] ss:$12 sps:$4 sm:$0xff]   ;;  %v9870_v44 = vld [vmem:[%s10555_s17 + $0x20] ss:$12 sps:$4 sm:$0xff]  }
 0x5cf   :  { %2279 = vmatpush1.bf16.msra.mxu0 %v11217_v12  ;;  %2310 = vmatprep.mubr.bf16.mxu0 %v13195_v60 }
 0x5d0   :  { %2280 = vmatprep.subr.bf16.mxu0 %v11223_v3  ;;  %8977 = vmatprep.mubr.msk.bf16.mxu1 %vm10530_vm2, %v13196_v63 }
 0x5d1   :  { %8962 = vmatpush3.bf16.msra.mxu1 %v9861_v15 }
 0x5d2   :  { %8963 = vmatprep.subr.bf16.mxu1 %v13196_v63 }
 0x5d3   :  { %2281 = vmatpush1.bf16.msra.mxu0 %v11227_v11 }
 0x5d4   :  { %2282 = vmatprep.subr.bf16.mxu0 %v11233_v47 }
 0x5d5   :  { %8964 = vmatpush3.bf16.msra.mxu1 %v9862_v31 }
 0x5d6   :  { %8965 = vmatprep.subr.bf16.mxu1 %v13196_v63 }
 0x5d7   :  { %2283 = vmatpush1.bf16.msra.mxu0 %v11237_v35 }
 0x5d8   :  { %2284 = vmatprep.subr.bf16.mxu0 %v11243_v9 }
 0x5d9   :  { %8966 = vmatpush3.bf16.msra.mxu1 %v9863_v45 }
 0x5da   :  { %8967 = vmatprep.subr.bf16.mxu1 %v13196_v63 }
 0x5db   :  { %2285 = vmatpush1.bf16.msra.mxu0 %v11247_v43 }
 0x5dc   :  { %2286 = vmatprep.subr.bf16.mxu0 %v11253_v61 }
 0x5dd   :  { %8968 = vmatpush3.bf16.msra.mxu1 %v9864_v59 }
 0x5de   :  { %8969 = vmatprep.subr.bf16.mxu1 %v13196_v63 }
 0x5df   :  { %2287 = vmatpush1.bf16.msra.mxu0 %v11257_v58 }
 0x5e0   :  { %2288 = vmatprep.subr.bf16.mxu0 %v11263_v0 }
 0x5e3   :  { %2289 = vmatpush1.bf16.msra.mxu0 %v11267_v7 }
 0x5e4   :  { %2290 = vmatprep.subr.bf16.mxu0 %v11273_v55 }
 0x5e7   :  { %2291 = vmatpush1.bf16.msra.mxu0 %v11277_v18 }
 0x5e8   :  { %2292 = vmatprep.subr.bf16.mxu0 %v11283_v14 }
 0x5eb   :  { %2293 = vmatpush1.bf16.msra.mxu0 %v11287_v22 }
 0x5ec   :  { %2546 = vmatprep.subr.bf16.mxu0 %v11214_v4  ;;  %v9865_v4 = vld [vmem:[%s10555_s17 + $0x68] ss:$12 sps:$4 sm:$0xff]  }
 0x5ed   :  { %8970 = vmatpush3.bf16.msra.mxu1 %v9865_v4 }
 0x5ee   :  { %8971 = vmatprep.subr.bf16.mxu1 %v13196_v63 }
 0x5f1   :  { %8972 = vmatpush3.bf16.msra.mxu1 %v9866_v40 }
 0x5f2   :  { %8973 = vmatprep.subr.bf16.mxu1 %v13196_v63 }
 0x5f5   :  { %8974 = vmatpush3.bf16.msra.mxu1 %v9867_v28 }
 0x5f6   :  { %8975 = vmatprep.subr.bf16.mxu1 %v13196_v63 }
 0x5f9   :  { %8976 = vmatpush3.bf16.msra.mxu1 %v9868_v46 }
 0x5fa   :  { %8981 = vmatprep.subr.bf16.mxu1 %v13196_v63 }
 0x6a1   :  { %v2044_v50 = vpop.f32.mrb[32].mxu0  ;;  %v2085_v30 = vpop.f32.mrb[32].mxu1 }
 0x6a2   :  { %v2045_v33 = vadd.f32 %v2044_v50, %v11022_v8  ;;  %v2046_v52 = vpop.f32.mrb[33].mxu0  ;;  %v8959_v32 = vpop.f32.mrb[33].mxu1  ;;  %v2086_v23 = vadd.f32 %v2085_v30, %v11038_v42 }
 0x6a3   :  { %v2047_v39 = vadd.f32 %v2046_v52, %v11033_v57  ;;  %v2048_v54 = vpop.f32.mrb[34].mxu0  ;;  %v2088_v36 = vpop.f32.mrb[34].mxu1 }
 0x6a4   :  { %v2091_v29 = vadd.f32 %v2045_v33, %v13209_v37  ;;  %v2049_v1 = vpop.f32.mrb[35].mxu0  ;;  %v8960_v41 = vpop.f32.mrb[35].mxu1 }
 0x6a5   :  { %v2092_v15 = vadd.f32 %v2047_v39, %v13210_v53  ;;  %v13214_v1 = vsel %vm10928_vm6, %v10980_v20, %v10859_v17  ;;  %v13215_v17 = vsel %vm10864_vm4, %v10871_v25, %v10862_v19  ;;  %v8160_v19 = vld.sshfl [vmem:[%s10570_s29] sm:$0x13 pattern:$0x75316420]  ;;  %s13340_s29 = sld [smem:[#allocation23_spill]] }
 0x6a6   :  { %v8106_v31 = vmul.f32 -1.442695, %v2091_v29  ;;  %v2716_v25 = vcombine.high %v8160_v19, %v8160_v19 }
 0x6a7   :  { %v8107_v45 = vmul.f32 -1.442695, %v2092_v15 }
 0x6a8   :  { %10167 = vpow2.f32 %v8106_v31 }
 0x6a9   :  { %10169 = vpow2.f32 %v8107_v45 }
 0x6b2   :  { %v10168_v59 = vpop.eup %10167 }
 0x6b3   :  { %v2099_v4 = vadd.f32 1.0, %v10168_v59  ;;  %v10170_v40 = vpop.eup %10169 }
 0x6b4   :  { %v2100_v28 = vadd.f32 1.0, %v10170_v40 }
 0x6b5   :  { %10171 = vrcp.f32 %v2099_v4 }
 0x6b6   :  { %10173 = vrcp.f32 %v2100_v28 }
 0x6bf   :  { %v10172_v56 = vpop.eup %10171 }
 0x6c0   :  { %v2105_v46 = vmul.f32 %v10172_v56, %v2086_v23  ;;  %v10174_v50 = vpop.eup %10173 }
 0x6c1   :  { %v2108_v33 = vsub.f32 1.0, %v10174_v50  ;;  %v2110_v39 = vmul.f32 %v10174_v50, %v11371_v48 }
 0x6c2   :  { %v2106_v62 = vadd.f32 %v2105_v46, %v13211_v27 }
 0x6c4   :  { %10175 = vtanh.f32 %v2106_v62 }
 0x6ce   :  { %v10176_v52 = vpop.eup %10175 }
 0x6cf   :  { %v2109_v32 = vmul.f32 %v10176_v52, %v2108_v33  ;;  %v2723_v33 = vrot.slane %v8160_v19, %v10738_v6  ;;  %v2730_v52 = vrot.slane %v2716_v25, %v10738_v6 }
 0x6d1   :  { %v11429_v54 = vadd.f32 %v2110_v39, %v2109_v32  ;;  %v2731_v32 = vcombine.high %v2723_v33, %v2723_v33  ;;  %v2745_v39 = vsel %vm254_vm0, %v2723_v33, 0 }
 0x6d3   :  { %13212 = vst [vmem:[#allocation39_spill] sm:$0xff] %v11429_v54  ;;  %v2117_v30 = vpack.c.bf16 %v11429_v54, %v11429_v54 }
 0x6d5   :  { %2311 = vmatmul.mubr.bf16.vlgmr.msra.gmra.mrb[36].mxu0 %v2117_v30  ;;  %8978 = vmatmul.mubr.bf16.vlgmr.msra.gmra.mrb[36].mxu1 %v2117_v30  ;;  %v2751_v30 = vsel %vm254_vm0, %v2731_v32, 0 }
 0x6d6   :  { %2547 = vmatpush1.bf16.msra.mxu0 %v11217_v12  ;;  %2578 = vmatprep.mubr.bf16.mxu0 %v13195_v60  ;;  %v9871_v12 = vld [vmem:[%s10555_s17 + $0x38] ss:$12 sps:$4 sm:$0xff]  }
 0x6d7   :  { %2548 = vmatprep.subr.bf16.mxu0 %v11223_v3  ;;  %8997 = vmatprep.mubr.msk.bf16.mxu1 %vm10530_vm2, %v13196_v63  ;;  %v9872_v3 = vld [vmem:[%s10555_s17 + $0x50] ss:$12 sps:$4 sm:$0xff]  }
 0x6d8   :  { %8982 = vmatpush3.bf16.msra.mxu1 %v9869_v10  ;;  %v2695_v10 = vld [vmem:[%s10540_s5] sm:$0xff] }
 0x6d9   :  { %8983 = vmatprep.subr.bf16.mxu1 %v13196_v63 }
 0x6da   :  { %2549 = vmatpush1.bf16.msra.mxu0 %v11227_v11  ;;  %v9873_v11 = vld [vmem:[%s10555_s17 + $0x68] ss:$12 sps:$4 sm:$0xff]  }
 0x6db   :  { %2550 = vmatprep.subr.bf16.mxu0 %v11233_v47  ;;  %v9874_v47 = vld [vmem:[%s10555_s17 + $0x80] ss:$12 sps:$4 sm:$0xff]  }
 0x6dc   :  { %8984 = vmatpush3.bf16.msra.mxu1 %v9870_v44  ;;  %v2696_v44 = vld [vmem:[%s10540_s5 + $0x8] sm:$0xff] }
 0x6dd   :  { %8985 = vmatprep.subr.bf16.mxu1 %v13196_v63 }
 0x6de   :  { %2551 = vmatpush1.bf16.msra.mxu0 %v11237_v35  ;;  %v9875_v35 = vld [vmem:[%s10555_s17 + $0x98] ss:$12 sps:$4 sm:$0xff]  }
 0x6df   :  { %2552 = vmatprep.subr.bf16.mxu0 %v11243_v9  ;;  %v9876_v9 = vld [vmem:[%s10555_s17 + $0xb0] ss:$12 sps:$4 sm:$0xff]   ;;  %s13292_s17 = sld [smem:[#allocation17_spill]] }
 0x6e0   :  { %8986 = vmatpush3.bf16.msra.mxu1 %v9871_v12  ;;  %v9879_v12 = vld [vmem:[%s10575_s3 + $0x4] ss:$12 sps:$4 sm:$0xff]  }
 0x6e1   :  { %8987 = vmatprep.subr.bf16.mxu1 %v13196_v63 }
 0x6e2   :  { %2553 = vmatpush1.bf16.msra.mxu0 %v11247_v43 }
 0x6e3   :  { %2554 = vmatprep.subr.bf16.mxu0 %v11253_v61 }
 0x6e4   :  { %8988 = vmatpush3.bf16.msra.mxu1 %v9872_v3  ;;  %v2703_v3 = vpack.c.bf16 %v2696_v44, %v2695_v10 }
 0x6e5   :  { %8989 = vmatprep.subr.bf16.mxu1 %v13196_v63 }
 0x6e6   :  { %2555 = vmatpush1.bf16.msra.mxu0 %v11257_v58 }
 0x6e7   :  { %2556 = vmatprep.subr.bf16.mxu0 %v11263_v0 }
 0x6e8   :  { %8990 = vmatpush3.bf16.msra.mxu1 %v9873_v11  ;;  %v9877_v11 = vld [vmem:[%s10575_s3] ss:$12 sps:$4 sm:$0xff]  }
 0x6e9   :  { %8991 = vmatprep.subr.bf16.mxu1 %v13196_v63 }
 0x6ea   :  { %2557 = vmatpush1.bf16.msra.mxu0 %v11267_v7 }
 0x6eb   :  { %2558 = vmatprep.subr.bf16.mxu0 %v11273_v55 }
 0x6ec   :  { %8992 = vmatpush3.bf16.msra.mxu1 %v9874_v47  ;;  %v9880_v47 = vld [vmem:[%s10575_s3 + $0x8] ss:$12 sps:$4 sm:$0xff]  }
 0x6ed   :  { %8993 = vmatprep.subr.bf16.mxu1 %v13196_v63 }
 0x6ee   :  { %2559 = vmatpush1.bf16.msra.mxu0 %v11277_v18 }
 0x6ef   :  { %2560 = vmatprep.subr.bf16.mxu0 %v11283_v14 }
 0x6f0   :  { %8994 = vmatpush3.bf16.msra.mxu1 %v9875_v35  ;;  %v2697_v35 = vld [vmem:[%s10540_s5 + $0x10] sm:$0xff] }
 0x6f1   :  { %8995 = vmatprep.subr.bf16.mxu1 %v13196_v63 }
 0x6f2   :  { %2561 = vmatpush1.bf16.msra.mxu0 %v11287_v22  ;;  %v13213_v22 = vsel %vm10924_vm5, %v10977_v16, %v10854_v13 }
 0x6f3   :  { %8161 = vmatprep.subr.msk.bf16.mxu0 %vm254_vm0, %v2730_v52 }
 0x6f4   :  { %8996 = vmatpush3.bf16.msra.mxu1 %v9876_v9  ;;  %v2698_v9 = vld [vmem:[%s10540_s5 + $0x18] sm:$0xff] }
 0x6f5   :  { %9722 = vmatprep.subr.msk.bf16.mxu1 %vm254_vm0, %v2731_v32 }
 0x7a8   :  { %v2312_v43 = vpop.f32.mrb[36].mxu0  ;;  %v2353_v61 = vpop.f32.mrb[36].mxu1 }
 0x7a9   :  { %v2313_v58 = vadd.f32 %v2312_v43, %v11022_v8  ;;  %v2314_v0 = vpop.f32.mrb[37].mxu0  ;;  %v8979_v7 = vpop.f32.mrb[37].mxu1  ;;  %v2354_v13 = vadd.f32 %v2353_v61, %v11038_v42  ;;  %v2704_v43 = vpack.c.bf16 %v2698_v9, %v2697_v35  ;;  %v9883_v61 = vld [vmem:[%s10575_s3 + $0x1c] ss:$12 sps:$4 sm:$0xff]  }
 0x7aa   :  { %v2315_v55 = vadd.f32 %v2314_v0, %v11033_v57  ;;  %v2316_v18 = vpop.f32.mrb[38].mxu0  ;;  %v2356_v14 = vpop.f32.mrb[38].mxu1  ;;  %v9884_v0 = vld [vmem:[%s10575_s3 + $0x20] ss:$12 sps:$4 sm:$0xff]  }
 0x7ab   :  { %v2359_v36 = vadd.f32 %v2313_v58, %v13213_v22  ;;  %v2317_v37 = vpop.f32.mrb[39].mxu0  ;;  %v8980_v29 = vpop.f32.mrb[39].mxu1  ;;  %v9881_v58 = vld [vmem:[%s10575_s3 + $0x18] ss:$12 sps:$4 sm:$0xff]   ;;  %v9887_v7 = vld [vmem:[%s10575_s3 + $0x34] ss:$12 sps:$4 sm:$0xff]  }
 0x7ac   :  { %v2360_v41 = vadd.f32 %v2315_v55, %v13214_v1  ;;  %v9885_v55 = vld [vmem:[%s10575_s3 + $0x30] ss:$12 sps:$4 sm:$0xff]   ;;  %v9888_v18 = vld [vmem:[%s10575_s3 + $0x38] ss:$12 sps:$4 sm:$0xff]   ;;  %v9889_v22 = vld [vmem:[%s10575_s3 + $0x48] ss:$12 sps:$4 sm:$0xff]  }
 0x7ad   :  { %v8132_v53 = vmul.f32 -1.442695, %v2359_v36  ;;  %v9891_v14 = vld [vmem:[%s10575_s3 + $0x4c] ss:$12 sps:$4 sm:$0xff]   ;;  %v9892_v36 = vld [vmem:[%s10575_s3 + $0x50] ss:$12 sps:$4 sm:$0xff]  }
 0x7ae   :  { %v8133_v15 = vmul.f32 -1.442695, %v2360_v41  ;;  %v2699_v37 = vld [vmem:[%s10540_s5 + $0x20] sm:$0xff]  ;;  %v2700_v29 = vld [vmem:[%s10540_s5 + $0x28] sm:$0xff] }
 0x7af   :  { %10177 = vpow2.f32 %v8132_v53  ;;  %v9893_v1 = vld [vmem:[%s10575_s3 + $0x60] ss:$12 sps:$4 sm:$0xff]   ;;  %v9895_v41 = vld [vmem:[%s10575_s3 + $0x64] ss:$12 sps:$4 sm:$0xff]   ;;  %v2705_v53 = vpack.c.bf16 %v2700_v29, %v2699_v37  ;;  %v11570_v37 = vld [vmem:[#allocation5] ss:$12 sps:$4 sm:$0xff]  }
 0x7b0   :  { %10179 = vpow2.f32 %v8133_v15  ;;  %v9896_v15 = vld [vmem:[%s10575_s3 + $0x68] ss:$12 sps:$4 sm:$0xff]   ;;  %v13223_v29 = vld [vmem:[#allocation34_spill] sm:$0xff] }
 0x7b9   :  { %v10178_v31 = vpop.eup %10177 }
 0x7ba   :  { %v2367_v45 = vadd.f32 1.0, %v10178_v31  ;;  %v10180_v59 = vpop.eup %10179  ;;  %v9899_v31 = vld [vmem:[%s10575_s3 + $0x7c] ss:$12 sps:$4 sm:$0xff]  }
 0x7bb   :  { %v2368_v4 = vadd.f32 1.0, %v10180_v59  ;;  %v9900_v59 = vld [vmem:[%s10575_s3 + $0x80] ss:$12 sps:$4 sm:$0xff]  }
 0x7bc   :  { %10181 = vrcp.f32 %v2367_v45  ;;  %v2701_v45 = vld [vmem:[%s10540_s5 + $0x30] sm:$0xff] }
 0x7bd   :  { %10183 = vrcp.f32 %v2368_v4  ;;  %v2702_v4 = vld [vmem:[%s10540_s5 + $0x38] sm:$0xff] }
 0x7c6   :  { %v10182_v16 = vpop.eup %10181 }
 0x7c7   :  { %v2373_v40 = vmul.f32 %v10182_v16, %v2354_v13  ;;  %v10184_v28 = vpop.eup %10183  ;;  %v9897_v13 = vld [vmem:[%s10575_s3 + $0x78] ss:$12 sps:$4 sm:$0xff]   ;;  %v2706_v16 = vpack.c.bf16 %v2702_v4, %v2701_v45  ;;  %v2671_v45 = vsel %vm10924_vm5, %v11313_v5, %v11371_v48 }
 0x7c8   :  { %v2376_v23 = vsub.f32 1.0, %v10184_v28  ;;  %v2378_v27 = vmul.f32 %v10184_v28, %v11429_v54  ;;  %v9907_v28 = vld [vmem:[%s10575_s3 + $0xac] ss:$12 sps:$4 sm:$0xff]  }
 0x7c9   :  { %v2374_v20 = vadd.f32 %v2373_v40, %v13215_v17  ;;  %v9903_v40 = vld [vmem:[%s10575_s3 + $0x94] ss:$12 sps:$4 sm:$0xff]   ;;  %v9904_v17 = vld [vmem:[%s10575_s3 + $0x98] ss:$12 sps:$4 sm:$0xff]  }
 0x7cb   :  { %10185 = vtanh.f32 %v2374_v20  ;;  %v9901_v20 = vld [vmem:[%s10575_s3 + $0x90] ss:$12 sps:$4 sm:$0xff]  }
 0x7d5   :  { %v10186_v56 = vpop.eup %10185 }
 0x7d6   :  { %v2377_v46 = vmul.f32 %v10186_v56, %v2376_v23  ;;  %v9908_v23 = vld [vmem:[%s10575_s3 + $0xb0] ss:$12 sps:$4 sm:$0xff]   ;;  %v9905_v56 = vld [vmem:[%s10575_s3 + $0xa8] ss:$12 sps:$4 sm:$0xff]   ;;  %s13347_s3 = sld [smem:[#allocation20_spill]] }
 0x7d8   :  { %v11485_v62 = vadd.f32 %v2378_v27, %v2377_v46  ;;  %v11541_v46 = vld [vmem:[#allocation5 + $0x4] ss:$12 sps:$4 sm:$0xff]  }
 0x7da   :  { %13216 = vst [vmem:[#allocation40_spill] sm:$0xff] %v11485_v62  ;;  %v2385_v50 = vpack.c.bf16 %v11485_v62, %v11485_v62 }
 0x7dc   :  { %2579 = vmatmul.mubr.bf16.vlgmr.msra.gmra.mrb[40].mxu0 %v2385_v50  ;;  %8998 = vmatmul.mubr.bf16.vlgmr.msra.gmra.mrb[40].mxu1 %v2385_v50 }
 0x7dd   :  { %2785 = vmatprep.mubr.bf16.mxu0 %v13195_v60  ;;  %2754 = vmatpush1.bf16.msra.mxu0 %v2745_v39 }
 0x7de   :  { %9002 = vmatpush3.bf16.msra.mxu1 %v2751_v30  ;;  %3087 = vmatprep.subr.bf16.mxu0 %v9879_v12  ;;  %v13217_v30 = vsel %vm10924_vm5, %v10987_v26, %v10984_v24 }
 0x7df   :  { %9003 = vmatprep.mubr.msk.bf16.mxu1 %vm241_vm1, %v2703_v3  ;;  %9011 = vmatprep.subr.bf16.mxu1 %v9880_v47 }
 0x7e4   :  { %8162 = vmatmul.mubr.msk.bf16.vlgmr.msra.gmra.mrb[44].mxu0 %vm241_vm1, %v2703_v3  ;;  %9004 = vmatmul.mubr.msk.bf16.vlgmr.msra.gmra.mrb[44].mxu1 %vm241_vm1, %v2704_v43  ;;  %v13218_v3 = vsel %vm10928_vm6, %v11003_v2, %v11000_v38 }
 0x7e5   :  { %3088 = vmatpush1.bf16.msra.mxu0 %v9877_v11  ;;  %2795 = vmatprep.mubr.bf16.mxu0 %v13195_v60 }
 0x7e6   :  { %9012 = vmatpush3.bf16.msra.mxu1 %v9880_v47  ;;  %3089 = vmatprep.subr.bf16.mxu0 %v9883_v61 }
 0x7e7   :  { %9013 = vmatprep.subr.bf16.mxu1 %v9884_v0  ;;  %9007 = vmatprep.mubr.msk.bf16.mxu1 %vm241_vm1, %v2705_v53 }
 0x7e9   :  { %3090 = vmatpush1.bf16.msra.mxu0 %v9881_v58  ;;  %v13219_v58 = vld [vmem:[#allocation33_spill] sm:$0xff] }
 0x7ea   :  { %9014 = vmatpush3.bf16.msra.mxu1 %v9884_v0  ;;  %3091 = vmatprep.subr.bf16.mxu0 %v9887_v7  ;;  %v13220_v0 = vld [vmem:[#allocation32_spill] sm:$0xff] }
 0x7eb   :  { %9015 = vmatprep.subr.bf16.mxu1 %v9888_v18  ;;  %v13221_v38 = vsel %vm10864_vm4, %v13219_v58, %v13220_v0  ;;  %v9946_v58 = vld [vmem:[#allocation5 + $0x80] ss:$12 sps:$4 sm:$0xff]   ;;  %v9947_v0 = vld [vmem:[#allocation5 + $0x98] ss:$12 sps:$4 sm:$0xff]  }
 0x7ec   :  { %8163 = vmatmul.mubr.msk.bf16.gmra.mrb[48].mxu0 %vm241_vm1, %v2704_v43  ;;  %9008 = vmatmul.mubr.msk.bf16.gmra.mrb[48].mxu1 %vm241_vm1, %v2706_v16 }
 0x7ed   :  { %3092 = vmatpush1.bf16.msra.mxu0 %v9885_v55  ;;  %2805 = vmatprep.mubr.bf16.mxu0 %v13195_v60 }
 0x7ee   :  { %9016 = vmatpush3.bf16.msra.mxu1 %v9888_v18  ;;  %3093 = vmatprep.subr.bf16.mxu0 %v9891_v14 }
 0x7ef   :  { %9017 = vmatprep.subr.bf16.mxu1 %v9892_v36 }
 0x7f1   :  { %3094 = vmatpush1.bf16.msra.mxu0 %v9889_v22 }
 0x7f2   :  { %9018 = vmatpush3.bf16.msra.mxu1 %v9892_v36  ;;  %3095 = vmatprep.subr.bf16.mxu0 %v9895_v41  ;;  %v13224_v41 = vld [vmem:[#allocation35_spill] sm:$0xff] }
 0x7f3   :  { %9019 = vmatprep.subr.bf16.mxu1 %v9896_v15 }
 0x7f4   :  { %8164 = vmatmul.mubr.msk.bf16.gmra.mrb[52].mxu0 %vm241_vm1, %v2705_v53  ;;  %v2663_v53 = vsel %vm10924_vm5, %v13224_v41, %v11485_v62 }
 0x7f5   :  { %3096 = vmatpush1.bf16.msra.mxu0 %v9893_v1  ;;  %2815 = vmatprep.mubr.bf16.mxu0 %v13195_v60 }
 0x7f6   :  { %3097 = vmatprep.subr.bf16.mxu0 %v9899_v31  ;;  %9020 = vmatpush3.bf16.msra.mxu1 %v9896_v15  ;;  %v2669_v15 = vsel %vm10924_vm5, %v11429_v54, %v11206_v34 }
 0x7f7   :  { %9021 = vmatprep.subr.bf16.mxu1 %v9900_v59 }
 0x7f9   :  { %3098 = vmatpush1.bf16.msra.mxu0 %v9897_v13  ;;  %v2673_v13 = vsel %vm10924_vm5, %v11371_v48, %v11313_v5  ;;  %v3297_v48 = vld [vmem:[%s10590_s19] sm:$0x7]  ;;  %s13352_s19 = sld [smem:[#allocation26_spill]] }
 0x7fa   :  { %3099 = vmatprep.subr.bf16.mxu0 %v9903_v40  ;;  %9022 = vmatpush3.bf16.msra.mxu1 %v9900_v59  ;;  %v11590_v59 = vld [vmem:[#allocation5 + $0x1c] ss:$12 sps:$4 sm:$0xff]   ;;  %v11600_v40 = vpack.c.bf16 %v2669_v15, %v2673_v13 }
 0x7fb   :  { %9023 = vmatprep.subr.bf16.mxu1 %v9904_v17 }
 0x7fc   :  { %8165 = vmatmul.mubr.msk.bf16.gmra.mrb[56].mxu0 %vm241_vm1, %v2706_v16  ;;  %v9930_v16 = vld [vmem:[#allocation5 + $0x8] ss:$12 sps:$4 sm:$0xff]   ;;  %13227 = vst [vmem:[#allocation42_spill] sm:$0xff] %v11600_v40 }
 0x7fd   :  { %3100 = vmatpush1.bf16.msra.mxu0 %v9901_v20  ;;  %3119 = vmatprep.mubr.bf16.mxu0 %v13195_v60  ;;  %v11608_v20 = vld [vmem:[#allocation5 + $0x34] ss:$12 sps:$4 sm:$0xff]  }
 0x7fe   :  { %3101 = vmatprep.subr.bf16.mxu0 %v9907_v28  ;;  %9024 = vmatpush3.bf16.msra.mxu1 %v9904_v17  ;;  %v11604_v17 = vld [vmem:[#allocation5 + $0x18] ss:$12 sps:$4 sm:$0xff]   ;;  %v9934_v28 = vld [vmem:[#allocation5 + $0x20] ss:$12 sps:$4 sm:$0xff]  }
 0x7ff   :  { %9025 = vmatprep.subr.bf16.mxu1 %v9908_v23 }
 0x801   :  { %3102 = vmatpush1.bf16.msra.mxu0 %v9905_v56  ;;  %v11617_v56 = vld [vmem:[#allocation5 + $0x30] ss:$12 sps:$4 sm:$0xff]  }
 0x802   :  { %3477 = vmatprep.subr.bf16.mxu0 %v11541_v46  ;;  %9026 = vmatpush3.bf16.msra.mxu1 %v9908_v23 }
 0x803   :  { %9035 = vmatprep.subr.bf16.mxu1 %v13196_v63 }
 0x8af   :  { %v2580_v27 = vpop.f32.mrb[40].mxu0  ;;  %v2621_v50 = vpop.f32.mrb[40].mxu1 }
 0x8b0   :  { %v2581_v19 = vadd.f32 %v2580_v27, %v11022_v8  ;;  %v2582_v25 = vpop.f32.mrb[41].mxu0  ;;  %v8999_v33 = vpop.f32.mrb[41].mxu1  ;;  %v2622_v24 = vadd.f32 %v2621_v50, %v11038_v42  ;;  %v2667_v42 = vsel %vm10924_vm5, %v11206_v34, %v11429_v54  ;;  %v2665_v27 = vsel %vm10924_vm5, %v11485_v62, %v13224_v41  ;;  %v11624_v50 = vld [vmem:[#allocation5 + $0x4c] ss:$12 sps:$4 sm:$0xff]  }
 0x8b1   :  { %v2583_v52 = vadd.f32 %v2582_v25, %v11033_v57  ;;  %v2584_v32 = vpop.f32.mrb[42].mxu0  ;;  %v2624_v39 = vpop.f32.mrb[42].mxu1  ;;  %v11592_v4 = vpack.c.bf16 %v2671_v45, %v2667_v42  ;;  %v9935_v25 = vld [vmem:[#allocation5 + $0x38] ss:$12 sps:$4 sm:$0xff]   ;;  %v11632_v33 = vld [vmem:[#allocation5 + $0x48] ss:$12 sps:$4 sm:$0xff]  }
 0x8b2   :  { %v2627_v10 = vadd.f32 %v2581_v19, %v13217_v30  ;;  %v2585_v44 = vpop.f32.mrb[43].mxu0  ;;  %v9000_v12 = vpop.f32.mrb[43].mxu1  ;;  %v9936_v32 = vld [vmem:[#allocation5 + $0x50] ss:$12 sps:$4 sm:$0xff]   ;;  %v11642_v39 = vld [vmem:[#allocation5 + $0x60] ss:$12 sps:$4 sm:$0xff]  }
 0x8b3   :  { %v2628_v8 = vadd.f32 %v2583_v52, %v13218_v3  ;;  %13226 = vst [vmem:[#allocation41_spill] sm:$0xff] %v11592_v4  ;;  %v11636_v52 = vld [vmem:[#allocation5 + $0x64] ss:$12 sps:$4 sm:$0xff]   ;;  %v11645_v30 = vld [vmem:[#allocation5 + $0x7c] ss:$12 sps:$4 sm:$0xff]  }
 0x8b4   :  { %v8158_v11 = vmul.f32 -1.442695, %v2627_v10  ;;  %v9937_v10 = vld [vmem:[#allocation5 + $0x68] ss:$12 sps:$4 sm:$0xff]   ;;  %v11650_v44 = vld [vmem:[#allocation5 + $0x78] ss:$12 sps:$4 sm:$0xff]  }
 0x8b5   :  { %v8159_v47 = vmul.f32 -1.442695, %v2628_v8  ;;  %v11654_v12 = vld [vmem:[#allocation5 + $0x94] ss:$12 sps:$4 sm:$0xff]   ;;  %v11658_v8 = vld [vmem:[#allocation5 + $0x90] ss:$12 sps:$4 sm:$0xff]  }
 0x8b6   :  { %10187 = vpow2.f32 %v8158_v11  ;;  %v9938_v3 = vld [vmem:[#allocation5 + $0x80] ss:$12 sps:$4 sm:$0xff]  }
 0x8b7   :  { %10189 = vpow2.f32 %v8159_v47  ;;  %v11661_v11 = vld [vmem:[#allocation5 + $0xac] ss:$12 sps:$4 sm:$0xff]  }
 0x8b8   :  { %v9939_v47 = vld [vmem:[#allocation5 + $0x98] ss:$12 sps:$4 sm:$0xff]  }
 0x8c0   :  { %v10188_v57 = vpop.eup %10187 }
 0x8c1   :  { %v2635_v35 = vadd.f32 1.0, %v10188_v57  ;;  %v10190_v9 = vpop.eup %10189  ;;  %v11666_v57 = vld [vmem:[#allocation5 + $0xa8] ss:$12 sps:$4 sm:$0xff]  }
 0x8c2   :  { %v2636_v43 = vadd.f32 1.0, %v10190_v9  ;;  %v9941_v9 = vld [vmem:[#allocation5 + $0x8] ss:$12 sps:$4 sm:$0xff]  }
 0x8c3   :  { %10191 = vrcp.f32 %v2635_v35  ;;  %v9940_v35 = vld [vmem:[#allocation5 + $0xb0] ss:$12 sps:$4 sm:$0xff]  }
 0x8c4   :  { %10193 = vrcp.f32 %v2636_v43  ;;  %v9942_v43 = vld [vmem:[#allocation5 + $0x20] ss:$12 sps:$4 sm:$0xff]  }
 0x8cd   :  { %v10192_v26 = vpop.eup %10191 }
 0x8ce   :  { %v2641_v61 = vmul.f32 %v10192_v26, %v2622_v24  ;;  %v10194_v7 = vpop.eup %10193  ;;  %v9943_v24 = vld [vmem:[#allocation5 + $0x38] ss:$12 sps:$4 sm:$0xff]   ;;  %v9944_v26 = vld [vmem:[#allocation5 + $0x50] ss:$12 sps:$4 sm:$0xff]  }
 0x8cf   :  { %v2644_v55 = vsub.f32 1.0, %v10194_v7  ;;  %v2646_v14 = vmul.f32 %v10194_v7, %v11485_v62  ;;  %v13229_v7 = vld [vmem:[#allocation29_spill] sm:$0xff] }
 0x8d0   :  { %v2642_v2 = vadd.f32 %v2641_v61, %v13221_v38  ;;  %v9945_v61 = vld [vmem:[#allocation5 + $0x68] ss:$12 sps:$4 sm:$0xff]   ;;  %v9948_v38 = vld [vmem:[#allocation5 + $0xb0] ss:$12 sps:$4 sm:$0xff]  }
 0x8d2   :  { %10195 = vtanh.f32 %v2642_v2  ;;  %v2675_v2 = vld [vmem:[%s10585_s14] sm:$0x7]  ;;  %s13350_s14 = sld [smem:[#allocation24_spill]] }
 0x8dc   :  { %v10196_v18 = vpop.eup %10195 }
 0x8dd   :  { %v2645_v22 = vmul.f32 %v10196_v18, %v2644_v55  ;;  %v2688_v55 = vrot.slane %v2675_v2, %v13229_v7 }
 0x8df   :  { %v11564_v36 = vadd.f32 %v2646_v14, %v2645_v22  ;;  %v13230_v14 = vld [vmem:[#allocation30_spill] sm:$0xff] }
 0x8e0   :  { %v2680_v22 = vrot.slane %v2675_v2, %v13230_v14 }
 0x8e1   :  { %13222 = vst [vmem:[#allocation33_spill] sm:$0xff] %v11564_v36  ;;  %v2659_v1 = vsel %vm10924_vm5, %v13223_v29, %v11564_v36  ;;  %v2661_v23 = vsel %vm10924_vm5, %v11564_v36, %v13223_v29 }
 0x8e2   :  { %v11584_v31 = vpack.c.bf16 %v2663_v53, %v2659_v1  ;;  %v11626_v19 = vpack.c.bf16 %v2661_v23, %v2665_v27  ;;  %v13231_v53 = vld [vmem:[#allocation31_spill] sm:$0xff] }
 0x8e3   :  { %v11709_v15 = vrot.slane %v2675_v2, %v13231_v53 }
 0x8e4   :  { %13225 = vst [vmem:[#allocation32_spill] sm:$0xff] %v11584_v31  ;;  %3120 = vmatmul.mubr.bf16.vlgmr.msra.gmra.mrb[44].mxu0 %v11584_v31  ;;  %9027 = vmatprep.mubr.bf16.mxu1 %v11584_v31  ;;  %13228 = vst [vmem:[#allocation43_spill] sm:$0xff] %v11626_v19 }
 0x8e5   :  { %3478 = vmatpush1.bf16.msra.mxu0 %v11570_v37  ;;  %9028 = vmatmul.mubr.bf16.vlgmr.msra.gmra.mrb[44].mxu1 %v11592_v4 }
 0x8e6   :  { %9031 = vmatprep.mubr.bf16.mxu1 %v11600_v40  ;;  %3479 = vmatprep.subr.bf16.mxu0 %v11590_v59 }
 0x8e7   :  { %3129 = vmatprep.mubr.bf16.mxu0 %v13195_v60  ;;  %9036 = vmatpush3.bf16.msra.mxu1 %v9930_v16 }
 0x8e8   :  { %9037 = vmatprep.subr.bf16.mxu1 %v13196_v63 }
 0x8e9   :  { %3480 = vmatpush1.bf16.msra.mxu0 %v11604_v17 }
 0x8ea   :  { %3481 = vmatprep.subr.bf16.mxu0 %v11608_v20 }
 0x8eb   :  { %9038 = vmatpush3.bf16.msra.mxu1 %v9934_v28 }
 0x8ec   :  { %3130 = vmatmul.mubr.bf16.gmra.mrb[48].mxu0 %v11592_v4  ;;  %9039 = vmatprep.subr.bf16.mxu1 %v13196_v63 }
 0x8ed   :  { %3482 = vmatpush1.bf16.msra.mxu0 %v11617_v56  ;;  %9032 = vmatmul.mubr.bf16.gmra.mrb[48].mxu1 %v11626_v19 }
 0x8ee   :  { %3483 = vmatprep.subr.bf16.mxu0 %v11624_v50  ;;  %3139 = vmatprep.mubr.bf16.mxu0 %v13195_v60 }
 0x8ef   :  { %9040 = vmatpush3.bf16.msra.mxu1 %v9935_v25  ;;  %9051 = vmatprep.mubr.msk.bf16.mxu1 %vm10530_vm2, %v13196_v63 }
 0x8f0   :  { %9041 = vmatprep.subr.bf16.mxu1 %v13196_v63 }
 0x8f1   :  { %3484 = vmatpush1.bf16.msra.mxu0 %v11632_v33 }
 0x8f2   :  { %3485 = vmatprep.subr.bf16.mxu0 %v11636_v52 }
 0x8f3   :  { %9042 = vmatpush3.bf16.msra.mxu1 %v9936_v32 }
 0x8f4   :  { %3140 = vmatmul.mubr.bf16.gmra.mrb[52].mxu0 %v11600_v40  ;;  %9043 = vmatprep.subr.bf16.mxu1 %v13196_v63 }
 0x8f5   :  { %3486 = vmatpush1.bf16.msra.mxu0 %v11642_v39  ;;  %3149 = vmatprep.mubr.bf16.mxu0 %v13195_v60 }
 0x8f6   :  { %3487 = vmatprep.subr.bf16.mxu0 %v11645_v30 }
 0x8f7   :  { %9044 = vmatpush3.bf16.msra.mxu1 %v9937_v10 }
 0x8f8   :  { %9045 = vmatprep.subr.bf16.mxu1 %v13196_v63 }
 0x8f9   :  { %3488 = vmatpush1.bf16.msra.mxu0 %v11650_v44 }
 0x8fa   :  { %3489 = vmatprep.subr.bf16.mxu0 %v11654_v12 }
 0x8fb   :  { %9046 = vmatpush3.bf16.msra.mxu1 %v9938_v3 }
 0x8fc   :  { %3150 = vmatmul.mubr.bf16.gmra.mrb[56].mxu0 %v11626_v19  ;;  %9047 = vmatprep.subr.bf16.mxu1 %v13196_v63 }
 0x8fd   :  { %3490 = vmatpush1.bf16.msra.mxu0 %v11658_v8  ;;  %3509 = vmatprep.mubr.bf16.mxu0 %v13195_v60 }
 0x8fe   :  { %3491 = vmatprep.subr.bf16.mxu0 %v11661_v11 }
 0x8ff   :  { %9048 = vmatpush3.bf16.msra.mxu1 %v9939_v47 }
 0x900   :  { %9049 = vmatprep.subr.bf16.mxu1 %v13196_v63 }
 0x901   :  { %3492 = vmatpush1.bf16.msra.mxu0 %v11666_v57 }
 0x902   :  { %3745 = vmatprep.subr.bf16.mxu0 %v11541_v46 }
 0x903   :  { %9050 = vmatpush3.bf16.msra.mxu1 %v9940_v35 }
 0x904   :  { %3510 = vmatmul.mubr.bf16.vlgmr.msra.gmra.mrb[60].mxu0 %v13195_v60  ;;  %9055 = vmatprep.subr.bf16.mxu1 %v13196_v63 }
 0x905   :  { %3746 = vmatpush1.bf16.msra.mxu0 %v11570_v37  ;;  %3777 = vmatprep.mubr.bf16.mxu0 %v13195_v60 }
 0x906   :  { %9052 = vmatmul.mubr.bf16.vlgmr.msra.gmra.mrb[52].mxu1 %v13195_v60  ;;  %3747 = vmatprep.subr.bf16.mxu0 %v11590_v59 }
 0x907   :  { %9071 = vmatprep.mubr.msk.bf16.mxu1 %vm10530_vm2, %v13196_v63  ;;  %9056 = vmatpush3.bf16.msra.mxu1 %v9941_v9 }
 0x908   :  { %9057 = vmatprep.subr.bf16.mxu1 %v13196_v63 }
 0x909   :  { %3748 = vmatpush1.bf16.msra.mxu0 %v11604_v17 }
 0x90a   :  { %3749 = vmatprep.subr.bf16.mxu0 %v11608_v20 }
 0x90b   :  { %9058 = vmatpush3.bf16.msra.mxu1 %v9942_v43 }
 0x90c   :  { %9059 = vmatprep.subr.bf16.mxu1 %v13196_v63 }
 0x90d   :  { %3750 = vmatpush1.bf16.msra.mxu0 %v11617_v56 }
 0x90e   :  { %3751 = vmatprep.subr.bf16.mxu0 %v11624_v50 }
 0x90f   :  { %9060 = vmatpush3.bf16.msra.mxu1 %v9943_v24 }
 0x910   :  { %9061 = vmatprep.subr.bf16.mxu1 %v13196_v63 }
 0x911   :  { %3752 = vmatpush1.bf16.msra.mxu0 %v11632_v33 }
 0x912   :  { %3753 = vmatprep.subr.bf16.mxu0 %v11636_v52 }
 0x913   :  { %9062 = vmatpush3.bf16.msra.mxu1 %v9944_v26 }
 0x914   :  { %9063 = vmatprep.subr.bf16.mxu1 %v13196_v63 }
 0x915   :  { %3754 = vmatpush1.bf16.msra.mxu0 %v11642_v39 }
 0x916   :  { %3755 = vmatprep.subr.bf16.mxu0 %v11645_v30 }
 0x917   :  { %9064 = vmatpush3.bf16.msra.mxu1 %v9945_v61 }
 0x918   :  { %9065 = vmatprep.subr.bf16.mxu1 %v13196_v63 }
 0x919   :  { %3756 = vmatpush1.bf16.msra.mxu0 %v11650_v44 }
 0x91a   :  { %3757 = vmatprep.subr.bf16.mxu0 %v11654_v12 }
 0x91b   :  { %9066 = vmatpush3.bf16.msra.mxu1 %v9946_v58 }
 0x91c   :  { %9067 = vmatprep.subr.bf16.mxu1 %v13196_v63 }
 0x91d   :  { %3758 = vmatpush1.bf16.msra.mxu0 %v11658_v8 }
 0x91e   :  { %3759 = vmatprep.subr.bf16.mxu0 %v11661_v11 }
 0x91f   :  { %9068 = vmatpush3.bf16.msra.mxu1 %v9947_v0 }
 0x920   :  { %9069 = vmatprep.subr.bf16.mxu1 %v13196_v63 }
 0x921   :  { %3760 = vmatpush1.bf16.msra.mxu0 %v11666_v57 }
 0x922   :  { %4013 = vmatprep.subr.bf16.mxu0 %v11541_v46 }
 0x923   :  { %9070 = vmatpush3.bf16.msra.mxu1 %v9948_v38 }
 0x924   :  { %9075 = vmatprep.subr.bf16.mxu1 %v13196_v63 }
 0x9b7   :  { %v3121_v18 = vpop.f32.mrb[44].mxu0 }
 0x9b8   :  { %v11706_v42 = vpop.f32.mrb[45].mxu0  ;;  %v9029_v1 = vpop.f32.mrb[44].mxu1 }
 0x9b9   :  { %v11711_v45 = vadd.f32 %v9029_v1, %v2688_v55  ;;  %v3125_v13 = vpop.f32.mrb[46].mxu0  ;;  %v3194_v16 = vpop.f32.mrb[45].mxu1 }
 0x9ba   :  { %v11713_v28 = vadd.f32 %v3125_v13, %v2680_v22  ;;  %v3127_v23 = vpop.f32.mrb[47].mxu0  ;;  %v9030_v27 = vpop.f32.mrb[46].mxu1  ;;  %v11729_v0 = vadd.f32 %v3194_v16, %v2688_v55 }
 0x9bb   :  { %v11716_v25 = vadd.f32 %v3127_v23, %v11709_v15  ;;  %v11718_v32 = vadd.f32 %v9030_v27, %v2688_v55  ;;  %v3197_v10 = vpop.f32.mrb[47].mxu1 }
 0x9bc   :  { %v11720_v3 = vadd.f32 %v3197_v10, %v2688_v55 }
 0x9bf   :  { %v3131_v47 = vpop.f32.mrb[48].mxu0 }
 0x9c0   :  { %v11722_v35 = vadd.f32 %v3131_v47, %v2680_v22  ;;  %v3133_v9 = vpop.f32.mrb[49].mxu0  ;;  %v9033_v43 = vpop.f32.mrb[48].mxu1 }
 0x9c1   :  { %v11725_v24 = vadd.f32 %v3133_v9, %v11709_v15  ;;  %v11727_v26 = vadd.f32 %v9033_v43, %v2688_v55  ;;  %v3135_v61 = vpop.f32.mrb[50].mxu0  ;;  %v3210_v58 = vpop.f32.mrb[49].mxu1 }
 0x9c2   :  { %v11731_v38 = vadd.f32 %v3135_v61, %v2680_v22  ;;  %v11733_v2 = vadd.f32 %v3210_v58, %v2688_v55  ;;  %v3137_v1 = vpop.f32.mrb[51].mxu0  ;;  %v9034_v13 = vpop.f32.mrb[50].mxu1 }
 0x9c3   :  { %v11744_v10 = vadd.f32 %v3137_v1, %v11709_v15  ;;  %v11746_v16 = vadd.f32 %v9034_v13, %v2688_v55  ;;  %v3213_v47 = vpop.f32.mrb[51].mxu1 }
 0x9c4   :  { %13232 = vst [vmem:[#allocation44_spill] sm:$0xff] %v11733_v2  ;;  %v11756_v61 = vadd.f32 %v3213_v47, %v2688_v55 }
 0x9c7   :  { %v3141_v47 = vpop.f32.mrb[52].mxu0 }
 0x9c8   :  { %v11774_v27 = vadd.f32 %v3141_v47, %v2680_v22  ;;  %v3143_v43 = vpop.f32.mrb[53].mxu0 }
 0x9c9   :  { %v11777_v9 = vadd.f32 %v3143_v43, %v11709_v15  ;;  %v3145_v23 = vpop.f32.mrb[54].mxu0 }
 0x9ca   :  { %v11779_v58 = vadd.f32 %v3145_v23, %v2680_v22  ;;  %v3147_v1 = vpop.f32.mrb[55].mxu0 }
 0x9cb   :  { %v11790_v55 = vadd.f32 %v3147_v1, %v11709_v15  ;;  %v11822_v1 = vadd.f32 %v3121_v18, %v2680_v22 }
 0x9cd   :  { %13233 = vst [vmem:[#allocation45_spill] sm:$0xff] %v11822_v1 }
 0x9cf   :  { %v3151_v23 = vpop.f32.mrb[56].mxu0 }
 0x9d0   :  { %v11816_v36 = vadd.f32 %v3151_v23, %v2680_v22  ;;  %v3153_v62 = vpop.f32.mrb[57].mxu0 }
 0x9d1   :  { %v11819_v13 = vadd.f32 %v3153_v62, %v11709_v15  ;;  %v3155_v54 = vpop.f32.mrb[58].mxu0  ;;  %v11836_v62 = vadd.f32 %v11706_v42, %v11709_v15  ;;  %v11854_v42 = vrot.slane %v3297_v48, %v13230_v14 }
 0x9d2   :  { %v11824_v5 = vadd.f32 %v3155_v54, %v2680_v22  ;;  %v3157_v34 = vpop.f32.mrb[59].mxu0  ;;  %v11865_v22 = vrot.slane %v3297_v48, %v13231_v53 }
 0x9d3   :  { %13235 = vst [vmem:[#allocation47_spill] sm:$0xff] %v11836_v62  ;;  %v11839_v18 = vadd.f32 %v3157_v34, %v11709_v15 }
 0x9d4   :  { %13234 = vst [vmem:[#allocation46_spill] sm:$0xff] %v11824_v5  ;;  %v3249_v23 = vsel %vm10924_vm5, %v11822_v1, %v11824_v5 }
 0x9d5   :  { %v3250_v15 = vsel %vm10928_vm6, %v11836_v62, %v11839_v18 }
 0x9d7   :  { %v3511_v54 = vpop.f32.mrb[60].mxu0 }
 0x9d8   :  { %v3512_v47 = vadd.f32 %v3511_v54, %v11854_v42  ;;  %v3513_v41 = vpop.f32.mrb[61].mxu0  ;;  %v11874_v54 = vrot.slane %v3297_v48, %v13229_v7 }
 0x9d9   :  { %v3514_v29 = vadd.f32 %v3513_v41, %v11865_v22  ;;  %v3515_v34 = vpop.f32.mrb[62].mxu0  ;;  %v3552_v14 = vpop.f32.mrb[52].mxu1 }
 0x9da   :  { %v3558_v1 = vadd.f32 %v3512_v47, %v3249_v23  ;;  %v3516_v5 = vpop.f32.mrb[63].mxu0  ;;  %v9053_v19 = vpop.f32.mrb[53].mxu1  ;;  %v3553_v34 = vadd.f32 %v3552_v14, %v11874_v54  ;;  %v9952_v23 = vld [vmem:[#allocation5 + $0x50] ss:$12 sps:$4 sm:$0xff]  }
 0x9db   :  { %v3559_v40 = vadd.f32 %v3514_v29, %v3250_v15  ;;  %v3555_v4 = vpop.f32.mrb[54].mxu1  ;;  %v13236_v29 = vsel %vm10864_vm4, %v11729_v0, %v11746_v16  ;;  %v9955_v15 = vld [vmem:[#allocation5 + $0x98] ss:$12 sps:$4 sm:$0xff]  }
 0x9dc   :  { %v8218_v53 = vmul.f32 -1.442695, %v3558_v1  ;;  %v9054_v31 = vpop.f32.mrb[55].mxu1  ;;  %v9951_v1 = vld [vmem:[#allocation5 + $0x38] ss:$12 sps:$4 sm:$0xff]  }
 0x9dd   :  { %v8219_v6 = vmul.f32 -1.442695, %v3559_v40 }
 0x9de   :  { %10197 = vpow2.f32 %v8218_v53 }
 0x9df   :  { %10199 = vpow2.f32 %v8219_v6 }
 0x9e8   :  { %v10198_v2 = vpop.eup %10197 }
 0x9e9   :  { %v3566_v43 = vadd.f32 1.0, %v10198_v2  ;;  %v10200_v62 = vpop.eup %10199  ;;  %v9949_v2 = vld [vmem:[#allocation5 + $0x8] ss:$12 sps:$4 sm:$0xff]  }
 0x9ea   :  { %v3567_v41 = vadd.f32 1.0, %v10200_v62  ;;  %v9953_v62 = vld [vmem:[#allocation5 + $0x68] ss:$12 sps:$4 sm:$0xff]  }
 0x9eb   :  { %10201 = vrcp.f32 %v3566_v43  ;;  %v9950_v43 = vld [vmem:[#allocation5 + $0x20] ss:$12 sps:$4 sm:$0xff]  }
 0x9ec   :  { %10203 = vrcp.f32 %v3567_v41  ;;  %v9956_v41 = vld [vmem:[#allocation5 + $0xb0] ss:$12 sps:$4 sm:$0xff]  }
 0x9f5   :  { %v10202_v47 = vpop.eup %10201 }
 0x9f6   :  { %v3572_v5 = vmul.f32 %v10202_v47, %v3553_v34  ;;  %v10204_v6 = vpop.eup %10203 }
 0x9f7   :  { %v3575_v4 = vsub.f32 1.0, %v10204_v6  ;;  %v3577_v19 = vmul.f32 0.0, %v10204_v6 }
 0x9f8   :  { %v3573_v31 = vadd.f32 %v3572_v5, %v13236_v29 }
 0x9fa   :  { %10205 = vtanh.f32 %v3573_v31 }
 0xa04   :  { %v10206_v40 = vpop.eup %10205 }
 0xa05   :  { %v3576_v48 = vmul.f32 %v10206_v40, %v3575_v4 }
 0xa07   :  { %v11882_v53 = vadd.f32 %v3577_v19, %v3576_v48  ;;  %v13238_v19 = vsel %vm10924_vm5, %v11713_v28, %v11816_v36 }
 0xa09   :  { %13237 = vst [vmem:[#allocation48_spill] sm:$0xff] %v11882_v53  ;;  %v3584_v14 = vpack.c.bf16 %v11882_v53, %v11882_v53 }
 0xa0b   :  { %3778 = vmatmul.mubr.bf16.vlgmr.msra.gmra.mrb[64].mxu0 %v3584_v14  ;;  %9072 = vmatmul.mubr.bf16.vlgmr.msra.gmra.mrb[56].mxu1 %v3584_v14 }
 0xa0c   :  { %4014 = vmatpush1.bf16.msra.mxu0 %v11570_v37  ;;  %4045 = vmatprep.mubr.bf16.mxu0 %v13195_v60 }
 0xa0d   :  { %4015 = vmatprep.subr.bf16.mxu0 %v11590_v59  ;;  %9091 = vmatprep.mubr.msk.bf16.mxu1 %vm10530_vm2, %v13196_v63 }
 0xa0e   :  { %9076 = vmatpush3.bf16.msra.mxu1 %v9949_v2 }
 0xa0f   :  { %9077 = vmatprep.subr.bf16.mxu1 %v13196_v63 }
 0xa10   :  { %4016 = vmatpush1.bf16.msra.mxu0 %v11604_v17 }
 0xa11   :  { %4017 = vmatprep.subr.bf16.mxu0 %v11608_v20 }
 0xa12   :  { %9078 = vmatpush3.bf16.msra.mxu1 %v9950_v43  ;;  %v13239_v43 = vsel %vm10928_vm6, %v11716_v25, %v11819_v13 }
 0xa13   :  { %9079 = vmatprep.subr.bf16.mxu1 %v13196_v63 }
 0xa14   :  { %4018 = vmatpush1.bf16.msra.mxu0 %v11617_v56 }
 0xa15   :  { %4019 = vmatprep.subr.bf16.mxu0 %v11624_v50 }
 0xa16   :  { %9080 = vmatpush3.bf16.msra.mxu1 %v9951_v1 }
 0xa17   :  { %9081 = vmatprep.subr.bf16.mxu1 %v13196_v63 }
 0xa18   :  { %4020 = vmatpush1.bf16.msra.mxu0 %v11632_v33 }
 0xa19   :  { %4021 = vmatprep.subr.bf16.mxu0 %v11636_v52 }
 0xa1a   :  { %9082 = vmatpush3.bf16.msra.mxu1 %v9952_v23 }
 0xa1b   :  { %9083 = vmatprep.subr.bf16.mxu1 %v13196_v63 }
 0xa1c   :  { %4022 = vmatpush1.bf16.msra.mxu0 %v11642_v39 }
 0xa1d   :  { %4023 = vmatprep.subr.bf16.mxu0 %v11645_v30 }
 0xa1e   :  { %9084 = vmatpush3.bf16.msra.mxu1 %v9953_v62 }
 0xa1f   :  { %9085 = vmatprep.subr.bf16.mxu1 %v13196_v63 }
 0xa20   :  { %4024 = vmatpush1.bf16.msra.mxu0 %v11650_v44 }
 0xa21   :  { %4025 = vmatprep.subr.bf16.mxu0 %v11654_v12 }
 0xa24   :  { %4026 = vmatpush1.bf16.msra.mxu0 %v11658_v8 }
 0xa25   :  { %4027 = vmatprep.subr.bf16.mxu0 %v11661_v11 }
 0xa28   :  { %4028 = vmatpush1.bf16.msra.mxu0 %v11666_v57 }
 0xa29   :  { %4281 = vmatprep.subr.bf16.mxu0 %v11541_v46  ;;  %v9954_v46 = vld [vmem:[#allocation5 + $0x80] ss:$12 sps:$4 sm:$0xff]  }
 0xa2a   :  { %9086 = vmatpush3.bf16.msra.mxu1 %v9954_v46 }
 0xa2b   :  { %9087 = vmatprep.subr.bf16.mxu1 %v13196_v63 }
 0xa2e   :  { %9088 = vmatpush3.bf16.msra.mxu1 %v9955_v15 }
 0xa2f   :  { %9089 = vmatprep.subr.bf16.mxu1 %v13196_v63 }
 0xa32   :  { %9090 = vmatpush3.bf16.msra.mxu1 %v9956_v41 }
 0xa33   :  { %9095 = vmatprep.subr.bf16.mxu1 %v13196_v63 }
 0xade   :  { %v3779_v34 = vpop.f32.mrb[64].mxu0  ;;  %v3820_v47 = vpop.f32.mrb[56].mxu1 }
 0xadf   :  { %v3780_v5 = vadd.f32 %v3779_v34, %v11854_v42  ;;  %v3781_v29 = vpop.f32.mrb[65].mxu0  ;;  %v9073_v31 = vpop.f32.mrb[57].mxu1 }
 0xae0   :  { %v3782_v6 = vadd.f32 %v3781_v29, %v11865_v22  ;;  %v3783_v4 = vpop.f32.mrb[66].mxu0  ;;  %v3823_v40 = vpop.f32.mrb[58].mxu1  ;;  %v3821_v29 = vadd.f32 %v3820_v47, %v11874_v54 }
 0xae1   :  { %v3826_v48 = vadd.f32 %v3780_v5, %v13238_v19  ;;  %v3784_v14 = vpop.f32.mrb[67].mxu0  ;;  %v9074_v2 = vpop.f32.mrb[59].mxu1  ;;  %v13240_v4 = vsel %vm10864_vm4, %v11720_v3, %v11727_v26 }
 0xae2   :  { %v3827_v1 = vadd.f32 %v3782_v6, %v13239_v43 }
 0xae3   :  { %v8244_v23 = vmul.f32 -1.442695, %v3826_v48 }
 0xae4   :  { %v8245_v62 = vmul.f32 -1.442695, %v3827_v1 }
 0xae5   :  { %10207 = vpow2.f32 %v8244_v23  ;;  %v13242_v23 = vsel %vm10924_vm5, %v11722_v35, %v11779_v58 }
 0xae6   :  { %10209 = vpow2.f32 %v8245_v62 }
 0xaef   :  { %v10208_v46 = vpop.eup %10207 }
 0xaf0   :  { %v3834_v15 = vadd.f32 1.0, %v10208_v46  ;;  %v10210_v41 = vpop.eup %10209 }
 0xaf1   :  { %v3835_v34 = vadd.f32 1.0, %v10210_v41  ;;  %v13243_v41 = vsel %vm10928_vm6, %v11725_v24, %v11790_v55 }
 0xaf2   :  { %10211 = vrcp.f32 %v3834_v15 }
 0xaf3   :  { %10213 = vrcp.f32 %v3835_v34 }
 0xafc   :  { %v10212_v5 = vpop.eup %10211 }
 0xafd   :  { %v3840_v31 = vmul.f32 %v10212_v5, %v3821_v29  ;;  %v10214_v40 = vpop.eup %10213 }
 0xafe   :  { %v3843_v19 = vsub.f32 1.0, %v10214_v40  ;;  %v3845_v2 = vmul.f32 %v10214_v40, %v11882_v53 }
 0xaff   :  { %v3841_v6 = vadd.f32 %v3840_v31, %v13240_v4 }
 0xb01   :  { %10215 = vtanh.f32 %v3841_v6 }
 0xb0b   :  { %v10216_v48 = vpop.eup %10215 }
 0xb0c   :  { %v3844_v14 = vmul.f32 %v10216_v48, %v3843_v19 }
 0xb0e   :  { %v11932_v43 = vadd.f32 %v3845_v2, %v3844_v14  ;;  %v13244_v2 = vsel %vm10864_vm4, %v11711_v45, %v11756_v61 }
 0xb10   :  { %13241 = vst [vmem:[#allocation49_spill] sm:$0xff] %v11932_v43  ;;  %v3852_v47 = vpack.c.bf16 %v11932_v43, %v11932_v43 }
 0xb12   :  { %4046 = vmatmul.mubr.bf16.vlgmr.msra.gmra.mrb[68].mxu0 %v3852_v47  ;;  %9092 = vmatmul.mubr.bf16.vlgmr.msra.gmra.mrb[60].mxu1 %v3852_v47 }
 0xb13   :  { %4282 = vmatpush1.bf16.msra.mxu0 %v11570_v37  ;;  %4313 = vmatprep.mubr.bf16.mxu0 %v13195_v60  ;;  %v9957_v37 = vld [vmem:[#allocation5 + $0x8] ss:$12 sps:$4 sm:$0xff]  }
 0xb14   :  { %4283 = vmatprep.subr.bf16.mxu0 %v11590_v59  ;;  %9111 = vmatprep.mubr.msk.bf16.mxu1 %vm10530_vm2, %v13196_v63  ;;  %v9958_v59 = vld [vmem:[#allocation5 + $0x20] ss:$12 sps:$4 sm:$0xff]  }
 0xb15   :  { %9096 = vmatpush3.bf16.msra.mxu1 %v9957_v37 }
 0xb16   :  { %9097 = vmatprep.subr.bf16.mxu1 %v13196_v63 }
 0xb17   :  { %4284 = vmatpush1.bf16.msra.mxu0 %v11604_v17  ;;  %v9959_v17 = vld [vmem:[#allocation5 + $0x38] ss:$12 sps:$4 sm:$0xff]  }
 0xb18   :  { %4285 = vmatprep.subr.bf16.mxu0 %v11608_v20  ;;  %v9960_v20 = vld [vmem:[#allocation5 + $0x50] ss:$12 sps:$4 sm:$0xff]  }
 0xb19   :  { %9098 = vmatpush3.bf16.msra.mxu1 %v9958_v59 }
 0xb1a   :  { %9099 = vmatprep.subr.bf16.mxu1 %v13196_v63 }
 0xb1b   :  { %4286 = vmatpush1.bf16.msra.mxu0 %v11617_v56  ;;  %v9961_v56 = vld [vmem:[#allocation5 + $0x68] ss:$12 sps:$4 sm:$0xff]  }
 0xb1c   :  { %4287 = vmatprep.subr.bf16.mxu0 %v11624_v50  ;;  %v9962_v50 = vld [vmem:[#allocation5 + $0x80] ss:$12 sps:$4 sm:$0xff]  }
 0xb1d   :  { %9100 = vmatpush3.bf16.msra.mxu1 %v9959_v17 }
 0xb1e   :  { %9101 = vmatprep.subr.bf16.mxu1 %v13196_v63 }
 0xb1f   :  { %4288 = vmatpush1.bf16.msra.mxu0 %v11632_v33  ;;  %v9963_v33 = vld [vmem:[#allocation5 + $0x98] ss:$12 sps:$4 sm:$0xff]  }
 0xb20   :  { %4289 = vmatprep.subr.bf16.mxu0 %v11636_v52  ;;  %v9964_v52 = vld [vmem:[#allocation5 + $0xb0] ss:$12 sps:$4 sm:$0xff]  }
 0xb21   :  { %9102 = vmatpush3.bf16.msra.mxu1 %v9960_v20 }
 0xb22   :  { %9103 = vmatprep.subr.bf16.mxu1 %v13196_v63 }
 0xb23   :  { %4290 = vmatpush1.bf16.msra.mxu0 %v11642_v39 }
 0xb24   :  { %4291 = vmatprep.subr.bf16.mxu0 %v11645_v30 }
 0xb25   :  { %9104 = vmatpush3.bf16.msra.mxu1 %v9961_v56 }
 0xb26   :  { %9105 = vmatprep.subr.bf16.mxu1 %v13196_v63 }
 0xb27   :  { %4292 = vmatpush1.bf16.msra.mxu0 %v11650_v44 }
 0xb28   :  { %4293 = vmatprep.subr.bf16.mxu0 %v11654_v12 }
 0xb29   :  { %9106 = vmatpush3.bf16.msra.mxu1 %v9962_v50 }
 0xb2a   :  { %9107 = vmatprep.subr.bf16.mxu1 %v13196_v63 }
 0xb2b   :  { %4294 = vmatpush1.bf16.msra.mxu0 %v11658_v8 }
 0xb2c   :  { %4295 = vmatprep.subr.bf16.mxu0 %v11661_v11 }
 0xb2d   :  { %9108 = vmatpush3.bf16.msra.mxu1 %v9963_v33 }
 0xb2e   :  { %9109 = vmatprep.subr.bf16.mxu1 %v13196_v63 }
 0xb2f   :  { %4296 = vmatpush1.bf16.msra.mxu0 %v11666_v57 }
 0xb31   :  { %9110 = vmatpush3.bf16.msra.mxu1 %v9964_v52  ;;  %v11988_v52 = vld [vmem:[#allocation5 + $0x4] ss:$12 sps:$4 sm:$0xff]  }
 0xb32   :  { %9115 = vmatprep.subr.bf16.mxu1 %v13196_v63  ;;  %4549 = vmatprep.subr.bf16.mxu0 %v11988_v52 }
 0xbe5   :  { %v4047_v39 = vpop.f32.mrb[68].mxu0  ;;  %v4088_v30 = vpop.f32.mrb[60].mxu1 }
 0xbe6   :  { %v4048_v44 = vadd.f32 %v4047_v39, %v11854_v42  ;;  %v4049_v12 = vpop.f32.mrb[69].mxu0  ;;  %v9093_v8 = vpop.f32.mrb[61].mxu1  ;;  %v4089_v19 = vadd.f32 %v4088_v30, %v11874_v54  ;;  %v11990_v39 = vld [vmem:[#allocation5] ss:$12 sps:$4 sm:$0xff]   ;;  %v9968_v30 = vld [vmem:[#allocation5 + $0x8] ss:$12 sps:$4 sm:$0xff]  }
 0xbe7   :  { %v4050_v11 = vadd.f32 %v4049_v12, %v11865_v22  ;;  %v4051_v57 = vpop.f32.mrb[70].mxu0  ;;  %v4091_v1 = vpop.f32.mrb[62].mxu1  ;;  %v11997_v12 = vld [vmem:[#allocation5 + $0x18] ss:$12 sps:$4 sm:$0xff]   ;;  %v9972_v8 = vld [vmem:[#allocation5 + $0x20] ss:$12 sps:$4 sm:$0xff]  }
 0xbe8   :  { %v4094_v62 = vadd.f32 %v4048_v44, %v13242_v23  ;;  %v4052_v46 = vpop.f32.mrb[71].mxu0  ;;  %v9094_v15 = vpop.f32.mrb[63].mxu1  ;;  %v11994_v44 = vld [vmem:[#allocation5 + $0x1c] ss:$12 sps:$4 sm:$0xff]   ;;  %v9976_v1 = vld [vmem:[#allocation5 + $0x38] ss:$12 sps:$4 sm:$0xff]  }
 0xbe9   :  { %v4095_v34 = vadd.f32 %v4050_v11, %v13243_v41  ;;  %v12001_v11 = vld [vmem:[#allocation5 + $0x34] ss:$12 sps:$4 sm:$0xff]   ;;  %v12004_v57 = vld [vmem:[#allocation5 + $0x30] ss:$12 sps:$4 sm:$0xff]   ;;  %v12008_v23 = vld [vmem:[#allocation5 + $0x4c] ss:$12 sps:$4 sm:$0xff]  }
 0xbea   :  { %v8270_v29 = vmul.f32 -1.442695, %v4094_v62  ;;  %v12011_v62 = vld [vmem:[#allocation5 + $0x48] ss:$12 sps:$4 sm:$0xff]   ;;  %v9980_v46 = vld [vmem:[#allocation5 + $0x50] ss:$12 sps:$4 sm:$0xff]  }
 0xbeb   :  { %v8271_v5 = vmul.f32 -1.442695, %v4095_v34  ;;  %v12015_v15 = vld [vmem:[#allocation5 + $0x64] ss:$12 sps:$4 sm:$0xff]   ;;  %v12018_v41 = vld [vmem:[#allocation5 + $0x60] ss:$12 sps:$4 sm:$0xff]  }
 0xbec   :  { %10217 = vpow2.f32 %v8270_v29  ;;  %v9984_v34 = vld [vmem:[#allocation5 + $0x68] ss:$12 sps:$4 sm:$0xff]  }
 0xbed   :  { %10219 = vpow2.f32 %v8271_v5  ;;  %v12022_v29 = vld [vmem:[#allocation5 + $0x7c] ss:$12 sps:$4 sm:$0xff]   ;;  %v12025_v5 = vld [vmem:[#allocation5 + $0x78] ss:$12 sps:$4 sm:$0xff]  }
 0xbf6   :  { %v10218_v31 = vpop.eup %10217 }
 0xbf7   :  { %v4102_v4 = vadd.f32 1.0, %v10218_v31  ;;  %v10220_v6 = vpop.eup %10219  ;;  %v9988_v31 = vld [vmem:[#allocation5 + $0x80] ss:$12 sps:$4 sm:$0xff]  }
 0xbf8   :  { %v4103_v40 = vadd.f32 1.0, %v10220_v6  ;;  %v12032_v6 = vld [vmem:[#allocation5 + $0x90] ss:$12 sps:$4 sm:$0xff]  }
 0xbf9   :  { %10221 = vrcp.f32 %v4102_v4  ;;  %v12029_v4 = vld [vmem:[#allocation5 + $0x94] ss:$12 sps:$4 sm:$0xff]  }
 0xbfa   :  { %10223 = vrcp.f32 %v4103_v40  ;;  %v9992_v40 = vld [vmem:[#allocation5 + $0x98] ss:$12 sps:$4 sm:$0xff]  }
 0xc03   :  { %v10222_v48 = vpop.eup %10221 }
 0xc04   :  { %v4108_v14 = vmul.f32 %v10222_v48, %v4089_v19  ;;  %v10224_v37 = vpop.eup %10223  ;;  %v12036_v19 = vld [vmem:[#allocation5 + $0xac] ss:$12 sps:$4 sm:$0xff]   ;;  %v12039_v48 = vld [vmem:[#allocation5 + $0xa8] ss:$12 sps:$4 sm:$0xff]  }
 0xc05   :  { %v4111_v59 = vsub.f32 1.0, %v10224_v37  ;;  %v4113_v56 = vmul.f32 %v10224_v37, %v11932_v43 }
 0xc06   :  { %v4109_v47 = vadd.f32 %v4108_v14, %v13244_v2  ;;  %v9996_v14 = vld [vmem:[#allocation5 + $0xb0] ss:$12 sps:$4 sm:$0xff]  }
 0xc08   :  { %10225 = vtanh.f32 %v4109_v47 }
 0xc12   :  { %v10226_v17 = vpop.eup %10225 }
 0xc13   :  { %v4112_v20 = vmul.f32 %v10226_v17, %v4111_v59 }
 0xc15   :  { %v11981_v50 = vadd.f32 %v4113_v56, %v4112_v20 }
 0xc17   :  { %13245 = vst [vmem:[#allocation50_spill] sm:$0xff] %v11981_v50  ;;  %v4120_v33 = vpack.c.bf16 %v11981_v50, %v11981_v50 }
 0xc19   :  { %4314 = vmatmul.mubr.bf16.vlgmr.msra.gmra.mrb[72].mxu0 %v4120_v33  ;;  %9112 = vmatmul.mubr.bf16.vlgmr.msra.gmra.mrb[64].mxu1 %v4120_v33 }
 0xc1a   :  { %4581 = vmatprep.mubr.bf16.mxu0 %v13195_v60  ;;  %9131 = vmatprep.mubr.msk.bf16.mxu1 %vm10530_vm2, %v13196_v63 }
 0xc1b   :  { %4550 = vmatpush1.bf16.msra.mxu0 %v11990_v39  ;;  %9116 = vmatpush3.bf16.msra.mxu1 %v9968_v30  ;;  %v13246_v30 = vsel %vm10924_vm5, %v11731_v38, %v11774_v27 }
 0xc1c   :  { %9117 = vmatprep.subr.bf16.mxu1 %v13196_v63  ;;  %4551 = vmatprep.subr.bf16.mxu0 %v11994_v44 }
 0xc1f   :  { %4552 = vmatpush1.bf16.msra.mxu0 %v11997_v12  ;;  %9118 = vmatpush3.bf16.msra.mxu1 %v9972_v8 }
 0xc20   :  { %9119 = vmatprep.subr.bf16.mxu1 %v13196_v63  ;;  %4553 = vmatprep.subr.bf16.mxu0 %v12001_v11 }
 0xc23   :  { %4554 = vmatpush1.bf16.msra.mxu0 %v12004_v57  ;;  %9120 = vmatpush3.bf16.msra.mxu1 %v9976_v1 }
 0xc24   :  { %9121 = vmatprep.subr.bf16.mxu1 %v13196_v63  ;;  %4555 = vmatprep.subr.bf16.mxu0 %v12008_v23 }
 0xc27   :  { %4556 = vmatpush1.bf16.msra.mxu0 %v12011_v62  ;;  %9122 = vmatpush3.bf16.msra.mxu1 %v9980_v46 }
 0xc28   :  { %9123 = vmatprep.subr.bf16.mxu1 %v13196_v63  ;;  %4557 = vmatprep.subr.bf16.mxu0 %v12015_v15 }
 0xc2b   :  { %4558 = vmatpush1.bf16.msra.mxu0 %v12018_v41  ;;  %9124 = vmatpush3.bf16.msra.mxu1 %v9984_v34  ;;  %v13247_v34 = vsel %vm10928_vm6, %v11744_v10, %v11777_v9 }
 0xc2c   :  { %9125 = vmatprep.subr.bf16.mxu1 %v13196_v63  ;;  %4559 = vmatprep.subr.bf16.mxu0 %v12022_v29 }
 0xc2f   :  { %4560 = vmatpush1.bf16.msra.mxu0 %v12025_v5  ;;  %9126 = vmatpush3.bf16.msra.mxu1 %v9988_v31 }
 0xc30   :  { %9127 = vmatprep.subr.bf16.mxu1 %v13196_v63  ;;  %4561 = vmatprep.subr.bf16.mxu0 %v12029_v4 }
 0xc33   :  { %4562 = vmatpush1.bf16.msra.mxu0 %v12032_v6  ;;  %9128 = vmatpush3.bf16.msra.mxu1 %v9992_v40 }
 0xc34   :  { %9129 = vmatprep.subr.bf16.mxu1 %v13196_v63  ;;  %4563 = vmatprep.subr.bf16.mxu0 %v12036_v19 }
 0xc37   :  { %4564 = vmatpush1.bf16.msra.mxu0 %v12039_v48  ;;  %9130 = vmatpush3.bf16.msra.mxu1 %v9996_v14 }
 0xc38   :  { %4817 = vmatprep.subr.bf16.mxu0 %v11988_v52  ;;  %9135 = vmatprep.subr.bf16.mxu1 %v13196_v63 }
 0xcec   :  { %v4315_v2 = vpop.f32.mrb[72].mxu0  ;;  %v4356_v47 = vpop.f32.mrb[64].mxu1 }
 0xced   :  { %v4316_v37 = vadd.f32 %v4315_v2, %v11854_v42  ;;  %v4317_v59 = vpop.f32.mrb[73].mxu0  ;;  %v9113_v17 = vpop.f32.mrb[65].mxu1 }
 0xcee   :  { %v4318_v20 = vadd.f32 %v4317_v59, %v11865_v22  ;;  %v4319_v56 = vpop.f32.mrb[74].mxu0  ;;  %v4359_v33 = vpop.f32.mrb[66].mxu1 }
 0xcef   :  { %v4362_v8 = vadd.f32 %v4316_v37, %v13246_v30  ;;  %v4320_v1 = vpop.f32.mrb[75].mxu0  ;;  %v9114_v46 = vpop.f32.mrb[67].mxu1  ;;  %v4357_v33 = vadd.f32 %v4356_v47, %v11874_v54 }
 0xcf0   :  { %v4363_v31 = vadd.f32 %v4318_v20, %v13247_v34  ;;  %v13248_v1 = vld [vmem:[#allocation44_spill] sm:$0xff] }
 0xcf1   :  { %v8296_v40 = vmul.f32 -1.442695, %v4362_v8  ;;  %v13249_v46 = vsel %vm10864_vm4, %v11718_v32, %v13248_v1 }
 0xcf2   :  { %v8297_v14 = vmul.f32 -1.442695, %v4363_v31 }
 0xcf3   :  { %10227 = vpow2.f32 %v8296_v40 }
 0xcf4   :  { %10229 = vpow2.f32 %v8297_v14 }
 0xcfd   :  { %v10228_v2 = vpop.eup %10227 }
 0xcfe   :  { %v4370_v59 = vadd.f32 1.0, %v10228_v2  ;;  %v10230_v17 = vpop.eup %10229 }
 0xcff   :  { %v4371_v56 = vadd.f32 1.0, %v10230_v17  ;;  %v9998_v17 = vld [vmem:[#allocation5 + $0x20] ss:$12 sps:$4 sm:$0xff]  }
 0xd00   :  { %10231 = vrcp.f32 %v4370_v59  ;;  %v9997_v59 = vld [vmem:[#allocation5 + $0x8] ss:$12 sps:$4 sm:$0xff]  }
 0xd01   :  { %10233 = vrcp.f32 %v4371_v56  ;;  %v9999_v56 = vld [vmem:[#allocation5 + $0x38] ss:$12 sps:$4 sm:$0xff]  }
 0xd0a   :  { %v10232_v37 = vpop.eup %10231 }
 0xd0b   :  { %v4376_v30 = vmul.f32 %v10232_v37, %v4357_v33  ;;  %v10234_v8 = vpop.eup %10233  ;;  %v10000_v33 = vld [vmem:[#allocation5 + $0x50] ss:$12 sps:$4 sm:$0xff]   ;;  %v10001_v37 = vld [vmem:[#allocation5 + $0x68] ss:$12 sps:$4 sm:$0xff]  }
 0xd0c   :  { %v4379_v34 = vsub.f32 1.0, %v10234_v8  ;;  %v4381_v14 = vmul.f32 %v10234_v8, %v11981_v50 }
 0xd0d   :  { %v4377_v20 = vadd.f32 %v4376_v30, %v13249_v46  ;;  %v10002_v30 = vld [vmem:[#allocation5 + $0x80] ss:$12 sps:$4 sm:$0xff]   ;;  %v10003_v46 = vld [vmem:[#allocation5 + $0x98] ss:$12 sps:$4 sm:$0xff]  }
 0xd0f   :  { %10235 = vtanh.f32 %v4377_v20  ;;  %v10004_v20 = vld [vmem:[#allocation5 + $0xb0] ss:$12 sps:$4 sm:$0xff]  }
 0xd19   :  { %v10236_v31 = vpop.eup %10235 }
 0xd1a   :  { %v4380_v40 = vmul.f32 %v10236_v31, %v4379_v34 }
 0xd1c   :  { %v12064_v2 = vadd.f32 %v4381_v14, %v4380_v40 }
 0xd1e   :  { %13250 = vst [vmem:[#allocation44_spill] sm:$0xff] %v12064_v2  ;;  %v4388_v47 = vpack.c.bf16 %v12064_v2, %v12064_v2 }
 0xd20   :  { %4582 = vmatmul.mubr.bf16.vlgmr.msra.gmra.mrb[76].mxu0 %v4388_v47  ;;  %9132 = vmatmul.mubr.bf16.vlgmr.msra.gmra.mrb[68].mxu1 %v4388_v47 }
 0xd21   :  { %4818 = vmatpush1.bf16.msra.mxu0 %v11990_v39  ;;  %4849 = vmatprep.mubr.bf16.mxu0 %v13195_v60 }
 0xd22   :  { %4819 = vmatprep.subr.bf16.mxu0 %v11994_v44  ;;  %9151 = vmatprep.mubr.msk.bf16.mxu1 %vm10530_vm2, %v13196_v63 }
 0xd23   :  { %9136 = vmatpush3.bf16.msra.mxu1 %v9997_v59 }
 0xd24   :  { %9137 = vmatprep.subr.bf16.mxu1 %v13196_v63 }
 0xd25   :  { %4820 = vmatpush1.bf16.msra.mxu0 %v11997_v12 }
 0xd26   :  { %4821 = vmatprep.subr.bf16.mxu0 %v12001_v11 }
 0xd27   :  { %9138 = vmatpush3.bf16.msra.mxu1 %v9998_v17 }
 0xd28   :  { %9139 = vmatprep.subr.bf16.mxu1 %v13196_v63 }
 0xd29   :  { %4822 = vmatpush1.bf16.msra.mxu0 %v12004_v57 }
 0xd2a   :  { %4823 = vmatprep.subr.bf16.mxu0 %v12008_v23 }
 0xd2b   :  { %9140 = vmatpush3.bf16.msra.mxu1 %v9999_v56  ;;  %v13251_v56 = vsel %vm10924_vm5, %v11774_v27, %v11731_v38 }
 0xd2c   :  { %9141 = vmatprep.subr.bf16.mxu1 %v13196_v63 }
 0xd2d   :  { %4824 = vmatpush1.bf16.msra.mxu0 %v12011_v62 }
 0xd2e   :  { %4825 = vmatprep.subr.bf16.mxu0 %v12015_v15 }
 0xd2f   :  { %9142 = vmatpush3.bf16.msra.mxu1 %v10000_v33 }
 0xd30   :  { %9143 = vmatprep.subr.bf16.mxu1 %v13196_v63 }
 0xd31   :  { %4826 = vmatpush1.bf16.msra.mxu0 %v12018_v41 }
 0xd32   :  { %4827 = vmatprep.subr.bf16.mxu0 %v12022_v29 }
 0xd33   :  { %9144 = vmatpush3.bf16.msra.mxu1 %v10001_v37 }
 0xd34   :  { %9145 = vmatprep.subr.bf16.mxu1 %v13196_v63 }
 0xd35   :  { %4828 = vmatpush1.bf16.msra.mxu0 %v12025_v5 }
 0xd36   :  { %4829 = vmatprep.subr.bf16.mxu0 %v12029_v4 }
 0xd37   :  { %9146 = vmatpush3.bf16.msra.mxu1 %v10002_v30 }
 0xd38   :  { %9147 = vmatprep.subr.bf16.mxu1 %v13196_v63 }
 0xd39   :  { %4830 = vmatpush1.bf16.msra.mxu0 %v12032_v6 }
 0xd3a   :  { %4831 = vmatprep.subr.bf16.mxu0 %v12036_v19 }
 0xd3b   :  { %9148 = vmatpush3.bf16.msra.mxu1 %v10003_v46  ;;  %v13252_v46 = vsel %vm10928_vm6, %v11777_v9, %v11744_v10  ;;  %v13253_v10 = vsel %vm10864_vm4, %v13248_v1, %v11718_v32  ;;  %v10006_v32 = vld [vmem:[#allocation5 + $0x20] ss:$12 sps:$4 sm:$0xff]   ;;  %v10007_v1 = vld [vmem:[#allocation5 + $0x38] ss:$12 sps:$4 sm:$0xff]  }
 0xd3c   :  { %9149 = vmatprep.subr.bf16.mxu1 %v13196_v63 }
 0xd3d   :  { %4832 = vmatpush1.bf16.msra.mxu0 %v12039_v48 }
 0xd3e   :  { %5085 = vmatprep.subr.bf16.mxu0 %v11988_v52 }
 0xd3f   :  { %9150 = vmatpush3.bf16.msra.mxu1 %v10004_v20 }
 0xd40   :  { %9155 = vmatprep.subr.bf16.mxu1 %v13196_v63 }
 0xdf3   :  { %v4583_v8 = vpop.f32.mrb[76].mxu0  ;;  %v4624_v34 = vpop.f32.mrb[68].mxu1 }
 0xdf4   :  { %v4584_v31 = vadd.f32 %v4583_v8, %v11854_v42  ;;  %v4585_v40 = vpop.f32.mrb[77].mxu0  ;;  %v9133_v14 = vpop.f32.mrb[69].mxu1  ;;  %v4625_v38 = vadd.f32 %v4624_v34, %v11874_v54 }
 0xdf5   :  { %v4586_v47 = vadd.f32 %v4585_v40, %v11865_v22  ;;  %v4587_v59 = vpop.f32.mrb[78].mxu0  ;;  %v4627_v17 = vpop.f32.mrb[70].mxu1 }
 0xdf6   :  { %v4630_v33 = vadd.f32 %v4584_v31, %v13251_v56  ;;  %v4588_v37 = vpop.f32.mrb[79].mxu0  ;;  %v9134_v30 = vpop.f32.mrb[71].mxu1 }
 0xdf7   :  { %v4631_v20 = vadd.f32 %v4586_v47, %v13252_v46 }
 0xdf8   :  { %v8322_v8 = vmul.f32 -1.442695, %v4630_v33 }
 0xdf9   :  { %v8323_v14 = vmul.f32 -1.442695, %v4631_v20  ;;  %v10008_v20 = vld [vmem:[#allocation5 + $0x50] ss:$12 sps:$4 sm:$0xff]  }
 0xdfa   :  { %10237 = vpow2.f32 %v8322_v8  ;;  %v10009_v8 = vld [vmem:[#allocation5 + $0x68] ss:$12 sps:$4 sm:$0xff]  }
 0xdfb   :  { %10239 = vpow2.f32 %v8323_v14  ;;  %v10011_v14 = vld [vmem:[#allocation5 + $0x98] ss:$12 sps:$4 sm:$0xff]  }
 0xe04   :  { %v10238_v40 = vpop.eup %10237 }
 0xe05   :  { %v4638_v59 = vadd.f32 1.0, %v10238_v40  ;;  %v10240_v17 = vpop.eup %10239  ;;  %v10012_v40 = vld [vmem:[#allocation5 + $0xb0] ss:$12 sps:$4 sm:$0xff]  }
 0xe06   :  { %v4639_v7 = vadd.f32 1.0, %v10240_v17 }
 0xe07   :  { %10241 = vrcp.f32 %v4638_v59 }
 0xe08   :  { %10243 = vrcp.f32 %v4639_v7  ;;  %v10005_v7 = vld [vmem:[#allocation5 + $0x8] ss:$12 sps:$4 sm:$0xff]  }
 0xe11   :  { %v10242_v27 = vpop.eup %10241 }
 0xe12   :  { %v4644_v31 = vmul.f32 %v10242_v27, %v4625_v38  ;;  %v10244_v47 = vpop.eup %10243 }
 0xe13   :  { %v4647_v56 = vsub.f32 1.0, %v10244_v47  ;;  %v4649_v30 = vmul.f32 %v10244_v47, %v12064_v2 }
 0xe14   :  { %v4645_v9 = vadd.f32 %v4644_v31, %v13253_v10 }
 0xe16   :  { %10245 = vtanh.f32 %v4645_v9 }
 0xe20   :  { %v10246_v33 = vpop.eup %10245 }
 0xe21   :  { %v4648_v37 = vmul.f32 %v10246_v33, %v4647_v56  ;;  %v13255_v56 = vsel %vm10924_vm5, %v11779_v58, %v11722_v35 }
 0xe23   :  { %v12114_v46 = vadd.f32 %v4649_v30, %v4648_v37 }
 0xe25   :  { %13254 = vst [vmem:[#allocation51_spill] sm:$0xff] %v12114_v46  ;;  %v4656_v34 = vpack.c.bf16 %v12114_v46, %v12114_v46 }
 0xe27   :  { %4850 = vmatmul.mubr.bf16.vlgmr.msra.gmra.mrb[80].mxu0 %v4656_v34  ;;  %9152 = vmatmul.mubr.bf16.vlgmr.msra.gmra.mrb[72].mxu1 %v4656_v34  ;;  %v13256_v34 = vsel %vm10928_vm6, %v11790_v55, %v11725_v24  ;;  %v13257_v24 = vsel %vm10864_vm4, %v11756_v61, %v11711_v45  ;;  %v10013_v45 = vld [vmem:[#allocation5 + $0x8] ss:$12 sps:$4 sm:$0xff]   ;;  %v10014_v61 = vld [vmem:[#allocation5 + $0x20] ss:$12 sps:$4 sm:$0xff]  }
 0xe28   :  { %5086 = vmatpush1.bf16.msra.mxu0 %v11990_v39  ;;  %5117 = vmatprep.mubr.bf16.mxu0 %v13195_v60 }
 0xe29   :  { %5087 = vmatprep.subr.bf16.mxu0 %v11994_v44  ;;  %9171 = vmatprep.mubr.msk.bf16.mxu1 %vm10530_vm2, %v13196_v63 }
 0xe2a   :  { %9156 = vmatpush3.bf16.msra.mxu1 %v10005_v7 }
 0xe2b   :  { %9157 = vmatprep.subr.bf16.mxu1 %v13196_v63 }
 0xe2c   :  { %5088 = vmatpush1.bf16.msra.mxu0 %v11997_v12 }
 0xe2d   :  { %5089 = vmatprep.subr.bf16.mxu0 %v12001_v11 }
 0xe2e   :  { %9158 = vmatpush3.bf16.msra.mxu1 %v10006_v32 }
 0xe2f   :  { %9159 = vmatprep.subr.bf16.mxu1 %v13196_v63 }
 0xe30   :  { %5090 = vmatpush1.bf16.msra.mxu0 %v12004_v57 }
 0xe31   :  { %5091 = vmatprep.subr.bf16.mxu0 %v12008_v23 }
 0xe32   :  { %9160 = vmatpush3.bf16.msra.mxu1 %v10007_v1 }
 0xe33   :  { %9161 = vmatprep.subr.bf16.mxu1 %v13196_v63 }
 0xe34   :  { %5092 = vmatpush1.bf16.msra.mxu0 %v12011_v62 }
 0xe35   :  { %5093 = vmatprep.subr.bf16.mxu0 %v12015_v15 }
 0xe36   :  { %9162 = vmatpush3.bf16.msra.mxu1 %v10008_v20 }
 0xe37   :  { %9163 = vmatprep.subr.bf16.mxu1 %v13196_v63 }
 0xe38   :  { %5094 = vmatpush1.bf16.msra.mxu0 %v12018_v41 }
 0xe39   :  { %5095 = vmatprep.subr.bf16.mxu0 %v12022_v29 }
 0xe3a   :  { %9164 = vmatpush3.bf16.msra.mxu1 %v10009_v8 }
 0xe3b   :  { %9165 = vmatprep.subr.bf16.mxu1 %v13196_v63 }
 0xe3c   :  { %5096 = vmatpush1.bf16.msra.mxu0 %v12025_v5 }
 0xe3d   :  { %5097 = vmatprep.subr.bf16.mxu0 %v12029_v4 }
 0xe40   :  { %5098 = vmatpush1.bf16.msra.mxu0 %v12032_v6 }
 0xe41   :  { %5099 = vmatprep.subr.bf16.mxu0 %v12036_v19 }
 0xe44   :  { %5100 = vmatpush1.bf16.msra.mxu0 %v12039_v48 }
 0xe45   :  { %5353 = vmatprep.subr.bf16.mxu0 %v11988_v52  ;;  %v10010_v52 = vld [vmem:[#allocation5 + $0x80] ss:$12 sps:$4 sm:$0xff]  }
 0xe46   :  { %9166 = vmatpush3.bf16.msra.mxu1 %v10010_v52 }
 0xe47   :  { %9167 = vmatprep.subr.bf16.mxu1 %v13196_v63 }
 0xe4a   :  { %9168 = vmatpush3.bf16.msra.mxu1 %v10011_v14 }
 0xe4b   :  { %9169 = vmatprep.subr.bf16.mxu1 %v13196_v63 }
 0xe4e   :  { %9170 = vmatpush3.bf16.msra.mxu1 %v10012_v40 }
 0xe4f   :  { %9175 = vmatprep.subr.bf16.mxu1 %v13196_v63 }
 0xefa   :  { %v4851_v59 = vpop.f32.mrb[80].mxu0  ;;  %v4892_v17 = vpop.f32.mrb[72].mxu1 }
 0xefb   :  { %v4852_v38 = vadd.f32 %v4851_v59, %v11854_v42  ;;  %v4853_v27 = vpop.f32.mrb[81].mxu0  ;;  %v9153_v31 = vpop.f32.mrb[73].mxu1  ;;  %v4893_v35 = vadd.f32 %v4892_v17, %v11874_v54 }
 0xefc   :  { %v4854_v10 = vadd.f32 %v4853_v27, %v11865_v22  ;;  %v4855_v9 = vpop.f32.mrb[82].mxu0  ;;  %v4895_v47 = vpop.f32.mrb[74].mxu1 }
 0xefd   :  { %v4898_v33 = vadd.f32 %v4852_v38, %v13255_v56  ;;  %v4856_v37 = vpop.f32.mrb[83].mxu0  ;;  %v9154_v30 = vpop.f32.mrb[75].mxu1 }
 0xefe   :  { %v4899_v7 = vadd.f32 %v4854_v10, %v13256_v34  ;;  %v13261_v34 = vsel %vm10924_vm5, %v11816_v36, %v11713_v28 }
 0xeff   :  { %v8348_v32 = vmul.f32 -1.442695, %v4898_v33 }
 0xf00   :  { %v8349_v1 = vmul.f32 -1.442695, %v4899_v7 }
 0xf01   :  { %10247 = vpow2.f32 %v8348_v32 }
 0xf02   :  { %10249 = vpow2.f32 %v8349_v1 }
 0xf0b   :  { %v10248_v20 = vpop.eup %10247 }
 0xf0c   :  { %v4906_v8 = vadd.f32 1.0, %v10248_v20  ;;  %v10250_v52 = vpop.eup %10249  ;;  %v13262_v20 = vsel %vm10928_vm6, %v11819_v13, %v11716_v25  ;;  %v13263_v25 = vsel %vm10864_vm4, %v11727_v26, %v11720_v3 }
 0xf0d   :  { %v4907_v14 = vadd.f32 1.0, %v10250_v52 }
 0xf0e   :  { %10251 = vrcp.f32 %v4906_v8 }
 0xf0f   :  { %10253 = vrcp.f32 %v4907_v14 }
 0xf18   :  { %v10252_v58 = vpop.eup %10251 }
 0xf19   :  { %v4912_v40 = vmul.f32 %v10252_v58, %v4893_v35  ;;  %v10254_v59 = vpop.eup %10253 }
 0xf1a   :  { %v4915_v38 = vsub.f32 1.0, %v10254_v59  ;;  %v4917_v10 = vmul.f32 %v10254_v59, %v12114_v46 }
 0xf1b   :  { %v4913_v55 = vadd.f32 %v4912_v40, %v13257_v24 }
 0xf1d   :  { %10255 = vtanh.f32 %v4913_v55 }
 0xf27   :  { %v10256_v27 = vpop.eup %10255 }
 0xf28   :  { %v4916_v31 = vmul.f32 %v10256_v27, %v4915_v38 }
 0xf2a   :  { %v12164_v9 = vadd.f32 %v4917_v10, %v4916_v31 }
 0xf2c   :  { %13258 = vst [vmem:[#allocation52_spill] sm:$0xff] %v12164_v9  ;;  %v4924_v17 = vpack.c.bf16 %v12164_v9, %v12164_v9 }
 0xf2e   :  { %5118 = vmatmul.mubr.bf16.vlgmr.msra.gmra.mrb[84].mxu0 %v4924_v17  ;;  %9172 = vmatmul.mubr.bf16.vlgmr.msra.gmra.mrb[76].mxu1 %v4924_v17  ;;  %v5502_v17 = vld [vmem:[%s10540_s5] sm:$0xff] }
 0xf2f   :  { %5354 = vmatpush1.bf16.msra.mxu0 %v11990_v39  ;;  %5385 = vmatprep.mubr.bf16.mxu0 %v13195_v60  ;;  %v10015_v39 = vld [vmem:[#allocation5 + $0x38] ss:$12 sps:$4 sm:$0xff]  }
 0xf30   :  { %5355 = vmatprep.subr.bf16.mxu0 %v11994_v44  ;;  %9191 = vmatprep.mubr.msk.bf16.mxu1 %vm10530_vm2, %v13196_v63  ;;  %v10016_v44 = vld [vmem:[#allocation5 + $0x50] ss:$12 sps:$4 sm:$0xff]  }
 0xf31   :  { %9176 = vmatpush3.bf16.msra.mxu1 %v10013_v45  ;;  %v5503_v45 = vld [vmem:[%s10540_s5 + $0x8] sm:$0xff] }
 0xf32   :  { %9177 = vmatprep.subr.bf16.mxu1 %v13196_v63  ;;  %v5510_v26 = vpack.c.bf16 %v5503_v45, %v5502_v17  ;;  %v10059_v17 = vld [vmem:[#allocation9 + $0x1c] ss:$12 sps:$4 sm:$0xff]   ;;  %v10057_v45 = vld [vmem:[#allocation9 + $0x18] ss:$12 sps:$4 sm:$0xff]  }
 0xf33   :  { %5356 = vmatpush1.bf16.msra.mxu0 %v11997_v12  ;;  %v10017_v12 = vld [vmem:[#allocation5 + $0x68] ss:$12 sps:$4 sm:$0xff]  }
 0xf34   :  { %5357 = vmatprep.subr.bf16.mxu0 %v12001_v11  ;;  %v10018_v11 = vld [vmem:[#allocation5 + $0x80] ss:$12 sps:$4 sm:$0xff]  }
 0xf35   :  { %9178 = vmatpush3.bf16.msra.mxu1 %v10014_v61 }
 0xf36   :  { %9179 = vmatprep.subr.bf16.mxu1 %v13196_v63 }
 0xf37   :  { %5358 = vmatpush1.bf16.msra.mxu0 %v12004_v57  ;;  %v10019_v57 = vld [vmem:[#allocation5 + $0x98] ss:$12 sps:$4 sm:$0xff]  }
 0xf38   :  { %5359 = vmatprep.subr.bf16.mxu0 %v12008_v23  ;;  %v10020_v23 = vld [vmem:[#allocation5 + $0xb0] ss:$12 sps:$4 sm:$0xff]  }
 0xf39   :  { %9180 = vmatpush3.bf16.msra.mxu1 %v10015_v39 }
 0xf3a   :  { %9181 = vmatprep.subr.bf16.mxu1 %v13196_v63 }
 0xf3b   :  { %5360 = vmatpush1.bf16.msra.mxu0 %v12011_v62  ;;  %v8402_v62 = vld.sshfl [vmem:[%s13259_s9] sm:$0x13 pattern:$0x75316420] }
 0xf3c   :  { %5361 = vmatprep.subr.bf16.mxu0 %v12015_v15  ;;  %v13260_v15 = vld [vmem:[#allocation28_spill] sm:$0xff] }
 0xf3d   :  { %9182 = vmatpush3.bf16.msra.mxu1 %v10016_v44 }
 0xf3e   :  { %9183 = vmatprep.subr.bf16.mxu1 %v13196_v63 }
 0xf3f   :  { %5362 = vmatpush1.bf16.msra.mxu0 %v12018_v41  ;;  %v5530_v41 = vrot.slane %v8402_v62, %v13260_v15 }
 0xf40   :  { %5363 = vmatprep.subr.bf16.mxu0 %v12022_v29  ;;  %v5523_v29 = vcombine.high %v8402_v62, %v8402_v62 }
 0xf41   :  { %9184 = vmatpush3.bf16.msra.mxu1 %v10017_v12  ;;  %v5552_v3 = vsel %vm254_vm0, %v5530_v41, 0  ;;  %v10021_v12 = vld [vmem:[#allocation7 + $0x8] ss:$12 sps:$4 sm:$0xff]  }
 0xf42   :  { %9185 = vmatprep.subr.bf16.mxu1 %v13196_v63 }
 0xf43   :  { %5364 = vmatpush1.bf16.msra.mxu0 %v12025_v5  ;;  %v5538_v5 = vcombine.high %v5530_v41, %v5530_v41  ;;  %v5507_v41 = vld [vmem:[%s10540_s5 + $0x28] sm:$0xff] }
 0xf44   :  { %5365 = vmatprep.subr.bf16.mxu0 %v12029_v4  ;;  %v5537_v4 = vrot.slane %v5523_v29, %v13260_v15  ;;  %v5506_v15 = vld [vmem:[%s10540_s5 + $0x20] sm:$0xff]  ;;  %v10022_v29 = vld [vmem:[#allocation7] ss:$12 sps:$4 sm:$0xff]  }
 0xf45   :  { %9186 = vmatpush3.bf16.msra.mxu1 %v10018_v11  ;;  %v5558_v44 = vsel %vm254_vm0, %v5538_v5, 0  ;;  %v10024_v11 = vld [vmem:[#allocation7 + $0x4] ss:$12 sps:$4 sm:$0xff]  }
 0xf46   :  { %9187 = vmatprep.subr.bf16.mxu1 %v13196_v63 }
 0xf47   :  { %5366 = vmatpush1.bf16.msra.mxu0 %v12032_v6 }
 0xf48   :  { %5367 = vmatprep.subr.bf16.mxu0 %v12036_v19 }
 0xf49   :  { %9188 = vmatpush3.bf16.msra.mxu1 %v10019_v57  ;;  %v5504_v57 = vld [vmem:[%s10540_s5 + $0x10] sm:$0xff] }
 0xf4a   :  { %9189 = vmatprep.subr.bf16.mxu1 %v13196_v63 }
 0xf4b   :  { %5368 = vmatpush1.bf16.msra.mxu0 %v12039_v48 }
 0xf4c   :  { %8403 = vmatprep.subr.msk.bf16.mxu0 %vm254_vm0, %v5537_v4  ;;  %v10028_v4 = vld [vmem:[#allocation7 + $0x1c] ss:$12 sps:$4 sm:$0xff]  }
 0xf4d   :  { %9190 = vmatpush3.bf16.msra.mxu1 %v10020_v23  ;;  %v5505_v23 = vld [vmem:[%s10540_s5 + $0x18] sm:$0xff] }
 0xf4e   :  { %9723 = vmatprep.subr.msk.bf16.mxu1 %vm254_vm0, %v5538_v5  ;;  %v5511_v62 = vpack.c.bf16 %v5505_v23, %v5504_v57  ;;  %v10025_v5 = vld [vmem:[#allocation7 + $0x20] ss:$12 sps:$4 sm:$0xff]   ;;  %v10068_v57 = vld [vmem:[#allocation9 + $0x50] ss:$12 sps:$4 sm:$0xff]  }
 0xf4f   :  { %v10069_v23 = vld [vmem:[#allocation9 + $0x60] ss:$12 sps:$4 sm:$0xff]  }
0x1001   :  { %v5119_v6 = vpop.f32.mrb[84].mxu0  ;;  %v5160_v19 = vpop.f32.mrb[76].mxu1 }
0x1002   :  { %v5120_v48 = vadd.f32 %v5119_v6, %v11854_v42  ;;  %v5121_v47 = vpop.f32.mrb[85].mxu0  ;;  %v9173_v56 = vpop.f32.mrb[77].mxu1  ;;  %v5161_v28 = vadd.f32 %v5160_v19, %v11874_v54  ;;  %v5512_v6 = vpack.c.bf16 %v5507_v41, %v5506_v15  ;;  %v10026_v19 = vld [vmem:[#allocation7 + $0x18] ss:$12 sps:$4 sm:$0xff]   ;;  %v10072_v15 = vld [vmem:[#allocation9 + $0x68] ss:$12 sps:$4 sm:$0xff]  }
0x1003   :  { %v5122_v33 = vadd.f32 %v5121_v47, %v11865_v22  ;;  %v5123_v37 = vpop.f32.mrb[86].mxu0  ;;  %v5163_v30 = vpop.f32.mrb[78].mxu1  ;;  %v5509_v47 = vld [vmem:[%s10540_s5 + $0x38] sm:$0xff]  ;;  %v10029_v56 = vld [vmem:[#allocation7 + $0x38] ss:$12 sps:$4 sm:$0xff]  }
0x1004   :  { %v5166_v7 = vadd.f32 %v5120_v48, %v13261_v34  ;;  %v5124_v32 = vpop.f32.mrb[87].mxu0  ;;  %v9174_v1 = vpop.f32.mrb[79].mxu1  ;;  %v5508_v48 = vld [vmem:[%s10540_s5 + $0x30] sm:$0xff]  ;;  %v10030_v30 = vld [vmem:[#allocation7 + $0x30] ss:$12 sps:$4 sm:$0xff]  }
0x1005   :  { %v5167_v8 = vadd.f32 %v5122_v33, %v13262_v20  ;;  %v10032_v33 = vld [vmem:[#allocation7 + $0x34] ss:$12 sps:$4 sm:$0xff]   ;;  %v5513_v37 = vpack.c.bf16 %v5509_v47, %v5508_v48  ;;  %v10033_v34 = vld [vmem:[#allocation7 + $0x50] ss:$12 sps:$4 sm:$0xff]   ;;  %v10083_v48 = vld [vmem:[#allocation9 + $0xac] ss:$12 sps:$4 sm:$0xff]  }
0x1006   :  { %v8374_v52 = vmul.f32 -1.442695, %v5166_v7  ;;  %v10036_v7 = vld [vmem:[#allocation7 + $0x4c] ss:$12 sps:$4 sm:$0xff]   ;;  %v10034_v32 = vld [vmem:[#allocation7 + $0x48] ss:$12 sps:$4 sm:$0xff]  }
0x1007   :  { %v8375_v14 = vmul.f32 -1.442695, %v5167_v8  ;;  %v13265_v1 = vld [vmem:[#allocation32_spill] sm:$0xff]  ;;  %v10037_v20 = vld [vmem:[#allocation7 + $0x68] ss:$12 sps:$4 sm:$0xff]  }
0x1008   :  { %10257 = vpow2.f32 %v8374_v52  ;;  %v10040_v8 = vld [vmem:[#allocation7 + $0x64] ss:$12 sps:$4 sm:$0xff]   ;;  %v10038_v52 = vld [vmem:[#allocation7 + $0x60] ss:$12 sps:$4 sm:$0xff]   ;;  %v10075_v41 = vld [vmem:[#allocation9 + $0x7c] ss:$12 sps:$4 sm:$0xff]  }
0x1009   :  { %10259 = vpow2.f32 %v8375_v14  ;;  %v10041_v14 = vld [vmem:[#allocation7 + $0x80] ss:$12 sps:$4 sm:$0xff]   ;;  %v10084_v47 = vld [vmem:[#allocation9 + $0xb0] ss:$12 sps:$4 sm:$0xff]  }
0x1012   :  { %v10258_v35 = vpop.eup %10257 }
0x1013   :  { %v5174_v58 = vadd.f32 1.0, %v10258_v35  ;;  %v10260_v40 = vpop.eup %10259  ;;  %v10044_v35 = vld [vmem:[#allocation7 + $0x7c] ss:$12 sps:$4 sm:$0xff]  }
0x1014   :  { %v5175_v36 = vadd.f32 1.0, %v10260_v40  ;;  %v10045_v40 = vld [vmem:[#allocation7 + $0x98] ss:$12 sps:$4 sm:$0xff]  }
0x1015   :  { %10261 = vrcp.f32 %v5174_v58  ;;  %v10042_v58 = vld [vmem:[#allocation7 + $0x78] ss:$12 sps:$4 sm:$0xff]  }
0x1016   :  { %10263 = vrcp.f32 %v5175_v36  ;;  %v10048_v36 = vld [vmem:[#allocation7 + $0x94] ss:$12 sps:$4 sm:$0xff]  }
0x101f   :  { %v10262_v24 = vpop.eup %10261 }
0x1020   :  { %v5180_v55 = vmul.f32 %v10262_v24, %v5161_v28  ;;  %v10264_v59 = vpop.eup %10263  ;;  %v10046_v28 = vld [vmem:[#allocation7 + $0x90] ss:$12 sps:$4 sm:$0xff]  }
0x1021   :  { %v5183_v38 = vsub.f32 1.0, %v10264_v59  ;;  %v5185_v10 = vmul.f32 %v10264_v59, %v12164_v9  ;;  %v10049_v24 = vld [vmem:[#allocation7 + $0xb0] ss:$12 sps:$4 sm:$0xff]  }
0x1022   :  { %v5181_v13 = vadd.f32 %v5180_v55, %v13263_v25  ;;  %v10052_v55 = vld [vmem:[#allocation7 + $0xac] ss:$12 sps:$4 sm:$0xff]   ;;  %v10050_v25 = vld [vmem:[#allocation7 + $0xa8] ss:$12 sps:$4 sm:$0xff]  }
0x1023   :  { %v13267_v59 = vld [vmem:[#allocation42_spill] sm:$0xff] }
0x1024   :  { %10265 = vtanh.f32 %v5181_v13  ;;  %v13266_v13 = vld [vmem:[#allocation41_spill] sm:$0xff] }
0x102e   :  { %v10266_v27 = vpop.eup %10265 }
0x102f   :  { %v5184_v31 = vmul.f32 %v10266_v27, %v5183_v38  ;;  %v13268_v38 = vld [vmem:[#allocation43_spill] sm:$0xff]  ;;  %v10055_v27 = vld [vmem:[#allocation9 + $0x4] ss:$12 sps:$4 sm:$0xff]  }
0x1031   :  { %v12219_v61 = vadd.f32 %v5185_v10, %v5184_v31  ;;  %v10053_v31 = vld [vmem:[#allocation9] ss:$12 sps:$4 sm:$0xff]   ;;  %v10056_v10 = vld [vmem:[#allocation9 + $0x8] ss:$12 sps:$4 sm:$0xff]  }
0x1033   :  { %13264 = vst [vmem:[#allocation28_spill] sm:$0xff] %v12219_v61  ;;  %v5192_v39 = vpack.c.bf16 %v12219_v61, %v12219_v61 }
0x1035   :  { %5386 = vmatmul.mubr.bf16.vlgmr.msra.gmra.mrb[88].mxu0 %v5192_v39  ;;  %9192 = vmatmul.mubr.bf16.vlgmr.msra.gmra.mrb[80].mxu1 %v5192_v39  ;;  %v10060_v39 = vld [vmem:[#allocation9 + $0x20] ss:$12 sps:$4 sm:$0xff]  }
0x1036   :  { %9196 = vmatpush3.bf16.msra.mxu1 %v5558_v44  ;;  %5561 = vmatpush1.bf16.msra.mxu0 %v5552_v3  ;;  %v10063_v44 = vld [vmem:[#allocation9 + $0x34] ss:$12 sps:$4 sm:$0xff]   ;;  %v10061_v3 = vld [vmem:[#allocation9 + $0x30] ss:$12 sps:$4 sm:$0xff]  }
0x1037   :  { %5592 = vmatprep.mubr.bf16.mxu0 %v13195_v60  ;;  %9197 = vmatprep.mubr.msk.bf16.mxu1 %vm241_vm1, %v5510_v26 }
0x1038   :  { %9205 = vmatprep.subr.bf16.mxu1 %v10021_v12  ;;  %5894 = vmatprep.subr.bf16.mxu0 %v10024_v11  ;;  %v10065_v11 = vld [vmem:[#allocation9 + $0x48] ss:$12 sps:$4 sm:$0xff]  }
0x103d   :  { %8404 = vmatmul.mubr.msk.bf16.vlgmr.msra.gmra.mrb[92].mxu0 %vm241_vm1, %v5510_v26  ;;  %9198 = vmatmul.mubr.msk.bf16.vlgmr.msra.gmra.mrb[84].mxu1 %vm241_vm1, %v5511_v62  ;;  %v10064_v26 = vld [vmem:[#allocation9 + $0x38] ss:$12 sps:$4 sm:$0xff]  }
0x103e   :  { %9206 = vmatpush3.bf16.msra.mxu1 %v10021_v12  ;;  %5895 = vmatpush1.bf16.msra.mxu0 %v10022_v29  ;;  %v10067_v12 = vld [vmem:[#allocation9 + $0x4c] ss:$12 sps:$4 sm:$0xff]  }
0x103f   :  { %9207 = vmatprep.subr.bf16.mxu1 %v10025_v5  ;;  %5896 = vmatprep.subr.bf16.mxu0 %v10028_v4  ;;  %v10076_v29 = vld [vmem:[#allocation9 + $0x80] ss:$12 sps:$4 sm:$0xff]  }
0x1040   :  { %5602 = vmatprep.mubr.bf16.mxu0 %v13195_v60  ;;  %9201 = vmatprep.mubr.msk.bf16.mxu1 %vm241_vm1, %v5512_v6  ;;  %v10079_v4 = vld [vmem:[#allocation9 + $0x94] ss:$12 sps:$4 sm:$0xff]  }
0x1042   :  { %9208 = vmatpush3.bf16.msra.mxu1 %v10025_v5  ;;  %5897 = vmatpush1.bf16.msra.mxu0 %v10026_v19  ;;  %v10073_v5 = vld [vmem:[#allocation9 + $0x78] ss:$12 sps:$4 sm:$0xff]   ;;  %v10077_v19 = vld [vmem:[#allocation9 + $0x90] ss:$12 sps:$4 sm:$0xff]  }
0x1043   :  { %9209 = vmatprep.subr.bf16.mxu1 %v10029_v56  ;;  %5898 = vmatprep.subr.bf16.mxu0 %v10032_v33  ;;  %v12256_v33 = vld [vmem:[#allocation10 + $0x4] ss:$12 sps:$4 sm:$0xff]  }
0x1045   :  { %8405 = vmatmul.mubr.msk.bf16.gmra.mrb[96].mxu0 %vm241_vm1, %v5511_v62  ;;  %9202 = vmatmul.mubr.msk.bf16.gmra.mrb[88].mxu1 %vm241_vm1, %v5513_v37  ;;  %v10071_v62 = vld [vmem:[#allocation9 + $0x64] ss:$12 sps:$4 sm:$0xff]  }
0x1046   :  { %9210 = vmatpush3.bf16.msra.mxu1 %v10029_v56  ;;  %5899 = vmatpush1.bf16.msra.mxu0 %v10030_v30  ;;  %v10081_v56 = vld [vmem:[#allocation9 + $0xa8] ss:$12 sps:$4 sm:$0xff]  }
0x1047   :  { %9221 = vmatprep.mubr.bf16.mxu1 %v13265_v1  ;;  %9211 = vmatprep.subr.bf16.mxu1 %v10033_v34 }
0x1048   :  { %5900 = vmatprep.subr.bf16.mxu0 %v10036_v7  ;;  %5612 = vmatprep.mubr.bf16.mxu0 %v13195_v60 }
0x104a   :  { %9212 = vmatpush3.bf16.msra.mxu1 %v10033_v34  ;;  %5901 = vmatpush1.bf16.msra.mxu0 %v10034_v32 }
0x104b   :  { %9213 = vmatprep.subr.bf16.mxu1 %v10037_v20  ;;  %5902 = vmatprep.subr.bf16.mxu0 %v10040_v8 }
0x104d   :  { %8406 = vmatmul.mubr.msk.bf16.gmra.mrb[100].mxu0 %vm241_vm1, %v5512_v6  ;;  %v10080_v6 = vld [vmem:[#allocation9 + $0x98] ss:$12 sps:$4 sm:$0xff]  }
0x104e   :  { %9214 = vmatpush3.bf16.msra.mxu1 %v10037_v20  ;;  %5903 = vmatpush1.bf16.msra.mxu0 %v10038_v52  ;;  %v13269_v52 = vld [vmem:[#allocation46_spill] sm:$0xff] }
0x104f   :  { %9215 = vmatprep.subr.bf16.mxu1 %v10041_v14  ;;  %5904 = vmatprep.subr.bf16.mxu0 %v10044_v35 }
0x1050   :  { %5622 = vmatprep.mubr.bf16.mxu0 %v13195_v60 }
0x1052   :  { %9216 = vmatpush3.bf16.msra.mxu1 %v10041_v14  ;;  %5905 = vmatpush1.bf16.msra.mxu0 %v10042_v58  ;;  %v13270_v14 = vld [vmem:[#allocation45_spill] sm:$0xff] }
0x1053   :  { %9217 = vmatprep.subr.bf16.mxu1 %v10045_v40  ;;  %5906 = vmatprep.subr.bf16.mxu0 %v10048_v36  ;;  %v13271_v35 = vsel %vm10924_vm5, %v13269_v52, %v13270_v14  ;;  %v12357_v52 = vld [vmem:[#allocation10 + $0x7c] ss:$12 sps:$4 sm:$0xff]  }
0x1054   :  { %v12360_v14 = vld [vmem:[#allocation10 + $0x68] ss:$12 sps:$4 sm:$0xff]  }
0x1055   :  { %8407 = vmatmul.mubr.msk.bf16.gmra.mrb[104].mxu0 %vm241_vm1, %v5513_v37 }
0x1056   :  { %9218 = vmatpush3.bf16.msra.mxu1 %v10045_v40  ;;  %5907 = vmatpush1.bf16.msra.mxu0 %v10046_v28  ;;  %v13272_v28 = vld [vmem:[#allocation47_spill] sm:$0xff] }
0x1057   :  { %9219 = vmatprep.subr.bf16.mxu1 %v10049_v24  ;;  %5908 = vmatprep.subr.bf16.mxu0 %v10052_v55 }
0x1058   :  { %5926 = vmatprep.mubr.bf16.mxu0 %v13195_v60 }
0x105a   :  { %9220 = vmatpush3.bf16.msra.mxu1 %v10049_v24  ;;  %5909 = vmatpush1.bf16.msra.mxu0 %v10050_v25  ;;  %v13273_v24 = vsel %vm10928_vm6, %v11839_v18, %v13272_v28  ;;  %v13274_v18 = vsel %vm10864_vm4, %v11746_v16, %v11729_v0  ;;  %v5470_v16 = vsel %vm10924_vm5, %v11932_v43, %v12219_v61  ;;  %v12378_v28 = vld [vmem:[#allocation10 + $0xac] ss:$12 sps:$4 sm:$0xff]  }
0x105b   :  { %6228 = vmatprep.subr.bf16.mxu0 %v10055_v27  ;;  %9229 = vmatprep.subr.bf16.mxu1 %v10056_v10 }
0x105d   :  { %9222 = vmatmul.mubr.bf16.vlgmr.msra.gmra.mrb[84].mxu1 %v13266_v13  ;;  %5927 = vmatmul.mubr.bf16.vlgmr.msra.gmra.mrb[92].mxu0 %v13265_v1 }
0x105e   :  { %9225 = vmatprep.mubr.bf16.mxu1 %v13267_v59  ;;  %5936 = vmatprep.mubr.bf16.mxu0 %v13195_v60 }
0x105f   :  { %6229 = vmatpush1.bf16.msra.mxu0 %v10053_v31  ;;  %9230 = vmatpush3.bf16.msra.mxu1 %v10056_v10 }
0x1060   :  { %6230 = vmatprep.subr.bf16.mxu0 %v10059_v17  ;;  %9231 = vmatprep.subr.bf16.mxu1 %v10060_v39 }
0x1063   :  { %6231 = vmatpush1.bf16.msra.mxu0 %v10057_v45  ;;  %9232 = vmatpush3.bf16.msra.mxu1 %v10060_v39 }
0x1064   :  { %6232 = vmatprep.subr.bf16.mxu0 %v10063_v44  ;;  %9233 = vmatprep.subr.bf16.mxu1 %v10064_v26 }
0x1065   :  { %9226 = vmatmul.mubr.bf16.gmra.mrb[88].mxu1 %v13268_v38  ;;  %5937 = vmatmul.mubr.bf16.gmra.mrb[96].mxu0 %v13266_v13 }
0x1066   :  { %5946 = vmatprep.mubr.bf16.mxu0 %v13195_v60 }
0x1067   :  { %6233 = vmatpush1.bf16.msra.mxu0 %v10061_v3  ;;  %9234 = vmatpush3.bf16.msra.mxu1 %v10064_v26 }
0x1068   :  { %6234 = vmatprep.subr.bf16.mxu0 %v10067_v12  ;;  %9235 = vmatprep.subr.bf16.mxu1 %v10068_v57 }
0x106b   :  { %6235 = vmatpush1.bf16.msra.mxu0 %v10065_v11  ;;  %9236 = vmatpush3.bf16.msra.mxu1 %v10068_v57  ;;  %v12293_v11 = vld [vmem:[#allocation10] ss:$12 sps:$4 sm:$0xff]   ;;  %v5476_v57 = vsel %vm10924_vm5, %v12164_v9, %v11981_v50 }
0x106c   :  { %6236 = vmatprep.subr.bf16.mxu0 %v10071_v62  ;;  %9237 = vmatprep.subr.bf16.mxu1 %v10072_v15  ;;  %v5478_v62 = vsel %vm10924_vm5, %v12064_v2, %v12114_v46 }
0x106d   :  { %5947 = vmatmul.mubr.bf16.gmra.mrb[100].mxu0 %v13267_v59 }
0x106e   :  { %5956 = vmatprep.mubr.bf16.mxu0 %v13195_v60 }
0x106f   :  { %6237 = vmatpush1.bf16.msra.mxu0 %v10069_v23  ;;  %9238 = vmatpush3.bf16.msra.mxu1 %v10072_v15  ;;  %v12303_v15 = vld [vmem:[#allocation10 + $0x1c] ss:$12 sps:$4 sm:$0xff]  }
0x1070   :  { %6238 = vmatprep.subr.bf16.mxu0 %v10075_v41  ;;  %9239 = vmatprep.subr.bf16.mxu1 %v10076_v29 }
0x1073   :  { %6239 = vmatpush1.bf16.msra.mxu0 %v10073_v5  ;;  %9240 = vmatpush3.bf16.msra.mxu1 %v10076_v29  ;;  %v5480_v29 = vsel %vm10924_vm5, %v12114_v46, %v12064_v2  ;;  %v12309_v5 = vld [vmem:[#allocation10 + $0x8] ss:$12 sps:$4 sm:$0xff]  }
0x1074   :  { %6240 = vmatprep.subr.bf16.mxu0 %v10079_v4  ;;  %9241 = vmatprep.subr.bf16.mxu1 %v10080_v6  ;;  %v6066_v4 = vpack.c.bf16 %v5476_v57, %v5480_v29 }
0x1075   :  { %5957 = vmatmul.mubr.bf16.gmra.mrb[104].mxu0 %v13268_v38 }
0x1076   :  { %6260 = vmatprep.mubr.bf16.mxu0 %v13195_v60 }
0x1077   :  { %6241 = vmatpush1.bf16.msra.mxu0 %v10077_v19  ;;  %9242 = vmatpush3.bf16.msra.mxu1 %v10080_v6  ;;  %v12312_v6 = vld [vmem:[#allocation10 + $0x18] ss:$12 sps:$4 sm:$0xff]   ;;  %v12315_v19 = vld [vmem:[#allocation10 + $0x34] ss:$12 sps:$4 sm:$0xff]  }
0x1078   :  { %6242 = vmatprep.subr.bf16.mxu0 %v10083_v48  ;;  %9243 = vmatprep.subr.bf16.mxu1 %v10084_v47  ;;  %v12319_v48 = vld [vmem:[#allocation10 + $0x20] ss:$12 sps:$4 sm:$0xff]  }
0x107b   :  { %6243 = vmatpush1.bf16.msra.mxu0 %v10081_v56  ;;  %9244 = vmatpush3.bf16.msra.mxu1 %v10084_v47  ;;  %v12327_v56 = vld [vmem:[#allocation10 + $0x30] ss:$12 sps:$4 sm:$0xff]  }
0x107c   :  { %6618 = vmatprep.subr.bf16.mxu0 %v12256_v33  ;;  %9253 = vmatprep.subr.bf16.mxu1 %v13196_v63 }
0x1108   :  { %v5387_v37 = vpop.f32.mrb[88].mxu0  ;;  %v5428_v30 = vpop.f32.mrb[80].mxu1 }
0x1109   :  { %v5388_v34 = vadd.f32 %v5387_v37, %v11854_v42  ;;  %v5389_v7 = vpop.f32.mrb[89].mxu0  ;;  %v9193_v32 = vpop.f32.mrb[81].mxu1  ;;  %v5429_v27 = vadd.f32 %v5428_v30, %v11874_v54  ;;  %v5474_v54 = vsel %vm10924_vm5, %v11981_v50, %v12164_v9  ;;  %v5472_v37 = vsel %vm10924_vm5, %v12219_v61, %v11932_v43  ;;  %v12334_v30 = vld [vmem:[#allocation10 + $0x4c] ss:$12 sps:$4 sm:$0xff]  }
0x110a   :  { %v5390_v1 = vadd.f32 %v5389_v7, %v11865_v22  ;;  %v5391_v20 = vpop.f32.mrb[90].mxu0  ;;  %v5431_v8 = vpop.f32.mrb[82].mxu1  ;;  %v6065_v41 = vpack.c.bf16 %v5478_v62, %v5474_v54  ;;  %v12337_v7 = vld [vmem:[#allocation10 + $0x38] ss:$12 sps:$4 sm:$0xff]   ;;  %v12341_v32 = vld [vmem:[#allocation10 + $0x48] ss:$12 sps:$4 sm:$0xff]  }
0x110b   :  { %v5434_v58 = vadd.f32 %v5388_v34, %v13271_v35  ;;  %v5392_v40 = vpop.f32.mrb[91].mxu0  ;;  %v9194_v36 = vpop.f32.mrb[83].mxu1  ;;  %v12348_v20 = vld [vmem:[#allocation10 + $0x50] ss:$12 sps:$4 sm:$0xff]   ;;  %v12354_v8 = vld [vmem:[#allocation10 + $0x60] ss:$12 sps:$4 sm:$0xff]  }
0x110c   :  { %v5435_v42 = vadd.f32 %v5390_v1, %v13273_v24  ;;  %v12345_v1 = vld [vmem:[#allocation10 + $0x64] ss:$12 sps:$4 sm:$0xff]   ;;  %v12371_v40 = vld [vmem:[#allocation10 + $0x80] ss:$12 sps:$4 sm:$0xff]   ;;  %v6438_v43 = vld [vmem:[%s13292_s17] sm:$0x7] }
0x110d   :  { %v8400_v55 = vmul.f32 -1.442695, %v5434_v58  ;;  %v12364_v35 = vld [vmem:[#allocation10 + $0x78] ss:$12 sps:$4 sm:$0xff]   ;;  %v12368_v58 = vld [vmem:[#allocation10 + $0x94] ss:$12 sps:$4 sm:$0xff]  }
0x110e   :  { %v8401_v25 = vmul.f32 -1.442695, %v5435_v42  ;;  %v12375_v36 = vld [vmem:[#allocation10 + $0x90] ss:$12 sps:$4 sm:$0xff]   ;;  %v12381_v24 = vld [vmem:[#allocation10 + $0x98] ss:$12 sps:$4 sm:$0xff]  }
0x110f   :  { %10267 = vpow2.f32 %v8400_v55  ;;  %v12385_v42 = vld [vmem:[#allocation10 + $0xa8] ss:$12 sps:$4 sm:$0xff]   ;;  %v12390_v55 = vld [vmem:[#allocation10 + $0xb0] ss:$12 sps:$4 sm:$0xff]  }
0x1110   :  { %10269 = vpow2.f32 %v8401_v25  ;;  %v5482_v25 = vld [vmem:[%s13276_s13] sm:$0x7] }
0x1119   :  { %v10268_v22 = vpop.eup %10267 }
0x111a   :  { %v5442_v13 = vadd.f32 1.0, %v10268_v22  ;;  %v10270_v59 = vpop.eup %10269  ;;  %v13277_v22 = vld [vmem:[#allocation29_spill] sm:$0xff] }
0x111b   :  { %v5443_v38 = vadd.f32 1.0, %v10270_v59 }
0x111c   :  { %10271 = vrcp.f32 %v5442_v13  ;;  %v5495_v13 = vrot.slane %v5482_v25, %v13277_v22 }
0x111d   :  { %10273 = vrcp.f32 %v5443_v38  ;;  %v13278_v38 = vld [vmem:[#allocation30_spill] sm:$0xff] }
0x1126   :  { %v10272_v31 = vpop.eup %10271 }
0x1127   :  { %v5448_v10 = vmul.f32 %v10272_v31, %v5429_v27  ;;  %v10274_v45 = vpop.eup %10273  ;;  %v5487_v27 = vrot.slane %v5482_v25, %v13278_v38 }
0x1128   :  { %v5451_v39 = vsub.f32 1.0, %v10274_v45  ;;  %v5453_v3 = vmul.f32 %v10274_v45, %v12219_v61 }
0x1129   :  { %v5449_v17 = vadd.f32 %v5448_v10, %v13274_v18  ;;  %v13279_v18 = vld [vmem:[#allocation31_spill] sm:$0xff] }
0x112b   :  { %10275 = vtanh.f32 %v5449_v17  ;;  %v12440_v17 = vrot.slane %v5482_v25, %v13279_v18 }
0x1135   :  { %v10276_v44 = vpop.eup %10275 }
0x1136   :  { %v5452_v26 = vmul.f32 %v10276_v44, %v5451_v39 }
0x1138   :  { %v12279_v12 = vadd.f32 %v5453_v3, %v5452_v26 }
0x113a   :  { %13275 = vst [vmem:[#allocation32_spill] sm:$0xff] %v12279_v12  ;;  %v5466_v0 = vsel %vm10924_vm5, %v11882_v53, %v12279_v12  ;;  %v5468_v47 = vsel %vm10924_vm5, %v12279_v12, %v11882_v53 }
0x113b   :  { %v6064_v23 = vpack.c.bf16 %v5470_v16, %v5466_v0  ;;  %v6067_v34 = vpack.c.bf16 %v5468_v47, %v5472_v37 }
0x113d   :  { %6261 = vmatmul.mubr.bf16.vlgmr.msra.gmra.mrb[92].mxu0 %v6064_v23  ;;  %9245 = vmatprep.mubr.bf16.mxu1 %v6064_v23 }
0x113e   :  { %6619 = vmatpush1.bf16.msra.mxu0 %v12293_v11  ;;  %9246 = vmatmul.mubr.bf16.vlgmr.msra.gmra.mrb[84].mxu1 %v6065_v41 }
0x113f   :  { %9249 = vmatprep.mubr.bf16.mxu1 %v6066_v4  ;;  %6620 = vmatprep.subr.bf16.mxu0 %v12303_v15 }
0x1140   :  { %6270 = vmatprep.mubr.bf16.mxu0 %v13195_v60  ;;  %9254 = vmatpush3.bf16.msra.mxu1 %v12309_v5 }
0x1141   :  { %9255 = vmatprep.subr.bf16.mxu1 %v13196_v63 }
0x1142   :  { %6621 = vmatpush1.bf16.msra.mxu0 %v12312_v6 }
0x1143   :  { %6622 = vmatprep.subr.bf16.mxu0 %v12315_v19 }
0x1144   :  { %9256 = vmatpush3.bf16.msra.mxu1 %v12319_v48 }
0x1145   :  { %6271 = vmatmul.mubr.bf16.gmra.mrb[96].mxu0 %v6065_v41  ;;  %9257 = vmatprep.subr.bf16.mxu1 %v13196_v63 }
0x1146   :  { %6623 = vmatpush1.bf16.msra.mxu0 %v12327_v56  ;;  %9250 = vmatmul.mubr.bf16.gmra.mrb[88].mxu1 %v6067_v34 }
0x1147   :  { %6624 = vmatprep.subr.bf16.mxu0 %v12334_v30  ;;  %6280 = vmatprep.mubr.bf16.mxu0 %v13195_v60 }
0x1148   :  { %9258 = vmatpush3.bf16.msra.mxu1 %v12337_v7  ;;  %9269 = vmatprep.mubr.msk.bf16.mxu1 %vm10530_vm2, %v13196_v63 }
0x1149   :  { %9259 = vmatprep.subr.bf16.mxu1 %v13196_v63 }
0x114a   :  { %6625 = vmatpush1.bf16.msra.mxu0 %v12341_v32 }
0x114b   :  { %6626 = vmatprep.subr.bf16.mxu0 %v12345_v1 }
0x114c   :  { %9260 = vmatpush3.bf16.msra.mxu1 %v12348_v20 }
0x114d   :  { %6281 = vmatmul.mubr.bf16.gmra.mrb[100].mxu0 %v6066_v4  ;;  %9261 = vmatprep.subr.bf16.mxu1 %v13196_v63 }
0x114e   :  { %6627 = vmatpush1.bf16.msra.mxu0 %v12354_v8  ;;  %6290 = vmatprep.mubr.bf16.mxu0 %v13195_v60 }
0x114f   :  { %6628 = vmatprep.subr.bf16.mxu0 %v12357_v52 }
0x1150   :  { %9262 = vmatpush3.bf16.msra.mxu1 %v12360_v14 }
0x1151   :  { %9263 = vmatprep.subr.bf16.mxu1 %v13196_v63 }
0x1152   :  { %6629 = vmatpush1.bf16.msra.mxu0 %v12364_v35 }
0x1153   :  { %6630 = vmatprep.subr.bf16.mxu0 %v12368_v58 }
0x1154   :  { %9264 = vmatpush3.bf16.msra.mxu1 %v12371_v40 }
0x1155   :  { %6291 = vmatmul.mubr.bf16.gmra.mrb[104].mxu0 %v6067_v34  ;;  %9265 = vmatprep.subr.bf16.mxu1 %v13196_v63 }
0x1156   :  { %6631 = vmatpush1.bf16.msra.mxu0 %v12375_v36  ;;  %6650 = vmatprep.mubr.bf16.mxu0 %v13195_v60 }
0x1157   :  { %6632 = vmatprep.subr.bf16.mxu0 %v12378_v28 }
0x1158   :  { %9266 = vmatpush3.bf16.msra.mxu1 %v12381_v24 }
0x1159   :  { %9267 = vmatprep.subr.bf16.mxu1 %v13196_v63 }
0x115a   :  { %6633 = vmatpush1.bf16.msra.mxu0 %v12385_v42 }
0x115b   :  { %6725 = vmatprep.subr.bf16.mxu0 %v12256_v33 }
0x115c   :  { %9268 = vmatpush3.bf16.msra.mxu1 %v12390_v55 }
0x115d   :  { %6651 = vmatmul.mubr.bf16.vlgmr.msra.gmra.mrb[108].mxu0 %v13195_v60  ;;  %9273 = vmatprep.subr.bf16.mxu1 %v13196_v63 }
0x115e   :  { %6726 = vmatpush1.bf16.msra.mxu0 %v12293_v11  ;;  %6757 = vmatprep.mubr.bf16.mxu0 %v13195_v60 }
0x115f   :  { %9270 = vmatmul.mubr.bf16.vlgmr.msra.gmra.mrb[92].mxu1 %v13195_v60  ;;  %6727 = vmatprep.subr.bf16.mxu0 %v12303_v15 }
0x1160   :  { %9274 = vmatpush3.bf16.msra.mxu1 %v12309_v5  ;;  %9289 = vmatprep.mubr.msk.bf16.mxu1 %vm10530_vm2, %v13196_v63 }
0x1161   :  { %9275 = vmatprep.subr.bf16.mxu1 %v13196_v63 }
0x1162   :  { %6728 = vmatpush1.bf16.msra.mxu0 %v12312_v6 }
0x1163   :  { %6729 = vmatprep.subr.bf16.mxu0 %v12315_v19 }
0x1164   :  { %9276 = vmatpush3.bf16.msra.mxu1 %v12319_v48 }
0x1165   :  { %9277 = vmatprep.subr.bf16.mxu1 %v13196_v63 }
0x1166   :  { %6730 = vmatpush1.bf16.msra.mxu0 %v12327_v56 }
0x1167   :  { %6731 = vmatprep.subr.bf16.mxu0 %v12334_v30 }
0x1168   :  { %9278 = vmatpush3.bf16.msra.mxu1 %v12337_v7 }
0x1169   :  { %9279 = vmatprep.subr.bf16.mxu1 %v13196_v63 }
0x116a   :  { %6732 = vmatpush1.bf16.msra.mxu0 %v12341_v32 }
0x116b   :  { %6733 = vmatprep.subr.bf16.mxu0 %v12345_v1 }
0x116c   :  { %9280 = vmatpush3.bf16.msra.mxu1 %v12348_v20 }
0x116d   :  { %9281 = vmatprep.subr.bf16.mxu1 %v13196_v63 }
0x116e   :  { %6734 = vmatpush1.bf16.msra.mxu0 %v12354_v8 }
0x116f   :  { %6735 = vmatprep.subr.bf16.mxu0 %v12357_v52 }
0x1170   :  { %9282 = vmatpush3.bf16.msra.mxu1 %v12360_v14 }
0x1171   :  { %9283 = vmatprep.subr.bf16.mxu1 %v13196_v63 }
0x1172   :  { %6736 = vmatpush1.bf16.msra.mxu0 %v12364_v35 }
0x1173   :  { %6737 = vmatprep.subr.bf16.mxu0 %v12368_v58 }
0x1174   :  { %9284 = vmatpush3.bf16.msra.mxu1 %v12371_v40 }
0x1175   :  { %9285 = vmatprep.subr.bf16.mxu1 %v13196_v63 }
0x1176   :  { %6738 = vmatpush1.bf16.msra.mxu0 %v12375_v36 }
0x1177   :  { %6739 = vmatprep.subr.bf16.mxu0 %v12378_v28 }
0x1178   :  { %9286 = vmatpush3.bf16.msra.mxu1 %v12381_v24 }
0x1179   :  { %9287 = vmatprep.subr.bf16.mxu1 %v13196_v63 }
0x117a   :  { %6740 = vmatpush1.bf16.msra.mxu0 %v12385_v42 }
0x117b   :  { %6832 = vmatprep.subr.bf16.mxu0 %v12256_v33 }
0x117c   :  { %9288 = vmatpush3.bf16.msra.mxu1 %v12390_v55 }
0x117d   :  { %9293 = vmatprep.subr.bf16.mxu1 %v13196_v63 }
0x1210   :  { %v6262_v59 = vpop.f32.mrb[92].mxu0 }
0x1211   :  { %v12437_v31 = vpop.f32.mrb[93].mxu0  ;;  %v9247_v10 = vpop.f32.mrb[84].mxu1 }
0x1212   :  { %v12442_v45 = vadd.f32 %v9247_v10, %v5495_v13  ;;  %v6266_v39 = vpop.f32.mrb[94].mxu0  ;;  %v6335_v44 = vpop.f32.mrb[85].mxu1 }
0x1213   :  { %v12444_v3 = vadd.f32 %v6266_v39, %v5487_v27  ;;  %v6268_v26 = vpop.f32.mrb[95].mxu0  ;;  %v9248_v54 = vpop.f32.mrb[86].mxu1  ;;  %v12460_v10 = vadd.f32 %v6335_v44, %v5495_v13 }
0x1214   :  { %13280 = vst [vmem:[#allocation41_spill] sm:$0xff] %v12442_v45  ;;  %v12447_v0 = vadd.f32 %v6268_v26, %v12440_v17  ;;  %v12449_v16 = vadd.f32 %v9248_v54, %v5495_v13  ;;  %v6338_v57 = vpop.f32.mrb[87].mxu1 }
0x1215   :  { %v12451_v23 = vadd.f32 %v6338_v57, %v5495_v13  ;;  %13284 = vst [vmem:[#allocation45_spill] sm:$0xff] %v12460_v10 }
0x1216   :  { %13281 = vst [vmem:[#allocation42_spill] sm:$0xff] %v12449_v16 }
0x1217   :  { %13282 = vst [vmem:[#allocation43_spill] sm:$0xff] %v12451_v23 }
0x1218   :  { %v6272_v62 = vpop.f32.mrb[96].mxu0 }
0x1219   :  { %v12453_v41 = vadd.f32 %v6272_v62, %v5487_v27  ;;  %v6274_v29 = vpop.f32.mrb[97].mxu0  ;;  %v9251_v4 = vpop.f32.mrb[88].mxu1 }
0x121a   :  { %v12456_v47 = vadd.f32 %v6274_v29, %v12440_v17  ;;  %v12458_v37 = vadd.f32 %v9251_v4, %v5495_v13  ;;  %v6276_v34 = vpop.f32.mrb[98].mxu0  ;;  %v6351_v25 = vpop.f32.mrb[89].mxu1 }
0x121b   :  { %v12462_v39 = vadd.f32 %v6276_v34, %v5487_v27  ;;  %v12464_v26 = vadd.f32 %v6351_v25, %v5495_v13  ;;  %v6278_v54 = vpop.f32.mrb[99].mxu0  ;;  %v9252_v57 = vpop.f32.mrb[90].mxu1 }
0x121c   :  { %13283 = vst [vmem:[#allocation46_spill] sm:$0xff] %v12458_v37  ;;  %v12475_v4 = vadd.f32 %v6278_v54, %v12440_v17  ;;  %v12477_v44 = vadd.f32 %v9252_v57, %v5495_v13  ;;  %v6354_v34 = vpop.f32.mrb[91].mxu1 }
0x121d   :  { %13285 = vst [vmem:[#allocation47_spill] sm:$0xff] %v12462_v39  ;;  %13286 = vst [vmem:[#allocation29_spill] sm:$0xff] %v12464_v26  ;;  %v12487_v12 = vadd.f32 %v6354_v34, %v5495_v13 }
0x121e   :  { %13287 = vst [vmem:[#allocation30_spill] sm:$0xff] %v12475_v4  ;;  %13288 = vst [vmem:[#allocation31_spill] sm:$0xff] %v12477_v44 }
0x121f   :  { %13289 = vst [vmem:[#allocation53_spill] sm:$0xff] %v12487_v12 }
0x1220   :  { %v6282_v34 = vpop.f32.mrb[100].mxu0 }
0x1221   :  { %v12505_v62 = vadd.f32 %v6282_v34, %v5487_v27  ;;  %v6284_v25 = vpop.f32.mrb[101].mxu0 }
0x1222   :  { %v12508_v54 = vadd.f32 %v6284_v25, %v12440_v17  ;;  %v6286_v61 = vpop.f32.mrb[102].mxu0 }
0x1223   :  { %13290 = vst [vmem:[#allocation54_spill] sm:$0xff] %v12505_v62  ;;  %v12510_v9 = vadd.f32 %v6286_v61, %v5487_v27  ;;  %v6288_v57 = vpop.f32.mrb[103].mxu0 }
0x1224   :  { %13291 = vst [vmem:[#allocation55_spill] sm:$0xff] %v12508_v54  ;;  %v12521_v13 = vadd.f32 %v6288_v57, %v12440_v17  ;;  %v12553_v57 = vadd.f32 %v6262_v59, %v5487_v27 }
0x1225   :  { %v13361_v51 = vld [vmem:[#allocation31_spill] sm:$0xff] }
0x1226   :  { %13293 = vst [vmem:[#allocation56_spill] sm:$0xff] %v12521_v13  ;;  %13294 = vst [vmem:[#allocation57_spill] sm:$0xff] %v12553_v57 }
0x1228   :  { %v6292_v61 = vpop.f32.mrb[104].mxu0 }
0x1229   :  { %v12547_v46 = vadd.f32 %v6292_v61, %v5487_v27  ;;  %v6294_v2 = vpop.f32.mrb[105].mxu0 }
0x122a   :  { %v12550_v29 = vadd.f32 %v6294_v2, %v12440_v17  ;;  %v6296_v50 = vpop.f32.mrb[106].mxu0  ;;  %v12567_v2 = vadd.f32 %v12437_v31, %v12440_v17  ;;  %v12585_v31 = vrot.slane %v6438_v43, %v13278_v38 }
0x122b   :  { %v12555_v53 = vadd.f32 %v6296_v50, %v5487_v27  ;;  %v6298_v26 = vpop.f32.mrb[107].mxu0  ;;  %v12596_v27 = vrot.slane %v6438_v43, %v13279_v18 }
0x122c   :  { %13296 = vst [vmem:[#allocation59_spill] sm:$0xff] %v12567_v2  ;;  %v12570_v59 = vadd.f32 %v6298_v26, %v12440_v17 }
0x122d   :  { %13295 = vst [vmem:[#allocation58_spill] sm:$0xff] %v12555_v53  ;;  %v6390_v61 = vsel %vm10924_vm5, %v12553_v57, %v12555_v53 }
0x122e   :  { %13297 = vst [vmem:[#allocation60_spill] sm:$0xff] %v12570_v59  ;;  %v6391_v26 = vsel %vm10928_vm6, %v12567_v2, %v12570_v59 }
0x1230   :  { %v6652_v38 = vpop.f32.mrb[108].mxu0 }
0x1231   :  { %v6653_v50 = vadd.f32 %v6652_v38, %v12585_v31  ;;  %v6654_v34 = vpop.f32.mrb[109].mxu0  ;;  %v12605_v38 = vrot.slane %v6438_v43, %v13277_v22 }
0x1232   :  { %v6655_v16 = vadd.f32 %v6654_v34, %v12596_v27  ;;  %v6656_v17 = vpop.f32.mrb[110].mxu0  ;;  %v6693_v57 = vpop.f32.mrb[92].mxu1 }
0x1233   :  { %v6699_v53 = vadd.f32 %v6653_v50, %v6390_v61  ;;  %v6657_v54 = vpop.f32.mrb[111].mxu0  ;;  %v9271_v4 = vpop.f32.mrb[93].mxu1  ;;  %v6694_v17 = vadd.f32 %v6693_v57, %v12605_v38 }
0x1234   :  { %v6700_v62 = vadd.f32 %v6655_v16, %v6391_v26  ;;  %v6696_v39 = vpop.f32.mrb[94].mxu1 }
0x1235   :  { %v8484_v18 = vmul.f32 -1.442695, %v6699_v53  ;;  %v9272_v12 = vpop.f32.mrb[95].mxu1  ;;  %v13298_v53 = vsel %vm10864_vm4, %v12460_v10, %v12477_v44 }
0x1236   :  { %v8485_v45 = vmul.f32 -1.442695, %v6700_v62 }
0x1237   :  { %10277 = vpow2.f32 %v8484_v18 }
0x1238   :  { %10279 = vpow2.f32 %v8485_v45 }
0x1241   :  { %v10278_v13 = vpop.eup %10277 }
0x1242   :  { %v6707_v25 = vadd.f32 1.0, %v10278_v13  ;;  %v10280_v2 = vpop.eup %10279 }
0x1243   :  { %v6708_v34 = vadd.f32 1.0, %v10280_v2 }
0x1244   :  { %10281 = vrcp.f32 %v6707_v25 }
0x1245   :  { %10283 = vrcp.f32 %v6708_v34 }
0x124e   :  { %v10282_v61 = vpop.eup %10281 }
0x124f   :  { %v6713_v4 = vmul.f32 %v10282_v61, %v6694_v17  ;;  %v10284_v45 = vpop.eup %10283  ;;  %v13300_v17 = vsel %vm10924_vm5, %v12444_v3, %v12547_v46 }
0x1250   :  { %v6716_v16 = vsub.f32 1.0, %v10284_v45  ;;  %v6718_v43 = vmul.f32 0.0, %v10284_v45 }
0x1251   :  { %v6714_v12 = vadd.f32 %v6713_v4, %v13298_v53 }
0x1253   :  { %10285 = vtanh.f32 %v6714_v12  ;;  %v13301_v12 = vsel %vm10928_vm6, %v12447_v0, %v12550_v29 }
0x125d   :  { %v10286_v39 = vpop.eup %10285 }
0x125e   :  { %v6717_v62 = vmul.f32 %v10286_v39, %v6716_v16 }
0x1260   :  { %v12613_v22 = vadd.f32 %v6718_v43, %v6717_v62 }
0x1262   :  { %13299 = vst [vmem:[#allocation61_spill] sm:$0xff] %v12613_v22  ;;  %v6724_v54 = vpack.c.bf16 %v12613_v22, %v12613_v22 }
0x1264   :  { %6758 = vmatmul.mubr.bf16.vlgmr.msra.gmra.mrb[112].mxu0 %v6724_v54  ;;  %9290 = vmatmul.mubr.bf16.vlgmr.msra.gmra.mrb[96].mxu1 %v6724_v54 }
0x1265   :  { %6833 = vmatpush1.bf16.msra.mxu0 %v12293_v11  ;;  %9294 = vmatpush3.bf16.msra.mxu1 %v12309_v5 }
0x1266   :  { %6834 = vmatprep.subr.bf16.mxu0 %v12303_v15  ;;  %9295 = vmatprep.subr.bf16.mxu1 %v13196_v63 }
0x1267   :  { %6864 = vmatprep.mubr.bf16.mxu0 %v13195_v60  ;;  %9309 = vmatprep.mubr.msk.bf16.mxu1 %vm10530_vm2, %v13196_v63 }
0x1269   :  { %6835 = vmatpush1.bf16.msra.mxu0 %v12312_v6  ;;  %9296 = vmatpush3.bf16.msra.mxu1 %v12319_v48 }
0x126a   :  { %6836 = vmatprep.subr.bf16.mxu0 %v12315_v19  ;;  %9297 = vmatprep.subr.bf16.mxu1 %v13196_v63 }
0x126d   :  { %6837 = vmatpush1.bf16.msra.mxu0 %v12327_v56  ;;  %9298 = vmatpush3.bf16.msra.mxu1 %v12337_v7 }
0x126e   :  { %6838 = vmatprep.subr.bf16.mxu0 %v12334_v30  ;;  %9299 = vmatprep.subr.bf16.mxu1 %v13196_v63 }
0x1271   :  { %6839 = vmatpush1.bf16.msra.mxu0 %v12341_v32  ;;  %9300 = vmatpush3.bf16.msra.mxu1 %v12348_v20 }
0x1272   :  { %6840 = vmatprep.subr.bf16.mxu0 %v12345_v1  ;;  %9301 = vmatprep.subr.bf16.mxu1 %v13196_v63 }
0x1275   :  { %6841 = vmatpush1.bf16.msra.mxu0 %v12354_v8  ;;  %9302 = vmatpush3.bf16.msra.mxu1 %v12360_v14 }
0x1276   :  { %6842 = vmatprep.subr.bf16.mxu0 %v12357_v52  ;;  %9303 = vmatprep.subr.bf16.mxu1 %v13196_v63 }
0x1279   :  { %6843 = vmatpush1.bf16.msra.mxu0 %v12364_v35  ;;  %9304 = vmatpush3.bf16.msra.mxu1 %v12371_v40 }
0x127a   :  { %6844 = vmatprep.subr.bf16.mxu0 %v12368_v58  ;;  %9305 = vmatprep.subr.bf16.mxu1 %v13196_v63 }
0x127d   :  { %6845 = vmatpush1.bf16.msra.mxu0 %v12375_v36  ;;  %9306 = vmatpush3.bf16.msra.mxu1 %v12381_v24 }
0x127e   :  { %6846 = vmatprep.subr.bf16.mxu0 %v12378_v28  ;;  %9307 = vmatprep.subr.bf16.mxu1 %v13196_v63 }
0x1281   :  { %6847 = vmatpush1.bf16.msra.mxu0 %v12385_v42  ;;  %9308 = vmatpush3.bf16.msra.mxu1 %v12390_v55 }
0x1282   :  { %6939 = vmatprep.subr.bf16.mxu0 %v12256_v33  ;;  %9313 = vmatprep.subr.bf16.mxu1 %v13196_v63 }
0x1337   :  { %v6759_v13 = vpop.f32.mrb[112].mxu0  ;;  %v6800_v25 = vpop.f32.mrb[96].mxu1 }
0x1338   :  { %v6760_v57 = vadd.f32 %v6759_v13, %v12585_v31  ;;  %v6761_v2 = vpop.f32.mrb[113].mxu0  ;;  %v9291_v50 = vpop.f32.mrb[97].mxu1 }
0x1339   :  { %v6762_v26 = vadd.f32 %v6761_v2, %v12596_v27  ;;  %v6763_v18 = vpop.f32.mrb[114].mxu0  ;;  %v6803_v34 = vpop.f32.mrb[98].mxu1  ;;  %v6801_v2 = vadd.f32 %v6800_v25, %v12605_v38 }
0x133a   :  { %v6806_v61 = vadd.f32 %v6760_v57, %v13300_v17  ;;  %v6764_v4 = vpop.f32.mrb[115].mxu0  ;;  %v9292_v53 = vpop.f32.mrb[99].mxu1  ;;  %v13302_v18 = vsel %vm10864_vm4, %v12451_v23, %v12458_v37 }
0x133b   :  { %v6807_v45 = vadd.f32 %v6762_v26, %v13301_v12 }
0x133c   :  { %v8486_v16 = vmul.f32 -1.442695, %v6806_v61 }
0x133d   :  { %v8487_v39 = vmul.f32 -1.442695, %v6807_v45 }
0x133e   :  { %10287 = vpow2.f32 %v8486_v16 }
0x133f   :  { %10289 = vpow2.f32 %v8487_v39 }
0x1348   :  { %v10288_v62 = vpop.eup %10287 }
0x1349   :  { %v6814_v43 = vadd.f32 1.0, %v10288_v62  ;;  %v10290_v54 = vpop.eup %10289 }
0x134a   :  { %v6815_v13 = vadd.f32 1.0, %v10290_v54 }
0x134b   :  { %10291 = vrcp.f32 %v6814_v43 }
0x134c   :  { %10293 = vrcp.f32 %v6815_v13 }
0x1355   :  { %v10292_v57 = vpop.eup %10291 }
0x1356   :  { %v6820_v50 = vmul.f32 %v10292_v57, %v6801_v2  ;;  %v10294_v34 = vpop.eup %10293  ;;  %v13304_v57 = vsel %vm10924_vm5, %v12453_v41, %v12510_v9 }
0x1357   :  { %v6823_v17 = vsub.f32 1.0, %v10294_v34  ;;  %v6825_v53 = vmul.f32 %v10294_v34, %v12613_v22  ;;  %v13305_v34 = vld [vmem:[#allocation56_spill] sm:$0xff] }
0x1358   :  { %v6821_v26 = vadd.f32 %v6820_v50, %v13302_v18 }
0x135a   :  { %10295 = vtanh.f32 %v6821_v26 }
0x1364   :  { %v10296_v61 = vpop.eup %10295 }
0x1365   :  { %v6824_v4 = vmul.f32 %v10296_v61, %v6823_v17  ;;  %v13306_v17 = vsel %vm10928_vm6, %v12456_v47, %v13305_v34 }
0x1367   :  { %v12671_v12 = vadd.f32 %v6825_v53, %v6824_v4 }
0x1369   :  { %13303 = vst [vmem:[#allocation62_spill] sm:$0xff] %v12671_v12  ;;  %v6831_v25 = vpack.c.bf16 %v12671_v12, %v12671_v12 }
0x136b   :  { %6865 = vmatmul.mubr.bf16.vlgmr.msra.gmra.mrb[116].mxu0 %v6831_v25  ;;  %9310 = vmatmul.mubr.bf16.vlgmr.msra.gmra.mrb[100].mxu1 %v6831_v25 }
0x136c   :  { %6940 = vmatpush1.bf16.msra.mxu0 %v12293_v11  ;;  %9314 = vmatpush3.bf16.msra.mxu1 %v12309_v5 }
0x136d   :  { %6941 = vmatprep.subr.bf16.mxu0 %v12303_v15  ;;  %9315 = vmatprep.subr.bf16.mxu1 %v13196_v63 }
0x136e   :  { %6971 = vmatprep.mubr.bf16.mxu0 %v13195_v60  ;;  %9329 = vmatprep.mubr.msk.bf16.mxu1 %vm10530_vm2, %v13196_v63 }
0x1370   :  { %6942 = vmatpush1.bf16.msra.mxu0 %v12312_v6  ;;  %9316 = vmatpush3.bf16.msra.mxu1 %v12319_v48 }
0x1371   :  { %6943 = vmatprep.subr.bf16.mxu0 %v12315_v19  ;;  %9317 = vmatprep.subr.bf16.mxu1 %v13196_v63 }
0x1374   :  { %6944 = vmatpush1.bf16.msra.mxu0 %v12327_v56  ;;  %9318 = vmatpush3.bf16.msra.mxu1 %v12337_v7 }
0x1375   :  { %6945 = vmatprep.subr.bf16.mxu0 %v12334_v30  ;;  %9319 = vmatprep.subr.bf16.mxu1 %v13196_v63 }
0x1378   :  { %6946 = vmatpush1.bf16.msra.mxu0 %v12341_v32  ;;  %9320 = vmatpush3.bf16.msra.mxu1 %v12348_v20 }
0x1379   :  { %6947 = vmatprep.subr.bf16.mxu0 %v12345_v1  ;;  %9321 = vmatprep.subr.bf16.mxu1 %v13196_v63 }
0x137c   :  { %6948 = vmatpush1.bf16.msra.mxu0 %v12354_v8  ;;  %9322 = vmatpush3.bf16.msra.mxu1 %v12360_v14 }
0x137d   :  { %6949 = vmatprep.subr.bf16.mxu0 %v12357_v52  ;;  %9323 = vmatprep.subr.bf16.mxu1 %v13196_v63 }
0x1380   :  { %6950 = vmatpush1.bf16.msra.mxu0 %v12364_v35  ;;  %9324 = vmatpush3.bf16.msra.mxu1 %v12371_v40 }
0x1381   :  { %6951 = vmatprep.subr.bf16.mxu0 %v12368_v58  ;;  %9325 = vmatprep.subr.bf16.mxu1 %v13196_v63 }
0x1384   :  { %6952 = vmatpush1.bf16.msra.mxu0 %v12375_v36  ;;  %9326 = vmatpush3.bf16.msra.mxu1 %v12381_v24 }
0x1385   :  { %6953 = vmatprep.subr.bf16.mxu0 %v12378_v28  ;;  %9327 = vmatprep.subr.bf16.mxu1 %v13196_v63 }
0x1388   :  { %6954 = vmatpush1.bf16.msra.mxu0 %v12385_v42  ;;  %9328 = vmatpush3.bf16.msra.mxu1 %v12390_v55 }
0x1389   :  { %7046 = vmatprep.subr.bf16.mxu0 %v12256_v33  ;;  %9333 = vmatprep.subr.bf16.mxu1 %v13196_v63 }
0x143e   :  { %v6866_v45 = vpop.f32.mrb[116].mxu0  ;;  %v6907_v16 = vpop.f32.mrb[100].mxu1 }
0x143f   :  { %v6867_v39 = vadd.f32 %v6866_v45, %v12585_v31  ;;  %v6868_v62 = vpop.f32.mrb[117].mxu0  ;;  %v9311_v43 = vpop.f32.mrb[101].mxu1 }
0x1440   :  { %v6869_v54 = vadd.f32 %v6868_v62, %v12596_v27  ;;  %v6870_v13 = vpop.f32.mrb[118].mxu0  ;;  %v6910_v2 = vpop.f32.mrb[102].mxu1 }
0x1441   :  { %v6913_v50 = vadd.f32 %v6867_v39, %v13304_v57  ;;  %v6871_v18 = vpop.f32.mrb[119].mxu0  ;;  %v9312_v26 = vpop.f32.mrb[103].mxu1  ;;  %v6908_v13 = vadd.f32 %v6907_v16, %v12605_v38  ;;  %v13307_v57 = vld [vmem:[#allocation41_spill] sm:$0xff] }
0x1442   :  { %v6914_v61 = vadd.f32 %v6869_v54, %v13306_v17  ;;  %v13308_v18 = vld [vmem:[#allocation53_spill] sm:$0xff] }
0x1443   :  { %v8488_v4 = vmul.f32 -1.442695, %v6913_v50  ;;  %v13309_v26 = vsel %vm10864_vm4, %v13307_v57, %v13308_v18 }
0x1444   :  { %v8489_v53 = vmul.f32 -1.442695, %v6914_v61 }
0x1445   :  { %10297 = vpow2.f32 %v8488_v4 }
0x1446   :  { %10299 = vpow2.f32 %v8489_v53 }
0x144f   :  { %v10298_v25 = vpop.eup %10297 }
0x1450   :  { %v6921_v45 = vadd.f32 1.0, %v10298_v25  ;;  %v10300_v62 = vpop.eup %10299 }
0x1451   :  { %v6922_v43 = vadd.f32 1.0, %v10300_v62 }
0x1452   :  { %10301 = vrcp.f32 %v6921_v45 }
0x1453   :  { %10303 = vrcp.f32 %v6922_v43 }
0x145c   :  { %v10302_v39 = vpop.eup %10301 }
0x145d   :  { %v6927_v2 = vmul.f32 %v10302_v39, %v6908_v13  ;;  %v10304_v50 = vpop.eup %10303 }
0x145e   :  { %v6930_v17 = vsub.f32 1.0, %v10304_v50  ;;  %v6932_v53 = vmul.f32 %v10304_v50, %v12671_v12  ;;  %v13311_v50 = vld [vmem:[#allocation47_spill] sm:$0xff] }
0x145f   :  { %v6928_v54 = vadd.f32 %v6927_v2, %v13309_v26  ;;  %v13315_v12 = vld [vmem:[#allocation55_spill] sm:$0xff] }
0x1461   :  { %10305 = vtanh.f32 %v6928_v54 }
0x146b   :  { %v10306_v61 = vpop.eup %10305 }
0x146c   :  { %v6931_v4 = vmul.f32 %v10306_v61, %v6930_v17  ;;  %v13312_v17 = vld [vmem:[#allocation54_spill] sm:$0xff] }
0x146d   :  { %v13313_v61 = vsel %vm10924_vm5, %v13311_v50, %v13312_v17 }
0x146e   :  { %v12729_v25 = vadd.f32 %v6932_v53, %v6931_v4 }
0x1470   :  { %13310 = vst [vmem:[#allocation56_spill] sm:$0xff] %v12729_v25  ;;  %v6938_v16 = vpack.c.bf16 %v12729_v25, %v12729_v25 }
0x1472   :  { %6972 = vmatmul.mubr.bf16.vlgmr.msra.gmra.mrb[120].mxu0 %v6938_v16  ;;  %9330 = vmatmul.mubr.bf16.vlgmr.msra.gmra.mrb[104].mxu1 %v6938_v16  ;;  %v13314_v16 = vld [vmem:[#allocation30_spill] sm:$0xff] }
0x1473   :  { %7047 = vmatpush1.bf16.msra.mxu0 %v12293_v11  ;;  %9334 = vmatpush3.bf16.msra.mxu1 %v12309_v5  ;;  %v13316_v22 = vsel %vm10928_vm6, %v13314_v16, %v13315_v12 }
0x1474   :  { %7048 = vmatprep.subr.bf16.mxu0 %v12303_v15  ;;  %9335 = vmatprep.subr.bf16.mxu1 %v13196_v63 }
0x1475   :  { %7078 = vmatprep.mubr.bf16.mxu0 %v13195_v60  ;;  %9349 = vmatprep.mubr.msk.bf16.mxu1 %vm10530_vm2, %v13196_v63 }
0x1477   :  { %7049 = vmatpush1.bf16.msra.mxu0 %v12312_v6  ;;  %9336 = vmatpush3.bf16.msra.mxu1 %v12319_v48 }
0x1478   :  { %7050 = vmatprep.subr.bf16.mxu0 %v12315_v19  ;;  %9337 = vmatprep.subr.bf16.mxu1 %v13196_v63 }
0x147b   :  { %7051 = vmatpush1.bf16.msra.mxu0 %v12327_v56  ;;  %9338 = vmatpush3.bf16.msra.mxu1 %v12337_v7 }
0x147c   :  { %7052 = vmatprep.subr.bf16.mxu0 %v12334_v30  ;;  %9339 = vmatprep.subr.bf16.mxu1 %v13196_v63 }
0x147f   :  { %7053 = vmatpush1.bf16.msra.mxu0 %v12341_v32  ;;  %9340 = vmatpush3.bf16.msra.mxu1 %v12348_v20 }
0x1480   :  { %7054 = vmatprep.subr.bf16.mxu0 %v12345_v1  ;;  %9341 = vmatprep.subr.bf16.mxu1 %v13196_v63 }
0x1483   :  { %7055 = vmatpush1.bf16.msra.mxu0 %v12354_v8  ;;  %9342 = vmatpush3.bf16.msra.mxu1 %v12360_v14 }
0x1484   :  { %7056 = vmatprep.subr.bf16.mxu0 %v12357_v52  ;;  %9343 = vmatprep.subr.bf16.mxu1 %v13196_v63 }
0x1487   :  { %7057 = vmatpush1.bf16.msra.mxu0 %v12364_v35  ;;  %9344 = vmatpush3.bf16.msra.mxu1 %v12371_v40 }
0x1488   :  { %7058 = vmatprep.subr.bf16.mxu0 %v12368_v58  ;;  %9345 = vmatprep.subr.bf16.mxu1 %v13196_v63 }
0x148b   :  { %7059 = vmatpush1.bf16.msra.mxu0 %v12375_v36  ;;  %9346 = vmatpush3.bf16.msra.mxu1 %v12381_v24 }
0x148c   :  { %7060 = vmatprep.subr.bf16.mxu0 %v12378_v28  ;;  %9347 = vmatprep.subr.bf16.mxu1 %v13196_v63 }
0x148f   :  { %7061 = vmatpush1.bf16.msra.mxu0 %v12385_v42  ;;  %9348 = vmatpush3.bf16.msra.mxu1 %v12390_v55 }
0x1490   :  { %7153 = vmatprep.subr.bf16.mxu0 %v12256_v33  ;;  %9353 = vmatprep.subr.bf16.mxu1 %v13196_v63 }
0x1545   :  { %v6973_v45 = vpop.f32.mrb[120].mxu0  ;;  %v7014_v62 = vpop.f32.mrb[104].mxu1 }
0x1546   :  { %v6974_v43 = vadd.f32 %v6973_v45, %v12585_v31  ;;  %v6975_v13 = vpop.f32.mrb[121].mxu0  ;;  %v9331_v39 = vpop.f32.mrb[105].mxu1  ;;  %v7015_v59 = vadd.f32 %v7014_v62, %v12605_v38 }
0x1547   :  { %v6976_v2 = vadd.f32 %v6975_v13, %v12596_v27  ;;  %v6977_v26 = vpop.f32.mrb[122].mxu0  ;;  %v7017_v54 = vpop.f32.mrb[106].mxu1 }
0x1548   :  { %v7020_v4 = vadd.f32 %v6974_v43, %v13313_v61  ;;  %v6978_v53 = vpop.f32.mrb[123].mxu0  ;;  %v9332_v33 = vpop.f32.mrb[107].mxu1 }
0x1549   :  { %v7021_v45 = vadd.f32 %v6976_v2, %v13316_v22  ;;  %v13317_v53 = vld [vmem:[#allocation42_spill] sm:$0xff]  ;;  %v13318_v33 = vld [vmem:[#allocation29_spill] sm:$0xff] }
0x154a   :  { %v8490_v10 = vmul.f32 -1.442695, %v7020_v4  ;;  %v13319_v23 = vsel %vm10864_vm4, %v13317_v53, %v13318_v33 }
0x154b   :  { %v8491_v39 = vmul.f32 -1.442695, %v7021_v45 }
0x154c   :  { %10307 = vpow2.f32 %v8490_v10 }
0x154d   :  { %10309 = vpow2.f32 %v8491_v39 }
0x1556   :  { %v10308_v13 = vpop.eup %10307 }
0x1557   :  { %v7028_v26 = vadd.f32 1.0, %v10308_v13  ;;  %v10310_v54 = vpop.eup %10309 }
0x1558   :  { %v7029_v44 = vadd.f32 1.0, %v10310_v54 }
0x1559   :  { %10311 = vrcp.f32 %v7028_v26 }
0x155a   :  { %10313 = vrcp.f32 %v7029_v44 }
0x1563   :  { %v10312_v43 = vpop.eup %10311 }
0x1564   :  { %v7034_v61 = vmul.f32 %v10312_v43, %v7015_v59  ;;  %v10314_v10 = vpop.eup %10313 }
0x1565   :  { %v7037_v2 = vsub.f32 1.0, %v10314_v10  ;;  %v7039_v39 = vmul.f32 %v10314_v10, %v12729_v25 }
0x1566   :  { %v7035_v22 = vadd.f32 %v7034_v61, %v13319_v23  ;;  %v12824_v23 = vld [vmem:[#allocation10 + $0x4] ss:$12 sps:$4 sm:$0xff]  }
0x1568   :  { %10315 = vtanh.f32 %v7035_v22 }
0x1572   :  { %v10316_v4 = vpop.eup %10315 }
0x1573   :  { %v7038_v45 = vmul.f32 %v10316_v4, %v7037_v2  ;;  %v13320_v2 = vsel %vm10924_vm5, %v13312_v17, %v13311_v50 }
0x1575   :  { %v12787_v13 = vadd.f32 %v7039_v39, %v7038_v45 }
0x1577   :  { %v7045_v62 = vpack.c.bf16 %v12787_v13, %v12787_v13 }
0x1579   :  { %7079 = vmatmul.mubr.bf16.vlgmr.msra.gmra.mrb[124].mxu0 %v7045_v62  ;;  %9350 = vmatmul.mubr.bf16.vlgmr.msra.gmra.mrb[108].mxu1 %v7045_v62  ;;  %v13321_v62 = vsel %vm10928_vm6, %v13315_v12, %v13314_v16  ;;  %v13322_v12 = vsel %vm10864_vm4, %v13318_v33, %v13317_v53 }
0x157a   :  { %7154 = vmatpush1.bf16.msra.mxu0 %v12293_v11  ;;  %9354 = vmatpush3.bf16.msra.mxu1 %v12309_v5 }
0x157b   :  { %7155 = vmatprep.subr.bf16.mxu0 %v12303_v15  ;;  %9355 = vmatprep.subr.bf16.mxu1 %v13196_v63 }
0x157c   :  { %7185 = vmatprep.mubr.bf16.mxu0 %v13195_v60  ;;  %9369 = vmatprep.mubr.msk.bf16.mxu1 %vm10530_vm2, %v13196_v63 }
0x157e   :  { %7156 = vmatpush1.bf16.msra.mxu0 %v12312_v6  ;;  %9356 = vmatpush3.bf16.msra.mxu1 %v12319_v48 }
0x157f   :  { %7157 = vmatprep.subr.bf16.mxu0 %v12315_v19  ;;  %9357 = vmatprep.subr.bf16.mxu1 %v13196_v63 }
0x1582   :  { %7158 = vmatpush1.bf16.msra.mxu0 %v12327_v56  ;;  %9358 = vmatpush3.bf16.msra.mxu1 %v12337_v7 }
0x1583   :  { %7159 = vmatprep.subr.bf16.mxu0 %v12334_v30  ;;  %9359 = vmatprep.subr.bf16.mxu1 %v13196_v63 }
0x1586   :  { %7160 = vmatpush1.bf16.msra.mxu0 %v12341_v32  ;;  %9360 = vmatpush3.bf16.msra.mxu1 %v12348_v20 }
0x1587   :  { %7161 = vmatprep.subr.bf16.mxu0 %v12345_v1  ;;  %9361 = vmatprep.subr.bf16.mxu1 %v13196_v63 }
0x158a   :  { %7162 = vmatpush1.bf16.msra.mxu0 %v12354_v8  ;;  %9362 = vmatpush3.bf16.msra.mxu1 %v12360_v14 }
0x158b   :  { %7163 = vmatprep.subr.bf16.mxu0 %v12357_v52  ;;  %9363 = vmatprep.subr.bf16.mxu1 %v13196_v63 }
0x158e   :  { %7164 = vmatpush1.bf16.msra.mxu0 %v12364_v35  ;;  %9364 = vmatpush3.bf16.msra.mxu1 %v12371_v40 }
0x158f   :  { %7165 = vmatprep.subr.bf16.mxu0 %v12368_v58  ;;  %9365 = vmatprep.subr.bf16.mxu1 %v13196_v63 }
0x1592   :  { %7166 = vmatpush1.bf16.msra.mxu0 %v12375_v36  ;;  %9366 = vmatpush3.bf16.msra.mxu1 %v12381_v24 }
0x1593   :  { %7167 = vmatprep.subr.bf16.mxu0 %v12378_v28  ;;  %9367 = vmatprep.subr.bf16.mxu1 %v13196_v63 }
0x1596   :  { %7168 = vmatpush1.bf16.msra.mxu0 %v12385_v42  ;;  %9368 = vmatpush3.bf16.msra.mxu1 %v12390_v55 }
0x1597   :  { %7260 = vmatprep.subr.bf16.mxu0 %v12824_v23  ;;  %9373 = vmatprep.subr.bf16.mxu1 %v13196_v63 }
0x164c   :  { %v7080_v44 = vpop.f32.mrb[124].mxu0  ;;  %v7121_v59 = vpop.f32.mrb[108].mxu1 }
0x164d   :  { %v7081_v26 = vadd.f32 %v7080_v44, %v12585_v31  ;;  %v7082_v54 = vpop.f32.mrb[125].mxu0  ;;  %v9351_v43 = vpop.f32.mrb[109].mxu1  ;;  %v7122_v50 = vadd.f32 %v7121_v59, %v12605_v38 }
0x164e   :  { %v7083_v61 = vadd.f32 %v7082_v54, %v12596_v27  ;;  %v7084_v22 = vpop.f32.mrb[126].mxu0  ;;  %v7124_v10 = vpop.f32.mrb[110].mxu1 }
0x164f   :  { %v7127_v4 = vadd.f32 %v7081_v26, %v13320_v2  ;;  %v7085_v45 = vpop.f32.mrb[127].mxu0  ;;  %v9352_v39 = vpop.f32.mrb[111].mxu1 }
0x1650   :  { %v7128_v44 = vadd.f32 %v7083_v61, %v13321_v62 }
0x1651   :  { %v8492_v25 = vmul.f32 -1.442695, %v7127_v4 }
0x1652   :  { %v8493_v43 = vmul.f32 -1.442695, %v7128_v44  ;;  %v10374_v44 = vld [vmem:[#allocation10] ss:$12 sps:$4 sm:$0xff]  }
0x1653   :  { %10317 = vpow2.f32 %v8492_v25 }
0x1654   :  { %10319 = vpow2.f32 %v8493_v43  ;;  %v10375_v43 = vld [vmem:[#allocation10 + $0x8] ss:$12 sps:$4 sm:$0xff]  }
0x165d   :  { %v10318_v54 = vpop.eup %10317 }
0x165e   :  { %v7135_v22 = vadd.f32 1.0, %v10318_v54  ;;  %v10320_v10 = vpop.eup %10319  ;;  %v10378_v54 = vld [vmem:[#allocation10 + $0x20] ss:$12 sps:$4 sm:$0xff]  }
0x165f   :  { %v7136_v37 = vadd.f32 1.0, %v10320_v10  ;;  %v10380_v10 = vld [vmem:[#allocation10 + $0x30] ss:$12 sps:$4 sm:$0xff]  }
0x1660   :  { %10321 = vrcp.f32 %v7135_v22  ;;  %v10379_v22 = vld [vmem:[#allocation10 + $0x34] ss:$12 sps:$4 sm:$0xff]  }
0x1661   :  { %10323 = vrcp.f32 %v7136_v37 }
0x166a   :  { %v10322_v17 = vpop.eup %10321 }
0x166b   :  { %v7141_v26 = vmul.f32 %v10322_v17, %v7122_v50  ;;  %v10324_v25 = vpop.eup %10323  ;;  %v10381_v50 = vld [vmem:[#allocation10 + $0x38] ss:$12 sps:$4 sm:$0xff]  }
0x166c   :  { %v7144_v61 = vsub.f32 1.0, %v10324_v25  ;;  %v7146_v45 = vmul.f32 %v10324_v25, %v12787_v13  ;;  %v10382_v17 = vld [vmem:[#allocation10 + $0x4c] ss:$12 sps:$4 sm:$0xff]   ;;  %v10387_v25 = vld [vmem:[#allocation10 + $0x68] ss:$12 sps:$4 sm:$0xff]  }
0x166d   :  { %v7142_v16 = vadd.f32 %v7141_v26, %v13322_v12  ;;  %v10384_v26 = vld [vmem:[#allocation10 + $0x50] ss:$12 sps:$4 sm:$0xff]  }
0x166e   :  { %v10385_v12 = vld [vmem:[#allocation10 + $0x64] ss:$12 sps:$4 sm:$0xff]  }
0x166f   :  { %10325 = vtanh.f32 %v7142_v16  ;;  %v10386_v16 = vld [vmem:[#allocation10 + $0x60] ss:$12 sps:$4 sm:$0xff]  }
0x1679   :  { %v10326_v2 = vpop.eup %10325 }
0x167a   :  { %v7145_v4 = vmul.f32 %v10326_v2, %v7144_v61  ;;  %v10388_v61 = vld [vmem:[#allocation10 + $0x7c] ss:$12 sps:$4 sm:$0xff]   ;;  %v10389_v2 = vld [vmem:[#allocation10 + $0x78] ss:$12 sps:$4 sm:$0xff]  }
0x167c   :  { %v12847_v39 = vadd.f32 %v7146_v45, %v7145_v4  ;;  %v10390_v4 = vld [vmem:[#allocation10 + $0x80] ss:$12 sps:$4 sm:$0xff]  }
0x167d   :  { %v10391_v45 = vld [vmem:[#allocation10 + $0x94] ss:$12 sps:$4 sm:$0xff]  }
0x167e   :  { %v7152_v59 = vpack.c.bf16 %v12847_v39, %v12847_v39 }
0x1680   :  { %7186 = vmatmul.mubr.bf16.vlgmr.msra.gmra.mrb[128].mxu0 %v7152_v59  ;;  %9370 = vmatmul.mubr.bf16.vlgmr.msra.gmra.mrb[112].mxu1 %v7152_v59  ;;  %v10392_v59 = vld [vmem:[#allocation10 + $0x90] ss:$12 sps:$4 sm:$0xff]  }
0x1681   :  { %7261 = vmatpush1.bf16.msra.mxu0 %v12293_v11  ;;  %9374 = vmatpush3.bf16.msra.mxu1 %v12309_v5 }
0x1682   :  { %7262 = vmatprep.subr.bf16.mxu0 %v12303_v15  ;;  %9375 = vmatprep.subr.bf16.mxu1 %v13196_v63 }
0x1683   :  { %7292 = vmatprep.mubr.bf16.mxu0 %v13195_v60  ;;  %9389 = vmatprep.mubr.msk.bf16.mxu1 %vm10530_vm2, %v13196_v63 }
0x1685   :  { %7263 = vmatpush1.bf16.msra.mxu0 %v12312_v6  ;;  %9376 = vmatpush3.bf16.msra.mxu1 %v12319_v48 }
0x1686   :  { %7264 = vmatprep.subr.bf16.mxu0 %v12315_v19  ;;  %9377 = vmatprep.subr.bf16.mxu1 %v13196_v63 }
0x1689   :  { %7265 = vmatpush1.bf16.msra.mxu0 %v12327_v56  ;;  %9378 = vmatpush3.bf16.msra.mxu1 %v12337_v7  ;;  %v13323_v7 = vsel %vm10924_vm5, %v12510_v9, %v12453_v41 }
0x168a   :  { %7266 = vmatprep.subr.bf16.mxu0 %v12334_v30  ;;  %9379 = vmatprep.subr.bf16.mxu1 %v13196_v63 }
0x168d   :  { %7267 = vmatpush1.bf16.msra.mxu0 %v12341_v32  ;;  %9380 = vmatpush3.bf16.msra.mxu1 %v12348_v20 }
0x168e   :  { %7268 = vmatprep.subr.bf16.mxu0 %v12345_v1  ;;  %9381 = vmatprep.subr.bf16.mxu1 %v13196_v63 }
0x1691   :  { %7269 = vmatpush1.bf16.msra.mxu0 %v12354_v8  ;;  %9382 = vmatpush3.bf16.msra.mxu1 %v12360_v14  ;;  %v13324_v8 = vsel %vm10928_vm6, %v13305_v34, %v12456_v47 }
0x1692   :  { %7270 = vmatprep.subr.bf16.mxu0 %v12357_v52  ;;  %9383 = vmatprep.subr.bf16.mxu1 %v13196_v63 }
0x1695   :  { %7271 = vmatpush1.bf16.msra.mxu0 %v12364_v35  ;;  %9384 = vmatpush3.bf16.msra.mxu1 %v12371_v40 }
0x1696   :  { %7272 = vmatprep.subr.bf16.mxu0 %v12368_v58  ;;  %9385 = vmatprep.subr.bf16.mxu1 %v13196_v63 }
0x1699   :  { %7273 = vmatpush1.bf16.msra.mxu0 %v12375_v36  ;;  %9386 = vmatpush3.bf16.msra.mxu1 %v12381_v24 }
0x169a   :  { %7274 = vmatprep.subr.bf16.mxu0 %v12378_v28  ;;  %9387 = vmatprep.subr.bf16.mxu1 %v13196_v63 }
0x169d   :  { %7275 = vmatpush1.bf16.msra.mxu0 %v12385_v42  ;;  %9388 = vmatpush3.bf16.msra.mxu1 %v12390_v55  ;;  %v13325_v55 = vsel %vm10864_vm4, %v13308_v18, %v13307_v57  ;;  %v10376_v57 = vld [vmem:[#allocation10 + $0x1c] ss:$12 sps:$4 sm:$0xff]   ;;  %v10377_v18 = vld [vmem:[#allocation10 + $0x18] ss:$12 sps:$4 sm:$0xff]  }
0x169e   :  { %7367 = vmatprep.subr.bf16.mxu0 %v12824_v23  ;;  %9393 = vmatprep.subr.bf16.mxu1 %v13196_v63 }
0x1753   :  { %v7187_v11 = vpop.f32.mrb[128].mxu0  ;;  %v7228_v15 = vpop.f32.mrb[112].mxu1 }
0x1754   :  { %v7188_v5 = vadd.f32 %v7187_v11, %v12585_v31  ;;  %v7189_v6 = vpop.f32.mrb[129].mxu0  ;;  %v9371_v19 = vpop.f32.mrb[113].mxu1  ;;  %v7229_v9 = vadd.f32 %v7228_v15, %v12605_v38  ;;  %v10393_v11 = vld [vmem:[#allocation10 + $0x98] ss:$12 sps:$4 sm:$0xff]  }
0x1755   :  { %v7190_v48 = vadd.f32 %v7189_v6, %v12596_v27  ;;  %v7191_v56 = vpop.f32.mrb[130].mxu0  ;;  %v7231_v30 = vpop.f32.mrb[114].mxu1  ;;  %v10394_v15 = vld [vmem:[#allocation10 + $0xac] ss:$12 sps:$4 sm:$0xff]   ;;  %v10396_v6 = vld [vmem:[#allocation10 + $0xb0] ss:$12 sps:$4 sm:$0xff]  }
0x1756   :  { %v7234_v32 = vadd.f32 %v7188_v5, %v13323_v7  ;;  %v7192_v1 = vpop.f32.mrb[131].mxu0  ;;  %v9372_v20 = vpop.f32.mrb[115].mxu1  ;;  %v10395_v5 = vld [vmem:[#allocation10 + $0xa8] ss:$12 sps:$4 sm:$0xff]   ;;  %v10531_v19 = vmov 0.0|0.0  }
0x1757   :  { %v7235_v52 = vadd.f32 %v7190_v48, %v13324_v8 }
0x1758   :  { %v8494_v14 = vmul.f32 -1.442695, %v7234_v32 }
0x1759   :  { %v8495_v35 = vmul.f32 -1.442695, %v7235_v52  ;;  %v13326_v52 = vsel %vm10924_vm5, %v12547_v46, %v12444_v3 }
0x175a   :  { %10327 = vpow2.f32 %v8494_v14 }
0x175b   :  { %10329 = vpow2.f32 %v8495_v35 }
0x1764   :  { %v10328_v58 = vpop.eup %10327 }
0x1765   :  { %v7242_v40 = vadd.f32 1.0, %v10328_v58  ;;  %v10330_v36 = vpop.eup %10329 }
0x1766   :  { %v7243_v28 = vadd.f32 1.0, %v10330_v36 }
0x1767   :  { %10331 = vrcp.f32 %v7242_v40  ;;  %v13327_v40 = vsel %vm10928_vm6, %v12550_v29, %v12447_v0  ;;  %v13329_v0 = vld [vmem:[#allocation46_spill] sm:$0xff]  ;;  %v13330_v29 = vld [vmem:[#allocation43_spill] sm:$0xff] }
0x1768   :  { %10333 = vrcp.f32 %v7243_v28 }
0x1771   :  { %v10332_v24 = vpop.eup %10331 }
0x1772   :  { %v7248_v42 = vmul.f32 %v10332_v24, %v7229_v9  ;;  %v10334_v47 = vpop.eup %10333 }
0x1773   :  { %v7251_v37 = vsub.f32 1.0, %v10334_v47  ;;  %v7253_v33 = vmul.f32 %v10334_v47, %v12847_v39 }
0x1774   :  { %v7249_v41 = vadd.f32 %v7248_v42, %v13325_v55 }
0x1776   :  { %10335 = vtanh.f32 %v7249_v41 }
0x1780   :  { %v10336_v34 = vpop.eup %10335 }
0x1781   :  { %v7252_v53 = vmul.f32 %v10336_v34, %v7251_v37  ;;  %v13331_v37 = vsel %vm10864_vm4, %v13329_v0, %v13330_v29 }
0x1783   :  { %v12905_v23 = vadd.f32 %v7253_v33, %v7252_v53 }
0x1785   :  { %v7259_v62 = vpack.c.bf16 %v12905_v23, %v12905_v23 }
0x1787   :  { %7293 = vmatmul.mubr.bf16.vlgmr.msra.gmra.mrb[132].mxu0 %v7259_v62  ;;  %9390 = vmatmul.mubr.bf16.vlgmr.msra.gmra.mrb[116].mxu1 %v7259_v62 }
0x1788   :  { %7368 = vmatpush1.bf16.msra.mxu0 %v10374_v44  ;;  %9394 = vmatpush3.bf16.msra.mxu1 %v10375_v43 }
0x1789   :  { %7369 = vmatprep.subr.bf16.mxu0 %v10376_v57  ;;  %9395 = vmatprep.subr.bf16.mxu1 %v13196_v63  ;;  %v7609_v57 = vld [vmem:[%s13328_s21] sm:$0xff] }
0x178a   :  { %7399 = vmatprep.mubr.bf16.mxu0 %v13195_v60  ;;  %9409 = vmatprep.mubr.msk.bf16.mxu1 %vm10530_vm2, %v13196_v63  ;;  %v10383_v60 = vld [vmem:[#allocation10 + $0x48] ss:$12 sps:$4 sm:$0xff]  }
0x178c   :  { %7370 = vmatpush1.bf16.msra.mxu0 %v10377_v18  ;;  %9396 = vmatpush3.bf16.msra.mxu1 %v10378_v54  ;;  %v7610_v18 = vld [vmem:[%s13328_s21 + $0x8] sm:$0xff] }
0x178d   :  { %7371 = vmatprep.subr.bf16.mxu0 %v10379_v22  ;;  %9397 = vmatprep.subr.bf16.mxu1 %v13196_v63  ;;  %v9524_v22 = vpack.c.bf16 %v7610_v18, %v7609_v57  ;;  %v7717_v57 = vld [vmem:[%s10675_s20 + $0x20] sm:$0xff]  ;;  %v7718_v18 = vld [vmem:[%s10675_s20 + $0x28] sm:$0xff] }
0x1790   :  { %7372 = vmatpush1.bf16.msra.mxu0 %v10380_v10  ;;  %9398 = vmatpush3.bf16.msra.mxu1 %v10381_v50  ;;  %v7611_v50 = vld [vmem:[%s13328_s21 + $0x10] sm:$0xff] }
0x1791   :  { %7373 = vmatprep.subr.bf16.mxu0 %v10382_v17  ;;  %9399 = vmatprep.subr.bf16.mxu1 %v13196_v63  ;;  %v7612_v17 = vld [vmem:[%s13328_s21 + $0x18] sm:$0xff] }
0x1794   :  { %7374 = vmatpush1.bf16.msra.mxu0 %v10383_v60  ;;  %9400 = vmatpush3.bf16.msra.mxu1 %v10384_v26  ;;  %v9527_v60 = vpack.c.bf16 %v7612_v17, %v7611_v50  ;;  %v7613_v26 = vld [vmem:[%s13328_s21 + $0x20] sm:$0xff]  ;;  %v13344_v17 = vld [vmem:[#allocation50_spill] sm:$0xff] }
0x1795   :  { %7375 = vmatprep.subr.bf16.mxu0 %v10385_v12  ;;  %9401 = vmatprep.subr.bf16.mxu1 %v13196_v63  ;;  %v7614_v12 = vld [vmem:[%s13328_s21 + $0x28] sm:$0xff] }
0x1798   :  { %7376 = vmatpush1.bf16.msra.mxu0 %v10386_v16  ;;  %9402 = vmatpush3.bf16.msra.mxu1 %v10387_v25  ;;  %v13332_v16 = vld [vmem:[#allocation34_spill] sm:$0xff]  ;;  %v13333_v25 = vld [vmem:[#allocation35_spill] sm:$0xff] }
0x1799   :  { %7377 = vmatprep.subr.bf16.mxu0 %v10388_v61  ;;  %9403 = vmatprep.subr.bf16.mxu1 %v13196_v63  ;;  %v1040_v61 = vadd.f32 %v13333_v25, %v13332_v16  ;;  %v7720_v16 = vld [vmem:[%s10675_s20 + $0x38] sm:$0xff]  ;;  %v13345_v25 = vld [vmem:[#allocation44_spill] sm:$0xff] }
0x179c   :  { %7378 = vmatpush1.bf16.msra.mxu0 %v10389_v2  ;;  %9404 = vmatpush3.bf16.msra.mxu1 %v10390_v4  ;;  %v13334_v2 = vld [vmem:[#allocation36_spill] sm:$0xff] }
0x179d   :  { %7379 = vmatprep.subr.bf16.mxu0 %v10391_v45  ;;  %9405 = vmatprep.subr.bf16.mxu1 %v13196_v63  ;;  %v1308_v4 = vadd.f32 %v13334_v2, %v1040_v61  ;;  %v9530_v45 = vpack.c.bf16 %v7614_v12, %v7613_v26  ;;  %v9554_v26 = vpack.c.bf16 %v7718_v18, %v7717_v57  ;;  %v7719_v12 = vld [vmem:[%s10675_s20 + $0x30] sm:$0xff]  ;;  %v13346_v2 = vld [vmem:[#allocation51_spill] sm:$0xff]  ;;  %v7826_v18 = vld [vmem:[%s10680_s27 + $0x48] sm:$0xff] }
0x179e   :  { %v7471_v57 = vld [vmem:[%s10540_s5] sm:$0xff] }
0x17a0   :  { %7380 = vmatpush1.bf16.msra.mxu0 %v10392_v59  ;;  %9406 = vmatpush3.bf16.msra.mxu1 %v10393_v11  ;;  %v7615_v59 = vld [vmem:[%s13328_s21 + $0x30] sm:$0xff]  ;;  %v7616_v11 = vld [vmem:[%s13328_s21 + $0x38] sm:$0xff] }
0x17a1   :  { %7381 = vmatprep.subr.bf16.mxu0 %v10394_v15  ;;  %9407 = vmatprep.subr.bf16.mxu1 %v13196_v63  ;;  %v13335_v15 = vld [vmem:[#allocation37_spill] sm:$0xff] }
0x17a4   :  { %7382 = vmatpush1.bf16.msra.mxu0 %v10395_v5  ;;  %9408 = vmatpush3.bf16.msra.mxu1 %v10396_v6  ;;  %v1576_v5 = vadd.f32 %v13335_v15, %v1308_v4  ;;  %v13336_v6 = vld [vmem:[#allocation38_spill] sm:$0xff]  ;;  %v13348_v15 = vld [vmem:[#allocation52_spill] sm:$0xff] }
0x17a5   :  { %9413 = vmatprep.subr.mxu1 %v13196_v63  ;;  %9523 = vmatprep.subr.bf16.mxu0 %v10531_v19 }
0x185a   :  { %v7294_v48 = vpop.f32.mrb[132].mxu0  ;;  %v7335_v56 = vpop.f32.mrb[116].mxu1 }
0x185b   :  { %v7295_v30 = vadd.f32 %v7294_v48, %v12585_v31  ;;  %v7296_v7 = vpop.f32.mrb[133].mxu0  ;;  %v9391_v32 = vpop.f32.mrb[117].mxu1  ;;  %v7336_v3 = vadd.f32 %v7335_v56, %v12605_v38  ;;  %v1844_v48 = vadd.f32 %v13336_v6, %v1576_v5  ;;  %v9533_v56 = vpack.c.bf16 %v7616_v11, %v7615_v59  ;;  %v7721_v59 = vld [vmem:[%s10675_s20 + $0x40] sm:$0xff]  ;;  %v7722_v11 = vld [vmem:[%s10675_s20 + $0x48] sm:$0xff] }
0x185c   :  { %v7297_v1 = vadd.f32 %v7296_v7, %v12596_v27  ;;  %v7298_v20 = vpop.f32.mrb[134].mxu0  ;;  %v7338_v8 = vpop.f32.mrb[118].mxu1  ;;  %v7618_v7 = vld [vmem:[%s13328_s21 + $0x48] sm:$0xff]  ;;  %v13338_v32 = vld [vmem:[#allocation39_spill] sm:$0xff] }
0x185d   :  { %v7341_v14 = vadd.f32 %v7295_v30, %v13326_v52  ;;  %v7299_v35 = vpop.f32.mrb[135].mxu0  ;;  %v9392_v58 = vpop.f32.mrb[119].mxu1  ;;  %v7617_v30 = vld [vmem:[%s13328_s21 + $0x40] sm:$0xff]  ;;  %v13339_v20 = vld [vmem:[#allocation40_spill] sm:$0xff] }
0x185e   :  { %v7342_v36 = vadd.f32 %v7297_v1, %v13327_v40  ;;  %v2112_v1 = vadd.f32 %v13338_v32, %v1844_v48  ;;  %v9536_v52 = vpack.c.bf16 %v7618_v7, %v7617_v30  ;;  %v7620_v35 = vld [vmem:[%s13328_s21 + $0x58] sm:$0xff]  ;;  %v13341_v58 = vld [vmem:[#allocation33_spill] sm:$0xff]  ;;  %v13349_v6 = vld [vmem:[#allocation28_spill] sm:$0xff] }
0x185f   :  { %v8496_v28 = vmul.f32 -1.442695, %v7341_v14  ;;  %v7619_v14 = vld [vmem:[%s13328_s21 + $0x50] sm:$0xff]  ;;  %v7724_v7 = vld [vmem:[%s10675_s20 + $0x58] sm:$0xff]  ;;  %v13351_v32 = vld [vmem:[#allocation32_spill] sm:$0xff] }
0x1860   :  { %v8497_v9 = vmul.f32 -1.442695, %v7342_v36  ;;  %v2380_v8 = vadd.f32 %v13339_v20, %v2112_v1  ;;  %v9539_v36 = vpack.c.bf16 %v7620_v35, %v7619_v14  ;;  %v7723_v30 = vld [vmem:[%s10675_s20 + $0x50] sm:$0xff]  ;;  %v8507_v35 = vld [vmem:[%s13347_s3] ss:$0 sm:$0xff] }
0x1861   :  { %10337 = vpow2.f32 %v8496_v28  ;;  %v7621_v28 = vld [vmem:[%s13328_s21 + $0x60] sm:$0xff]  ;;  %v9563_v20 = vpack.c.bf16 %v7724_v7, %v7723_v30  ;;  %v7831_v30 = vld [vmem:[%s10680_s27 + $0x70] sm:$0xff]  ;;  %v7832_v7 = vld [vmem:[%s10680_s27 + $0x78] sm:$0xff] }
0x1862   :  { %10339 = vpow2.f32 %v8497_v9  ;;  %v2648_v40 = vadd.f32 %v13341_v58, %v2380_v8  ;;  %v7622_v9 = vld [vmem:[%s13328_s21 + $0x68] sm:$0xff]  ;;  %v7725_v8 = vld [vmem:[%s10675_s20 + $0x60] sm:$0xff] }
0x186b   :  { %v10338_v24 = vpop.eup %10337 }
0x186c   :  { %v7349_v42 = vadd.f32 1.0, %v10338_v24  ;;  %v10340_v55 = vpop.eup %10339  ;;  %v2650_v24 = vmul.f32 0.125, %v2648_v40  ;;  %v7727_v40 = vld [vmem:[%s10675_s20 + $0x70] sm:$0xff] }
0x186d   :  { %v7350_v46 = vadd.f32 1.0, %v10340_v55  ;;  %v9542_v55 = vpack.c.bf16 %v7622_v9, %v7621_v28  ;;  %v8508_v9 = vld [vmem:[%s13350_s14] ss:$0 sm:$0xff] }
0x186e   :  { %10341 = vrcp.f32 %v7349_v42  ;;  %v8505_v42 = vld [vmem:[%s13337_s25] ss:$0 sm:$0xff] }
0x186f   :  { %10343 = vrcp.f32 %v7350_v46  ;;  %v7623_v46 = vld [vmem:[%s13328_s21 + $0x70] sm:$0xff] }
0x1878   :  { %v10342_v41 = vpop.eup %10341 }
0x1879   :  { %v7355_v47 = vmul.f32 %v10342_v41, %v7336_v3  ;;  %v10344_v53 = vpop.eup %10343  ;;  %v7624_v3 = vld [vmem:[%s13328_s21 + $0x78] sm:$0xff]  ;;  %v7599_v41 = vmul.f32 %v8505_v42, %v2650_v24 }
0x187a   :  { %v7358_v33 = vsub.f32 1.0, %v10344_v53  ;;  %v7360_v43 = vmul.f32 %v10344_v53, %v12905_v23  ;;  %v9545_v0 = vpack.c.bf16 %v7624_v3, %v7623_v46  ;;  %v7817_v46 = vld [vmem:[%s10680_s27] sm:$0xff]  ;;  %v7818_v3 = vld [vmem:[%s10680_s27 + $0x8] sm:$0xff] }
0x187b   :  { %v7356_v34 = vadd.f32 %v7355_v47, %v13331_v37  ;;  %v8506_v47 = vld [vmem:[%s13340_s29] ss:$0 sm:$0xff] }
0x187c   :  { %v7607_v29 = vadd.f32 %v8506_v47, %v7599_v41  ;;  %v7713_v37 = vld [vmem:[%s10675_s20] sm:$0xff]  ;;  %v9572_v41 = vpack.c.bf16 %v7818_v3, %v7817_v46  ;;  %v7819_v47 = vld [vmem:[%s10680_s27 + $0x10] sm:$0xff] }
0x187d   :  { %10345 = vtanh.f32 %v7356_v34  ;;  %v7714_v34 = vld [vmem:[%s10675_s20 + $0x8] sm:$0xff]  ;;  %v13356_v3 = vld [vmem:[#allocation57_spill] sm:$0xff] }
0x187e   :  { %v9548_v53 = vpack.c.bf16 %v7714_v34, %v7713_v37  ;;  %v7822_v37 = vld [vmem:[%s10680_s27 + $0x28] sm:$0xff]  ;;  %v7823_v34 = vld [vmem:[%s10680_s27 + $0x30] sm:$0xff] }
0x1887   :  { %v10346_v62 = vpop.eup %10345 }
0x1888   :  { %v7359_v44 = vmul.f32 %v10346_v62, %v7358_v33  ;;  %v7608_v33 = vmax.f32 %v7607_v29, 0.0  ;;  %v7715_v62 = vld [vmem:[%s10675_s20 + $0x10] sm:$0xff] }
0x188a   :  { %v12942_v54 = vadd.f32 %v7360_v43, %v7359_v44  ;;  %v7716_v44 = vld [vmem:[%s10675_s20 + $0x18] sm:$0xff] }
0x188b   :  { %v9551_v43 = vpack.c.bf16 %v7716_v44, %v7715_v62  ;;  %v7513_v62 = vld [vmem:[%s13352_s19] sm:$0x3] }
0x188c   :  { %v7366_v10 = vpack.c.bf16 %v12942_v54, %v12942_v54 }
0x188e   :  { %7400 = vmatmul.mubr.bf16.vlgmr.msra.gmra.mrb[136].mxu0 %v7366_v10  ;;  %9410 = vmatmul.mubr.bf16.vlgmr.msra.gmra.mrb[120].mxu1 %v7366_v10  ;;  %v13343_v10 = vld [vmem:[#allocation49_spill] sm:$0xff] }
0x188f   :  { %9525 = vmatpush3.bf16.msra.mxu0 %v9524_v22  ;;  %9450 = vmatprep.mubr.msk.f32.mxu0 %vm10530_vm2, %v13196_v63  ;;  %v13342_v22 = vld [vmem:[#allocation48_spill] sm:$0xff] }
0x1890   :  { %9526 = vmatprep.subr.bf16.mxu0 %v10531_v19  ;;  %9415 = vmatprep.mubr.msk.f32.mxu1 %vm10530_vm2, %v13196_v63  ;;  %v3847_v50 = vadd.f32 %v13343_v10, %v13342_v22  ;;  %v7473_v22 = vld [vmem:[%s10540_s5 + $0x8] sm:$0xff]  ;;  %v7475_v10 = vld [vmem:[%s10540_s5 + $0x10] sm:$0xff] }
0x1891   :  { %9414 = vmatpush3.msk.msra.mxu1 %vm7517_vm7, %v7513_v62 }
0x1893   :  { %9528 = vmatpush3.bf16.msra.mxu0 %v9527_v60  ;;  %v4115_v60 = vadd.f32 %v13344_v17, %v3847_v50  ;;  %v7474_v50 = vadd.f32 %v7473_v22, %v7471_v57  ;;  %v7477_v17 = vld [vmem:[%s10540_s5 + $0x18] sm:$0xff]  ;;  %v13362_v22 = vld [vmem:[#allocation45_spill] sm:$0xff] }
0x1894   :  { %9529 = vmatprep.subr.bf16.mxu0 %v10531_v19 }
0x1895   :  { %v4383_v61 = vadd.f32 %v13345_v25, %v4115_v60  ;;  %v7479_v25 = vld [vmem:[%s10540_s5 + $0x20] sm:$0xff] }
0x1897   :  { %9531 = vmatpush3.bf16.msra.mxu0 %v9530_v45  ;;  %v4651_v4 = vadd.f32 %v13346_v2, %v4383_v61  ;;  %v9557_v45 = vpack.c.bf16 %v7720_v16, %v7719_v12  ;;  %v7827_v12 = vld [vmem:[%s10680_s27 + $0x50] sm:$0xff]  ;;  %v7828_v16 = vld [vmem:[%s10680_s27 + $0x58] sm:$0xff]  ;;  %v7481_v2 = vld [vmem:[%s10540_s5 + $0x28] sm:$0xff] }
0x1898   :  { %9532 = vmatprep.subr.bf16.mxu0 %v10531_v19 }
0x1899   :  { %v4919_v5 = vadd.f32 %v13348_v15, %v4651_v4  ;;  %v9587_v4 = vpack.c.bf16 %v7828_v16, %v7827_v12  ;;  %v7483_v15 = vld [vmem:[%s10540_s5 + $0x30] sm:$0xff]  ;;  %v13368_v12 = vld [vmem:[#allocation56_spill] sm:$0xff] }
0x189b   :  { %9534 = vmatpush3.bf16.msra.mxu0 %v9533_v56  ;;  %v5187_v48 = vadd.f32 %v13349_v6, %v4919_v5  ;;  %v9560_v56 = vpack.c.bf16 %v7722_v11, %v7721_v59  ;;  %v7829_v59 = vld [vmem:[%s10680_s27 + $0x60] sm:$0xff]  ;;  %v7830_v11 = vld [vmem:[%s10680_s27 + $0x68] sm:$0xff]  ;;  %v7485_v6 = vld [vmem:[%s10540_s5 + $0x38] sm:$0xff]  ;;  %s13364_s5 = sld [smem:[#allocation21_spill]] }
0x189c   :  { %9535 = vmatprep.subr.bf16.mxu0 %v10531_v19 }
0x189d   :  { %v5455_v1 = vadd.f32 %v13351_v32, %v5187_v48  ;;  %v9590_v48 = vpack.c.bf16 %v7830_v11, %v7829_v59 }
0x189f   :  { %9537 = vmatpush3.bf16.msra.mxu0 %v9536_v52  ;;  %v7726_v52 = vld [vmem:[%s10675_s20 + $0x68] sm:$0xff]  ;;  %v5457_v14 = vmul.f32 0.125, %v5455_v1  ;;  %v8501_v1 = vld [vmem:[%s13353_s6] ss:$0 sm:$0xff] }
0x18a0   :  { %9538 = vmatprep.subr.bf16.mxu0 %v10531_v19  ;;  %v9566_v58 = vpack.c.bf16 %v7726_v52, %v7725_v8  ;;  %v9593_v8 = vpack.c.bf16 %v7832_v7, %v7831_v30  ;;  %v8502_v52 = vld [vmem:[%s13354_s12] ss:$0 sm:$0xff] }
0x18a1   :  { %v7703_v28 = vmul.f32 %v8507_v35, %v5457_v14 }
0x18a3   :  { %9540 = vmatpush3.bf16.msra.mxu0 %v9539_v36  ;;  %v7728_v36 = vld [vmem:[%s10675_s20 + $0x78] sm:$0xff]  ;;  %v7711_v42 = vadd.f32 %v8508_v9, %v7703_v28  ;;  %s13367_s20 = sld [smem:[#allocation25_spill]] }
0x18a4   :  { %9541 = vmatprep.subr.bf16.mxu0 %v10531_v19  ;;  %v9569_v24 = vpack.c.bf16 %v7728_v36, %v7727_v40 }
0x18a7   :  { %9543 = vmatpush3.bf16.msra.mxu0 %v9542_v55  ;;  %v7712_v55 = vmax.f32 %v7711_v42, 0.0 }
0x18a8   :  { %9544 = vmatprep.subr.bf16.mxu0 %v10531_v19 }
0x18ab   :  { %9546 = vmatpush3.bf16.msra.mxu0 %v9545_v0  ;;  %v7820_v0 = vld [vmem:[%s10680_s27 + $0x18] sm:$0xff] }
0x18ac   :  { %9547 = vmatprep.subr.bf16.mxu0 %v10531_v19  ;;  %v9575_v29 = vpack.c.bf16 %v7820_v0, %v7819_v47 }
0x18ae   :  { %9451 = vmatmul.mubr.f32.vlgmr.msra.gmra.mrb[140].mxu0 %v7608_v33  ;;  %v7824_v33 = vld [vmem:[%s10680_s27 + $0x38] sm:$0xff] }
0x18af   :  { %9549 = vmatpush3.bf16.msra.mxu0 %v9548_v53  ;;  %9485 = vmatprep.mubr.msk.f32.mxu0 %vm10530_vm2, %v13196_v63  ;;  %v9581_v44 = vpack.c.bf16 %v7824_v33, %v7823_v34 }
0x18b0   :  { %9550 = vmatprep.subr.bf16.mxu0 %v10531_v19 }
0x18b3   :  { %9552 = vmatpush3.bf16.msra.mxu0 %v9551_v43  ;;  %v7825_v43 = vld [vmem:[%s10680_s27 + $0x40] sm:$0xff] }
0x18b4   :  { %9553 = vmatprep.subr.bf16.mxu0 %v10531_v19  ;;  %v9584_v60 = vpack.c.bf16 %v7826_v18, %v7825_v43 }
0x18b7   :  { %9555 = vmatpush3.bf16.msra.mxu0 %v9554_v26  ;;  %v7476_v26 = vadd.f32 %v7475_v10, %v7474_v50  ;;  %v13363_v10 = vsel %vm10864_vm4, %v13361_v51, %v13362_v22 }
0x18b8   :  { %9556 = vmatprep.subr.bf16.mxu0 %v10531_v19 }
0x18b9   :  { %v7478_v61 = vadd.f32 %v7477_v17, %v7476_v26  ;;  %v13365_v17 = vld [vmem:[#allocation61_spill] sm:$0xff] }
0x18bb   :  { %9558 = vmatpush3.bf16.msra.mxu0 %v9557_v45  ;;  %v7480_v45 = vadd.f32 %v7479_v25, %v7478_v61 }
0x18bc   :  { %9559 = vmatprep.subr.bf16.mxu0 %v10531_v19 }
0x18bd   :  { %v7482_v5 = vadd.f32 %v7481_v2, %v7480_v45 }
0x18bf   :  { %9561 = vmatpush3.bf16.msra.mxu0 %v9560_v56  ;;  %v7484_v56 = vadd.f32 %v7483_v15, %v7482_v5 }
0x18c0   :  { %9562 = vmatprep.subr.bf16.mxu0 %v10531_v19 }
0x18c1   :  { %v7486_v32 = vadd.f32 %v7485_v6, %v7484_v56  ;;  %v8509_v6 = vld [vmem:[%s13364_s5] ss:$0 sm:$0xff] }
0x18c2   :  { %v8510_v56 = vld [vmem:[%s13367_s20] ss:$0 sm:$0xff] }
0x18c3   :  { %9564 = vmatpush3.bf16.msra.mxu0 %v9563_v20  ;;  %v7487_v20 = vmul.f32 0.125, %v7486_v32 }
0x18c4   :  { %9565 = vmatprep.subr.bf16.mxu0 %v10531_v19 }
0x18c5   :  { %v7503_v14 = vmul.f32 %v8501_v1, %v7487_v20  ;;  %v8500_v1 = vld [vmem:[%s10685_s4] ss:$0 sm:$0xff] }
0x18c7   :  { %9567 = vmatpush3.bf16.msra.mxu0 %v9566_v58  ;;  %v7511_v35 = vadd.f32 %v8502_v52, %v7503_v14 }
0x18c8   :  { %9568 = vmatprep.subr.bf16.mxu0 %v10531_v19 }
0x18c9   :  { %v7512_v58 = vmax.f32 %v7511_v35, 0.0 }
0x18cb   :  { %9570 = vmatpush3.bf16.msra.mxu0 %v9569_v24  ;;  %9416 = vmatmul.mubr.msk.f32.vlgmr.msra.gmra.mrb[124].mxu1 %vm241_vm1, %v7512_v58 }
0x18cc   :  { %9571 = vmatprep.subr.bf16.mxu0 %v10531_v19 }
0x18ce   :  { %9486 = vmatmul.mubr.f32.vlgmr.msra.gmra.mrb[140].mxu0 %v7712_v55 }
0x18cf   :  { %9520 = vmatprep.mubr.msk.f32.mxu0 %vm10530_vm2, %v13196_v63  ;;  %9573 = vmatpush3.bf16.msra.mxu0 %v9572_v41  ;;  %v7821_v63 = vld [vmem:[%s10680_s27 + $0x20] sm:$0xff] }
0x18d0   :  { %9574 = vmatprep.subr.bf16.mxu0 %v10531_v19  ;;  %v9578_v53 = vpack.c.bf16 %v7822_v37, %v7821_v63  ;;  %v13358_v63 = vld [vmem:[#allocation60_spill] sm:$0xff]  ;;  %v13359_v37 = vld [vmem:[#allocation59_spill] sm:$0xff] }
0x18d1   :  { %v13360_v34 = vsel %vm10928_vm6, %v13358_v63, %v13359_v37 }
0x18d3   :  { %9576 = vmatpush3.bf16.msra.mxu0 %v9575_v29 }
0x18d4   :  { %9577 = vmatprep.subr.bf16.mxu0 %v10531_v19 }
0x18d7   :  { %9579 = vmatpush3.bf16.msra.mxu0 %v9578_v53 }
0x18d8   :  { %9580 = vmatprep.subr.bf16.mxu0 %v10531_v19 }
0x18db   :  { %9582 = vmatpush3.bf16.msra.mxu0 %v9581_v44 }
0x18dc   :  { %9583 = vmatprep.subr.bf16.mxu0 %v10531_v19 }
0x18df   :  { %9585 = vmatpush3.bf16.msra.mxu0 %v9584_v60  ;;  %v13366_v60 = vld [vmem:[#allocation62_spill] sm:$0xff] }
0x18e0   :  { %9586 = vmatprep.subr.bf16.mxu0 %v10531_v19  ;;  %v6827_v26 = vadd.f32 %v13366_v60, %v13365_v17 }
0x18e2   :  { %v6934_v16 = vadd.f32 %v13368_v12, %v6827_v26 }
0x18e3   :  { %9588 = vmatpush3.bf16.msra.mxu0 %v9587_v4 }
0x18e4   :  { %9589 = vmatprep.subr.bf16.mxu0 %v10531_v19 }
0x18e7   :  { %9591 = vmatpush3.bf16.msra.mxu0 %v9590_v48 }
0x18e8   :  { %9592 = vmatprep.subr.bf16.mxu0 %v10531_v19  ;;  %v13355_v19 = vld [vmem:[#allocation58_spill] sm:$0xff] }
0x18e9   :  { %v13357_v41 = vsel %vm10924_vm5, %v13355_v19, %v13356_v3 }
0x18eb   :  { %9594 = vmatpush3.bf16.msra.mxu0 %v9593_v8 }
0x1961   :  { %v7401_v40 = vpop.f32.mrb[136].mxu0  ;;  %v7442_v36 = vpop.f32.mrb[120].mxu1 }
0x1962   :  { %v7402_v28 = vadd.f32 %v7401_v40, %v12585_v31  ;;  %v7403_v9 = vpop.f32.mrb[137].mxu0  ;;  %v9411_v24 = vpop.f32.mrb[121].mxu1  ;;  %v7443_v43 = vadd.f32 %v7442_v36, %v12605_v38  ;;  %v7041_v38 = vadd.f32 %v12787_v13, %v6934_v16 }
0x1963   :  { %v7404_v42 = vadd.f32 %v7403_v9, %v12596_v27  ;;  %v7405_v55 = vpop.f32.mrb[138].mxu0  ;;  %v7445_v46 = vpop.f32.mrb[122].mxu1 }
0x1964   :  { %v7448_v47 = vadd.f32 %v7402_v28, %v13357_v41  ;;  %v7406_v0 = vpop.f32.mrb[139].mxu0  ;;  %v9412_v29 = vpop.f32.mrb[123].mxu1  ;;  %v7148_v61 = vadd.f32 %v12847_v39, %v7041_v38 }
0x1965   :  { %v7449_v31 = vadd.f32 %v7404_v42, %v13360_v34 }
0x1966   :  { %v8498_v53 = vmul.f32 -1.442695, %v7448_v47  ;;  %v7255_v21 = vadd.f32 %v12905_v23, %v7148_v61 }
0x1967   :  { %v8499_v33 = vmul.f32 -1.442695, %v7449_v31 }
0x1968   :  { %10347 = vpow2.f32 %v8498_v53  ;;  %v7362_v11 = vadd.f32 %v12942_v54, %v7255_v21 }
0x1969   :  { %10349 = vpow2.f32 %v8499_v33 }
0x1972   :  { %v10348_v27 = vpop.eup %10347 }
0x1973   :  { %v7456_v62 = vadd.f32 1.0, %v10348_v27  ;;  %v10350_v49 = vpop.eup %10349 }
0x1974   :  { %v7457_v44 = vadd.f32 1.0, %v10350_v49 }
0x1975   :  { %10351 = vrcp.f32 %v7456_v62 }
0x1976   :  { %10353 = vrcp.f32 %v7457_v44 }
0x197f   :  { %v10352_v57 = vpop.eup %10351 }
0x1980   :  { %v7462_v18 = vmul.f32 %v10352_v57, %v7443_v43  ;;  %v10354_v25 = vpop.eup %10353 }
0x1981   :  { %v7465_v2 = vsub.f32 1.0, %v10354_v25  ;;  %v7467_v59 = vmul.f32 %v10354_v25, %v12942_v54 }
0x1982   :  { %v7463_v50 = vadd.f32 %v7462_v18, %v13363_v10 }
0x1984   :  { %10355 = vtanh.f32 %v7463_v50 }
0x198e   :  { %v10356_v4 = vpop.eup %10355 }
0x198f   :  { %v7466_v45 = vmul.f32 %v10356_v4, %v7465_v2 }
0x1991   :  { %v7468_v15 = vadd.f32 %v7467_v59, %v7466_v45 }
0x1993   :  { %v7469_v5 = vadd.f32 %v7468_v15, %v7362_v11 }
0x1995   :  { %v7470_v48 = vmul.f32 0.125, %v7469_v5 }
0x1997   :  { %v7807_v30 = vmul.f32 %v8509_v6, %v7470_v48 }
0x1999   :  { %v7815_v13 = vadd.f32 %v8510_v56, %v7807_v30 }
0x199b   :  { %v7816_v7 = vmax.f32 %v7815_v13, 0.0 }
0x199d   :  { %9521 = vmatmul.mubr.f32.vlgmr.msra.gmra.mrb[140].mxu0 %v7816_v7 }
0x199e   :  { %v7587_v39 = vpop.f32.mrb[124].mxu1 }
0x199f   :  { %v9417_v32 = vpop.f32.mrb[125].mxu1  ;;  %v7591_v20 = vadd.f32 %v8500_v1, %v7587_v39 }
0x1a70   :  { %v7899_v23 = vpop.f32.mrb[140].mxu0 }
0x1a71   :  { %v9644_v8 = vadd.f32 %v7899_v23, %v7591_v20  ;;  %v9522_v52 = vpop.f32.mrb[141].mxu0 }
0x1a73   :  { %7904 = vst.msk [vmem:[%s10690_s24] sm:$0xff] %vm241_vm1, %v9644_v8 }
0x1a74   :  { %7909 = vsyncpa [#allocation6], 1 }
0x1a75   :  { %7910 = vsyncpa [#allocation8], 1 }
0x1a76   :  { %7911 = vsyncpa [#allocation11], 1 }

</bundles_post_ra>
